<compile_context>
chip_gen: v7x
topology: tpu7x:2x2x1
jax: 0.10.0
libtpu: 0.0.40
codegen_flags: <defaults>
</compile_context>

<pallas_src>
import functools

import jax
import jax.numpy as jnp
from jax.experimental import pallas as pl
from jax.experimental.pallas import tpu as pltpu


def _cparams(semantics):
    return pltpu.CompilerParams(dimension_semantics=semantics)


def _round_up(x, m):
    return (x + m - 1) // m * m


def _apply_act(x, act):
    if act is None:
        return x
    if act == "relu":
        return jnp.maximum(x, 0.0)
    if act == "silu":
        return x * jax.nn.sigmoid(x)
    if act == "gelu":
        # TODO(synk): PyTorch nn.GELU is erf-based; tanh approximation used here
        # because erf lowering support in Mosaic is uncertain.
        return jax.nn.gelu(x)
    if act == "elu1":          # ELU(x) + 1
        return jnp.where(x > 0, x + 1.0, jnp.exp(jnp.minimum(x, 0.0)))
    raise ValueError(f"unknown activation: {act}")


# ---------------------------------------------------------------------------
# Kernel 1: fused linear
#   out = act( LN_pro(x) [* act(premul)] @ W + b ) [+ residual] [-> LN_epi]
# ---------------------------------------------------------------------------
def _make_linear_kernel(act, has_premul, premul_act, has_residual,
                        has_ln_pro, has_ln_epi, ln_eps, epi_valid):
    def kernel(*refs):
        it = iter(refs)
        a_ref = next(it)
        if has_ln_pro:
            g_ref = next(it)
            be_ref = next(it)
        if has_premul:
            m_ref = next(it)
        w_ref = next(it)
        b_ref = next(it)
        if has_residual:
            r_ref = next(it)
        if has_ln_epi:
            eg_ref = next(it)
            eb_ref = next(it)
        o_ref = next(it)

        a = a_ref[...]
        if has_ln_pro or has_premul or a.dtype != jnp.bfloat16:
            a = a.astype(jnp.float32)
            if has_ln_pro:                          # LayerNorm prologue (full K in tile)
                mu = jnp.mean(a, axis=-1, keepdims=True)
                ac = a - mu
                var = jnp.mean(ac * ac, axis=-1, keepdims=True)
                a = ac * jax.lax.rsqrt(var + ln_eps) * g_ref[...] + be_ref[...]
            if has_premul:
                m = m_ref[...].astype(jnp.float32)
                if premul_act is not None:
                    m = _apply_act(m, premul_act)
                a = a * m
            a = a.astype(jnp.bfloat16)

        acc = jnp.dot(a, w_ref[...], preferred_element_type=jnp.float32)
        acc = acc + b_ref[...]
        acc = _apply_act(acc, act)
        if has_residual:
            acc = acc + r_ref[...].astype(jnp.float32)
        if has_ln_epi:                              # LayerNorm epilogue over valid cols
            col = jax.lax.broadcasted_iota(jnp.int32, acc.shape, 1)
            valid = col < epi_valid
            inv_cnt = 1.0 / float(epi_valid)
            mu = jnp.sum(jnp.where(valid, acc, 0.0), axis=-1, keepdims=True) * inv_cnt
            diff = jnp.where(valid, acc - mu, 0.0)
            var = jnp.sum(diff * diff, axis=-1, keepdims=True) * inv_cnt
            acc = (acc - mu) * jax.lax.rsqrt(var + ln_eps) * eg_ref[...] + eb_ref[...]
        o_ref[...] = acc.astype(o_ref.dtype)

    return kernel


def fused_linear(x2d, w, b, *, act=None, premul=None, premul_act=None,
                 residual=None, ln_prologue=None, ln_epilogue=None,
                 ln_eps=1e-5, out_dtype=jnp.bfloat16):
    """(M,K)@(K,N)+b with fused LN prologue/epilogue, gate premul, act, residual."""
    m_dim, k_dim = x2d.shape
    n_dim = w.shape[1]
    n_pad = _round_up(n_dim, 128)

    # Tiles: M capped at 256 (VMEM headroom on v7x); N lane-dense (128/256).
    tm = 256 if m_dim >= 256 else max(8, _round_up(m_dim, 8))
    m_pad = _round_up(m_dim, tm)
    if ln_epilogue is not None:
        # LN epilogue needs the full output row in one tile.
        # TODO(synk): multi-tile LN epilogue for very wide outputs.
        tn = n_pad
    else:
        tn = 256 if n_pad % 256 == 0 else 128
    m_tiles, n_tiles = m_pad // tm, n_pad // tn

    def pad_rows(t):
        return t if m_pad == m_dim else jnp.pad(t, ((0, m_pad - m_dim), (0, 0)))

    a_in = pad_rows(x2d)
    w_p = jnp.pad(w, ((0, 0), (0, n_pad - n_dim))).astype(jnp.bfloat16)
    b_p = jnp.pad(b, (0, n_pad - n_dim)).reshape(1, n_pad).astype(jnp.float32)

    # Grid order heuristic: keep the operand that would be re-streamed resident.
    stream_n_inner = m_pad * k_dim + m_tiles * k_dim * n_pad   # W re-fetched per M tile
    stream_m_inner = n_tiles * m_pad * k_dim + k_dim * n_pad   # A re-fetched per N tile
    if stream_n_inner <= stream_m_inner:
        grid = (m_tiles, n_tiles)
        a_map = lambda i, j: (i, 0)
        w_map = lambda i, j: (0, j)
        o_map = lambda i, j: (i, j)
    else:
        grid = (n_tiles, m_tiles)
        a_map = lambda j, i: (i, 0)
        w_map = lambda j, i: (0, j)
        o_map = lambda j, i: (i, j)
    one_map = lambda *_: (0, 0)

    inputs = [a_in]
    in_specs = [pl.BlockSpec((tm, k_dim), a_map)]
    if ln_prologue is not None:
        g, be = ln_prologue
        inputs += [g.reshape(1, k_dim).astype(jnp.float32),
                   be.reshape(1, k_dim).astype(jnp.float32)]
        in_specs += [pl.BlockSpec((1, k_dim), one_map),
                     pl.BlockSpec((1, k_dim), one_map)]
    if premul is not None:
        inputs.append(pad_rows(premul))
        in_specs.append(pl.BlockSpec((tm, k_dim), a_map))
    inputs += [w_p, b_p]
    in_specs += [pl.BlockSpec((k_dim, tn), w_map),
                 pl.BlockSpec((1, tn), w_map)]
    if residual is not None:
        r_p = pad_rows(jnp.pad(residual, ((0, 0), (0, n_pad - n_dim))))
        inputs.append(r_p)
        in_specs.append(pl.BlockSpec((tm, tn), o_map))
    if ln_epilogue is not None:
        eg, eb = ln_epilogue
        inputs += [jnp.pad(eg, (0, n_pad - n_dim)).reshape(1, n_pad).astype(jnp.float32),
                   jnp.pad(eb, (0, n_pad - n_dim)).reshape(1, n_pad).astype(jnp.float32)]
        in_specs += [pl.BlockSpec((1, tn), one_map),
                     pl.BlockSpec((1, tn), one_map)]

    out = pl.pallas_call(
        _make_linear_kernel(act, premul is not None, premul_act,
                            residual is not None, ln_prologue is not None,
                            ln_epilogue is not None, ln_eps, n_dim),
        out_shape=jax.ShapeDtypeStruct((m_pad, n_pad), out_dtype),
        grid_spec=pl.GridSpec(grid=grid, in_specs=in_specs,
                              out_specs=pl.BlockSpec((tm, tn), o_map)),
        compiler_params=_cparams(("parallel", "parallel")),
    )(*inputs)
    if m_pad != m_dim or n_pad != n_dim:
        out = out[:m_dim, :n_dim]
    return out


def linear_tokens(x, w, b, **kw):
    bsz, n, _ = x.shape
    n_out = w.shape[1]
    premul = kw.pop("premul", None)
    residual = kw.pop("residual", None)
    out = fused_linear(
        x.reshape(bsz * n, -1), w, b,
        premul=None if premul is None else premul.reshape(bsz * n, -1),
        residual=None if residual is None else residual.reshape(bsz * n, n_out),
        **kw)
    return out.reshape(bsz, n, n_out)


# ---------------------------------------------------------------------------
# Kernel 2: depthwise 3x3 conv on pre-padded NHWC input (+bias/act/residual)
# ---------------------------------------------------------------------------
def _make_dwconv_kernel(ho, wo, act, has_residual):
    def kernel(*refs):
        if has_residual:
            x_ref, w_ref, b_ref, r_ref, o_ref = refs
        else:
            x_ref, w_ref, b_ref, o_ref = refs
        c = o_ref.shape[-1]
        acc = jnp.zeros((ho, wo, c), jnp.float32)
        for t in range(9):                      # statically unrolled taps
            dy, dx = divmod(t, 3)
            tap = x_ref[0, dy:dy + ho, dx:dx + wo, :].astype(jnp.float32)
            acc = acc + tap * w_ref[t:t + 1, :]
        acc = acc + b_ref[...]
        acc = _apply_act(acc, act)
        if has_residual:
            acc = acc + r_ref[0].astype(jnp.float32)
        o_ref[0] = acc.astype(o_ref.dtype)

    return kernel


def _dwconv_core(x_padded, ho, wo, w33c, bias_c, *, act=None, residual=None):
    b_dim, hp, wp, c = x_padded.shape
    w9 = w33c.reshape(9, c).astype(jnp.float32)
    if bias_c is None:
        bias_c = jnp.zeros((c,), jnp.float32)
    b2 = bias_c.reshape(1, c).astype(jnp.float32)

    inputs = [x_padded, w9, b2]
    in_specs = [pl.BlockSpec((1, hp, wp, c), lambda n: (n, 0, 0, 0)),
                pl.BlockSpec((9, c), lambda n: (0, 0)),
                pl.BlockSpec((1, c), lambda n: (0, 0))]
    if residual is not None:
        inputs.append(residual)
        in_specs.append(pl.BlockSpec((1, ho, wo, c), lambda n: (n, 0, 0, 0)))

    return pl.pallas_call(
        _make_dwconv_kernel(ho, wo, act, residual is not None),
        out_shape=jax.ShapeDtypeStruct((b_dim, ho, wo, c), jnp.bfloat16),
        grid_spec=pl.GridSpec(
            grid=(b_dim,),
            in_specs=in_specs,
            out_specs=pl.BlockSpec((1, ho, wo, c), lambda n: (n, 0, 0, 0)),
        ),
        compiler_params=_cparams(("parallel",)),
    )(*inputs)


def dwconv3x3(x_nhwc, w33c, bias_c, *, act=None, residual=None):
    """Depthwise 3x3, stride 1, padding 1 on an NHWC tensor (bf16 out)."""
    # TODO(synk): spatial halo tiling + pltpu.roll-generated taps for
    # decoder-scale feature maps (v7x 64 MiB VMEM budget).
    xp = jnp.pad(x_nhwc.astype(jnp.bfloat16), ((0, 0), (1, 1), (1, 1), (0, 0)))
    return _dwconv_core(xp, x_nhwc.shape[1], x_nhwc.shape[2], w33c, bias_c,
                        act=act, residual=residual)


# ---------------------------------------------------------------------------
# Kernel 3: depthwise ConvTranspose2d(k=3, s=2, p=1, op=1) as 4 subpixel taps
#   ee[i,j] = w11*y[i,j]
#   eo[i,j] = w10*y[i,j+1] + w12*y[i,j]
#   oe[i,j] = w01*y[i+1,j] + w21*y[i,j]
#   oo[i,j] = w00*y[i+1,j+1] + w02*y[i+1,j] + w20*y[i,j+1] + w22*y[i,j]
# ---------------------------------------------------------------------------
def _make_subpixel_kernel(ho, wo):
    def kernel(x_ref, w_ref, ee_ref, eo_ref, oe_ref, oo_ref):
        w = w_ref[...]                                  # (9, c) f32, t = 3*ky + kx

        def tap(i0, j0):
            return x_ref[0, i0:i0 + ho, j0:j0 + wo, :].astype(jnp.float32)

        x00 = tap(0, 0)
        x01 = tap(0, 1)
        x10 = tap(1, 0)
        x11 = tap(1, 1)
        ee = w[4:5] * x00
        eo = w[3:4] * x01 + w[5:6] * x00
        oe = w[1:2] * x10 + w[7:8] * x00
        oo = w[0:1] * x11 + w[2:3] * x10 + w[6:7] * x01 + w[8:9] * x00
        ee_ref[0] = ee.astype(ee_ref.dtype)
        eo_ref[0] = eo.astype(eo_ref.dtype)
        oe_ref[0] = oe.astype(oe_ref.dtype)
        oo_ref[0] = oo.astype(oo_ref.dtype)

    return kernel


def dwconv_transpose_subpixel(y, w33c):
    """Returns the 4 output parities (ee, eo, oe, oo), each (B, H, W, C)."""
    b_dim, hh, ww, c = y.shape
    yp = jnp.pad(y.astype(jnp.bfloat16), ((0, 0), (0, 1), (0, 1), (0, 0)))
    w9 = w33c.reshape(9, c).astype(jnp.float32)
    out_sds = tuple(jax.ShapeDtypeStruct((b_dim, hh, ww, c), jnp.bfloat16)
                    for _ in range(4))
    out_specs = tuple(pl.BlockSpec((1, hh, ww, c), lambda n: (n, 0, 0, 0))
                      for _ in range(4))
    return pl.pallas_call(
        _make_subpixel_kernel(hh, ww),
        out_shape=out_sds,
        grid_spec=pl.GridSpec(
            grid=(b_dim,),
            in_specs=[pl.BlockSpec((1, hh + 1, ww + 1, c), lambda n: (n, 0, 0, 0)),
                      pl.BlockSpec((9, c), lambda n: (0, 0))],
            out_specs=out_specs,
        ),
        compiler_params=_cparams(("parallel",)),
    )(yp, w9)


# ---------------------------------------------------------------------------
# Kernel 4: linear attention core — one batch per grid step, all heads inside
# ---------------------------------------------------------------------------
def _make_attn_kernel(num_heads, head_dim, c, inv_n):
    def kernel(qk_ref, qkr_ref, v_ref, o_ref):
        qk = qk_ref[0]            # (n, 2c) : [q | k], elu+1 already applied
        qkr = qkr_ref[0]          # (n, 2c) : [q_rope | k_rope]
        v = v_ref[0]              # (n, c)
        outs = []
        for hh in range(num_heads):                      # statically unrolled
            lo = hh * head_dim
            q_h = qk[:, lo:lo + head_dim].astype(jnp.float32)
            k_h = qk[:, c + lo:c + lo + head_dim].astype(jnp.float32)
            qr_h = qkr[:, lo:lo + head_dim]
            kr_h = qkr[:, c + lo:c + lo + head_dim]
            v_h = v[:, lo:lo + head_dim]
            k_mean = jnp.mean(k_h, axis=0, keepdims=True)                  # (1, hd)
            z = pl.reciprocal(
                jnp.sum(q_h * k_mean, axis=-1, keepdims=True) + 1e-6,
                approx=True)                                               # (n, 1)
            kv = jax.lax.dot_general(                                      # k_rope^T v / n
                kr_h, v_h, (((0,), (0,)), ((), ())),
                preferred_element_type=jnp.float32) * inv_n                # (hd, hd)
            o_h = jnp.dot(qr_h, kv.astype(jnp.bfloat16),
                          preferred_element_type=jnp.float32) * z          # (n, hd)
            outs.append(o_h)
        o_ref[0] = jnp.concatenate(outs, axis=-1).astype(o_ref.dtype)

    return kernel


def linear_attention_core(qk, qk_rope, v, *, num_heads):
    bsz, n, c2 = qk.shape
    c = c2 // 2
    hd = c // num_heads
    spec2 = pl.BlockSpec((1, n, c2), lambda b: (b, 0, 0))
    spec1 = pl.BlockSpec((1, n, c), lambda b: (b, 0, 0))
    return pl.pallas_call(
        _make_attn_kernel(num_heads, hd, c, 1.0 / n),
        out_shape=jax.ShapeDtypeStruct((bsz, n, c), jnp.bfloat16),
        grid_spec=pl.GridSpec(grid=(bsz,),
                              in_specs=[spec2, spec2, spec1],
                              out_specs=spec1),
        compiler_params=_cparams(("parallel",)),
    )(qk.astype(jnp.bfloat16), qk_rope.astype(jnp.bfloat16), v.astype(jnp.bfloat16))


# ---------------------------------------------------------------------------
# RoPE tables (lane-dense formulation): rope(x) = cos*x + sa*roll(x,-1) + sb*roll(x,+1)
# ---------------------------------------------------------------------------
def make_rope_tables(h, w, c, base=10000.0):
    k_max = c // 4
    theta = 1.0 / (base ** (jnp.arange(k_max, dtype=jnp.float32) / k_max))
    ti = jnp.broadcast_to(
        jnp.arange(h, dtype=jnp.float32)[:, None, None] * theta, (h, w, k_max))
    tj = jnp.broadcast_to(
        jnp.arange(w, dtype=jnp.float32)[None, :, None] * theta, (h, w, k_max))
    ang = jnp.concatenate([ti, tj], axis=-1).reshape(h * w, c // 2)   # (N, C/2)
    cosv, sinv = jnp.cos(ang), jnp.sin(ang)
    zeros = jnp.zeros_like(sinv)
    cos_full = jnp.repeat(cosv, 2, axis=-1)                           # (N, C)
    sa = jnp.stack([-sinv, zeros], axis=-1).reshape(h * w, c)         # -sin on even cols
    sb = jnp.stack([zeros, sinv], axis=-1).reshape(h * w, c)          # +sin on odd cols
    return cos_full, sa, sb


# ---------------------------------------------------------------------------
# LinearAttention / MLLABlock / PatchExpand / BasicLayer_up
# ---------------------------------------------------------------------------
def linear_attention(x, p, *, h, w, num_heads, rope_cos, rope_sa, rope_sb):
    bsz, n, c = x.shape
    # qk projection with ELU+1 fused into the matmul epilogue.
    qk = linear_tokens(x, p["qk_w"], p["qk_b"], act="elu1")           # (B, N, 2C) bf16
    # Lane-dense RoPE on both halves at once (pair structure never crosses the
    # q|k boundary because the signed-sin tables are zero there).
    # TODO(synk): fuse the rotation into the attention kernel with pltpu.roll.
    cos2 = jnp.concatenate([rope_cos, rope_cos], axis=-1)[None]
    sa2 = jnp.concatenate([rope_sa, rope_sa], axis=-1)[None]
    sb2 = jnp.concatenate([rope_sb, rope_sb], axis=-1)[None]
    qkf = qk.astype(jnp.float32)
    qk_rope = (cos2 * qkf + sa2 * jnp.roll(qkf, -1, axis=-1)
               + sb2 * jnp.roll(qkf, 1, axis=-1)).astype(jnp.bfloat16)
    attn = linear_attention_core(qk, qk_rope, x, num_heads=num_heads)  # (B, N, C)
    # LePE: depthwise 3x3 on v (=x) with the attention output fused as residual.
    out = dwconv3x3(x.reshape(bsz, h, w, c), p["lepe_w"], p["lepe_b"],
                    residual=attn.reshape(bsz, h, w, c))
    return out.reshape(bsz, n, c)


def mlla_block(x, p, *, h, w, num_heads, rope_cos, rope_sa, rope_sb):
    bsz, n, c = x.shape
    x_img = x.reshape(bsz, h, w, c)
    # x = x + cpe1(x)
    x = dwconv3x3(x_img, p["cpe1_w"], p["cpe1_b"], residual=x_img).reshape(bsz, n, c)
    shortcut = x

    # norm1 fused as a prologue into the merged in_proj|act_proj matmul.
    ia_w = jnp.concatenate([p["in_proj_w"], p["act_proj_w"]], axis=1)
    ia_b = jnp.concatenate([p["in_proj_b"], p["act_proj_b"]], axis=0)
    ia = linear_tokens(x, ia_w, ia_b,
                       ln_prologue=(p["norm1_g"], p["norm1_b"]))      # (B, N, 2C)
    xi, act_pre = ia[..., :c], ia[..., c:]

    xi = dwconv3x3(xi.reshape(bsz, h, w, c), p["dwc_w"], p["dwc_b"],
                   act="silu").reshape(bsz, n, c)
    xa = linear_attention(xi, p, h=h, w=w, num_heads=num_heads,
                          rope_cos=rope_cos, rope_sa=rope_sa, rope_sb=rope_sb)
    # x = shortcut + out_proj(attn * SiLU(act_proj(norm1(x))))  (drop_path == id)
    x = linear_tokens(xa, p["out_proj_w"], p["out_proj_b"],
                      premul=act_pre, premul_act="silu", residual=shortcut)
    # x = x + cpe2(x)
    x_img = x.reshape(bsz, h, w, c)
    x = dwconv3x3(x_img, p["cpe2_w"], p["cpe2_b"], residual=x_img).reshape(bsz, n, c)
    # x = x + mlp(norm2(x)) : norm2 fused into fc1, residual fused into fc2.
    hid = linear_tokens(x, p["fc1_w"], p["fc1_b"], act="gelu",
                        ln_prologue=(p["norm2_g"], p["norm2_b"]))
    x = linear_tokens(hid, p["fc2_w"], p["fc2_b"], residual=x)
    return x


def patch_expand(x, p, *, h, w):
    bsz, n, _ = x.shape
    c4 = p["pe1_w"].shape[1]
    c_out = p["pe3_w"].shape[1]
    # 1x1 conv + ReLU  (pointwise -> fused linear).
    y = linear_tokens(x, p["pe1_w"], p["pe1_b"], act="relu").reshape(bsz, h, w, c4)
    # Depthwise ConvTranspose2d(k=3, s=2, p=1, output_padding=1, bias=False)
    # via subpixel decomposition into 4 parity images.
    ee, eo, oe, oo = dwconv_transpose_subpixel(y, p["pe_dw_w"])
    yq = jnp.stack([jnp.stack([ee, eo], axis=1),
                    jnp.stack([oe, oo], axis=1)], axis=1)             # (B,2,2,H,W,C4)
    # 1x1 conv with eval-mode BatchNorm folded + LayerNorm fused as epilogue.
    scale = p["pe3_bn_g"] / jnp.sqrt(p["pe3_bn_v"] + 1e-5)
    w3 = p["pe3_w"] * scale[None, :]
    b3 = p["pe3_b"] * scale + (p["pe3_bn_b"] - p["pe3_bn_m"] * scale)
    y2 = fused_linear(yq.reshape(bsz * 4 * h * w, c4), w3, b3,
                      ln_epilogue=(p["pe_norm_g"], p["pe_norm_b"]),
                      out_dtype=jnp.float32)
    # Spatial interleave of the parities on the small c_out tensor.
    y2 = y2.reshape(bsz, 2, 2, h, w, c_out)
    y2 = y2.transpose(0, 3, 1, 4, 2, 5).reshape(bsz, 4 * n, c_out)
    return y2


def basic_layer_up_forward(x, params, *, input_resolution, num_heads):
    h, w = input_resolution
    rope_cos, rope_sa, rope_sb = (params["rope_cos"], params["rope_sa"],
                                  params["rope_sb"])
    for blk in params["blocks"]:
        x = mlla_block(x, blk, h=h, w=w, num_heads=num_heads,
                       rope_cos=rope_cos, rope_sa=rope_sa, rope_sb=rope_sb)
    if params["upsample"] is not None:
        x = patch_expand(x, params["upsample"], h=h, w=w)
    return x.astype(jnp.float32)


# ---------------------------------------------------------------------------
# Parameter initialization (deterministic, eval-mode stats for BatchNorm)
# ---------------------------------------------------------------------------
def _normal(key, shape, scale):
    return scale * jax.random.normal(key, shape, jnp.float32)


def init_block_params(key, dim, mlp_ratio=4.0):
    hidden = int(dim * mlp_ratio)
    ks = jax.random.split(key, 20)
    return {
        "cpe1_w": _normal(ks[0], (3, 3, dim), 0.2), "cpe1_b": _normal(ks[1], (dim,), 0.02),
        "norm1_g": jnp.ones((dim,), jnp.float32), "norm1_b": jnp.zeros((dim,), jnp.float32),
        "in_proj_w": _normal(ks[2], (dim, dim), 0.08), "in_proj_b": _normal(ks[3], (dim,), 0.02),
        "act_proj_w": _normal(ks[4], (dim, dim), 0.08), "act_proj_b": _normal(ks[5], (dim,), 0.02),
        "dwc_w": _normal(ks[6], (3, 3, dim), 0.2), "dwc_b": _normal(ks[7], (dim,), 0.02),
        "qk_w": _normal(ks[8], (dim, 2 * dim), 0.08), "qk_b": _normal(ks[9], (2 * dim,), 0.02),
        "lepe_w": _normal(ks[10], (3, 3, dim), 0.2), "lepe_b": _normal(ks[11], (dim,), 0.02),
        "out_proj_w": _normal(ks[12], (dim, dim), 0.08), "out_proj_b": _normal(ks[13], (dim,), 0.02),
        "cpe2_w": _normal(ks[14], (3, 3, dim), 0.2), "cpe2_b": _normal(ks[15], (dim,), 0.02),
        "norm2_g": jnp.ones((dim,), jnp.float32), "norm2_b": jnp.zeros((dim,), jnp.float32),
        "fc1_w": _normal(ks[16], (dim, hidden), 0.08), "fc1_b": _normal(ks[17], (hidden,), 0.02),
        "fc2_w": _normal(ks[18], (hidden, dim), 0.08), "fc2_b": _normal(ks[19], (dim,), 0.02),
    }


def init_patch_expand_params(key, dim, ratio=4.0):
    c4 = int(dim * ratio)
    c_out = dim // 2
    ks = jax.random.split(key, 8)
    return {
        "pe1_w": _normal(ks[0], (dim, c4), 0.08), "pe1_b": _normal(ks[1], (c4,), 0.02),
        "pe_dw_w": _normal(ks[2], (3, 3, c4), 0.2),
        "pe3_w": _normal(ks[3], (c4, c_out), 0.08), "pe3_b": _normal(ks[4], (c_out,), 0.02),
        "pe3_bn_g": jnp.ones((c_out,), jnp.float32),
        "pe3_bn_b": jnp.zeros((c_out,), jnp.float32),
        "pe3_bn_m": _normal(ks[5], (c_out,), 0.02),
        "pe3_bn_v": 1.0 + 0.1 * jnp.abs(jax.random.normal(ks[6], (c_out,), jnp.float32)),
        "pe_norm_g": jnp.ones((c_out,), jnp.float32),
        "pe_norm_b": jnp.zeros((c_out,), jnp.float32),
    }


def init_basic_layer_up_params(key, dim, input_resolution, depth, mlp_ratio=4.0,
                               upsample=True):
    h, w = input_resolution
    keys = jax.random.split(key, depth + 1)
    cos_t, sa_t, sb_t = make_rope_tables(h, w, dim)
    return {
        "blocks": [init_block_params(keys[i], dim, mlp_ratio) for i in range(depth)],
        "upsample": init_patch_expand_params(keys[-1], dim) if upsample else None,
        "rope_cos": cos_t,
        "rope_sa": sa_t,
        "rope_sb": sb_t,
    }


if __name__ == "__main__":
    # Small config consistent with the module: dim=32, resolution 8x8 (L=64),
    # depth=2, 4 heads (head_dim=8), mlp_ratio=4, PatchExpand upsample.
    B, H, W, DIM, HEADS, DEPTH = 2, 8, 8, 32, 4, 2

    key = jax.random.PRNGKey(0)
    kx, kp = jax.random.split(key)
    x = jax.random.normal(kx, (B, H * W, DIM), jnp.float32)
    params = init_basic_layer_up_params(kp, DIM, (H, W), DEPTH, upsample=True)

    fwd = jax.jit(functools.partial(basic_layer_up_forward,
                                    input_resolution=(H, W), num_heads=HEADS))
    out = jax.block_until_ready(fwd(x, params))

    assert out.shape == (B, 4 * H * W, DIM // 2), out.shape
    assert bool(jnp.all(jnp.isfinite(out)))
    print("KERNEL_OK")
</pallas_src>

<mosaic_0001>
module attributes {stable_mosaic.version = 11 : i64} {
  func.func @kernel(%arg0: i32, %arg1: memref<1x10x10x32xbf16, #tpu.memory_space<vmem>>, %arg2: memref<9x32xf32, #tpu.memory_space<vmem>>, %arg3: memref<1x32xf32, #tpu.memory_space<vmem>>, %arg4: memref<1x8x8x32xf32, #tpu.memory_space<vmem>>, %arg5: memref<1x8x8x32xbf16, #tpu.memory_space<vmem>>) attributes {dimension_semantics = [#tpu.dimension_semantics<parallel>], iteration_bounds = array<i64: 2>, scalar_prefetch = 0 : i64, scratch_operands = 0 : i64, tpu.core_type = #tpu.core_type<tc>, window_params = [{transform_indices = @transform_0, window_bounds = array<i64: 1, 10, 10, 32>}, {pipeline_mode = #tpu.pipeline_mode<synchronous>, transform_indices = @transform_1, window_bounds = array<i64: 9, 32>}, {pipeline_mode = #tpu.pipeline_mode<synchronous>, transform_indices = @transform_2, window_bounds = array<i64: 1, 32>}, {transform_indices = @transform_3, window_bounds = array<i64: 1, 8, 8, 32>}, {transform_indices = @transform_4, window_bounds = array<i64: 1, 8, 8, 32>}]} {
    %cst = arith.constant 0.000000e+00 : f32
    %0 = vector.broadcast %cst : f32 to vector<8x8x32xf32>
    %c0 = arith.constant 0 : index
    %c0_0 = arith.constant 0 : index
    %c0_1 = arith.constant 0 : index
    %c0_2 = arith.constant 0 : index
    %1 = vector.load %arg1[%c0, %c0_0, %c0_1, %c0_2] : memref<1x10x10x32xbf16, #tpu.memory_space<vmem>>, vector<1x8x8x32xbf16>
    %2 = vector.shape_cast %1 : vector<1x8x8x32xbf16> to vector<8x8x32xbf16>
    %3 = arith.extf %2 : vector<8x8x32xbf16> to vector<8x8x32xf32>
    %c0_3 = arith.constant 0 : index
    %c0_4 = arith.constant 0 : index
    %4 = vector.load %arg2[%c0_3, %c0_4] : memref<9x32xf32, #tpu.memory_space<vmem>>, vector<1x32xf32>
    %5 = vector.shape_cast %4 : vector<1x32xf32> to vector<1x1x32xf32>
    %6 = vector.broadcast %5 : vector<1x1x32xf32> to vector<8x8x32xf32>
    %7 = arith.mulf %3, %6 : vector<8x8x32xf32>
    %8 = arith.addf %0, %7 : vector<8x8x32xf32>
    %c0_5 = arith.constant 0 : index
    %c0_6 = arith.constant 0 : index
    %c1 = arith.constant 1 : index
    %c0_7 = arith.constant 0 : index
    %9 = vector.load %arg1[%c0_5, %c0_6, %c1, %c0_7] : memref<1x10x10x32xbf16, #tpu.memory_space<vmem>>, vector<1x8x8x32xbf16>
    %10 = vector.shape_cast %9 : vector<1x8x8x32xbf16> to vector<8x8x32xbf16>
    %11 = arith.extf %10 : vector<8x8x32xbf16> to vector<8x8x32xf32>
    %c1_8 = arith.constant 1 : index
    %c0_9 = arith.constant 0 : index
    %12 = vector.load %arg2[%c1_8, %c0_9] : memref<9x32xf32, #tpu.memory_space<vmem>>, vector<1x32xf32>
    %13 = vector.shape_cast %12 : vector<1x32xf32> to vector<1x1x32xf32>
    %14 = vector.broadcast %13 : vector<1x1x32xf32> to vector<8x8x32xf32>
    %15 = arith.mulf %11, %14 : vector<8x8x32xf32>
    %16 = arith.addf %8, %15 : vector<8x8x32xf32>
    %c0_10 = arith.constant 0 : index
    %c0_11 = arith.constant 0 : index
    %c2 = arith.constant 2 : index
    %c0_12 = arith.constant 0 : index
    %17 = vector.load %arg1[%c0_10, %c0_11, %c2, %c0_12] : memref<1x10x10x32xbf16, #tpu.memory_space<vmem>>, vector<1x8x8x32xbf16>
    %18 = vector.shape_cast %17 : vector<1x8x8x32xbf16> to vector<8x8x32xbf16>
    %19 = arith.extf %18 : vector<8x8x32xbf16> to vector<8x8x32xf32>
    %c2_13 = arith.constant 2 : index
    %c0_14 = arith.constant 0 : index
    %20 = vector.load %arg2[%c2_13, %c0_14] : memref<9x32xf32, #tpu.memory_space<vmem>>, vector<1x32xf32>
    %21 = vector.shape_cast %20 : vector<1x32xf32> to vector<1x1x32xf32>
    %22 = vector.broadcast %21 : vector<1x1x32xf32> to vector<8x8x32xf32>
    %23 = arith.mulf %19, %22 : vector<8x8x32xf32>
    %24 = arith.addf %16, %23 : vector<8x8x32xf32>
    %c0_15 = arith.constant 0 : index
    %c1_16 = arith.constant 1 : index
    %c0_17 = arith.constant 0 : index
    %c0_18 = arith.constant 0 : index
    %25 = vector.load %arg1[%c0_15, %c1_16, %c0_17, %c0_18] : memref<1x10x10x32xbf16, #tpu.memory_space<vmem>>, vector<1x8x8x32xbf16>
    %26 = vector.shape_cast %25 : vector<1x8x8x32xbf16> to vector<8x8x32xbf16>
    %27 = arith.extf %26 : vector<8x8x32xbf16> to vector<8x8x32xf32>
    %c3 = arith.constant 3 : index
    %c0_19 = arith.constant 0 : index
    %28 = vector.load %arg2[%c3, %c0_19] : memref<9x32xf32, #tpu.memory_space<vmem>>, vector<1x32xf32>
    %29 = vector.shape_cast %28 : vector<1x32xf32> to vector<1x1x32xf32>
    %30 = vector.broadcast %29 : vector<1x1x32xf32> to vector<8x8x32xf32>
    %31 = arith.mulf %27, %30 : vector<8x8x32xf32>
    %32 = arith.addf %24, %31 : vector<8x8x32xf32>
    %c0_20 = arith.constant 0 : index
    %c1_21 = arith.constant 1 : index
    %c1_22 = arith.constant 1 : index
    %c0_23 = arith.constant 0 : index
    %33 = vector.load %arg1[%c0_20, %c1_21, %c1_22, %c0_23] : memref<1x10x10x32xbf16, #tpu.memory_space<vmem>>, vector<1x8x8x32xbf16>
    %34 = vector.shape_cast %33 : vector<1x8x8x32xbf16> to vector<8x8x32xbf16>
    %35 = arith.extf %34 : vector<8x8x32xbf16> to vector<8x8x32xf32>
    %c4 = arith.constant 4 : index
    %c0_24 = arith.constant 0 : index
    %36 = vector.load %arg2[%c4, %c0_24] : memref<9x32xf32, #tpu.memory_space<vmem>>, vector<1x32xf32>
    %37 = vector.shape_cast %36 : vector<1x32xf32> to vector<1x1x32xf32>
    %38 = vector.broadcast %37 : vector<1x1x32xf32> to vector<8x8x32xf32>
    %39 = arith.mulf %35, %38 : vector<8x8x32xf32>
    %40 = arith.addf %32, %39 : vector<8x8x32xf32>
    %c0_25 = arith.constant 0 : index
    %c1_26 = arith.constant 1 : index
    %c2_27 = arith.constant 2 : index
    %c0_28 = arith.constant 0 : index
    %41 = vector.load %arg1[%c0_25, %c1_26, %c2_27, %c0_28] : memref<1x10x10x32xbf16, #tpu.memory_space<vmem>>, vector<1x8x8x32xbf16>
    %42 = vector.shape_cast %41 : vector<1x8x8x32xbf16> to vector<8x8x32xbf16>
    %43 = arith.extf %42 : vector<8x8x32xbf16> to vector<8x8x32xf32>
    %c5 = arith.constant 5 : index
    %c0_29 = arith.constant 0 : index
    %44 = vector.load %arg2[%c5, %c0_29] : memref<9x32xf32, #tpu.memory_space<vmem>>, vector<1x32xf32>
    %45 = vector.shape_cast %44 : vector<1x32xf32> to vector<1x1x32xf32>
    %46 = vector.broadcast %45 : vector<1x1x32xf32> to vector<8x8x32xf32>
    %47 = arith.mulf %43, %46 : vector<8x8x32xf32>
    %48 = arith.addf %40, %47 : vector<8x8x32xf32>
    %c0_30 = arith.constant 0 : index
    %c2_31 = arith.constant 2 : index
    %c0_32 = arith.constant 0 : index
    %c0_33 = arith.constant 0 : index
    %49 = vector.load %arg1[%c0_30, %c2_31, %c0_32, %c0_33] : memref<1x10x10x32xbf16, #tpu.memory_space<vmem>>, vector<1x8x8x32xbf16>
    %50 = vector.shape_cast %49 : vector<1x8x8x32xbf16> to vector<8x8x32xbf16>
    %51 = arith.extf %50 : vector<8x8x32xbf16> to vector<8x8x32xf32>
    %c6 = arith.constant 6 : index
    %c0_34 = arith.constant 0 : index
    %52 = vector.load %arg2[%c6, %c0_34] : memref<9x32xf32, #tpu.memory_space<vmem>>, vector<1x32xf32>
    %53 = vector.shape_cast %52 : vector<1x32xf32> to vector<1x1x32xf32>
    %54 = vector.broadcast %53 : vector<1x1x32xf32> to vector<8x8x32xf32>
    %55 = arith.mulf %51, %54 : vector<8x8x32xf32>
    %56 = arith.addf %48, %55 : vector<8x8x32xf32>
    %c0_35 = arith.constant 0 : index
    %c2_36 = arith.constant 2 : index
    %c1_37 = arith.constant 1 : index
    %c0_38 = arith.constant 0 : index
    %57 = vector.load %arg1[%c0_35, %c2_36, %c1_37, %c0_38] : memref<1x10x10x32xbf16, #tpu.memory_space<vmem>>, vector<1x8x8x32xbf16>
    %58 = vector.shape_cast %57 : vector<1x8x8x32xbf16> to vector<8x8x32xbf16>
    %59 = arith.extf %58 : vector<8x8x32xbf16> to vector<8x8x32xf32>
    %c7 = arith.constant 7 : index
    %c0_39 = arith.constant 0 : index
    %60 = vector.load %arg2[%c7, %c0_39] : memref<9x32xf32, #tpu.memory_space<vmem>>, vector<1x32xf32>
    %61 = vector.shape_cast %60 : vector<1x32xf32> to vector<1x1x32xf32>
    %62 = vector.broadcast %61 : vector<1x1x32xf32> to vector<8x8x32xf32>
    %63 = arith.mulf %59, %62 : vector<8x8x32xf32>
    %64 = arith.addf %56, %63 : vector<8x8x32xf32>
    %c0_40 = arith.constant 0 : index
    %c2_41 = arith.constant 2 : index
    %c2_42 = arith.constant 2 : index
    %c0_43 = arith.constant 0 : index
    %65 = vector.load %arg1[%c0_40, %c2_41, %c2_42, %c0_43] : memref<1x10x10x32xbf16, #tpu.memory_space<vmem>>, vector<1x8x8x32xbf16>
    %66 = vector.shape_cast %65 : vector<1x8x8x32xbf16> to vector<8x8x32xbf16>
    %67 = arith.extf %66 : vector<8x8x32xbf16> to vector<8x8x32xf32>
    %c8 = arith.constant 8 : index
    %c0_44 = arith.constant 0 : index
    %68 = vector.load %arg2[%c8, %c0_44] : memref<9x32xf32, #tpu.memory_space<vmem>>, vector<1x32xf32>
    %69 = vector.shape_cast %68 : vector<1x32xf32> to vector<1x1x32xf32>
    %70 = vector.broadcast %69 : vector<1x1x32xf32> to vector<8x8x32xf32>
    %71 = arith.mulf %67, %70 : vector<8x8x32xf32>
    %72 = arith.addf %64, %71 : vector<8x8x32xf32>
    %c0_45 = arith.constant 0 : index
    %c0_46 = arith.constant 0 : index
    %73 = vector.load %arg3[%c0_45, %c0_46] : memref<1x32xf32, #tpu.memory_space<vmem>>, vector<1x32xf32>
    %74 = vector.shape_cast %73 : vector<1x32xf32> to vector<1x1x32xf32>
    %75 = vector.broadcast %74 : vector<1x1x32xf32> to vector<8x8x32xf32>
    %76 = arith.addf %72, %75 : vector<8x8x32xf32>
    %c0_47 = arith.constant 0 : index
    %c0_48 = arith.constant 0 : index
    %c0_49 = arith.constant 0 : index
    %c0_50 = arith.constant 0 : index
    %77 = vector.load %arg4[%c0_47, %c0_48, %c0_49, %c0_50] : memref<1x8x8x32xf32, #tpu.memory_space<vmem>>, vector<1x8x8x32xf32>
    %78 = vector.shape_cast %77 : vector<1x8x8x32xf32> to vector<8x8x32xf32>
    %79 = arith.addf %76, %78 : vector<8x8x32xf32>
    %80 = arith.truncf %79 : vector<8x8x32xf32> to vector<8x8x32xbf16>
    %c0_51 = arith.constant 0 : index
    %c0_52 = arith.constant 0 : index
    %c0_53 = arith.constant 0 : index
    %c0_54 = arith.constant 0 : index
    %81 = vector.load %arg5[%c0_51, %c0_52, %c0_53, %c0_54] : memref<1x8x8x32xbf16, #tpu.memory_space<vmem>>, vector<1x8x8x32xbf16>
    %82 = vector.shape_cast %81 : vector<1x8x8x32xbf16> to vector<8x8x32xbf16>
    %83 = vector.shape_cast %80 : vector<8x8x32xbf16> to vector<1x8x8x32xbf16>
    tpu.vector_store %arg5[%c0_51, %c0_52, %c0_53, %c0_54], %83 {strides = array<i32>} : memref<1x8x8x32xbf16, #tpu.memory_space<vmem>>, vector<1x8x8x32xbf16>,
    return
  }
  func.func @transform_0(%arg0: i32) -> (i32, i32, i32, i32) {
    %c0_i32 = arith.constant 0 : i32
    %c0_i32_0 = arith.constant 0 : i32
    %c0_i32_1 = arith.constant 0 : i32
    %c0_i32_2 = arith.constant 0 : i32
    return %arg0, %c0_i32, %c0_i32_0, %c0_i32_1 : i32, i32, i32, i32
  }
  func.func @transform_1(%arg0: i32) -> (i32, i32) {
    %c0_i32 = arith.constant 0 : i32
    %c0_i32_0 = arith.constant 0 : i32
    %c0_i32_1 = arith.constant 0 : i32
    return %c0_i32, %c0_i32_0 : i32, i32
  }
  func.func @transform_2(%arg0: i32) -> (i32, i32) {
    %c0_i32 = arith.constant 0 : i32
    %c0_i32_0 = arith.constant 0 : i32
    %c0_i32_1 = arith.constant 0 : i32
    return %c0_i32, %c0_i32_0 : i32, i32
  }
  func.func @transform_3(%arg0: i32) -> (i32, i32, i32, i32) {
    %c0_i32 = arith.constant 0 : i32
    %c0_i32_0 = arith.constant 0 : i32
    %c0_i32_1 = arith.constant 0 : i32
    %c0_i32_2 = arith.constant 0 : i32
    return %arg0, %c0_i32, %c0_i32_0, %c0_i32_1 : i32, i32, i32, i32
  }
  func.func @transform_4(%arg0: i32) -> (i32, i32, i32, i32) {
    %c0_i32 = arith.constant 0 : i32
    %c0_i32_0 = arith.constant 0 : i32
    %c0_i32_1 = arith.constant 0 : i32
    %c0_i32_2 = arith.constant 0 : i32
    return %arg0, %c0_i32, %c0_i32_0, %c0_i32_1 : i32, i32, i32, i32
  }
}

module attributes {stable_mosaic.version = 11 : i64} {
  func.func @kernel(%arg0: i32, %arg1: i32, %arg2: memref<128x32xbf16, #tpu.memory_space<vmem>>, %arg3: memref<1x32xf32, #tpu.memory_space<vmem>>, %arg4: memref<1x32xf32, #tpu.memory_space<vmem>>, %arg5: memref<32x128xbf16, #tpu.memory_space<vmem>>, %arg6: memref<1x128xf32, #tpu.memory_space<vmem>>, %arg7: memref<128x128xbf16, #tpu.memory_space<vmem>>) attributes {dimension_semantics = [#tpu.dimension_semantics<parallel>, #tpu.dimension_semantics<parallel>], iteration_bounds = array<i64: 1, 1>, scalar_prefetch = 0 : i64, scratch_operands = 0 : i64, tpu.core_type = #tpu.core_type<tc>, window_params = [{transform_indices = @transform_0, window_bounds = array<i64: 128, 32>}, {pipeline_mode = #tpu.pipeline_mode<synchronous>, transform_indices = @transform_1, window_bounds = array<i64: 1, 32>}, {pipeline_mode = #tpu.pipeline_mode<synchronous>, transform_indices = @transform_2, window_bounds = array<i64: 1, 32>}, {transform_indices = @transform_3, window_bounds = array<i64: 32, 128>}, {transform_indices = @transform_4, window_bounds = array<i64: 1, 128>}, {transform_indices = @transform_5, window_bounds = array<i64: 128, 128>}]} {
    %c0 = arith.constant 0 : index
    %c0_0 = arith.constant 0 : index
    %0 = vector.load %arg2[%c0, %c0_0] : memref<128x32xbf16, #tpu.memory_space<vmem>>, vector<128x32xbf16>
    %1 = arith.extf %0 : vector<128x32xbf16> to vector<128x32xf32>
    %cst = arith.constant dense<0.000000e+00> : vector<128xf32>
    %2 = vector.multi_reduction <add>, %1, %cst [1] : vector<128x32xf32> to vector<128xf32>
    %3 = vector.shape_cast %2 : vector<128xf32> to vector<128x1xf32>
    %cst_1 = arith.constant 3.200000e+01 : f32
    %4 = vector.broadcast %cst_1 : f32 to vector<128x1xf32>
    %5 = arith.divf %3, %4 : vector<128x1xf32>
    %6 = vector.broadcast %5 : vector<128x1xf32> to vector<128x32xf32>
    %7 = arith.subf %1, %6 : vector<128x32xf32>
    %8 = arith.mulf %7, %7 : vector<128x32xf32>
    %cst_2 = arith.constant dense<0.000000e+00> : vector<128xf32>
    %9 = vector.multi_reduction <add>, %8, %cst_2 [1] : vector<128x32xf32> to vector<128xf32>
    %10 = vector.shape_cast %9 : vector<128xf32> to vector<128x1xf32>
    %cst_3 = arith.constant 3.200000e+01 : f32
    %11 = vector.broadcast %cst_3 : f32 to vector<128x1xf32>
    %12 = arith.divf %10, %11 : vector<128x1xf32>
    %cst_4 = arith.constant 9.99999974E-6 : f32
    %13 = vector.broadcast %cst_4 : f32 to vector<128x1xf32>
    %14 = arith.addf %12, %13 : vector<128x1xf32>
    %15 = math.rsqrt %14 : vector<128x1xf32>
    %16 = vector.broadcast %15 : vector<128x1xf32> to vector<128x32xf32>
    %17 = arith.mulf %7, %16 : vector<128x32xf32>
    %c0_5 = arith.constant 0 : index
    %c0_6 = arith.constant 0 : index
    %18 = vector.load %arg3[%c0_5, %c0_6] : memref<1x32xf32, #tpu.memory_space<vmem>>, vector<1x32xf32>
    %19 = vector.broadcast %18 : vector<1x32xf32> to vector<128x32xf32>
    %20 = arith.mulf %17, %19 : vector<128x32xf32>
    %c0_7 = arith.constant 0 : index
    %c0_8 = arith.constant 0 : index
    %21 = vector.load %arg4[%c0_7, %c0_8] : memref<1x32xf32, #tpu.memory_space<vmem>>, vector<1x32xf32>
    %22 = vector.broadcast %21 : vector<1x32xf32> to vector<128x32xf32>
    %23 = arith.addf %20, %22 : vector<128x32xf32>
    %24 = arith.truncf %23 : vector<128x32xf32> to vector<128x32xbf16>
    %c0_9 = arith.constant 0 : index
    %c0_10 = arith.constant 0 : index
    %25 = vector.load %arg5[%c0_9, %c0_10] : memref<32x128xbf16, #tpu.memory_space<vmem>>, vector<32x128xbf16>
    %cst_11 = arith.constant dense<0.000000e+00> : vector<128x128xf32>
    %26 = tpu.matmul %24, %25, %cst_11 {dimension_numbers = #tpu.dot_dimension_numbers<[1], [0], [0], [1], [0, 0, 1, 1], [], []>} : vector<128x32xbf16>, vector<32x128xbf16>, vector<128x128xf32> -> vector<128x128xf32>
    %c0_12 = arith.constant 0 : index
    %c0_13 = arith.constant 0 : index
    %27 = vector.load %arg6[%c0_12, %c0_13] : memref<1x128xf32, #tpu.memory_space<vmem>>, vector<1x128xf32>
    %28 = vector.broadcast %27 : vector<1x128xf32> to vector<128x128xf32>
    %29 = arith.addf %26, %28 : vector<128x128xf32>
    %30 = arith.truncf %29 : vector<128x128xf32> to vector<128x128xbf16>
    %c0_14 = arith.constant 0 : index
    %c0_15 = arith.constant 0 : index
    %31 = vector.load %arg7[%c0_14, %c0_15] : memref<128x128xbf16, #tpu.memory_space<vmem>>, vector<128x128xbf16>
    tpu.vector_store %arg7[%c0_14, %c0_15], %30 {strides = array<i32>} : memref<128x128xbf16, #tpu.memory_space<vmem>>, vector<128x128xbf16>,
    return
  }
  func.func @transform_0(%arg0: i32, %arg1: i32) -> (i32, i32) {
    %c0_i32 = arith.constant 0 : i32
    %c0_i32_0 = arith.constant 0 : i32
    return %arg0, %c0_i32 : i32, i32
  }
  func.func @transform_1(%arg0: i32, %arg1: i32) -> (i32, i32) {
    %c0_i32 = arith.constant 0 : i32
    %c0_i32_0 = arith.constant 0 : i32
    %c0_i32_1 = arith.constant 0 : i32
    return %c0_i32, %c0_i32_0 : i32, i32
  }
  func.func @transform_2(%arg0: i32, %arg1: i32) -> (i32, i32) {
    %c0_i32 = arith.constant 0 : i32
    %c0_i32_0 = arith.constant 0 : i32
    %c0_i32_1 = arith.constant 0 : i32
    return %c0_i32, %c0_i32_0 : i32, i32
  }
  func.func @transform_3(%arg0: i32, %arg1: i32) -> (i32, i32) {
    %c0_i32 = arith.constant 0 : i32
    %c0_i32_0 = arith.constant 0 : i32
    return %c0_i32, %arg1 : i32, i32
  }
  func.func @transform_4(%arg0: i32, %arg1: i32) -> (i32, i32) {
    %c0_i32 = arith.constant 0 : i32
    %c0_i32_0 = arith.constant 0 : i32
    return %c0_i32, %arg1 : i32, i32
  }
  func.func @transform_5(%arg0: i32, %arg1: i32) -> (i32, i32) {
    %c0_i32 = arith.constant 0 : i32
    return %arg0, %arg1 : i32, i32
  }
}

module attributes {stable_mosaic.version = 11 : i64} {
  func.func @kernel(%arg0: i32, %arg1: memref<1x10x10x32xbf16, #tpu.memory_space<vmem>>, %arg2: memref<9x32xf32, #tpu.memory_space<vmem>>, %arg3: memref<1x32xf32, #tpu.memory_space<vmem>>, %arg4: memref<1x8x8x32xbf16, #tpu.memory_space<vmem>>) attributes {dimension_semantics = [#tpu.dimension_semantics<parallel>], iteration_bounds = array<i64: 2>, scalar_prefetch = 0 : i64, scratch_operands = 0 : i64, tpu.core_type = #tpu.core_type<tc>, window_params = [{transform_indices = @transform_0, window_bounds = array<i64: 1, 10, 10, 32>}, {pipeline_mode = #tpu.pipeline_mode<synchronous>, transform_indices = @transform_1, window_bounds = array<i64: 9, 32>}, {pipeline_mode = #tpu.pipeline_mode<synchronous>, transform_indices = @transform_2, window_bounds = array<i64: 1, 32>}, {transform_indices = @transform_3, window_bounds = array<i64: 1, 8, 8, 32>}]} {
    %cst = arith.constant 0.000000e+00 : f32
    %0 = vector.broadcast %cst : f32 to vector<8x8x32xf32>
    %c0 = arith.constant 0 : index
    %c0_0 = arith.constant 0 : index
    %c0_1 = arith.constant 0 : index
    %c0_2 = arith.constant 0 : index
    %1 = vector.load %arg1[%c0, %c0_0, %c0_1, %c0_2] : memref<1x10x10x32xbf16, #tpu.memory_space<vmem>>, vector<1x8x8x32xbf16>
    %2 = vector.shape_cast %1 : vector<1x8x8x32xbf16> to vector<8x8x32xbf16>
    %3 = arith.extf %2 : vector<8x8x32xbf16> to vector<8x8x32xf32>
    %c0_3 = arith.constant 0 : index
    %c0_4 = arith.constant 0 : index
    %4 = vector.load %arg2[%c0_3, %c0_4] : memref<9x32xf32, #tpu.memory_space<vmem>>, vector<1x32xf32>
    %5 = vector.shape_cast %4 : vector<1x32xf32> to vector<1x1x32xf32>
    %6 = vector.broadcast %5 : vector<1x1x32xf32> to vector<8x8x32xf32>
    %7 = arith.mulf %3, %6 : vector<8x8x32xf32>
    %8 = arith.addf %0, %7 : vector<8x8x32xf32>
    %c0_5 = arith.constant 0 : index
    %c0_6 = arith.constant 0 : index
    %c1 = arith.constant 1 : index
    %c0_7 = arith.constant 0 : index
    %9 = vector.load %arg1[%c0_5, %c0_6, %c1, %c0_7] : memref<1x10x10x32xbf16, #tpu.memory_space<vmem>>, vector<1x8x8x32xbf16>
    %10 = vector.shape_cast %9 : vector<1x8x8x32xbf16> to vector<8x8x32xbf16>
    %11 = arith.extf %10 : vector<8x8x32xbf16> to vector<8x8x32xf32>
    %c1_8 = arith.constant 1 : index
    %c0_9 = arith.constant 0 : index
    %12 = vector.load %arg2[%c1_8, %c0_9] : memref<9x32xf32, #tpu.memory_space<vmem>>, vector<1x32xf32>
    %13 = vector.shape_cast %12 : vector<1x32xf32> to vector<1x1x32xf32>
    %14 = vector.broadcast %13 : vector<1x1x32xf32> to vector<8x8x32xf32>
    %15 = arith.mulf %11, %14 : vector<8x8x32xf32>
    %16 = arith.addf %8, %15 : vector<8x8x32xf32>
    %c0_10 = arith.constant 0 : index
    %c0_11 = arith.constant 0 : index
    %c2 = arith.constant 2 : index
    %c0_12 = arith.constant 0 : index
    %17 = vector.load %arg1[%c0_10, %c0_11, %c2, %c0_12] : memref<1x10x10x32xbf16, #tpu.memory_space<vmem>>, vector<1x8x8x32xbf16>
    %18 = vector.shape_cast %17 : vector<1x8x8x32xbf16> to vector<8x8x32xbf16>
    %19 = arith.extf %18 : vector<8x8x32xbf16> to vector<8x8x32xf32>
    %c2_13 = arith.constant 2 : index
    %c0_14 = arith.constant 0 : index
    %20 = vector.load %arg2[%c2_13, %c0_14] : memref<9x32xf32, #tpu.memory_space<vmem>>, vector<1x32xf32>
    %21 = vector.shape_cast %20 : vector<1x32xf32> to vector<1x1x32xf32>
    %22 = vector.broadcast %21 : vector<1x1x32xf32> to vector<8x8x32xf32>
    %23 = arith.mulf %19, %22 : vector<8x8x32xf32>
    %24 = arith.addf %16, %23 : vector<8x8x32xf32>
    %c0_15 = arith.constant 0 : index
    %c1_16 = arith.constant 1 : index
    %c0_17 = arith.constant 0 : index
    %c0_18 = arith.constant 0 : index
    %25 = vector.load %arg1[%c0_15, %c1_16, %c0_17, %c0_18] : memref<1x10x10x32xbf16, #tpu.memory_space<vmem>>, vector<1x8x8x32xbf16>
    %26 = vector.shape_cast %25 : vector<1x8x8x32xbf16> to vector<8x8x32xbf16>
    %27 = arith.extf %26 : vector<8x8x32xbf16> to vector<8x8x32xf32>
    %c3 = arith.constant 3 : index
    %c0_19 = arith.constant 0 : index
    %28 = vector.load %arg2[%c3, %c0_19] : memref<9x32xf32, #tpu.memory_space<vmem>>, vector<1x32xf32>
    %29 = vector.shape_cast %28 : vector<1x32xf32> to vector<1x1x32xf32>
    %30 = vector.broadcast %29 : vector<1x1x32xf32> to vector<8x8x32xf32>
    %31 = arith.mulf %27, %30 : vector<8x8x32xf32>
    %32 = arith.addf %24, %31 : vector<8x8x32xf32>
    %c0_20 = arith.constant 0 : index
    %c1_21 = arith.constant 1 : index
    %c1_22 = arith.constant 1 : index
    %c0_23 = arith.constant 0 : index
    %33 = vector.load %arg1[%c0_20, %c1_21, %c1_22, %c0_23] : memref<1x10x10x32xbf16, #tpu.memory_space<vmem>>, vector<1x8x8x32xbf16>
    %34 = vector.shape_cast %33 : vector<1x8x8x32xbf16> to vector<8x8x32xbf16>
    %35 = arith.extf %34 : vector<8x8x32xbf16> to vector<8x8x32xf32>
    %c4 = arith.constant 4 : index
    %c0_24 = arith.constant 0 : index
    %36 = vector.load %arg2[%c4, %c0_24] : memref<9x32xf32, #tpu.memory_space<vmem>>, vector<1x32xf32>
    %37 = vector.shape_cast %36 : vector<1x32xf32> to vector<1x1x32xf32>
    %38 = vector.broadcast %37 : vector<1x1x32xf32> to vector<8x8x32xf32>
    %39 = arith.mulf %35, %38 : vector<8x8x32xf32>
    %40 = arith.addf %32, %39 : vector<8x8x32xf32>
    %c0_25 = arith.constant 0 : index
    %c1_26 = arith.constant 1 : index
    %c2_27 = arith.constant 2 : index
    %c0_28 = arith.constant 0 : index
    %41 = vector.load %arg1[%c0_25, %c1_26, %c2_27, %c0_28] : memref<1x10x10x32xbf16, #tpu.memory_space<vmem>>, vector<1x8x8x32xbf16>
    %42 = vector.shape_cast %41 : vector<1x8x8x32xbf16> to vector<8x8x32xbf16>
    %43 = arith.extf %42 : vector<8x8x32xbf16> to vector<8x8x32xf32>
    %c5 = arith.constant 5 : index
    %c0_29 = arith.constant 0 : index
    %44 = vector.load %arg2[%c5, %c0_29] : memref<9x32xf32, #tpu.memory_space<vmem>>, vector<1x32xf32>
    %45 = vector.shape_cast %44 : vector<1x32xf32> to vector<1x1x32xf32>
    %46 = vector.broadcast %45 : vector<1x1x32xf32> to vector<8x8x32xf32>
    %47 = arith.mulf %43, %46 : vector<8x8x32xf32>
    %48 = arith.addf %40, %47 : vector<8x8x32xf32>
    %c0_30 = arith.constant 0 : index
    %c2_31 = arith.constant 2 : index
    %c0_32 = arith.constant 0 : index
    %c0_33 = arith.constant 0 : index
    %49 = vector.load %arg1[%c0_30, %c2_31, %c0_32, %c0_33] : memref<1x10x10x32xbf16, #tpu.memory_space<vmem>>, vector<1x8x8x32xbf16>
    %50 = vector.shape_cast %49 : vector<1x8x8x32xbf16> to vector<8x8x32xbf16>
    %51 = arith.extf %50 : vector<8x8x32xbf16> to vector<8x8x32xf32>
    %c6 = arith.constant 6 : index
    %c0_34 = arith.constant 0 : index
    %52 = vector.load %arg2[%c6, %c0_34] : memref<9x32xf32, #tpu.memory_space<vmem>>, vector<1x32xf32>
    %53 = vector.shape_cast %52 : vector<1x32xf32> to vector<1x1x32xf32>
    %54 = vector.broadcast %53 : vector<1x1x32xf32> to vector<8x8x32xf32>
    %55 = arith.mulf %51, %54 : vector<8x8x32xf32>
    %56 = arith.addf %48, %55 : vector<8x8x32xf32>
    %c0_35 = arith.constant 0 : index
    %c2_36 = arith.constant 2 : index
    %c1_37 = arith.constant 1 : index
    %c0_38 = arith.constant 0 : index
    %57 = vector.load %arg1[%c0_35, %c2_36, %c1_37, %c0_38] : memref<1x10x10x32xbf16, #tpu.memory_space<vmem>>, vector<1x8x8x32xbf16>
    %58 = vector.shape_cast %57 : vector<1x8x8x32xbf16> to vector<8x8x32xbf16>
    %59 = arith.extf %58 : vector<8x8x32xbf16> to vector<8x8x32xf32>
    %c7 = arith.constant 7 : index
    %c0_39 = arith.constant 0 : index
    %60 = vector.load %arg2[%c7, %c0_39] : memref<9x32xf32, #tpu.memory_space<vmem>>, vector<1x32xf32>
    %61 = vector.shape_cast %60 : vector<1x32xf32> to vector<1x1x32xf32>
    %62 = vector.broadcast %61 : vector<1x1x32xf32> to vector<8x8x32xf32>
    %63 = arith.mulf %59, %62 : vector<8x8x32xf32>
    %64 = arith.addf %56, %63 : vector<8x8x32xf32>
    %c0_40 = arith.constant 0 : index
    %c2_41 = arith.constant 2 : index
    %c2_42 = arith.constant 2 : index
    %c0_43 = arith.constant 0 : index
    %65 = vector.load %arg1[%c0_40, %c2_41, %c2_42, %c0_43] : memref<1x10x10x32xbf16, #tpu.memory_space<vmem>>, vector<1x8x8x32xbf16>
    %66 = vector.shape_cast %65 : vector<1x8x8x32xbf16> to vector<8x8x32xbf16>
    %67 = arith.extf %66 : vector<8x8x32xbf16> to vector<8x8x32xf32>
    %c8 = arith.constant 8 : index
    %c0_44 = arith.constant 0 : index
    %68 = vector.load %arg2[%c8, %c0_44] : memref<9x32xf32, #tpu.memory_space<vmem>>, vector<1x32xf32>
    %69 = vector.shape_cast %68 : vector<1x32xf32> to vector<1x1x32xf32>
    %70 = vector.broadcast %69 : vector<1x1x32xf32> to vector<8x8x32xf32>
    %71 = arith.mulf %67, %70 : vector<8x8x32xf32>
    %72 = arith.addf %64, %71 : vector<8x8x32xf32>
    %c0_45 = arith.constant 0 : index
    %c0_46 = arith.constant 0 : index
    %73 = vector.load %arg3[%c0_45, %c0_46] : memref<1x32xf32, #tpu.memory_space<vmem>>, vector<1x32xf32>
    %74 = vector.shape_cast %73 : vector<1x32xf32> to vector<1x1x32xf32>
    %75 = vector.broadcast %74 : vector<1x1x32xf32> to vector<8x8x32xf32>
    %76 = arith.addf %72, %75 : vector<8x8x32xf32>
    %77 = arith.negf %76 : vector<8x8x32xf32>
    %78 = math.exp %77 : vector<8x8x32xf32>
    %cst_47 = arith.constant 1.000000e+00 : f32
    %79 = vector.broadcast %cst_47 : f32 to vector<8x8x32xf32>
    %80 = arith.addf %79, %78 : vector<8x8x32xf32>
    %81 = arith.divf %79, %80 : vector<8x8x32xf32>
    %82 = arith.mulf %76, %81 : vector<8x8x32xf32>
    %83 = arith.truncf %82 : vector<8x8x32xf32> to vector<8x8x32xbf16>
    %c0_48 = arith.constant 0 : index
    %c0_49 = arith.constant 0 : index
    %c0_50 = arith.constant 0 : index
    %c0_51 = arith.constant 0 : index
    %84 = vector.load %arg4[%c0_48, %c0_49, %c0_50, %c0_51] : memref<1x8x8x32xbf16, #tpu.memory_space<vmem>>, vector<1x8x8x32xbf16>
    %85 = vector.shape_cast %84 : vector<1x8x8x32xbf16> to vector<8x8x32xbf16>
    %86 = vector.shape_cast %83 : vector<8x8x32xbf16> to vector<1x8x8x32xbf16>
    tpu.vector_store %arg4[%c0_48, %c0_49, %c0_50, %c0_51], %86 {strides = array<i32>} : memref<1x8x8x32xbf16, #tpu.memory_space<vmem>>, vector<1x8x8x32xbf16>,
    return
  }
  func.func @transform_0(%arg0: i32) -> (i32, i32, i32, i32) {
    %c0_i32 = arith.constant 0 : i32
    %c0_i32_0 = arith.constant 0 : i32
    %c0_i32_1 = arith.constant 0 : i32
    %c0_i32_2 = arith.constant 0 : i32
    return %arg0, %c0_i32, %c0_i32_0, %c0_i32_1 : i32, i32, i32, i32
  }
  func.func @transform_1(%arg0: i32) -> (i32, i32) {
    %c0_i32 = arith.constant 0 : i32
    %c0_i32_0 = arith.constant 0 : i32
    %c0_i32_1 = arith.constant 0 : i32
    return %c0_i32, %c0_i32_0 : i32, i32
  }
  func.func @transform_2(%arg0: i32) -> (i32, i32) {
    %c0_i32 = arith.constant 0 : i32
    %c0_i32_0 = arith.constant 0 : i32
    %c0_i32_1 = arith.constant 0 : i32
    return %c0_i32, %c0_i32_0 : i32, i32
  }
  func.func @transform_3(%arg0: i32) -> (i32, i32, i32, i32) {
    %c0_i32 = arith.constant 0 : i32
    %c0_i32_0 = arith.constant 0 : i32
    %c0_i32_1 = arith.constant 0 : i32
    %c0_i32_2 = arith.constant 0 : i32
    return %arg0, %c0_i32, %c0_i32_0, %c0_i32_1 : i32, i32, i32, i32
  }
}

module attributes {stable_mosaic.version = 11 : i64} {
  func.func @kernel(%arg0: i32, %arg1: i32, %arg2: memref<128x32xbf16, #tpu.memory_space<vmem>>, %arg3: memref<32x128xbf16, #tpu.memory_space<vmem>>, %arg4: memref<1x128xf32, #tpu.memory_space<vmem>>, %arg5: memref<128x128xbf16, #tpu.memory_space<vmem>>) attributes {dimension_semantics = [#tpu.dimension_semantics<parallel>, #tpu.dimension_semantics<parallel>], iteration_bounds = array<i64: 1, 1>, scalar_prefetch = 0 : i64, scratch_operands = 0 : i64, tpu.core_type = #tpu.core_type<tc>, window_params = [{transform_indices = @transform_0, window_bounds = array<i64: 128, 32>}, {transform_indices = @transform_1, window_bounds = array<i64: 32, 128>}, {transform_indices = @transform_2, window_bounds = array<i64: 1, 128>}, {transform_indices = @transform_3, window_bounds = array<i64: 128, 128>}]} {
    %c0 = arith.constant 0 : index
    %c0_0 = arith.constant 0 : index
    %0 = vector.load %arg2[%c0, %c0_0] : memref<128x32xbf16, #tpu.memory_space<vmem>>, vector<128x32xbf16>
    %c0_1 = arith.constant 0 : index
    %c0_2 = arith.constant 0 : index
    %1 = vector.load %arg3[%c0_1, %c0_2] : memref<32x128xbf16, #tpu.memory_space<vmem>>, vector<32x128xbf16>
    %cst = arith.constant dense<0.000000e+00> : vector<128x128xf32>
    %2 = tpu.matmul %0, %1, %cst {dimension_numbers = #tpu.dot_dimension_numbers<[1], [0], [0], [1], [0, 0, 1, 1], [], []>} : vector<128x32xbf16>, vector<32x128xbf16>, vector<128x128xf32> -> vector<128x128xf32>
    %c0_3 = arith.constant 0 : index
    %c0_4 = arith.constant 0 : index
    %3 = vector.load %arg4[%c0_3, %c0_4] : memref<1x128xf32, #tpu.memory_space<vmem>>, vector<1x128xf32>
    %4 = vector.broadcast %3 : vector<1x128xf32> to vector<128x128xf32>
    %5 = arith.addf %2, %4 : vector<128x128xf32>
    %cst_5 = arith.constant 0.000000e+00 : f32
    %6 = vector.broadcast %cst_5 : f32 to vector<128x128xf32>
    %7 = arith.cmpf ogt, %5, %6 : vector<128x128xf32>
    %cst_6 = arith.constant 1.000000e+00 : f32
    %8 = vector.broadcast %cst_6 : f32 to vector<128x128xf32>
    %9 = arith.addf %5, %8 : vector<128x128xf32>
    %cst_7 = arith.constant 0.000000e+00 : f32
    %10 = vector.broadcast %cst_7 : f32 to vector<128x128xf32>
    %11 = arith.minimumf %5, %10 : vector<128x128xf32>
    %12 = math.exp %11 : vector<128x128xf32>
    %13 = arith.select %7, %9, %12 : vector<128x128xi1>, vector<128x128xf32>
    %14 = arith.truncf %13 : vector<128x128xf32> to vector<128x128xbf16>
    %c0_8 = arith.constant 0 : index
    %c0_9 = arith.constant 0 : index
    %15 = vector.load %arg5[%c0_8, %c0_9] : memref<128x128xbf16, #tpu.memory_space<vmem>>, vector<128x128xbf16>
    tpu.vector_store %arg5[%c0_8, %c0_9], %14 {strides = array<i32>} : memref<128x128xbf16, #tpu.memory_space<vmem>>, vector<128x128xbf16>,
    return
  }
  func.func @transform_0(%arg0: i32, %arg1: i32) -> (i32, i32) {
    %c0_i32 = arith.constant 0 : i32
    %c0_i32_0 = arith.constant 0 : i32
    return %arg0, %c0_i32 : i32, i32
  }
  func.func @transform_1(%arg0: i32, %arg1: i32) -> (i32, i32) {
    %c0_i32 = arith.constant 0 : i32
    %c0_i32_0 = arith.constant 0 : i32
    return %c0_i32, %arg1 : i32, i32
  }
  func.func @transform_2(%arg0: i32, %arg1: i32) -> (i32, i32) {
    %c0_i32 = arith.constant 0 : i32
    %c0_i32_0 = arith.constant 0 : i32
    return %c0_i32, %arg1 : i32, i32
  }
  func.func @transform_3(%arg0: i32, %arg1: i32) -> (i32, i32) {
    %c0_i32 = arith.constant 0 : i32
    return %arg0, %arg1 : i32, i32
  }
}

module attributes {stable_mosaic.version = 11 : i64} {
  func.func @kernel(%arg0: i32, %arg1: memref<1x10x10x32xbf16, #tpu.memory_space<vmem>>, %arg2: memref<9x32xf32, #tpu.memory_space<vmem>>, %arg3: memref<1x32xf32, #tpu.memory_space<vmem>>, %arg4: memref<1x8x8x32xbf16, #tpu.memory_space<vmem>>, %arg5: memref<1x8x8x32xbf16, #tpu.memory_space<vmem>>) attributes {dimension_semantics = [#tpu.dimension_semantics<parallel>], iteration_bounds = array<i64: 2>, scalar_prefetch = 0 : i64, scratch_operands = 0 : i64, tpu.core_type = #tpu.core_type<tc>, window_params = [{transform_indices = @transform_0, window_bounds = array<i64: 1, 10, 10, 32>}, {pipeline_mode = #tpu.pipeline_mode<synchronous>, transform_indices = @transform_1, window_bounds = array<i64: 9, 32>}, {pipeline_mode = #tpu.pipeline_mode<synchronous>, transform_indices = @transform_2, window_bounds = array<i64: 1, 32>}, {transform_indices = @transform_3, window_bounds = array<i64: 1, 8, 8, 32>}, {transform_indices = @transform_4, window_bounds = array<i64: 1, 8, 8, 32>}]} {
    %cst = arith.constant 0.000000e+00 : f32
    %0 = vector.broadcast %cst : f32 to vector<8x8x32xf32>
    %c0 = arith.constant 0 : index
    %c0_0 = arith.constant 0 : index
    %c0_1 = arith.constant 0 : index
    %c0_2 = arith.constant 0 : index
    %1 = vector.load %arg1[%c0, %c0_0, %c0_1, %c0_2] : memref<1x10x10x32xbf16, #tpu.memory_space<vmem>>, vector<1x8x8x32xbf16>
    %2 = vector.shape_cast %1 : vector<1x8x8x32xbf16> to vector<8x8x32xbf16>
    %3 = arith.extf %2 : vector<8x8x32xbf16> to vector<8x8x32xf32>
    %c0_3 = arith.constant 0 : index
    %c0_4 = arith.constant 0 : index
    %4 = vector.load %arg2[%c0_3, %c0_4] : memref<9x32xf32, #tpu.memory_space<vmem>>, vector<1x32xf32>
    %5 = vector.shape_cast %4 : vector<1x32xf32> to vector<1x1x32xf32>
    %6 = vector.broadcast %5 : vector<1x1x32xf32> to vector<8x8x32xf32>
    %7 = arith.mulf %3, %6 : vector<8x8x32xf32>
    %8 = arith.addf %0, %7 : vector<8x8x32xf32>
    %c0_5 = arith.constant 0 : index
    %c0_6 = arith.constant 0 : index
    %c1 = arith.constant 1 : index
    %c0_7 = arith.constant 0 : index
    %9 = vector.load %arg1[%c0_5, %c0_6, %c1, %c0_7] : memref<1x10x10x32xbf16, #tpu.memory_space<vmem>>, vector<1x8x8x32xbf16>
    %10 = vector.shape_cast %9 : vector<1x8x8x32xbf16> to vector<8x8x32xbf16>
    %11 = arith.extf %10 : vector<8x8x32xbf16> to vector<8x8x32xf32>
    %c1_8 = arith.constant 1 : index
    %c0_9 = arith.constant 0 : index
    %12 = vector.load %arg2[%c1_8, %c0_9] : memref<9x32xf32, #tpu.memory_space<vmem>>, vector<1x32xf32>
    %13 = vector.shape_cast %12 : vector<1x32xf32> to vector<1x1x32xf32>
    %14 = vector.broadcast %13 : vector<1x1x32xf32> to vector<8x8x32xf32>
    %15 = arith.mulf %11, %14 : vector<8x8x32xf32>
    %16 = arith.addf %8, %15 : vector<8x8x32xf32>
    %c0_10 = arith.constant 0 : index
    %c0_11 = arith.constant 0 : index
    %c2 = arith.constant 2 : index
    %c0_12 = arith.constant 0 : index
    %17 = vector.load %arg1[%c0_10, %c0_11, %c2, %c0_12] : memref<1x10x10x32xbf16, #tpu.memory_space<vmem>>, vector<1x8x8x32xbf16>
    %18 = vector.shape_cast %17 : vector<1x8x8x32xbf16> to vector<8x8x32xbf16>
    %19 = arith.extf %18 : vector<8x8x32xbf16> to vector<8x8x32xf32>
    %c2_13 = arith.constant 2 : index
    %c0_14 = arith.constant 0 : index
    %20 = vector.load %arg2[%c2_13, %c0_14] : memref<9x32xf32, #tpu.memory_space<vmem>>, vector<1x32xf32>
    %21 = vector.shape_cast %20 : vector<1x32xf32> to vector<1x1x32xf32>
    %22 = vector.broadcast %21 : vector<1x1x32xf32> to vector<8x8x32xf32>
    %23 = arith.mulf %19, %22 : vector<8x8x32xf32>
    %24 = arith.addf %16, %23 : vector<8x8x32xf32>
    %c0_15 = arith.constant 0 : index
    %c1_16 = arith.constant 1 : index
    %c0_17 = arith.constant 0 : index
    %c0_18 = arith.constant 0 : index
    %25 = vector.load %arg1[%c0_15, %c1_16, %c0_17, %c0_18] : memref<1x10x10x32xbf16, #tpu.memory_space<vmem>>, vector<1x8x8x32xbf16>
    %26 = vector.shape_cast %25 : vector<1x8x8x32xbf16> to vector<8x8x32xbf16>
    %27 = arith.extf %26 : vector<8x8x32xbf16> to vector<8x8x32xf32>
    %c3 = arith.constant 3 : index
    %c0_19 = arith.constant 0 : index
    %28 = vector.load %arg2[%c3, %c0_19] : memref<9x32xf32, #tpu.memory_space<vmem>>, vector<1x32xf32>
    %29 = vector.shape_cast %28 : vector<1x32xf32> to vector<1x1x32xf32>
    %30 = vector.broadcast %29 : vector<1x1x32xf32> to vector<8x8x32xf32>
    %31 = arith.mulf %27, %30 : vector<8x8x32xf32>
    %32 = arith.addf %24, %31 : vector<8x8x32xf32>
    %c0_20 = arith.constant 0 : index
    %c1_21 = arith.constant 1 : index
    %c1_22 = arith.constant 1 : index
    %c0_23 = arith.constant 0 : index
    %33 = vector.load %arg1[%c0_20, %c1_21, %c1_22, %c0_23] : memref<1x10x10x32xbf16, #tpu.memory_space<vmem>>, vector<1x8x8x32xbf16>
    %34 = vector.shape_cast %33 : vector<1x8x8x32xbf16> to vector<8x8x32xbf16>
    %35 = arith.extf %34 : vector<8x8x32xbf16> to vector<8x8x32xf32>
    %c4 = arith.constant 4 : index
    %c0_24 = arith.constant 0 : index
    %36 = vector.load %arg2[%c4, %c0_24] : memref<9x32xf32, #tpu.memory_space<vmem>>, vector<1x32xf32>
    %37 = vector.shape_cast %36 : vector<1x32xf32> to vector<1x1x32xf32>
    %38 = vector.broadcast %37 : vector<1x1x32xf32> to vector<8x8x32xf32>
    %39 = arith.mulf %35, %38 : vector<8x8x32xf32>
    %40 = arith.addf %32, %39 : vector<8x8x32xf32>
    %c0_25 = arith.constant 0 : index
    %c1_26 = arith.constant 1 : index
    %c2_27 = arith.constant 2 : index
    %c0_28 = arith.constant 0 : index
    %41 = vector.load %arg1[%c0_25, %c1_26, %c2_27, %c0_28] : memref<1x10x10x32xbf16, #tpu.memory_space<vmem>>, vector<1x8x8x32xbf16>
    %42 = vector.shape_cast %41 : vector<1x8x8x32xbf16> to vector<8x8x32xbf16>
    %43 = arith.extf %42 : vector<8x8x32xbf16> to vector<8x8x32xf32>
    %c5 = arith.constant 5 : index
    %c0_29 = arith.constant 0 : index
    %44 = vector.load %arg2[%c5, %c0_29] : memref<9x32xf32, #tpu.memory_space<vmem>>, vector<1x32xf32>
    %45 = vector.shape_cast %44 : vector<1x32xf32> to vector<1x1x32xf32>
    %46 = vector.broadcast %45 : vector<1x1x32xf32> to vector<8x8x32xf32>
    %47 = arith.mulf %43, %46 : vector<8x8x32xf32>
    %48 = arith.addf %40, %47 : vector<8x8x32xf32>
    %c0_30 = arith.constant 0 : index
    %c2_31 = arith.constant 2 : index
    %c0_32 = arith.constant 0 : index
    %c0_33 = arith.constant 0 : index
    %49 = vector.load %arg1[%c0_30, %c2_31, %c0_32, %c0_33] : memref<1x10x10x32xbf16, #tpu.memory_space<vmem>>, vector<1x8x8x32xbf16>
    %50 = vector.shape_cast %49 : vector<1x8x8x32xbf16> to vector<8x8x32xbf16>
    %51 = arith.extf %50 : vector<8x8x32xbf16> to vector<8x8x32xf32>
    %c6 = arith.constant 6 : index
    %c0_34 = arith.constant 0 : index
    %52 = vector.load %arg2[%c6, %c0_34] : memref<9x32xf32, #tpu.memory_space<vmem>>, vector<1x32xf32>
    %53 = vector.shape_cast %52 : vector<1x32xf32> to vector<1x1x32xf32>
    %54 = vector.broadcast %53 : vector<1x1x32xf32> to vector<8x8x32xf32>
    %55 = arith.mulf %51, %54 : vector<8x8x32xf32>
    %56 = arith.addf %48, %55 : vector<8x8x32xf32>
    %c0_35 = arith.constant 0 : index
    %c2_36 = arith.constant 2 : index
    %c1_37 = arith.constant 1 : index
    %c0_38 = arith.constant 0 : index
    %57 = vector.load %arg1[%c0_35, %c2_36, %c1_37, %c0_38] : memref<1x10x10x32xbf16, #tpu.memory_space<vmem>>, vector<1x8x8x32xbf16>
    %58 = vector.shape_cast %57 : vector<1x8x8x32xbf16> to vector<8x8x32xbf16>
    %59 = arith.extf %58 : vector<8x8x32xbf16> to vector<8x8x32xf32>
    %c7 = arith.constant 7 : index
    %c0_39 = arith.constant 0 : index
    %60 = vector.load %arg2[%c7, %c0_39] : memref<9x32xf32, #tpu.memory_space<vmem>>, vector<1x32xf32>
    %61 = vector.shape_cast %60 : vector<1x32xf32> to vector<1x1x32xf32>
    %62 = vector.broadcast %61 : vector<1x1x32xf32> to vector<8x8x32xf32>
    %63 = arith.mulf %59, %62 : vector<8x8x32xf32>
    %64 = arith.addf %56, %63 : vector<8x8x32xf32>
    %c0_40 = arith.constant 0 : index
    %c2_41 = arith.constant 2 : index
    %c2_42 = arith.constant 2 : index
    %c0_43 = arith.constant 0 : index
    %65 = vector.load %arg1[%c0_40, %c2_41, %c2_42, %c0_43] : memref<1x10x10x32xbf16, #tpu.memory_space<vmem>>, vector<1x8x8x32xbf16>
    %66 = vector.shape_cast %65 : vector<1x8x8x32xbf16> to vector<8x8x32xbf16>
    %67 = arith.extf %66 : vector<8x8x32xbf16> to vector<8x8x32xf32>
    %c8 = arith.constant 8 : index
    %c0_44 = arith.constant 0 : index
    %68 = vector.load %arg2[%c8, %c0_44] : memref<9x32xf32, #tpu.memory_space<vmem>>, vector<1x32xf32>
    %69 = vector.shape_cast %68 : vector<1x32xf32> to vector<1x1x32xf32>
    %70 = vector.broadcast %69 : vector<1x1x32xf32> to vector<8x8x32xf32>
    %71 = arith.mulf %67, %70 : vector<8x8x32xf32>
    %72 = arith.addf %64, %71 : vector<8x8x32xf32>
    %c0_45 = arith.constant 0 : index
    %c0_46 = arith.constant 0 : index
    %73 = vector.load %arg3[%c0_45, %c0_46] : memref<1x32xf32, #tpu.memory_space<vmem>>, vector<1x32xf32>
    %74 = vector.shape_cast %73 : vector<1x32xf32> to vector<1x1x32xf32>
    %75 = vector.broadcast %74 : vector<1x1x32xf32> to vector<8x8x32xf32>
    %76 = arith.addf %72, %75 : vector<8x8x32xf32>
    %c0_47 = arith.constant 0 : index
    %c0_48 = arith.constant 0 : index
    %c0_49 = arith.constant 0 : index
    %c0_50 = arith.constant 0 : index
    %77 = vector.load %arg4[%c0_47, %c0_48, %c0_49, %c0_50] : memref<1x8x8x32xbf16, #tpu.memory_space<vmem>>, vector<1x8x8x32xbf16>
    %78 = vector.shape_cast %77 : vector<1x8x8x32xbf16> to vector<8x8x32xbf16>
    %79 = arith.extf %78 : vector<8x8x32xbf16> to vector<8x8x32xf32>
    %80 = arith.addf %76, %79 : vector<8x8x32xf32>
    %81 = arith.truncf %80 : vector<8x8x32xf32> to vector<8x8x32xbf16>
    %c0_51 = arith.constant 0 : index
    %c0_52 = arith.constant 0 : index
    %c0_53 = arith.constant 0 : index
    %c0_54 = arith.constant 0 : index
    %82 = vector.load %arg5[%c0_51, %c0_52, %c0_53, %c0_54] : memref<1x8x8x32xbf16, #tpu.memory_space<vmem>>, vector<1x8x8x32xbf16>
    %83 = vector.shape_cast %82 : vector<1x8x8x32xbf16> to vector<8x8x32xbf16>
    %84 = vector.shape_cast %81 : vector<8x8x32xbf16> to vector<1x8x8x32xbf16>
    tpu.vector_store %arg5[%c0_51, %c0_52, %c0_53, %c0_54], %84 {strides = array<i32>} : memref<1x8x8x32xbf16, #tpu.memory_space<vmem>>, vector<1x8x8x32xbf16>,
    return
  }
  func.func @transform_0(%arg0: i32) -> (i32, i32, i32, i32) {
    %c0_i32 = arith.constant 0 : i32
    %c0_i32_0 = arith.constant 0 : i32
    %c0_i32_1 = arith.constant 0 : i32
    %c0_i32_2 = arith.constant 0 : i32
    return %arg0, %c0_i32, %c0_i32_0, %c0_i32_1 : i32, i32, i32, i32
  }
  func.func @transform_1(%arg0: i32) -> (i32, i32) {
    %c0_i32 = arith.constant 0 : i32
    %c0_i32_0 = arith.constant 0 : i32
    %c0_i32_1 = arith.constant 0 : i32
    return %c0_i32, %c0_i32_0 : i32, i32
  }
  func.func @transform_2(%arg0: i32) -> (i32, i32) {
    %c0_i32 = arith.constant 0 : i32
    %c0_i32_0 = arith.constant 0 : i32
    %c0_i32_1 = arith.constant 0 : i32
    return %c0_i32, %c0_i32_0 : i32, i32
  }
  func.func @transform_3(%arg0: i32) -> (i32, i32, i32, i32) {
    %c0_i32 = arith.constant 0 : i32
    %c0_i32_0 = arith.constant 0 : i32
    %c0_i32_1 = arith.constant 0 : i32
    %c0_i32_2 = arith.constant 0 : i32
    return %arg0, %c0_i32, %c0_i32_0, %c0_i32_1 : i32, i32, i32, i32
  }
  func.func @transform_4(%arg0: i32) -> (i32, i32, i32, i32) {
    %c0_i32 = arith.constant 0 : i32
    %c0_i32_0 = arith.constant 0 : i32
    %c0_i32_1 = arith.constant 0 : i32
    %c0_i32_2 = arith.constant 0 : i32
    return %arg0, %c0_i32, %c0_i32_0, %c0_i32_1 : i32, i32, i32, i32
  }
}

module attributes {stable_mosaic.version = 11 : i64} {
  func.func @kernel(%arg0: i32, %arg1: memref<1x64x64xbf16, #tpu.memory_space<vmem>>, %arg2: memref<1x64x64xbf16, #tpu.memory_space<vmem>>, %arg3: memref<1x64x32xbf16, #tpu.memory_space<vmem>>, %arg4: memref<1x64x32xbf16, #tpu.memory_space<vmem>>) attributes {dimension_semantics = [#tpu.dimension_semantics<parallel>], iteration_bounds = array<i64: 2>, scalar_prefetch = 0 : i64, scratch_operands = 0 : i64, tpu.core_type = #tpu.core_type<tc>, window_params = [{transform_indices = @transform_0, window_bounds = array<i64: 1, 64, 64>}, {transform_indices = @transform_1, window_bounds = array<i64: 1, 64, 64>}, {transform_indices = @transform_2, window_bounds = array<i64: 1, 64, 32>}, {transform_indices = @transform_3, window_bounds = array<i64: 1, 64, 32>}]} {
    %c0 = arith.constant 0 : index
    %c0_0 = arith.constant 0 : index
    %c0_1 = arith.constant 0 : index
    %0 = vector.load %arg1[%c0, %c0_0, %c0_1] : memref<1x64x64xbf16, #tpu.memory_space<vmem>>, vector<1x64x64xbf16>
    %1 = vector.shape_cast %0 : vector<1x64x64xbf16> to vector<64x64xbf16>
    %c0_2 = arith.constant 0 : index
    %c0_3 = arith.constant 0 : index
    %c0_4 = arith.constant 0 : index
    %2 = vector.load %arg2[%c0_2, %c0_3, %c0_4] : memref<1x64x64xbf16, #tpu.memory_space<vmem>>, vector<1x64x64xbf16>
    %3 = vector.shape_cast %2 : vector<1x64x64xbf16> to vector<64x64xbf16>
    %c0_5 = arith.constant 0 : index
    %c0_6 = arith.constant 0 : index
    %c0_7 = arith.constant 0 : index
    %4 = vector.load %arg3[%c0_5, %c0_6, %c0_7] : memref<1x64x32xbf16, #tpu.memory_space<vmem>>, vector<1x64x32xbf16>
    %5 = vector.shape_cast %4 : vector<1x64x32xbf16> to vector<64x32xbf16>
    %6 = vector.extract_strided_slice %1 {offsets = [0, 0], sizes = [64, 8], strides = [1, 1]} : vector<64x64xbf16> to vector<64x8xbf16>
    %7 = arith.extf %6 : vector<64x8xbf16> to vector<64x8xf32>
    %8 = vector.extract_strided_slice %1 {offsets = [0, 32], sizes = [64, 8], strides = [1, 1]} : vector<64x64xbf16> to vector<64x8xbf16>
    %9 = arith.extf %8 : vector<64x8xbf16> to vector<64x8xf32>
    %10 = vector.extract_strided_slice %3 {offsets = [0, 0], sizes = [64, 8], strides = [1, 1]} : vector<64x64xbf16> to vector<64x8xbf16>
    %11 = vector.extract_strided_slice %3 {offsets = [0, 32], sizes = [64, 8], strides = [1, 1]} : vector<64x64xbf16> to vector<64x8xbf16>
    %12 = vector.extract_strided_slice %5 {offsets = [0, 0], sizes = [64, 8], strides = [1, 1]} : vector<64x32xbf16> to vector<64x8xbf16>
    %cst = arith.constant dense<0.000000e+00> : vector<8xf32>
    %13 = vector.multi_reduction <add>, %9, %cst [0] : vector<64x8xf32> to vector<8xf32>
    %14 = vector.shape_cast %13 : vector<8xf32> to vector<1x8xf32>
    %cst_8 = arith.constant 6.400000e+01 : f32
    %15 = vector.broadcast %cst_8 : f32 to vector<1x8xf32>
    %16 = arith.divf %14, %15 : vector<1x8xf32>
    %17 = vector.broadcast %16 : vector<1x8xf32> to vector<64x8xf32>
    %18 = arith.mulf %7, %17 : vector<64x8xf32>
    %cst_9 = arith.constant dense<0.000000e+00> : vector<64xf32>
    %19 = vector.multi_reduction <add>, %18, %cst_9 [1] : vector<64x8xf32> to vector<64xf32>
    %20 = vector.shape_cast %19 : vector<64xf32> to vector<64x1xf32>
    %cst_10 = arith.constant 9.99999997E-7 : f32
    %21 = vector.broadcast %cst_10 : f32 to vector<64x1xf32>
    %22 = arith.addf %20, %21 : vector<64x1xf32>
    %23 = tpu.reciprocal %22 {approx = true} : vector<64x1xf32> -> vector<64x1xf32>
    %cst_11 = arith.constant dense<0.000000e+00> : vector<8x8xf32>
    %24 = tpu.matmul %11, %12, %cst_11 {dimension_numbers = #tpu.dot_dimension_numbers<[0], [0], [1], [1], [0, 1, 1, 1], [], []>} : vector<64x8xbf16>, vector<64x8xbf16>, vector<8x8xf32> -> vector<8x8xf32>
    %cst_12 = arith.constant 1.562500e-02 : f32
    %25 = vector.broadcast %cst_12 : f32 to vector<8x8xf32>
    %26 = arith.mulf %24, %25 : vector<8x8xf32>
    %27 = arith.truncf %26 : vector<8x8xf32> to vector<8x8xbf16>
    %cst_13 = arith.constant dense<0.000000e+00> : vector<64x8xf32>
    %28 = tpu.matmul %10, %27, %cst_13 {dimension_numbers = #tpu.dot_dimension_numbers<[1], [0], [0], [1], [0, 0, 1, 1], [], []>} : vector<64x8xbf16>, vector<8x8xbf16>, vector<64x8xf32> -> vector<64x8xf32>
    %29 = vector.broadcast %23 : vector<64x1xf32> to vector<64x8xf32>
    %30 = arith.mulf %28, %29 : vector<64x8xf32>
    %31 = vector.extract_strided_slice %1 {offsets = [0, 8], sizes = [64, 8], strides = [1, 1]} : vector<64x64xbf16> to vector<64x8xbf16>
    %32 = arith.extf %31 : vector<64x8xbf16> to vector<64x8xf32>
    %33 = vector.extract_strided_slice %1 {offsets = [0, 40], sizes = [64, 8], strides = [1, 1]} : vector<64x64xbf16> to vector<64x8xbf16>
    %34 = arith.extf %33 : vector<64x8xbf16> to vector<64x8xf32>
    %35 = vector.extract_strided_slice %3 {offsets = [0, 8], sizes = [64, 8], strides = [1, 1]} : vector<64x64xbf16> to vector<64x8xbf16>
    %36 = vector.extract_strided_slice %3 {offsets = [0, 40], sizes = [64, 8], strides = [1, 1]} : vector<64x64xbf16> to vector<64x8xbf16>
    %37 = vector.extract_strided_slice %5 {offsets = [0, 8], sizes = [64, 8], strides = [1, 1]} : vector<64x32xbf16> to vector<64x8xbf16>
    %cst_14 = arith.constant dense<0.000000e+00> : vector<8xf32>
    %38 = vector.multi_reduction <add>, %34, %cst_14 [0] : vector<64x8xf32> to vector<8xf32>
    %39 = vector.shape_cast %38 : vector<8xf32> to vector<1x8xf32>
    %cst_15 = arith.constant 6.400000e+01 : f32
    %40 = vector.broadcast %cst_15 : f32 to vector<1x8xf32>
    %41 = arith.divf %39, %40 : vector<1x8xf32>
    %42 = vector.broadcast %41 : vector<1x8xf32> to vector<64x8xf32>
    %43 = arith.mulf %32, %42 : vector<64x8xf32>
    %cst_16 = arith.constant dense<0.000000e+00> : vector<64xf32>
    %44 = vector.multi_reduction <add>, %43, %cst_16 [1] : vector<64x8xf32> to vector<64xf32>
    %45 = vector.shape_cast %44 : vector<64xf32> to vector<64x1xf32>
    %cst_17 = arith.constant 9.99999997E-7 : f32
    %46 = vector.broadcast %cst_17 : f32 to vector<64x1xf32>
    %47 = arith.addf %45, %46 : vector<64x1xf32>
    %48 = tpu.reciprocal %47 {approx = true} : vector<64x1xf32> -> vector<64x1xf32>
    %cst_18 = arith.constant dense<0.000000e+00> : vector<8x8xf32>
    %49 = tpu.matmul %36, %37, %cst_18 {dimension_numbers = #tpu.dot_dimension_numbers<[0], [0], [1], [1], [0, 1, 1, 1], [], []>} : vector<64x8xbf16>, vector<64x8xbf16>, vector<8x8xf32> -> vector<8x8xf32>
    %cst_19 = arith.constant 1.562500e-02 : f32
    %50 = vector.broadcast %cst_19 : f32 to vector<8x8xf32>
    %51 = arith.mulf %49, %50 : vector<8x8xf32>
    %52 = arith.truncf %51 : vector<8x8xf32> to vector<8x8xbf16>
    %cst_20 = arith.constant dense<0.000000e+00> : vector<64x8xf32>
    %53 = tpu.matmul %35, %52, %cst_20 {dimension_numbers = #tpu.dot_dimension_numbers<[1], [0], [0], [1], [0, 0, 1, 1], [], []>} : vector<64x8xbf16>, vector<8x8xbf16>, vector<64x8xf32> -> vector<64x8xf32>
    %54 = vector.broadcast %48 : vector<64x1xf32> to vector<64x8xf32>
    %55 = arith.mulf %53, %54 : vector<64x8xf32>
    %56 = vector.extract_strided_slice %1 {offsets = [0, 16], sizes = [64, 8], strides = [1, 1]} : vector<64x64xbf16> to vector<64x8xbf16>
    %57 = arith.extf %56 : vector<64x8xbf16> to vector<64x8xf32>
    %58 = vector.extract_strided_slice %1 {offsets = [0, 48], sizes = [64, 8], strides = [1, 1]} : vector<64x64xbf16> to vector<64x8xbf16>
    %59 = arith.extf %58 : vector<64x8xbf16> to vector<64x8xf32>
    %60 = vector.extract_strided_slice %3 {offsets = [0, 16], sizes = [64, 8], strides = [1, 1]} : vector<64x64xbf16> to vector<64x8xbf16>
    %61 = vector.extract_strided_slice %3 {offsets = [0, 48], sizes = [64, 8], strides = [1, 1]} : vector<64x64xbf16> to vector<64x8xbf16>
    %62 = vector.extract_strided_slice %5 {offsets = [0, 16], sizes = [64, 8], strides = [1, 1]} : vector<64x32xbf16> to vector<64x8xbf16>
    %cst_21 = arith.constant dense<0.000000e+00> : vector<8xf32>
    %63 = vector.multi_reduction <add>, %59, %cst_21 [0] : vector<64x8xf32> to vector<8xf32>
    %64 = vector.shape_cast %63 : vector<8xf32> to vector<1x8xf32>
    %cst_22 = arith.constant 6.400000e+01 : f32
    %65 = vector.broadcast %cst_22 : f32 to vector<1x8xf32>
    %66 = arith.divf %64, %65 : vector<1x8xf32>
    %67 = vector.broadcast %66 : vector<1x8xf32> to vector<64x8xf32>
    %68 = arith.mulf %57, %67 : vector<64x8xf32>
    %cst_23 = arith.constant dense<0.000000e+00> : vector<64xf32>
    %69 = vector.multi_reduction <add>, %68, %cst_23 [1] : vector<64x8xf32> to vector<64xf32>
    %70 = vector.shape_cast %69 : vector<64xf32> to vector<64x1xf32>
    %cst_24 = arith.constant 9.99999997E-7 : f32
    %71 = vector.broadcast %cst_24 : f32 to vector<64x1xf32>
    %72 = arith.addf %70, %71 : vector<64x1xf32>
    %73 = tpu.reciprocal %72 {approx = true} : vector<64x1xf32> -> vector<64x1xf32>
    %cst_25 = arith.constant dense<0.000000e+00> : vector<8x8xf32>
    %74 = tpu.matmul %61, %62, %cst_25 {dimension_numbers = #tpu.dot_dimension_numbers<[0], [0], [1], [1], [0, 1, 1, 1], [], []>} : vector<64x8xbf16>, vector<64x8xbf16>, vector<8x8xf32> -> vector<8x8xf32>
    %cst_26 = arith.constant 1.562500e-02 : f32
    %75 = vector.broadcast %cst_26 : f32 to vector<8x8xf32>
    %76 = arith.mulf %74, %75 : vector<8x8xf32>
    %77 = arith.truncf %76 : vector<8x8xf32> to vector<8x8xbf16>
    %cst_27 = arith.constant dense<0.000000e+00> : vector<64x8xf32>
    %78 = tpu.matmul %60, %77, %cst_27 {dimension_numbers = #tpu.dot_dimension_numbers<[1], [0], [0], [1], [0, 0, 1, 1], [], []>} : vector<64x8xbf16>, vector<8x8xbf16>, vector<64x8xf32> -> vector<64x8xf32>
    %79 = vector.broadcast %73 : vector<64x1xf32> to vector<64x8xf32>
    %80 = arith.mulf %78, %79 : vector<64x8xf32>
    %81 = vector.extract_strided_slice %1 {offsets = [0, 24], sizes = [64, 8], strides = [1, 1]} : vector<64x64xbf16> to vector<64x8xbf16>
    %82 = arith.extf %81 : vector<64x8xbf16> to vector<64x8xf32>
    %83 = vector.extract_strided_slice %1 {offsets = [0, 56], sizes = [64, 8], strides = [1, 1]} : vector<64x64xbf16> to vector<64x8xbf16>
    %84 = arith.extf %83 : vector<64x8xbf16> to vector<64x8xf32>
    %85 = vector.extract_strided_slice %3 {offsets = [0, 24], sizes = [64, 8], strides = [1, 1]} : vector<64x64xbf16> to vector<64x8xbf16>
    %86 = vector.extract_strided_slice %3 {offsets = [0, 56], sizes = [64, 8], strides = [1, 1]} : vector<64x64xbf16> to vector<64x8xbf16>
    %87 = vector.extract_strided_slice %5 {offsets = [0, 24], sizes = [64, 8], strides = [1, 1]} : vector<64x32xbf16> to vector<64x8xbf16>
    %cst_28 = arith.constant dense<0.000000e+00> : vector<8xf32>
    %88 = vector.multi_reduction <add>, %84, %cst_28 [0] : vector<64x8xf32> to vector<8xf32>
    %89 = vector.shape_cast %88 : vector<8xf32> to vector<1x8xf32>
    %cst_29 = arith.constant 6.400000e+01 : f32
    %90 = vector.broadcast %cst_29 : f32 to vector<1x8xf32>
    %91 = arith.divf %89, %90 : vector<1x8xf32>
    %92 = vector.broadcast %91 : vector<1x8xf32> to vector<64x8xf32>
    %93 = arith.mulf %82, %92 : vector<64x8xf32>
    %cst_30 = arith.constant dense<0.000000e+00> : vector<64xf32>
    %94 = vector.multi_reduction <add>, %93, %cst_30 [1] : vector<64x8xf32> to vector<64xf32>
    %95 = vector.shape_cast %94 : vector<64xf32> to vector<64x1xf32>
    %cst_31 = arith.constant 9.99999997E-7 : f32
    %96 = vector.broadcast %cst_31 : f32 to vector<64x1xf32>
    %97 = arith.addf %95, %96 : vector<64x1xf32>
    %98 = tpu.reciprocal %97 {approx = true} : vector<64x1xf32> -> vector<64x1xf32>
    %cst_32 = arith.constant dense<0.000000e+00> : vector<8x8xf32>
    %99 = tpu.matmul %86, %87, %cst_32 {dimension_numbers = #tpu.dot_dimension_numbers<[0], [0], [1], [1], [0, 1, 1, 1], [], []>} : vector<64x8xbf16>, vector<64x8xbf16>, vector<8x8xf32> -> vector<8x8xf32>
    %cst_33 = arith.constant 1.562500e-02 : f32
    %100 = vector.broadcast %cst_33 : f32 to vector<8x8xf32>
    %101 = arith.mulf %99, %100 : vector<8x8xf32>
    %102 = arith.truncf %101 : vector<8x8xf32> to vector<8x8xbf16>
    %cst_34 = arith.constant dense<0.000000e+00> : vector<64x8xf32>
    %103 = tpu.matmul %85, %102, %cst_34 {dimension_numbers = #tpu.dot_dimension_numbers<[1], [0], [0], [1], [0, 0, 1, 1], [], []>} : vector<64x8xbf16>, vector<8x8xbf16>, vector<64x8xf32> -> vector<64x8xf32>
    %104 = vector.broadcast %98 : vector<64x1xf32> to vector<64x8xf32>
    %105 = arith.mulf %103, %104 : vector<64x8xf32>
    %106 = tpu.concatenate %30, %55, %80, %105 in 1 : vector<64x8xf32>, vector<64x8xf32>, vector<64x8xf32>, vector<64x8xf32> -> vector<64x32xf32>
    %107 = arith.truncf %106 : vector<64x32xf32> to vector<64x32xbf16>
    %c0_35 = arith.constant 0 : index
    %c0_36 = arith.constant 0 : index
    %c0_37 = arith.constant 0 : index
    %108 = vector.load %arg4[%c0_35, %c0_36, %c0_37] : memref<1x64x32xbf16, #tpu.memory_space<vmem>>, vector<1x64x32xbf16>
    %109 = vector.shape_cast %108 : vector<1x64x32xbf16> to vector<64x32xbf16>
    %110 = vector.shape_cast %107 : vector<64x32xbf16> to vector<1x64x32xbf16>
    tpu.vector_store %arg4[%c0_35, %c0_36, %c0_37], %110 {strides = array<i32>} : memref<1x64x32xbf16, #tpu.memory_space<vmem>>, vector<1x64x32xbf16>,
    return
  }
  func.func @transform_0(%arg0: i32) -> (i32, i32, i32) {
    %c0_i32 = arith.constant 0 : i32
    %c0_i32_0 = arith.constant 0 : i32
    %c0_i32_1 = arith.constant 0 : i32
    return %arg0, %c0_i32, %c0_i32_0 : i32, i32, i32
  }
  func.func @transform_1(%arg0: i32) -> (i32, i32, i32) {
    %c0_i32 = arith.constant 0 : i32
    %c0_i32_0 = arith.constant 0 : i32
    %c0_i32_1 = arith.constant 0 : i32
    return %arg0, %c0_i32, %c0_i32_0 : i32, i32, i32
  }
  func.func @transform_2(%arg0: i32) -> (i32, i32, i32) {
    %c0_i32 = arith.constant 0 : i32
    %c0_i32_0 = arith.constant 0 : i32
    %c0_i32_1 = arith.constant 0 : i32
    return %arg0, %c0_i32, %c0_i32_0 : i32, i32, i32
  }
  func.func @transform_3(%arg0: i32) -> (i32, i32, i32) {
    %c0_i32 = arith.constant 0 : i32
    %c0_i32_0 = arith.constant 0 : i32
    %c0_i32_1 = arith.constant 0 : i32
    return %arg0, %c0_i32, %c0_i32_0 : i32, i32, i32
  }
}

module attributes {stable_mosaic.version = 11 : i64} {
  func.func @kernel(%arg0: i32, %arg1: i32, %arg2: memref<128x32xbf16, #tpu.memory_space<vmem>>, %arg3: memref<128x32xbf16, #tpu.memory_space<vmem>>, %arg4: memref<32x128xbf16, #tpu.memory_space<vmem>>, %arg5: memref<1x128xf32, #tpu.memory_space<vmem>>, %arg6: memref<128x128xbf16, #tpu.memory_space<vmem>>, %arg7: memref<128x128xbf16, #tpu.memory_space<vmem>>) attributes {dimension_semantics = [#tpu.dimension_semantics<parallel>, #tpu.dimension_semantics<parallel>], iteration_bounds = array<i64: 1, 1>, scalar_prefetch = 0 : i64, scratch_operands = 0 : i64, tpu.core_type = #tpu.core_type<tc>, window_params = [{transform_indices = @transform_0, window_bounds = array<i64: 128, 32>}, {transform_indices = @transform_1, window_bounds = array<i64: 128, 32>}, {transform_indices = @transform_2, window_bounds = array<i64: 32, 128>}, {transform_indices = @transform_3, window_bounds = array<i64: 1, 128>}, {transform_indices = @transform_4, window_bounds = array<i64: 128, 128>}, {transform_indices = @transform_5, window_bounds = array<i64: 128, 128>}]} {
    %c0 = arith.constant 0 : index
    %c0_0 = arith.constant 0 : index
    %0 = vector.load %arg2[%c0, %c0_0] : memref<128x32xbf16, #tpu.memory_space<vmem>>, vector<128x32xbf16>
    %1 = arith.extf %0 : vector<128x32xbf16> to vector<128x32xf32>
    %c0_1 = arith.constant 0 : index
    %c0_2 = arith.constant 0 : index
    %2 = vector.load %arg3[%c0_1, %c0_2] : memref<128x32xbf16, #tpu.memory_space<vmem>>, vector<128x32xbf16>
    %3 = arith.extf %2 : vector<128x32xbf16> to vector<128x32xf32>
    %4 = arith.negf %3 : vector<128x32xf32>
    %5 = math.exp %4 : vector<128x32xf32>
    %cst = arith.constant 1.000000e+00 : f32
    %6 = vector.broadcast %cst : f32 to vector<128x32xf32>
    %7 = arith.addf %6, %5 : vector<128x32xf32>
    %8 = arith.divf %6, %7 : vector<128x32xf32>
    %9 = arith.mulf %3, %8 : vector<128x32xf32>
    %10 = arith.mulf %1, %9 : vector<128x32xf32>
    %11 = arith.truncf %10 : vector<128x32xf32> to vector<128x32xbf16>
    %c0_3 = arith.constant 0 : index
    %c0_4 = arith.constant 0 : index
    %12 = vector.load %arg4[%c0_3, %c0_4] : memref<32x128xbf16, #tpu.memory_space<vmem>>, vector<32x128xbf16>
    %cst_5 = arith.constant dense<0.000000e+00> : vector<128x128xf32>
    %13 = tpu.matmul %11, %12, %cst_5 {dimension_numbers = #tpu.dot_dimension_numbers<[1], [0], [0], [1], [0, 0, 1, 1], [], []>} : vector<128x32xbf16>, vector<32x128xbf16>, vector<128x128xf32> -> vector<128x128xf32>
    %c0_6 = arith.constant 0 : index
    %c0_7 = arith.constant 0 : index
    %14 = vector.load %arg5[%c0_6, %c0_7] : memref<1x128xf32, #tpu.memory_space<vmem>>, vector<1x128xf32>
    %15 = vector.broadcast %14 : vector<1x128xf32> to vector<128x128xf32>
    %16 = arith.addf %13, %15 : vector<128x128xf32>
    %c0_8 = arith.constant 0 : index
    %c0_9 = arith.constant 0 : index
    %17 = vector.load %arg6[%c0_8, %c0_9] : memref<128x128xbf16, #tpu.memory_space<vmem>>, vector<128x128xbf16>
    %18 = arith.extf %17 : vector<128x128xbf16> to vector<128x128xf32>
    %19 = arith.addf %16, %18 : vector<128x128xf32>
    %20 = arith.truncf %19 : vector<128x128xf32> to vector<128x128xbf16>
    %c0_10 = arith.constant 0 : index
    %c0_11 = arith.constant 0 : index
    %21 = vector.load %arg7[%c0_10, %c0_11] : memref<128x128xbf16, #tpu.memory_space<vmem>>, vector<128x128xbf16>
    tpu.vector_store %arg7[%c0_10, %c0_11], %20 {strides = array<i32>} : memref<128x128xbf16, #tpu.memory_space<vmem>>, vector<128x128xbf16>,
    return
  }
  func.func @transform_0(%arg0: i32, %arg1: i32) -> (i32, i32) {
    %c0_i32 = arith.constant 0 : i32
    %c0_i32_0 = arith.constant 0 : i32
    return %arg0, %c0_i32 : i32, i32
  }
  func.func @transform_1(%arg0: i32, %arg1: i32) -> (i32, i32) {
    %c0_i32 = arith.constant 0 : i32
    %c0_i32_0 = arith.constant 0 : i32
    return %arg0, %c0_i32 : i32, i32
  }
  func.func @transform_2(%arg0: i32, %arg1: i32) -> (i32, i32) {
    %c0_i32 = arith.constant 0 : i32
    %c0_i32_0 = arith.constant 0 : i32
    return %c0_i32, %arg1 : i32, i32
  }
  func.func @transform_3(%arg0: i32, %arg1: i32) -> (i32, i32) {
    %c0_i32 = arith.constant 0 : i32
    %c0_i32_0 = arith.constant 0 : i32
    return %c0_i32, %arg1 : i32, i32
  }
  func.func @transform_4(%arg0: i32, %arg1: i32) -> (i32, i32) {
    %c0_i32 = arith.constant 0 : i32
    return %arg0, %arg1 : i32, i32
  }
  func.func @transform_5(%arg0: i32, %arg1: i32) -> (i32, i32) {
    %c0_i32 = arith.constant 0 : i32
    return %arg0, %arg1 : i32, i32
  }
}

module attributes {stable_mosaic.version = 11 : i64} {
  func.func @kernel(%arg0: i32, %arg1: i32, %arg2: memref<128x32xbf16, #tpu.memory_space<vmem>>, %arg3: memref<1x32xf32, #tpu.memory_space<vmem>>, %arg4: memref<1x32xf32, #tpu.memory_space<vmem>>, %arg5: memref<32x128xbf16, #tpu.memory_space<vmem>>, %arg6: memref<1x128xf32, #tpu.memory_space<vmem>>, %arg7: memref<128x128xbf16, #tpu.memory_space<vmem>>) attributes {dimension_semantics = [#tpu.dimension_semantics<parallel>, #tpu.dimension_semantics<parallel>], iteration_bounds = array<i64: 1, 1>, scalar_prefetch = 0 : i64, scratch_operands = 0 : i64, tpu.core_type = #tpu.core_type<tc>, window_params = [{transform_indices = @transform_0, window_bounds = array<i64: 128, 32>}, {pipeline_mode = #tpu.pipeline_mode<synchronous>, transform_indices = @transform_1, window_bounds = array<i64: 1, 32>}, {pipeline_mode = #tpu.pipeline_mode<synchronous>, transform_indices = @transform_2, window_bounds = array<i64: 1, 32>}, {transform_indices = @transform_3, window_bounds = array<i64: 32, 128>}, {transform_indices = @transform_4, window_bounds = array<i64: 1, 128>}, {transform_indices = @transform_5, window_bounds = array<i64: 128, 128>}]} {
    %c0 = arith.constant 0 : index
    %c0_0 = arith.constant 0 : index
    %0 = vector.load %arg2[%c0, %c0_0] : memref<128x32xbf16, #tpu.memory_space<vmem>>, vector<128x32xbf16>
    %1 = arith.extf %0 : vector<128x32xbf16> to vector<128x32xf32>
    %cst = arith.constant dense<0.000000e+00> : vector<128xf32>
    %2 = vector.multi_reduction <add>, %1, %cst [1] : vector<128x32xf32> to vector<128xf32>
    %3 = vector.shape_cast %2 : vector<128xf32> to vector<128x1xf32>
    %cst_1 = arith.constant 3.200000e+01 : f32
    %4 = vector.broadcast %cst_1 : f32 to vector<128x1xf32>
    %5 = arith.divf %3, %4 : vector<128x1xf32>
    %6 = vector.broadcast %5 : vector<128x1xf32> to vector<128x32xf32>
    %7 = arith.subf %1, %6 : vector<128x32xf32>
    %8 = arith.mulf %7, %7 : vector<128x32xf32>
    %cst_2 = arith.constant dense<0.000000e+00> : vector<128xf32>
    %9 = vector.multi_reduction <add>, %8, %cst_2 [1] : vector<128x32xf32> to vector<128xf32>
    %10 = vector.shape_cast %9 : vector<128xf32> to vector<128x1xf32>
    %cst_3 = arith.constant 3.200000e+01 : f32
    %11 = vector.broadcast %cst_3 : f32 to vector<128x1xf32>
    %12 = arith.divf %10, %11 : vector<128x1xf32>
    %cst_4 = arith.constant 9.99999974E-6 : f32
    %13 = vector.broadcast %cst_4 : f32 to vector<128x1xf32>
    %14 = arith.addf %12, %13 : vector<128x1xf32>
    %15 = math.rsqrt %14 : vector<128x1xf32>
    %16 = vector.broadcast %15 : vector<128x1xf32> to vector<128x32xf32>
    %17 = arith.mulf %7, %16 : vector<128x32xf32>
    %c0_5 = arith.constant 0 : index
    %c0_6 = arith.constant 0 : index
    %18 = vector.load %arg3[%c0_5, %c0_6] : memref<1x32xf32, #tpu.memory_space<vmem>>, vector<1x32xf32>
    %19 = vector.broadcast %18 : vector<1x32xf32> to vector<128x32xf32>
    %20 = arith.mulf %17, %19 : vector<128x32xf32>
    %c0_7 = arith.constant 0 : index
    %c0_8 = arith.constant 0 : index
    %21 = vector.load %arg4[%c0_7, %c0_8] : memref<1x32xf32, #tpu.memory_space<vmem>>, vector<1x32xf32>
    %22 = vector.broadcast %21 : vector<1x32xf32> to vector<128x32xf32>
    %23 = arith.addf %20, %22 : vector<128x32xf32>
    %24 = arith.truncf %23 : vector<128x32xf32> to vector<128x32xbf16>
    %c0_9 = arith.constant 0 : index
    %c0_10 = arith.constant 0 : index
    %25 = vector.load %arg5[%c0_9, %c0_10] : memref<32x128xbf16, #tpu.memory_space<vmem>>, vector<32x128xbf16>
    %cst_11 = arith.constant dense<0.000000e+00> : vector<128x128xf32>
    %26 = tpu.matmul %24, %25, %cst_11 {dimension_numbers = #tpu.dot_dimension_numbers<[1], [0], [0], [1], [0, 0, 1, 1], [], []>} : vector<128x32xbf16>, vector<32x128xbf16>, vector<128x128xf32> -> vector<128x128xf32>
    %c0_12 = arith.constant 0 : index
    %c0_13 = arith.constant 0 : index
    %27 = vector.load %arg6[%c0_12, %c0_13] : memref<1x128xf32, #tpu.memory_space<vmem>>, vector<1x128xf32>
    %28 = vector.broadcast %27 : vector<1x128xf32> to vector<128x128xf32>
    %29 = arith.addf %26, %28 : vector<128x128xf32>
    %30 = arith.mulf %29, %29 : vector<128x128xf32>
    %31 = arith.mulf %29, %30 : vector<128x128xf32>
    %cst_14 = arith.constant 4.471500e-02 : f32
    %32 = vector.broadcast %cst_14 : f32 to vector<128x128xf32>
    %33 = arith.mulf %32, %31 : vector<128x128xf32>
    %34 = arith.addf %29, %33 : vector<128x128xf32>
    %cst_15 = arith.constant 0.797884583 : f32
    %35 = vector.broadcast %cst_15 : f32 to vector<128x128xf32>
    %36 = arith.mulf %35, %34 : vector<128x128xf32>
    %37 = math.tanh %36 : vector<128x128xf32>
    %cst_16 = arith.constant 1.000000e+00 : f32
    %38 = vector.broadcast %cst_16 : f32 to vector<128x128xf32>
    %39 = arith.addf %38, %37 : vector<128x128xf32>
    %cst_17 = arith.constant 5.000000e-01 : f32
    %40 = vector.broadcast %cst_17 : f32 to vector<128x128xf32>
    %41 = arith.mulf %40, %39 : vector<128x128xf32>
    %42 = arith.mulf %29, %41 : vector<128x128xf32>
    %43 = arith.truncf %42 : vector<128x128xf32> to vector<128x128xbf16>
    %c0_18 = arith.constant 0 : index
    %c0_19 = arith.constant 0 : index
    %44 = vector.load %arg7[%c0_18, %c0_19] : memref<128x128xbf16, #tpu.memory_space<vmem>>, vector<128x128xbf16>
    tpu.vector_store %arg7[%c0_18, %c0_19], %43 {strides = array<i32>} : memref<128x128xbf16, #tpu.memory_space<vmem>>, vector<128x128xbf16>,
    return
  }
  func.func @transform_0(%arg0: i32, %arg1: i32) -> (i32, i32) {
    %c0_i32 = arith.constant 0 : i32
    %c0_i32_0 = arith.constant 0 : i32
    return %arg0, %c0_i32 : i32, i32
  }
  func.func @transform_1(%arg0: i32, %arg1: i32) -> (i32, i32) {
    %c0_i32 = arith.constant 0 : i32
    %c0_i32_0 = arith.constant 0 : i32
    %c0_i32_1 = arith.constant 0 : i32
    return %c0_i32, %c0_i32_0 : i32, i32
  }
  func.func @transform_2(%arg0: i32, %arg1: i32) -> (i32, i32) {
    %c0_i32 = arith.constant 0 : i32
    %c0_i32_0 = arith.constant 0 : i32
    %c0_i32_1 = arith.constant 0 : i32
    return %c0_i32, %c0_i32_0 : i32, i32
  }
  func.func @transform_3(%arg0: i32, %arg1: i32) -> (i32, i32) {
    %c0_i32 = arith.constant 0 : i32
    %c0_i32_0 = arith.constant 0 : i32
    return %c0_i32, %arg1 : i32, i32
  }
  func.func @transform_4(%arg0: i32, %arg1: i32) -> (i32, i32) {
    %c0_i32 = arith.constant 0 : i32
    %c0_i32_0 = arith.constant 0 : i32
    return %c0_i32, %arg1 : i32, i32
  }
  func.func @transform_5(%arg0: i32, %arg1: i32) -> (i32, i32) {
    %c0_i32 = arith.constant 0 : i32
    return %arg0, %arg1 : i32, i32
  }
}

module attributes {stable_mosaic.version = 11 : i64} {
  func.func @kernel(%arg0: i32, %arg1: i32, %arg2: memref<128x32xbf16, #tpu.memory_space<vmem>>, %arg3: memref<32x128xbf16, #tpu.memory_space<vmem>>, %arg4: memref<1x128xf32, #tpu.memory_space<vmem>>, %arg5: memref<128x128xbf16, #tpu.memory_space<vmem>>) attributes {dimension_semantics = [#tpu.dimension_semantics<parallel>, #tpu.dimension_semantics<parallel>], iteration_bounds = array<i64: 1, 1>, scalar_prefetch = 0 : i64, scratch_operands = 0 : i64, tpu.core_type = #tpu.core_type<tc>, window_params = [{transform_indices = @transform_0, window_bounds = array<i64: 128, 32>}, {transform_indices = @transform_1, window_bounds = array<i64: 32, 128>}, {transform_indices = @transform_2, window_bounds = array<i64: 1, 128>}, {transform_indices = @transform_3, window_bounds = array<i64: 128, 128>}]} {
    %c0 = arith.constant 0 : index
    %c0_0 = arith.constant 0 : index
    %0 = vector.load %arg2[%c0, %c0_0] : memref<128x32xbf16, #tpu.memory_space<vmem>>, vector<128x32xbf16>
    %c0_1 = arith.constant 0 : index
    %c0_2 = arith.constant 0 : index
    %1 = vector.load %arg3[%c0_1, %c0_2] : memref<32x128xbf16, #tpu.memory_space<vmem>>, vector<32x128xbf16>
    %cst = arith.constant dense<0.000000e+00> : vector<128x128xf32>
    %2 = tpu.matmul %0, %1, %cst {dimension_numbers = #tpu.dot_dimension_numbers<[1], [0], [0], [1], [0, 0, 1, 1], [], []>} : vector<128x32xbf16>, vector<32x128xbf16>, vector<128x128xf32> -> vector<128x128xf32>
    %c0_3 = arith.constant 0 : index
    %c0_4 = arith.constant 0 : index
    %3 = vector.load %arg4[%c0_3, %c0_4] : memref<1x128xf32, #tpu.memory_space<vmem>>, vector<1x128xf32>
    %4 = vector.broadcast %3 : vector<1x128xf32> to vector<128x128xf32>
    %5 = arith.addf %2, %4 : vector<128x128xf32>
    %cst_5 = arith.constant 0.000000e+00 : f32
    %6 = vector.broadcast %cst_5 : f32 to vector<128x128xf32>
    %7 = arith.maximumf %5, %6 : vector<128x128xf32>
    %8 = arith.truncf %7 : vector<128x128xf32> to vector<128x128xbf16>
    %c0_6 = arith.constant 0 : index
    %c0_7 = arith.constant 0 : index
    %9 = vector.load %arg5[%c0_6, %c0_7] : memref<128x128xbf16, #tpu.memory_space<vmem>>, vector<128x128xbf16>
    tpu.vector_store %arg5[%c0_6, %c0_7], %8 {strides = array<i32>} : memref<128x128xbf16, #tpu.memory_space<vmem>>, vector<128x128xbf16>,
    return
  }
  func.func @transform_0(%arg0: i32, %arg1: i32) -> (i32, i32) {
    %c0_i32 = arith.constant 0 : i32
    %c0_i32_0 = arith.constant 0 : i32
    return %arg0, %c0_i32 : i32, i32
  }
  func.func @transform_1(%arg0: i32, %arg1: i32) -> (i32, i32) {
    %c0_i32 = arith.constant 0 : i32
    %c0_i32_0 = arith.constant 0 : i32
    return %c0_i32, %arg1 : i32, i32
  }
  func.func @transform_2(%arg0: i32, %arg1: i32) -> (i32, i32) {
    %c0_i32 = arith.constant 0 : i32
    %c0_i32_0 = arith.constant 0 : i32
    return %c0_i32, %arg1 : i32, i32
  }
  func.func @transform_3(%arg0: i32, %arg1: i32) -> (i32, i32) {
    %c0_i32 = arith.constant 0 : i32
    return %arg0, %arg1 : i32, i32
  }
}

module attributes {stable_mosaic.version = 11 : i64} {
  func.func @kernel(%arg0: i32, %arg1: i32, %arg2: memref<128x128xbf16, #tpu.memory_space<vmem>>, %arg3: memref<128x128xbf16, #tpu.memory_space<vmem>>, %arg4: memref<1x128xf32, #tpu.memory_space<vmem>>, %arg5: memref<128x128xbf16, #tpu.memory_space<vmem>>, %arg6: memref<128x128xbf16, #tpu.memory_space<vmem>>) attributes {dimension_semantics = [#tpu.dimension_semantics<parallel>, #tpu.dimension_semantics<parallel>], iteration_bounds = array<i64: 1, 1>, scalar_prefetch = 0 : i64, scratch_operands = 0 : i64, tpu.core_type = #tpu.core_type<tc>, window_params = [{transform_indices = @transform_0, window_bounds = array<i64: 128, 128>}, {transform_indices = @transform_1, window_bounds = array<i64: 128, 128>}, {transform_indices = @transform_2, window_bounds = array<i64: 1, 128>}, {transform_indices = @transform_3, window_bounds = array<i64: 128, 128>}, {transform_indices = @transform_4, window_bounds = array<i64: 128, 128>}]} {
    %c0 = arith.constant 0 : index
    %c0_0 = arith.constant 0 : index
    %0 = vector.load %arg2[%c0, %c0_0] : memref<128x128xbf16, #tpu.memory_space<vmem>>, vector<128x128xbf16>
    %c0_1 = arith.constant 0 : index
    %c0_2 = arith.constant 0 : index
    %1 = vector.load %arg3[%c0_1, %c0_2] : memref<128x128xbf16, #tpu.memory_space<vmem>>, vector<128x128xbf16>
    %cst = arith.constant dense<0.000000e+00> : vector<128x128xf32>
    %2 = tpu.matmul %0, %1, %cst {dimension_numbers = #tpu.dot_dimension_numbers<[1], [0], [0], [1], [0, 0, 1, 1], [], []>} : vector<128x128xbf16>, vector<128x128xbf16>, vector<128x128xf32> -> vector<128x128xf32>
    %c0_3 = arith.constant 0 : index
    %c0_4 = arith.constant 0 : index
    %3 = vector.load %arg4[%c0_3, %c0_4] : memref<1x128xf32, #tpu.memory_space<vmem>>, vector<1x128xf32>
    %4 = vector.broadcast %3 : vector<1x128xf32> to vector<128x128xf32>
    %5 = arith.addf %2, %4 : vector<128x128xf32>
    %c0_5 = arith.constant 0 : index
    %c0_6 = arith.constant 0 : index
    %6 = vector.load %arg5[%c0_5, %c0_6] : memref<128x128xbf16, #tpu.memory_space<vmem>>, vector<128x128xbf16>
    %7 = arith.extf %6 : vector<128x128xbf16> to vector<128x128xf32>
    %8 = arith.addf %5, %7 : vector<128x128xf32>
    %9 = arith.truncf %8 : vector<128x128xf32> to vector<128x128xbf16>
    %c0_7 = arith.constant 0 : index
    %c0_8 = arith.constant 0 : index
    %10 = vector.load %arg6[%c0_7, %c0_8] : memref<128x128xbf16, #tpu.memory_space<vmem>>, vector<128x128xbf16>
    tpu.vector_store %arg6[%c0_7, %c0_8], %9 {strides = array<i32>} : memref<128x128xbf16, #tpu.memory_space<vmem>>, vector<128x128xbf16>,
    return
  }
  func.func @transform_0(%arg0: i32, %arg1: i32) -> (i32, i32) {
    %c0_i32 = arith.constant 0 : i32
    %c0_i32_0 = arith.constant 0 : i32
    return %arg0, %c0_i32 : i32, i32
  }
  func.func @transform_1(%arg0: i32, %arg1: i32) -> (i32, i32) {
    %c0_i32 = arith.constant 0 : i32
    %c0_i32_0 = arith.constant 0 : i32
    return %c0_i32, %arg1 : i32, i32
  }
  func.func @transform_2(%arg0: i32, %arg1: i32) -> (i32, i32) {
    %c0_i32 = arith.constant 0 : i32
    %c0_i32_0 = arith.constant 0 : i32
    return %c0_i32, %arg1 : i32, i32
  }
  func.func @transform_3(%arg0: i32, %arg1: i32) -> (i32, i32) {
    %c0_i32 = arith.constant 0 : i32
    return %arg0, %arg1 : i32, i32
  }
  func.func @transform_4(%arg0: i32, %arg1: i32) -> (i32, i32) {
    %c0_i32 = arith.constant 0 : i32
    return %arg0, %arg1 : i32, i32
  }
}

module attributes {stable_mosaic.version = 11 : i64} {
  func.func @kernel(%arg0: i32, %arg1: memref<1x9x9x128xbf16, #tpu.memory_space<vmem>>, %arg2: memref<9x128xf32, #tpu.memory_space<vmem>>, %arg3: memref<1x8x8x128xbf16, #tpu.memory_space<vmem>>, %arg4: memref<1x8x8x128xbf16, #tpu.memory_space<vmem>>, %arg5: memref<1x8x8x128xbf16, #tpu.memory_space<vmem>>, %arg6: memref<1x8x8x128xbf16, #tpu.memory_space<vmem>>) attributes {dimension_semantics = [#tpu.dimension_semantics<parallel>], iteration_bounds = array<i64: 2>, scalar_prefetch = 0 : i64, scratch_operands = 0 : i64, tpu.core_type = #tpu.core_type<tc>, window_params = [{transform_indices = @transform_0, window_bounds = array<i64: 1, 9, 9, 128>}, {pipeline_mode = #tpu.pipeline_mode<synchronous>, transform_indices = @transform_1, window_bounds = array<i64: 9, 128>}, {transform_indices = @transform_2, window_bounds = array<i64: 1, 8, 8, 128>}, {transform_indices = @transform_3, window_bounds = array<i64: 1, 8, 8, 128>}, {transform_indices = @transform_4, window_bounds = array<i64: 1, 8, 8, 128>}, {transform_indices = @transform_5, window_bounds = array<i64: 1, 8, 8, 128>}]} {
    %c0 = arith.constant 0 : index
    %c0_0 = arith.constant 0 : index
    %0 = vector.load %arg2[%c0, %c0_0] : memref<9x128xf32, #tpu.memory_space<vmem>>, vector<9x128xf32>
    %c0_1 = arith.constant 0 : index
    %c0_2 = arith.constant 0 : index
    %c0_3 = arith.constant 0 : index
    %c0_4 = arith.constant 0 : index
    %1 = vector.load %arg1[%c0_1, %c0_2, %c0_3, %c0_4] : memref<1x9x9x128xbf16, #tpu.memory_space<vmem>>, vector<1x8x8x128xbf16>
    %2 = vector.shape_cast %1 : vector<1x8x8x128xbf16> to vector<8x8x128xbf16>
    %3 = arith.extf %2 : vector<8x8x128xbf16> to vector<8x8x128xf32>
    %c0_5 = arith.constant 0 : index
    %c0_6 = arith.constant 0 : index
    %c1 = arith.constant 1 : index
    %c0_7 = arith.constant 0 : index
    %4 = vector.load %arg1[%c0_5, %c0_6, %c1, %c0_7] : memref<1x9x9x128xbf16, #tpu.memory_space<vmem>>, vector<1x8x8x128xbf16>
    %5 = vector.shape_cast %4 : vector<1x8x8x128xbf16> to vector<8x8x128xbf16>
    %6 = arith.extf %5 : vector<8x8x128xbf16> to vector<8x8x128xf32>
    %c0_8 = arith.constant 0 : index
    %c1_9 = arith.constant 1 : index
    %c0_10 = arith.constant 0 : index
    %c0_11 = arith.constant 0 : index
    %7 = vector.load %arg1[%c0_8, %c1_9, %c0_10, %c0_11] : memref<1x9x9x128xbf16, #tpu.memory_space<vmem>>, vector<1x8x8x128xbf16>
    %8 = vector.shape_cast %7 : vector<1x8x8x128xbf16> to vector<8x8x128xbf16>
    %9 = arith.extf %8 : vector<8x8x128xbf16> to vector<8x8x128xf32>
    %c0_12 = arith.constant 0 : index
    %c1_13 = arith.constant 1 : index
    %c1_14 = arith.constant 1 : index
    %c0_15 = arith.constant 0 : index
    %10 = vector.load %arg1[%c0_12, %c1_13, %c1_14, %c0_15] : memref<1x9x9x128xbf16, #tpu.memory_space<vmem>>, vector<1x8x8x128xbf16>
    %11 = vector.shape_cast %10 : vector<1x8x8x128xbf16> to vector<8x8x128xbf16>
    %12 = arith.extf %11 : vector<8x8x128xbf16> to vector<8x8x128xf32>
    %13 = vector.extract_strided_slice %0 {offsets = [4, 0], sizes = [1, 128], strides = [1, 1]} : vector<9x128xf32> to vector<1x128xf32>
    %14 = vector.shape_cast %13 : vector<1x128xf32> to vector<1x1x128xf32>
    %15 = vector.broadcast %14 : vector<1x1x128xf32> to vector<8x8x128xf32>
    %16 = arith.mulf %15, %3 : vector<8x8x128xf32>
    %17 = vector.extract_strided_slice %0 {offsets = [3, 0], sizes = [1, 128], strides = [1, 1]} : vector<9x128xf32> to vector<1x128xf32>
    %18 = vector.shape_cast %17 : vector<1x128xf32> to vector<1x1x128xf32>
    %19 = vector.broadcast %18 : vector<1x1x128xf32> to vector<8x8x128xf32>
    %20 = arith.mulf %19, %6 : vector<8x8x128xf32>
    %21 = vector.extract_strided_slice %0 {offsets = [5, 0], sizes = [1, 128], strides = [1, 1]} : vector<9x128xf32> to vector<1x128xf32>
    %22 = vector.shape_cast %21 : vector<1x128xf32> to vector<1x1x128xf32>
    %23 = vector.broadcast %22 : vector<1x1x128xf32> to vector<8x8x128xf32>
    %24 = arith.mulf %23, %3 : vector<8x8x128xf32>
    %25 = arith.addf %20, %24 : vector<8x8x128xf32>
    %26 = vector.extract_strided_slice %0 {offsets = [1, 0], sizes = [1, 128], strides = [1, 1]} : vector<9x128xf32> to vector<1x128xf32>
    %27 = vector.shape_cast %26 : vector<1x128xf32> to vector<1x1x128xf32>
    %28 = vector.broadcast %27 : vector<1x1x128xf32> to vector<8x8x128xf32>
    %29 = arith.mulf %28, %9 : vector<8x8x128xf32>
    %30 = vector.extract_strided_slice %0 {offsets = [7, 0], sizes = [1, 128], strides = [1, 1]} : vector<9x128xf32> to vector<1x128xf32>
    %31 = vector.shape_cast %30 : vector<1x128xf32> to vector<1x1x128xf32>
    %32 = vector.broadcast %31 : vector<1x1x128xf32> to vector<8x8x128xf32>
    %33 = arith.mulf %32, %3 : vector<8x8x128xf32>
    %34 = arith.addf %29, %33 : vector<8x8x128xf32>
    %35 = vector.extract_strided_slice %0 {offsets = [0, 0], sizes = [1, 128], strides = [1, 1]} : vector<9x128xf32> to vector<1x128xf32>
    %36 = vector.shape_cast %35 : vector<1x128xf32> to vector<1x1x128xf32>
    %37 = vector.broadcast %36 : vector<1x1x128xf32> to vector<8x8x128xf32>
    %38 = arith.mulf %37, %12 : vector<8x8x128xf32>
    %39 = vector.extract_strided_slice %0 {offsets = [2, 0], sizes = [1, 128], strides = [1, 1]} : vector<9x128xf32> to vector<1x128xf32>
    %40 = vector.shape_cast %39 : vector<1x128xf32> to vector<1x1x128xf32>
    %41 = vector.broadcast %40 : vector<1x1x128xf32> to vector<8x8x128xf32>
    %42 = arith.mulf %41, %9 : vector<8x8x128xf32>
    %43 = arith.addf %38, %42 : vector<8x8x128xf32>
    %44 = vector.extract_strided_slice %0 {offsets = [6, 0], sizes = [1, 128], strides = [1, 1]} : vector<9x128xf32> to vector<1x128xf32>
    %45 = vector.shape_cast %44 : vector<1x128xf32> to vector<1x1x128xf32>
    %46 = vector.broadcast %45 : vector<1x1x128xf32> to vector<8x8x128xf32>
    %47 = arith.mulf %46, %6 : vector<8x8x128xf32>
    %48 = arith.addf %43, %47 : vector<8x8x128xf32>
    %49 = vector.extract_strided_slice %0 {offsets = [8, 0], sizes = [1, 128], strides = [1, 1]} : vector<9x128xf32> to vector<1x128xf32>
    %50 = vector.shape_cast %49 : vector<1x128xf32> to vector<1x1x128xf32>
    %51 = vector.broadcast %50 : vector<1x1x128xf32> to vector<8x8x128xf32>
    %52 = arith.mulf %51, %3 : vector<8x8x128xf32>
    %53 = arith.addf %48, %52 : vector<8x8x128xf32>
    %54 = arith.truncf %16 : vector<8x8x128xf32> to vector<8x8x128xbf16>
    %c0_16 = arith.constant 0 : index
    %c0_17 = arith.constant 0 : index
    %c0_18 = arith.constant 0 : index
    %c0_19 = arith.constant 0 : index
    %55 = vector.load %arg3[%c0_16, %c0_17, %c0_18, %c0_19] : memref<1x8x8x128xbf16, #tpu.memory_space<vmem>>, vector<1x8x8x128xbf16>
    %56 = vector.shape_cast %55 : vector<1x8x8x128xbf16> to vector<8x8x128xbf16>
    %57 = vector.shape_cast %54 : vector<8x8x128xbf16> to vector<1x8x8x128xbf16>
    tpu.vector_store %arg3[%c0_16, %c0_17, %c0_18, %c0_19], %57 {strides = array<i32>} : memref<1x8x8x128xbf16, #tpu.memory_space<vmem>>, vector<1x8x8x128xbf16>,
    %58 = arith.truncf %25 : vector<8x8x128xf32> to vector<8x8x128xbf16>
    %c0_20 = arith.constant 0 : index
    %c0_21 = arith.constant 0 : index
    %c0_22 = arith.constant 0 : index
    %c0_23 = arith.constant 0 : index
    %59 = vector.load %arg4[%c0_20, %c0_21, %c0_22, %c0_23] : memref<1x8x8x128xbf16, #tpu.memory_space<vmem>>, vector<1x8x8x128xbf16>
    %60 = vector.shape_cast %59 : vector<1x8x8x128xbf16> to vector<8x8x128xbf16>
    %61 = vector.shape_cast %58 : vector<8x8x128xbf16> to vector<1x8x8x128xbf16>
    tpu.vector_store %arg4[%c0_20, %c0_21, %c0_22, %c0_23], %61 {strides = array<i32>} : memref<1x8x8x128xbf16, #tpu.memory_space<vmem>>, vector<1x8x8x128xbf16>,
    %62 = arith.truncf %34 : vector<8x8x128xf32> to vector<8x8x128xbf16>
    %c0_24 = arith.constant 0 : index
    %c0_25 = arith.constant 0 : index
    %c0_26 = arith.constant 0 : index
    %c0_27 = arith.constant 0 : index
    %63 = vector.load %arg5[%c0_24, %c0_25, %c0_26, %c0_27] : memref<1x8x8x128xbf16, #tpu.memory_space<vmem>>, vector<1x8x8x128xbf16>
    %64 = vector.shape_cast %63 : vector<1x8x8x128xbf16> to vector<8x8x128xbf16>
    %65 = vector.shape_cast %62 : vector<8x8x128xbf16> to vector<1x8x8x128xbf16>
    tpu.vector_store %arg5[%c0_24, %c0_25, %c0_26, %c0_27], %65 {strides = array<i32>} : memref<1x8x8x128xbf16, #tpu.memory_space<vmem>>, vector<1x8x8x128xbf16>,
    %66 = arith.truncf %53 : vector<8x8x128xf32> to vector<8x8x128xbf16>
    %c0_28 = arith.constant 0 : index
    %c0_29 = arith.constant 0 : index
    %c0_30 = arith.constant 0 : index
    %c0_31 = arith.constant 0 : index
    %67 = vector.load %arg6[%c0_28, %c0_29, %c0_30, %c0_31] : memref<1x8x8x128xbf16, #tpu.memory_space<vmem>>, vector<1x8x8x128xbf16>
    %68 = vector.shape_cast %67 : vector<1x8x8x128xbf16> to vector<8x8x128xbf16>
    %69 = vector.shape_cast %66 : vector<8x8x128xbf16> to vector<1x8x8x128xbf16>
    tpu.vector_store %arg6[%c0_28, %c0_29, %c0_30, %c0_31], %69 {strides = array<i32>} : memref<1x8x8x128xbf16, #tpu.memory_space<vmem>>, vector<1x8x8x128xbf16>,
    return
  }
  func.func @transform_0(%arg0: i32) -> (i32, i32, i32, i32) {
    %c0_i32 = arith.constant 0 : i32
    %c0_i32_0 = arith.constant 0 : i32
    %c0_i32_1 = arith.constant 0 : i32
    %c0_i32_2 = arith.constant 0 : i32
    return %arg0, %c0_i32, %c0_i32_0, %c0_i32_1 : i32, i32, i32, i32
  }
  func.func @transform_1(%arg0: i32) -> (i32, i32) {
    %c0_i32 = arith.constant 0 : i32
    %c0_i32_0 = arith.constant 0 : i32
    %c0_i32_1 = arith.constant 0 : i32
    return %c0_i32, %c0_i32_0 : i32, i32
  }
  func.func @transform_2(%arg0: i32) -> (i32, i32, i32, i32) {
    %c0_i32 = arith.constant 0 : i32
    %c0_i32_0 = arith.constant 0 : i32
    %c0_i32_1 = arith.constant 0 : i32
    %c0_i32_2 = arith.constant 0 : i32
    return %arg0, %c0_i32, %c0_i32_0, %c0_i32_1 : i32, i32, i32, i32
  }
  func.func @transform_3(%arg0: i32) -> (i32, i32, i32, i32) {
    %c0_i32 = arith.constant 0 : i32
    %c0_i32_0 = arith.constant 0 : i32
    %c0_i32_1 = arith.constant 0 : i32
    %c0_i32_2 = arith.constant 0 : i32
    return %arg0, %c0_i32, %c0_i32_0, %c0_i32_1 : i32, i32, i32, i32
  }
  func.func @transform_4(%arg0: i32) -> (i32, i32, i32, i32) {
    %c0_i32 = arith.constant 0 : i32
    %c0_i32_0 = arith.constant 0 : i32
    %c0_i32_1 = arith.constant 0 : i32
    %c0_i32_2 = arith.constant 0 : i32
    return %arg0, %c0_i32, %c0_i32_0, %c0_i32_1 : i32, i32, i32, i32
  }
  func.func @transform_5(%arg0: i32) -> (i32, i32, i32, i32) {
    %c0_i32 = arith.constant 0 : i32
    %c0_i32_0 = arith.constant 0 : i32
    %c0_i32_1 = arith.constant 0 : i32
    %c0_i32_2 = arith.constant 0 : i32
    return %arg0, %c0_i32, %c0_i32_0, %c0_i32_1 : i32, i32, i32, i32
  }
}

module attributes {stable_mosaic.version = 11 : i64} {
  func.func @kernel(%arg0: i32, %arg1: i32, %arg2: memref<256x128xbf16, #tpu.memory_space<vmem>>, %arg3: memref<128x128xbf16, #tpu.memory_space<vmem>>, %arg4: memref<1x128xf32, #tpu.memory_space<vmem>>, %arg5: memref<1x128xf32, #tpu.memory_space<vmem>>, %arg6: memref<1x128xf32, #tpu.memory_space<vmem>>, %arg7: memref<256x128xf32, #tpu.memory_space<vmem>>) attributes {dimension_semantics = [#tpu.dimension_semantics<parallel>, #tpu.dimension_semantics<parallel>], iteration_bounds = array<i64: 1, 2>, scalar_prefetch = 0 : i64, scratch_operands = 0 : i64, tpu.core_type = #tpu.core_type<tc>, window_params = [{transform_indices = @transform_0, window_bounds = array<i64: 256, 128>}, {transform_indices = @transform_1, window_bounds = array<i64: 128, 128>}, {transform_indices = @transform_2, window_bounds = array<i64: 1, 128>}, {pipeline_mode = #tpu.pipeline_mode<synchronous>, transform_indices = @transform_3, window_bounds = array<i64: 1, 128>}, {pipeline_mode = #tpu.pipeline_mode<synchronous>, transform_indices = @transform_4, window_bounds = array<i64: 1, 128>}, {transform_indices = @transform_5, window_bounds = array<i64: 256, 128>}]} {
    %c0 = arith.constant 0 : index
    %c0_0 = arith.constant 0 : index
    %0 = vector.load %arg2[%c0, %c0_0] : memref<256x128xbf16, #tpu.memory_space<vmem>>, vector<256x128xbf16>
    %c0_1 = arith.constant 0 : index
    %c0_2 = arith.constant 0 : index
    %1 = vector.load %arg3[%c0_1, %c0_2] : memref<128x128xbf16, #tpu.memory_space<vmem>>, vector<128x128xbf16>
    %cst = arith.constant dense<0.000000e+00> : vector<256x128xf32>
    %2 = tpu.matmul %0, %1, %cst {dimension_numbers = #tpu.dot_dimension_numbers<[1], [0], [0], [1], [0, 0, 1, 1], [], []>} : vector<256x128xbf16>, vector<128x128xbf16>, vector<256x128xf32> -> vector<256x128xf32>
    %c0_3 = arith.constant 0 : index
    %c0_4 = arith.constant 0 : index
    %3 = vector.load %arg4[%c0_3, %c0_4] : memref<1x128xf32, #tpu.memory_space<vmem>>, vector<1x128xf32>
    %4 = vector.broadcast %3 : vector<1x128xf32> to vector<256x128xf32>
    %5 = arith.addf %2, %4 : vector<256x128xf32>
    %6 = tpu.iota {dimensions = array<i32: 1>} : vector<256x128xi32>
    %c16_i32 = arith.constant 16 : i32
    %7 = vector.broadcast %c16_i32 : i32 to vector<256x128xi32>
    %8 = arith.cmpi slt, %6, %7 : vector<256x128xi32>
    %cst_5 = arith.constant 0.000000e+00 : f32
    %9 = vector.broadcast %cst_5 : f32 to vector<256x128xf32>
    %10 = arith.select %8, %5, %9 : vector<256x128xi1>, vector<256x128xf32>
    %cst_6 = arith.constant dense<0.000000e+00> : vector<256xf32>
    %11 = vector.multi_reduction <add>, %10, %cst_6 [1] : vector<256x128xf32> to vector<256xf32>
    %12 = vector.shape_cast %11 : vector<256xf32> to vector<256x1xf32>
    %cst_7 = arith.constant 6.250000e-02 : f32
    %13 = vector.broadcast %cst_7 : f32 to vector<256x1xf32>
    %14 = arith.mulf %12, %13 : vector<256x1xf32>
    %15 = vector.broadcast %14 : vector<256x1xf32> to vector<256x128xf32>
    %16 = arith.subf %5, %15 : vector<256x128xf32>
    %cst_8 = arith.constant 0.000000e+00 : f32
    %17 = vector.broadcast %cst_8 : f32 to vector<256x128xf32>
    %18 = arith.select %8, %16, %17 : vector<256x128xi1>, vector<256x128xf32>
    %19 = arith.mulf %18, %18 : vector<256x128xf32>
    %cst_9 = arith.constant dense<0.000000e+00> : vector<256xf32>
    %20 = vector.multi_reduction <add>, %19, %cst_9 [1] : vector<256x128xf32> to vector<256xf32>
    %21 = vector.shape_cast %20 : vector<256xf32> to vector<256x1xf32>
    %cst_10 = arith.constant 6.250000e-02 : f32
    %22 = vector.broadcast %cst_10 : f32 to vector<256x1xf32>
    %23 = arith.mulf %21, %22 : vector<256x1xf32>
    %24 = vector.broadcast %14 : vector<256x1xf32> to vector<256x128xf32>
    %25 = arith.subf %5, %24 : vector<256x128xf32>
    %cst_11 = arith.constant 9.99999974E-6 : f32
    %26 = vector.broadcast %cst_11 : f32 to vector<256x1xf32>
    %27 = arith.addf %23, %26 : vector<256x1xf32>
    %28 = math.rsqrt %27 : vector<256x1xf32>
    %29 = vector.broadcast %28 : vector<256x1xf32> to vector<256x128xf32>
    %30 = arith.mulf %25, %29 : vector<256x128xf32>
    %c0_12 = arith.constant 0 : index
    %c0_13 = arith.constant 0 : index
    %31 = vector.load %arg5[%c0_12, %c0_13] : memref<1x128xf32, #tpu.memory_space<vmem>>, vector<1x128xf32>
    %32 = vector.broadcast %31 : vector<1x128xf32> to vector<256x128xf32>
    %33 = arith.mulf %30, %32 : vector<256x128xf32>
    %c0_14 = arith.constant 0 : index
    %c0_15 = arith.constant 0 : index
    %34 = vector.load %arg6[%c0_14, %c0_15] : memref<1x128xf32, #tpu.memory_space<vmem>>, vector<1x128xf32>
    %35 = vector.broadcast %34 : vector<1x128xf32> to vector<256x128xf32>
    %36 = arith.addf %33, %35 : vector<256x128xf32>
    %c0_16 = arith.constant 0 : index
    %c0_17 = arith.constant 0 : index
    %37 = vector.load %arg7[%c0_16, %c0_17] : memref<256x128xf32, #tpu.memory_space<vmem>>, vector<256x128xf32>
    tpu.vector_store %arg7[%c0_16, %c0_17], %36 {strides = array<i32>} : memref<256x128xf32, #tpu.memory_space<vmem>>, vector<256x128xf32>,
    return
  }
  func.func @transform_0(%arg0: i32, %arg1: i32) -> (i32, i32) {
    %c0_i32 = arith.constant 0 : i32
    %c0_i32_0 = arith.constant 0 : i32
    return %arg1, %c0_i32 : i32, i32
  }
  func.func @transform_1(%arg0: i32, %arg1: i32) -> (i32, i32) {
    %c0_i32 = arith.constant 0 : i32
    %c0_i32_0 = arith.constant 0 : i32
    return %c0_i32, %arg0 : i32, i32
  }
  func.func @transform_2(%arg0: i32, %arg1: i32) -> (i32, i32) {
    %c0_i32 = arith.constant 0 : i32
    %c0_i32_0 = arith.constant 0 : i32
    return %c0_i32, %arg0 : i32, i32
  }
  func.func @transform_3(%arg0: i32, %arg1: i32) -> (i32, i32) {
    %c0_i32 = arith.constant 0 : i32
    %c0_i32_0 = arith.constant 0 : i32
    %c0_i32_1 = arith.constant 0 : i32
    return %c0_i32, %c0_i32_0 : i32, i32
  }
  func.func @transform_4(%arg0: i32, %arg1: i32) -> (i32, i32) {
    %c0_i32 = arith.constant 0 : i32
    %c0_i32_0 = arith.constant 0 : i32
    %c0_i32_1 = arith.constant 0 : i32
    return %c0_i32, %c0_i32_0 : i32, i32
  }
  func.func @transform_5(%arg0: i32, %arg1: i32) -> (i32, i32) {
    %c0_i32 = arith.constant 0 : i32
    return %arg1, %arg0 : i32, i32
  }
}

</mosaic_0001>

<bundles_post_ra>
// kernel: basic_layer_up_forward.24
= control target key start
LH: loop header
LB: loop body
LE: loop exit
PB: predicated region body
PF: predicated region fallthrough
CT: control target
= control target key end

     0   :  { %vm53_vm0 = vcmask 261120   ;;  %s1081_s0 = inlined_call_operand.vmem [shape: bf16[128,32], index: 0, kind: input, shape index: {}]   ;;  %s1082_s3 = inlined_call_operand.vmem [shape: bf16[32,128], index: 3, kind: input, shape index: {}]   ;;  %s1083_s1 = inlined_call_operand.vmem [shape: f32[1,32], index: 1, kind: input, shape index: {}]   ;;  %s1084_s2 = inlined_call_operand.vmem [shape: f32[1,32], index: 2, kind: input, shape index: {}]   ;;  %s1085_s4 = inlined_call_operand.vmem [shape: f32[1,128], index: 4, kind: input, shape index: {}]   ;;  %s1086_s5 = inlined_call_operand.vmem [shape: bf16[128,128], index: 5, kind: output, shape index: {}]  }
   0x1   :  { %v777_v0 = vld [vmem:[%s1081_s0] sm:$0xff]   ;;  %v791_v6 = vld [vmem:[%s1081_s0 + $0x8] sm:$0xff]   ;;  %v819_v18 = vld [vmem:[%s1081_s0 + $0x10] sm:$0xff]  }
   0x2   :  { %v782_v1 = vld [vmem:[%s1081_s0 + $0x20] sm:$0xff]   ;;  %v592_v2 = vunpack.c.l.bf16 %v777_v0  ;;  %v593_v4 = vunpack.c.h.bf16 %v777_v0  ;;  %v596_v11 = vunpack.c.l.bf16 %v791_v6  ;;  %v597_v12 = vunpack.c.h.bf16 %v791_v6  ;;  %v806_v13 = vld [vmem:[%s1081_s0 + $0x28] sm:$0xff]   ;;  %v832_v23 = vld [vmem:[%s1081_s0 + $0x30] sm:$0xff]  }
   0x3   :  { %v608_v3 = vunpack.c.l.bf16 %v782_v1  ;;  %v609_v5 = vunpack.c.h.bf16 %v782_v1  ;;  %v612_v16 = vunpack.c.l.bf16 %v806_v13  ;;  %v613_v17 = vunpack.c.h.bf16 %v806_v13  ;;  %v845_v28 = vld [vmem:[%s1081_s0 + $0x18] sm:$0xff]  }
   0x4   :  { %v54_v7 = vsel %vm53_vm0, %v592_v2, 0.0  ;;  %v57_v9 = vsel %vm53_vm0, %v593_v4, 0.0  ;;  %v60_v14 = vsel %vm53_vm0, %v596_v11, 0.0  ;;  %v63_v15 = vsel %vm53_vm0, %v597_v12, 0.0  ;;  %v858_v33 = vld [vmem:[%s1081_s0 + $0x38] sm:$0xff]  }
   0x5   :  { %v78_v8 = vsel %vm53_vm0, %v608_v3, 0.0  ;;  %55 = vadd.xlane.f32.xlu0 %v54_v7  ;;  %v81_v10 = vsel %vm53_vm0, %v609_v5, 0.0  ;;  %v84_v19 = vsel %vm53_vm0, %v612_v16, 0.0  ;;  %v87_v20 = vsel %vm53_vm0, %v613_v17, 0.0 }
   0x6   :  { %79 = vadd.xlane.f32.xlu1 %v78_v8  ;;  %v600_v21 = vunpack.c.l.bf16 %v819_v18  ;;  %v601_v22 = vunpack.c.h.bf16 %v819_v18  ;;  %v616_v26 = vunpack.c.l.bf16 %v832_v23  ;;  %v617_v27 = vunpack.c.h.bf16 %v832_v23 }
   0x7   :  { %v604_v31 = vunpack.c.l.bf16 %v845_v28  ;;  %v605_v32 = vunpack.c.h.bf16 %v845_v28  ;;  %v620_v36 = vunpack.c.l.bf16 %v858_v33  ;;  %v621_v37 = vunpack.c.h.bf16 %v858_v33 }
   0x8   :  { %v66_v24 = vsel %vm53_vm0, %v600_v21, 0.0  ;;  %v69_v25 = vsel %vm53_vm0, %v601_v22, 0.0  ;;  %v90_v29 = vsel %vm53_vm0, %v616_v26, 0.0  ;;  %v93_v30 = vsel %vm53_vm0, %v617_v27, 0.0 }
   0x9   :  { %58 = vadd.xlane.f32.xlu0 %v57_v9  ;;  %v72_v34 = vsel %vm53_vm0, %v604_v31, 0.0  ;;  %v75_v35 = vsel %vm53_vm0, %v605_v32, 0.0  ;;  %v96_v38 = vsel %vm53_vm0, %v620_v36, 0.0  ;;  %v99_v39 = vsel %vm53_vm0, %v621_v37, 0.0 }
   0xa   :  { %82 = vadd.xlane.f32.xlu1 %v81_v10 }
   0xd   :  { %61 = vadd.xlane.f32.xlu0 %v60_v14 }
   0xe   :  { %64 = vadd.xlane.f32.xlu1 %v63_v15 }
  0x11   :  { %85 = vadd.xlane.f32.xlu0 %v84_v19 }
  0x12   :  { %88 = vadd.xlane.f32.xlu1 %v87_v20 }
  0x15   :  { %67 = vadd.xlane.f32.xlu0 %v66_v24 }
  0x16   :  { %70 = vadd.xlane.f32.xlu1 %v69_v25 }
  0x19   :  { %91 = vadd.xlane.f32.xlu0 %v90_v29 }
  0x1a   :  { %94 = vadd.xlane.f32.xlu1 %v93_v30 }
  0x1d   :  { %73 = vadd.xlane.f32.xlu0 %v72_v34 }
  0x1e   :  { %76 = vadd.xlane.f32.xlu1 %v75_v35 }
  0x21   :  { %97 = vadd.xlane.f32.xlu0 %v96_v38 }
  0x22   :  { %100 = vadd.xlane.f32.xlu1 %v99_v39 }
  0x92   :  { %v56_v40 = vpop.xlane.xlu0 %55 }
  0x93   :  { %v80_v41 = vpop.xlane.xlu1 %79  ;;  %v103_v42 = vmul.f32 0.03125, %v56_v40 }
  0x94   :  { %v111_v43 = vmul.f32 0.03125, %v80_v41 }
  0x95   :  { %v874_v44 = vsub.f32 %v592_v2, %v103_v42 }
  0x96   :  { %v876_v45 = vsub.f32 %v608_v3, %v111_v43  ;;  %v59_v46 = vpop.xlane.xlu0 %58 }
  0x97   :  { %v83_v47 = vpop.xlane.xlu1 %82  ;;  %v104_v48 = vmul.f32 0.03125, %v59_v46  ;;  %v135_v50 = vmul.f32 %v874_v44, %v874_v44 }
  0x98   :  { %v112_v49 = vmul.f32 0.03125, %v83_v47  ;;  %v143_v51 = vmul.f32 %v876_v45, %v876_v45 }
  0x99   :  { %v884_v52 = vsub.f32 %v593_v4, %v104_v48  ;;  %v151_v54 = vsel %vm53_vm0, %v135_v50, 0.0 }
  0x9a   :  { %v888_v53 = vsub.f32 %v609_v5, %v112_v49  ;;  %152 = vadd.xlane.f32.xlu0 %v151_v54  ;;  %v62_v55 = vpop.xlane.xlu0 %61  ;;  %v175_v57 = vsel %vm53_vm0, %v143_v51, 0.0 }
  0x9b   :  { %v65_v56 = vpop.xlane.xlu1 %64  ;;  %v105_v58 = vmul.f32 0.03125, %v62_v55  ;;  %v136_v60 = vmul.f32 %v884_v52, %v884_v52 }
  0x9c   :  { %v106_v59 = vmul.f32 0.03125, %v65_v56  ;;  %v144_v61 = vmul.f32 %v888_v53, %v888_v53 }
  0x9d   :  { %v898_v62 = vsub.f32 %v596_v11, %v105_v58  ;;  %v154_v0 = vsel %vm53_vm0, %v136_v60, 0.0 }
  0x9e   :  { %v902_v63 = vsub.f32 %v597_v12, %v106_v59  ;;  %176 = vadd.xlane.f32.xlu0 %v175_v57  ;;  %155 = vadd.xlane.f32.xlu1 %v154_v0  ;;  %v86_v1 = vpop.xlane.xlu0 %85  ;;  %v178_v3 = vsel %vm53_vm0, %v144_v61, 0.0 }
  0x9f   :  { %v89_v2 = vpop.xlane.xlu1 %88  ;;  %v113_v4 = vmul.f32 0.03125, %v86_v1  ;;  %v137_v7 = vmul.f32 %v898_v62, %v898_v62 }
  0xa0   :  { %v114_v5 = vmul.f32 0.03125, %v89_v2  ;;  %v138_v8 = vmul.f32 %v902_v63, %v902_v63 }
  0xa1   :  { %v912_v6 = vsub.f32 %v612_v16, %v113_v4  ;;  %v157_v10 = vsel %vm53_vm0, %v137_v7, 0.0 }
  0xa2   :  { %v916_v9 = vsub.f32 %v613_v17, %v114_v5  ;;  %179 = vadd.xlane.f32.xlu1 %v178_v3  ;;  %158 = vadd.xlane.f32.xlu0 %v157_v10  ;;  %v68_v11 = vpop.xlane.xlu0 %67  ;;  %v160_v14 = vsel %vm53_vm0, %v138_v8, 0.0 }
  0xa3   :  { %v71_v12 = vpop.xlane.xlu1 %70  ;;  %v107_v15 = vmul.f32 0.03125, %v68_v11  ;;  %v145_v20 = vmul.f32 %v912_v6, %v912_v6 }
  0xa4   :  { %v108_v19 = vmul.f32 0.03125, %v71_v12  ;;  %v146_v16 = vmul.f32 %v916_v9, %v916_v9 }
  0xa5   :  { %v926_v13 = vsub.f32 %v600_v21, %v107_v15  ;;  %v181_v24 = vsel %vm53_vm0, %v145_v20, 0.0 }
  0xa6   :  { %v930_v17 = vsub.f32 %v601_v22, %v108_v19  ;;  %161 = vadd.xlane.f32.xlu1 %v160_v14  ;;  %182 = vadd.xlane.f32.xlu0 %v181_v24  ;;  %v92_v25 = vpop.xlane.xlu0 %91  ;;  %v184_v30 = vsel %vm53_vm0, %v146_v16, 0.0 }
  0xa7   :  { %v95_v29 = vpop.xlane.xlu1 %94  ;;  %v115_v34 = vmul.f32 0.03125, %v92_v25  ;;  %v139_v38 = vmul.f32 %v926_v13, %v926_v13 }
  0xa8   :  { %v116_v35 = vmul.f32 0.03125, %v95_v29  ;;  %v140_v21 = vmul.f32 %v930_v17, %v930_v17 }
  0xa9   :  { %v940_v18 = vsub.f32 %v616_v26, %v115_v34  ;;  %v163_v39 = vsel %vm53_vm0, %v139_v38, 0.0 }
  0xaa   :  { %v944_v22 = vsub.f32 %v617_v27, %v116_v35  ;;  %185 = vadd.xlane.f32.xlu1 %v184_v30  ;;  %164 = vadd.xlane.f32.xlu0 %v163_v39  ;;  %v74_v40 = vpop.xlane.xlu0 %73  ;;  %v166_v42 = vsel %vm53_vm0, %v140_v21, 0.0 }
  0xab   :  { %v77_v41 = vpop.xlane.xlu1 %76  ;;  %v109_v43 = vmul.f32 0.03125, %v74_v40  ;;  %v147_v47 = vmul.f32 %v940_v18, %v940_v18 }
  0xac   :  { %v110_v46 = vmul.f32 0.03125, %v77_v41  ;;  %v148_v26 = vmul.f32 %v944_v22, %v944_v22 }
  0xad   :  { %v954_v23 = vsub.f32 %v604_v31, %v109_v43  ;;  %v187_v48 = vsel %vm53_vm0, %v147_v47, 0.0 }
  0xae   :  { %v958_v27 = vsub.f32 %v605_v32, %v110_v46  ;;  %167 = vadd.xlane.f32.xlu1 %v166_v42  ;;  %188 = vadd.xlane.f32.xlu0 %v187_v48  ;;  %v98_v49 = vpop.xlane.xlu0 %97  ;;  %v190_v51 = vsel %vm53_vm0, %v148_v26, 0.0  ;;  %v992_v42 = vld [vmem:[%s1083_s1] ss:$0 sm:$0xff] }
  0xaf   :  { %v101_v50 = vpop.xlane.xlu1 %100  ;;  %v117_v54 = vmul.f32 0.03125, %v98_v49  ;;  %v141_v56 = vmul.f32 %v954_v23, %v954_v23 }
  0xb0   :  { %v118_v55 = vmul.f32 0.03125, %v101_v50  ;;  %v142_v31 = vmul.f32 %v958_v27, %v958_v27 }
  0xb1   :  { %v968_v28 = vsub.f32 %v620_v36, %v117_v54  ;;  %v169_v57 = vsel %vm53_vm0, %v141_v56, 0.0  ;;  %v710_v36 = vld [vmem:[%s1082_s3] sm:$0xff]  }
  0xb2   :  { %v972_v32 = vsub.f32 %v621_v37, %v118_v55  ;;  %191 = vadd.xlane.f32.xlu1 %v190_v51  ;;  %170 = vadd.xlane.f32.xlu0 %v169_v57  ;;  %v172_v58 = vsel %vm53_vm0, %v142_v31, 0.0  ;;  %v711_v37 = vld [vmem:[%s1082_s3 + $0x8] sm:$0xff]   ;;  %v999_v55 = vld [vmem:[%s1084_s2] ss:$0 sm:$0xff] }
  0xb3   :  { %v149_v59 = vmul.f32 %v968_v28, %v968_v28  ;;  %686 = vmatprep.subr.bf16.mxu0 %v710_v36  ;;  %706 = vmatprep.subr.bf16.mxu1 %v710_v36 }
  0xb4   :  { %v150_v60 = vmul.f32 %v972_v32, %v972_v32  ;;  %687 = vmatpush3.bf16.msra.mxu0 %v710_v36  ;;  %708 = vmatpush3.bf16.msra.mxu1 %v710_v36 }
  0xb5   :  { %v193_v61 = vsel %vm53_vm0, %v149_v59, 0.0  ;;  %688 = vmatprep.subr.bf16.mxu0 %v711_v37  ;;  %707 = vmatprep.subr.bf16.mxu1 %v711_v37 }
  0xb6   :  { %173 = vadd.xlane.f32.xlu1 %v172_v58  ;;  %194 = vadd.xlane.f32.xlu0 %v193_v61  ;;  %v196_v33 = vsel %vm53_vm0, %v150_v60, 0.0 }
  0xb8   :  { %689 = vmatpush3.bf16.msra.mxu0 %v711_v37  ;;  %709 = vmatpush3.bf16.msra.mxu1 %v711_v37 }
  0xba   :  { %197 = vadd.xlane.f32.xlu1 %v196_v33 }
 0x127   :  { %v153_v0 = vpop.xlane.xlu0 %152 }
 0x128   :  { %v199_v1 = vmul.f32 0.03125, %v153_v0 }
 0x12a   :  { %v215_v2 = vadd.f32 1e-05, %v199_v1 }
 0x12b   :  { %v156_v3 = vpop.xlane.xlu1 %155  ;;  %v177_v4 = vpop.xlane.xlu0 %176 }
 0x12c   :  { %712 = vrsqrt.f32 %v215_v2  ;;  %v200_v5 = vmul.f32 0.03125, %v156_v3  ;;  %v207_v7 = vmul.f32 0.03125, %v177_v4 }
 0x12e   :  { %v216_v8 = vadd.f32 1e-05, %v200_v5  ;;  %v223_v10 = vadd.f32 1e-05, %v207_v7 }
 0x12f   :  { %v180_v11 = vpop.xlane.xlu1 %179  ;;  %v159_v12 = vpop.xlane.xlu0 %158 }
 0x130   :  { %714 = vrsqrt.f32 %v216_v8  ;;  %v208_v14 = vmul.f32 0.03125, %v180_v11  ;;  %v201_v15 = vmul.f32 0.03125, %v159_v12 }
 0x131   :  { %716 = vrsqrt.f32 %v223_v10 }
 0x132   :  { %v224_v19 = vadd.f32 1e-05, %v208_v14  ;;  %v217_v20 = vadd.f32 1e-05, %v201_v15 }
 0x133   :  { %v162_v16 = vpop.xlane.xlu1 %161  ;;  %v183_v24 = vpop.xlane.xlu0 %182 }
 0x134   :  { %718 = vrsqrt.f32 %v224_v19  ;;  %v202_v25 = vmul.f32 0.03125, %v162_v16  ;;  %v209_v29 = vmul.f32 0.03125, %v183_v24 }
 0x135   :  { %720 = vrsqrt.f32 %v217_v20 }
 0x136   :  { %v713_v30 = vpop.eup %712  ;;  %v218_v34 = vadd.f32 1e-05, %v202_v25  ;;  %v225_v35 = vadd.f32 1e-05, %v209_v29 }
 0x137   :  { %v186_v38 = vpop.xlane.xlu1 %185  ;;  %v165_v21 = vpop.xlane.xlu0 %164  ;;  %v247_v39 = vmul.f32 %v713_v30, %v874_v44 }
 0x138   :  { %722 = vrsqrt.f32 %v218_v34  ;;  %v210_v40 = vmul.f32 0.03125, %v186_v38  ;;  %v203_v41 = vmul.f32 0.03125, %v165_v21 }
 0x139   :  { %724 = vrsqrt.f32 %v225_v35  ;;  %v270_v51 = vmul.f32 %v992_v42, %v247_v39 }
 0x13a   :  { %v715_v43 = vpop.eup %714  ;;  %v226_v46 = vadd.f32 1e-05, %v210_v40  ;;  %v219_v47 = vadd.f32 1e-05, %v203_v41 }
 0x13b   :  { %v717_v26 = vpop.eup %716  ;;  %v168_v48 = vpop.xlane.xlu1 %167  ;;  %v248_v50 = vmul.f32 %v715_v43, %v884_v52  ;;  %v293_v33 = vadd.f32 %v999_v55, %v270_v51 }
 0x13c   :  { %v189_v49 = vpop.xlane.xlu0 %188  ;;  %726 = vrsqrt.f32 %v226_v46  ;;  %v204_v44 = vmul.f32 0.03125, %v168_v48  ;;  %v255_v56 = vmul.f32 %v717_v26, %v876_v45 }
 0x13d   :  { %v211_v54 = vmul.f32 0.03125, %v189_v49  ;;  %728 = vrsqrt.f32 %v219_v47  ;;  %v271_v31 = vmul.f32 %v992_v42, %v248_v50 }
 0x13e   :  { %v719_v57 = vpop.eup %718  ;;  %v220_v58 = vadd.f32 1e-05, %v204_v44  ;;  %v278_v0 = vmul.f32 %v992_v42, %v255_v56 }
 0x13f   :  { %v227_v59 = vadd.f32 1e-05, %v211_v54  ;;  %v721_v60 = vpop.eup %720  ;;  %v192_v52 = vpop.xlane.xlu1 %191  ;;  %v294_v36 = vadd.f32 %v999_v55, %v271_v31  ;;  %v256_v37 = vmul.f32 %v719_v57, %v888_v53 }
 0x140   :  { %v171_v61 = vpop.xlane.xlu0 %170  ;;  %v249_v1 = vmul.f32 %v721_v60, %v898_v62  ;;  %730 = vrsqrt.f32 %v220_v58  ;;  %v212_v45 = vmul.f32 0.03125, %v192_v52  ;;  %v301_v14 = vadd.f32 %v999_v55, %v278_v0 }
 0x141   :  { %v205_v2 = vmul.f32 0.03125, %v171_v61  ;;  %732 = vrsqrt.f32 %v227_v59  ;;  %v309_v3 = vpack.c.bf16 %v294_v36, %v293_v33  ;;  %v279_v4 = vmul.f32 %v992_v42, %v256_v37 }
 0x142   :  { %v723_v5 = vpop.eup %722  ;;  %v228_v7 = vadd.f32 1e-05, %v212_v45  ;;  %v272_v15 = vmul.f32 %v992_v42, %v249_v1 }
 0x143   :  { %v221_v8 = vadd.f32 1e-05, %v205_v2  ;;  %v725_v10 = vpop.eup %724  ;;  %v250_v11 = vmul.f32 %v723_v5, %v902_v63  ;;  %v174_v12 = vpop.xlane.xlu1 %173  ;;  %690 = vmatprep.mubr.msk.bf16.mxu0 %vm53_vm0, %v309_v3  ;;  %v302_v62 = vadd.f32 %v999_v55, %v279_v4 }
 0x144   :  { %v195_v53 = vpop.xlane.xlu0 %194  ;;  %v257_v19 = vmul.f32 %v725_v10, %v912_v6  ;;  %734 = vrsqrt.f32 %v228_v7  ;;  %v206_v20 = vmul.f32 0.03125, %v174_v12  ;;  %v295_v21 = vadd.f32 %v999_v55, %v272_v15  ;;  %v547_v12 = vld [vmem:[%s1085_s4] ss:$0 sm:$0xff] }
 0x145   :  { %v213_v16 = vmul.f32 0.03125, %v195_v53  ;;  %736 = vrsqrt.f32 %v221_v8  ;;  %v313_v24 = vpack.c.bf16 %v302_v62, %v301_v14  ;;  %v273_v25 = vmul.f32 %v992_v42, %v250_v11 }
 0x146   :  { %v727_v63 = vpop.eup %726  ;;  %v222_v29 = vadd.f32 1e-05, %v206_v20  ;;  %v280_v39 = vmul.f32 %v992_v42, %v257_v19 }
 0x147   :  { %v229_v30 = vadd.f32 1e-05, %v213_v16  ;;  %v729_v34 = vpop.eup %728  ;;  %v258_v35 = vmul.f32 %v727_v63, %v916_v9  ;;  %v198_v38 = vpop.xlane.xlu1 %197  ;;  %698 = vmatprep.mubr.msk.bf16.mxu1 %vm53_vm0, %v313_v24  ;;  %v296_v6 = vadd.f32 %v999_v55, %v273_v25 }
 0x148   :  { %v251_v40 = vmul.f32 %v729_v34, %v926_v13  ;;  %738 = vrsqrt.f32 %v222_v29  ;;  %v214_v41 = vmul.f32 0.03125, %v198_v38  ;;  %v303_v49 = vadd.f32 %v999_v55, %v280_v39 }
 0x149   :  { %740 = vrsqrt.f32 %v229_v30  ;;  %v310_v43 = vpack.c.bf16 %v296_v6, %v295_v21  ;;  %v281_v46 = vmul.f32 %v992_v42, %v258_v35 }
 0x14a   :  { %v731_v47 = vpop.eup %730  ;;  %v230_v26 = vadd.f32 1e-05, %v214_v41  ;;  %v274_v51 = vmul.f32 %v992_v42, %v251_v40 }
 0x14b   :  { %v733_v9 = vpop.eup %732  ;;  %v252_v48 = vmul.f32 %v731_v47, %v930_v17  ;;  %691 = vmatmul.mubr.msk.bf16.vlgmr.msra.gmra.mrb[0].mxu0 %vm53_vm0, %v310_v43  ;;  %v304_v50 = vadd.f32 %v999_v55, %v281_v46 }
 0x14c   :  { %v259_v13 = vmul.f32 %v733_v9, %v940_v18  ;;  %742 = vrsqrt.f32 %v230_v26  ;;  %v297_v17 = vadd.f32 %v999_v55, %v274_v51 }
 0x14d   :  { %v314_v44 = vpack.c.bf16 %v304_v50, %v303_v49  ;;  %v275_v54 = vmul.f32 %v992_v42, %v252_v48 }
 0x14e   :  { %v735_v56 = vpop.eup %734  ;;  %v282_v59 = vmul.f32 %v992_v42, %v259_v13 }
 0x14f   :  { %v737_v31 = vpop.eup %736  ;;  %v260_v57 = vmul.f32 %v735_v56, %v944_v22  ;;  %699 = vmatmul.mubr.msk.bf16.vlgmr.msra.gmra.mrb[0].mxu1 %vm53_vm0, %v314_v44  ;;  %v298_v58 = vadd.f32 %v999_v55, %v275_v54 }
 0x150   :  { %v253_v60 = vmul.f32 %v737_v31, %v954_v23  ;;  %v305_v22 = vadd.f32 %v999_v55, %v282_v59 }
 0x151   :  { %v311_v52 = vpack.c.bf16 %v298_v58, %v297_v17  ;;  %v283_v18 = vmul.f32 %v992_v42, %v260_v57 }
 0x152   :  { %v739_v61 = vpop.eup %738  ;;  %v276_v0 = vmul.f32 %v992_v42, %v253_v60 }
 0x153   :  { %v741_v33 = vpop.eup %740  ;;  %v254_v36 = vmul.f32 %v739_v61, %v958_v27  ;;  %694 = vmatprep.mubr.msk.bf16.mxu0 %vm53_vm0, %v311_v52  ;;  %v306_v37 = vadd.f32 %v999_v55, %v283_v18 }
 0x154   :  { %v261_v1 = vmul.f32 %v741_v33, %v968_v28  ;;  %v299_v27 = vadd.f32 %v999_v55, %v276_v0 }
 0x155   :  { %v315_v45 = vpack.c.bf16 %v306_v37, %v305_v22  ;;  %v277_v23 = vmul.f32 %v992_v42, %v254_v36 }
 0x156   :  { %v743_v2 = vpop.eup %742  ;;  %v284_v5 = vmul.f32 %v992_v42, %v261_v1 }
 0x157   :  { %v262_v3 = vmul.f32 %v743_v2, %v972_v32  ;;  %702 = vmatprep.mubr.msk.bf16.mxu1 %vm53_vm0, %v315_v45  ;;  %v300_v4 = vadd.f32 %v999_v55, %v277_v23 }
 0x158   :  { %v307_v28 = vadd.f32 %v999_v55, %v284_v5 }
 0x159   :  { %v312_v7 = vpack.c.bf16 %v300_v4, %v299_v27  ;;  %v285_v8 = vmul.f32 %v992_v42, %v262_v3 }
 0x15b   :  { %695 = vmatmul.mubr.msk.bf16.gmra.mrb[4].mxu0 %vm53_vm0, %v312_v7  ;;  %v308_v10 = vadd.f32 %v999_v55, %v285_v8 }
 0x15d   :  { %v316_v11 = vpack.c.bf16 %v308_v10, %v307_v28 }
 0x15f   :  { %703 = vmatmul.mubr.msk.bf16.gmra.mrb[4].mxu1 %vm53_vm0, %v316_v11 }
 0x21e   :  { %v692_v32 = vpop.f32.mrb[0].mxu0 }
 0x21f   :  { %v398_v53 = vpop.f32.mrb[1].mxu0  ;;  %v407_v62 = vadd.f32 %v692_v32, %v547_v12 }
 0x220   :  { %v693_v14 = vpop.f32.mrb[2].mxu0  ;;  %v399_v42 = vadd.f32 %v547_v12, %v398_v53 }
 0x221   :  { %v410_v15 = vadd.f32 %v693_v14, %v547_v12  ;;  %v401_v19 = vpop.f32.mrb[3].mxu0 }
 0x222   :  { %v402_v20 = vadd.f32 %v547_v12, %v401_v19  ;;  %v700_v16 = vpop.f32.mrb[0].mxu1 }
 0x223   :  { %v630_v24 = vpack.c.bf16 %v410_v15, %v407_v62  ;;  %v430_v25 = vpop.f32.mrb[1].mxu1  ;;  %v439_v29 = vadd.f32 %v700_v16, %v547_v12 }
 0x224   :  { %v625_v63 = vpack.c.bf16 %v402_v20, %v399_v42  ;;  %v701_v55 = vpop.f32.mrb[2].mxu1  ;;  %v431_v35 = vadd.f32 %v547_v12, %v430_v25 }
 0x225   :  { %669 = vst [vmem:[%s1086_s5 + $0x8] sm:$0xff] %v630_v24   ;;  %v442_v30 = vadd.f32 %v701_v55, %v547_v12  ;;  %v433_v34 = vpop.f32.mrb[3].mxu1 }
 0x226   :  { %626 = vst [vmem:[%s1086_s5] sm:$0xff] %v625_v63   ;;  %v434_v38 = vadd.f32 %v547_v12, %v433_v34 }
 0x227   :  { %v650_v21 = vpack.c.bf16 %v442_v30, %v439_v29 }
 0x228   :  { %v645_v6 = vpack.c.bf16 %v434_v38, %v431_v35 }
 0x229   :  { %673 = vst [vmem:[%s1086_s5 + $0x28] sm:$0xff] %v650_v21  }
 0x22a   :  { %672 = vst [vmem:[%s1086_s5 + $0x20] sm:$0xff] %v645_v6  }
 0x22e   :  { %v696_v39 = vpop.f32.mrb[4].mxu0 }
 0x22f   :  { %v414_v40 = vpop.f32.mrb[5].mxu0  ;;  %v423_v43 = vadd.f32 %v696_v39, %v547_v12 }
 0x230   :  { %v697_v41 = vpop.f32.mrb[6].mxu0  ;;  %v415_v26 = vadd.f32 %v547_v12, %v414_v40 }
 0x231   :  { %v426_v46 = vadd.f32 %v697_v41, %v547_v12  ;;  %v417_v47 = vpop.f32.mrb[7].mxu0 }
 0x232   :  { %v418_v9 = vadd.f32 %v547_v12, %v417_v47  ;;  %v704_v48 = vpop.f32.mrb[4].mxu1 }
 0x233   :  { %v640_v49 = vpack.c.bf16 %v426_v46, %v423_v43  ;;  %v446_v50 = vpop.f32.mrb[5].mxu1  ;;  %v455_v44 = vadd.f32 %v704_v48, %v547_v12 }
 0x234   :  { %v635_v51 = vpack.c.bf16 %v418_v9, %v415_v26  ;;  %v705_v13 = vpop.f32.mrb[6].mxu1  ;;  %v447_v31 = vadd.f32 %v547_v12, %v446_v50 }
 0x235   :  { %671 = vst [vmem:[%s1086_s5 + $0x18] sm:$0xff] %v640_v49   ;;  %v458_v54 = vadd.f32 %v705_v13, %v547_v12  ;;  %v449_v56 = vpop.f32.mrb[7].mxu1 }
 0x236   :  { %670 = vst [vmem:[%s1086_s5 + $0x10] sm:$0xff] %v635_v51   ;;  %v450_v57 = vadd.f32 %v547_v12, %v449_v56 }
 0x237   :  { %v660_v17 = vpack.c.bf16 %v458_v54, %v455_v44 }
 0x238   :  { %v655_v58 = vpack.c.bf16 %v450_v57, %v447_v31 }
 0x239   :  { %675 = vst [vmem:[%s1086_s5 + $0x38] sm:$0xff] %v660_v17  }
 0x23a   :  { %674 = vst [vmem:[%s1086_s5 + $0x30] sm:$0xff] %v655_v58  }

// kernel: basic_layer_up_forward.23
= control target key start
LH: loop header
LB: loop body
LE: loop exit
PB: predicated region body
PF: predicated region fallthrough
CT: control target
= control target key end

     0   :  { %s1120_s15 = smov 0   ;;  %s1558_s0 = inlined_call_operand.vmem [shape: bf16[2,10,10,32], index: 0, kind: input, shape index: {}]   ;;  %s1559_s1 = inlined_call_operand.vmem [shape: f32[9,32], index: 1, kind: input, shape index: {}]   ;;  %s1560_s2 = inlined_call_operand.vmem [shape: f32[1,32], index: 2, kind: input, shape index: {}]   ;;  %s1561_s3 = inlined_call_operand.vmem [shape: f32[2,8,8,32], index: 3, kind: input, shape index: {}]   ;;  %s1562_s4 = inlined_call_operand.vmem [shape: bf16[2,8,8,32], index: 4, kind: output, shape index: {}]  }
   0x1 LB: > { %s1006_s16 = sadd.s32 4294967295, %s1093_s15   ;;  %p1010_p0 = scmp.ge.s32.totalorder %s1093_s15, 1  ;;  %s1093_s15 = sphi %s1120_s15, %s14_s15  }
   0x2   : > { %p172_p1 = scmp.lt.s32.totalorder %s1093_s15, 3 }
   0x4   : > { %p173_p2 = pnand %p1010_p0, %p172_p1 }
   0x5   : > { %p203_p3 = scmp.lt.s32.totalorder (!%p173_p2), %s1006_s16, 1  ;;  %v1016_v0 = vld [vmem:[%s1559_s1] ss:$0 sm:$0xff] (!%p173_p2)  ;;  %vm308_vm0 = vcmask (!%p173_p2), 1046528   ;;  %v1017_v29 = vld [vmem:[%s1559_s1 + $0x1] ss:$0 sm:$0xff] (!%p173_p2) }
   0x6   : > { %176 = sbr.rel (%p173_p2) target bundleno = 128 (0x80), region = 36  ;;  %vm402_vm1 = vcmask (!%p173_p2), 1045504   ;;  %vm930_vm2 = vcmask (!%p173_p2), 257024  }
   0xd   : > { %s1564_s16 = smov (!%p203_p3, %s1006_s16), 1 }
   0xe   : > { %s1078_s17 = smul.u32 80, %s1564_s16  ;;  %s1076_s13 = sshll.u32 %s1564_s16, 6 }
   0xf   : > { %s1516_s18 = scalar_lea.vmem %s1561_s3, %s1076_s13  ;;  %s1077_s21 = sshll.u32 %s1564_s16, 5 }
  0x10   : > { %s1134_s20 = scalar_lea.vmem %s1558_s0, %s1078_s17  ;;  %s217_s23 = scalar_lea.vmem %s1562_s4, %s1077_s21 }
  0x11   : > { %v218_v1 = vld [vmem:[%s1134_s20] ss:$8 sps:$4 sm:$0xff]   ;;  %v220_v2 = vld [vmem:[%s1134_s20 + $0x10] ss:$8 sps:$4 sm:$0xff]   ;;  %v1144_v9 = vld [vmem:[%s1134_s20 + $0x4] sm:$0x1] }
  0x12   : > { %v222_v3 = vld [vmem:[%s1134_s20 + $0x20] ss:$8 sps:$4 sm:$0xff]   ;;  %v224_v4 = vld [vmem:[%s1134_s20 + $0x30] ss:$8 sps:$4 sm:$0xff]   ;;  %v226_v5 = vunpack.c.l.bf16 %v218_v1  ;;  %v227_v6 = vunpack.c.h.bf16 %v218_v1  ;;  %v228_v7 = vunpack.c.l.bf16 %v220_v2  ;;  %v229_v8 = vunpack.c.h.bf16 %v220_v2  ;;  %v1147_v10 = vld [vmem:[%s1134_s20 + $0xc] sm:$0x1] }
  0x13   : > { %v230_v11 = vunpack.c.l.bf16 %v222_v3  ;;  %v231_v12 = vunpack.c.h.bf16 %v222_v3  ;;  %v232_v13 = vunpack.c.l.bf16 %v224_v4  ;;  %v233_v14 = vunpack.c.h.bf16 %v224_v4  ;;  %v1150_v15 = vld [vmem:[%s1134_s20 + $0x14] sm:$0x1]  ;;  %v1153_v16 = vld [vmem:[%s1134_s20 + $0x1c] sm:$0x1]  ;;  %v1156_v17 = vld [vmem:[%s1134_s20 + $0x24] sm:$0x1] }
  0x14   : > { %v239_v18 = vmul.f32 %v1016_v0, %v226_v5  ;;  %v240_v19 = vmul.f32 %v1016_v0, %v227_v6  ;;  %v1158_v20 = vmul.f32 %v1016_v0, %v228_v7  ;;  %v1160_v21 = vmul.f32 %v1016_v0, %v229_v8  ;;  %v1163_v22 = vld [vmem:[%s1134_s20 + $0x2c] sm:$0x1]  ;;  %v1166_v23 = vld [vmem:[%s1134_s20 + $0x34] sm:$0x1]  ;;  %v1169_v24 = vld [vmem:[%s1134_s20 + $0x3c] sm:$0x1] }
  0x15   : > { %v243_v25 = vmul.f32 %v1016_v0, %v230_v11  ;;  %v1171_v26 = vmul.f32 %v1016_v0, %v231_v12  ;;  %v1173_v27 = vmul.f32 %v1016_v0, %v232_v13  ;;  %v1175_v28 = vmul.f32 %v1016_v0, %v233_v14 }
  0x16   : > { %v263_v30 = vunpack.c.l.bf16 %v1144_v9  ;;  %v264_v31 = vunpack.c.l.bf16 %v1147_v10  ;;  %v265_v32 = vunpack.c.l.bf16 %v1150_v15  ;;  %v266_v33 = vunpack.c.l.bf16 %v1153_v16 }
  0x17   : > { %v267_v34 = vunpack.c.l.bf16 %v1156_v17  ;;  %v268_v35 = vunpack.c.l.bf16 %v1163_v22  ;;  %v269_v36 = vunpack.c.l.bf16 %v1166_v23  ;;  %v270_v37 = vunpack.c.l.bf16 %v1169_v24 }
  0x18   : > { %v276_v38 = vmul.f32 %v1017_v29, %v226_v5  ;;  %v277_v39 = vmul.f32 %v1017_v29, %v263_v30  ;;  %v278_v40 = vmul.f32 %v1017_v29, %v227_v6  ;;  %v279_v41 = vmul.f32 %v1017_v29, %v264_v31  ;;  %v349_v6 = vld [vmem:[%s1134_s20] sm:$0xe] }
  0x19   : > { %v280_v42 = vmul.f32 %v1017_v29, %v228_v7  ;;  %v281_v43 = vmul.f32 %v1017_v29, %v265_v32  ;;  %v282_v44 = vmul.f32 %v1017_v29, %v229_v8  ;;  %v283_v45 = vmul.f32 %v1017_v29, %v266_v33  ;;  %v350_v7 = vld [vmem:[%s1134_s20 + $0x8] sm:$0xe] }
  0x1a   : > { %v284_v46 = vmul.f32 %v1017_v29, %v230_v11  ;;  %v285_v47 = vmul.f32 %v1017_v29, %v267_v34  ;;  %v286_v48 = vmul.f32 %v1017_v29, %v231_v12  ;;  %v287_v49 = vmul.f32 %v1017_v29, %v268_v35 }
  0x1b   : > { %v288_v50 = vmul.f32 %v1017_v29, %v232_v13  ;;  %v289_v51 = vmul.f32 %v1017_v29, %v269_v36  ;;  %v290_v52 = vmul.f32 %v1017_v29, %v233_v14  ;;  %v291_v53 = vmul.f32 %v1017_v29, %v270_v37  ;;  %v351_v14 = vld [vmem:[%s1134_s20 + $0x10] sm:$0xe] }
  0x1c   : > { %v309_v54 = vrot.slane %v276_v38, 1  ;;  %v310_v55 = vrot.slane %v277_v39, 1  ;;  %v312_v56 = vrot.slane %v278_v40, 1  ;;  %v313_v57 = vrot.slane %v279_v41, 1  ;;  %v352_v41 = vld [vmem:[%s1134_s20 + $0x18] sm:$0xe] }
  0x1d   : > { %v315_v58 = vrot.slane %v280_v42, 1  ;;  %v316_v59 = vrot.slane %v281_v43, 1  ;;  %v318_v60 = vrot.slane %v282_v44, 1  ;;  %v319_v61 = vrot.slane %v283_v45, 1  ;;  %v353_v42 = vld [vmem:[%s1134_s20 + $0x20] sm:$0xe] }
  0x1e   : > { %v311_v62 = vsel %vm308_vm0, %v309_v54, %v310_v55  ;;  %v314_v63 = vsel %vm308_vm0, %v312_v56, %v313_v57  ;;  %v321_v0 = vrot.slane %v284_v46, 1  ;;  %v322_v1 = vrot.slane %v285_v47, 1  ;;  %v354_v47 = vld [vmem:[%s1134_s20 + $0x28] sm:$0xe] }
  0x1f   : > { %v317_v2 = vsel %vm308_vm0, %v315_v58, %v316_v59  ;;  %v320_v3 = vsel %vm308_vm0, %v318_v60, %v319_v61  ;;  %v324_v4 = vrot.slane %v286_v48, 1  ;;  %v325_v5 = vrot.slane %v287_v49, 1  ;;  %v355_v48 = vld [vmem:[%s1134_s20 + $0x30] sm:$0xe]  ;;  %v356_v49 = vld [vmem:[%s1134_s20 + $0x38] sm:$0xe] }
  0x20   : > { %v323_v8 = vsel %vm308_vm0, %v321_v0, %v322_v1  ;;  %v327_v11 = vrot.slane %v288_v50, 1  ;;  %v328_v12 = vrot.slane %v289_v51, 1  ;;  %v330_v13 = vrot.slane %v290_v52, 1  ;;  %v1018_v52 = vld [vmem:[%s1559_s1 + $0x2] ss:$0 sm:$0xff] }
  0x21   : > { %v326_v29 = vsel %vm308_vm0, %v324_v4, %v325_v5  ;;  %v331_v38 = vrot.slane %v291_v53, 1  ;;  %v1213_v39 = vadd.f32 %v311_v62, %v239_v18  ;;  %v1215_v40 = vadd.f32 %v314_v63, %v240_v19 }
  0x22   : > { %v329_v43 = vsel %vm308_vm0, %v327_v11, %v328_v12  ;;  %v1221_v44 = vadd.f32 %v317_v2, %v1158_v20  ;;  %v344_v45 = vadd.f32 %v320_v3, %v1160_v21  ;;  %v345_v46 = vadd.f32 %v323_v8, %v243_v25 }
  0x23   : > { %v332_v50 = vsel %vm308_vm0, %v330_v13, %v331_v38  ;;  %v346_v18 = vadd.f32 %v326_v29, %v1171_v26  ;;  %v347_v19 = vadd.f32 %v329_v43, %v1173_v27  ;;  %v357_v51 = vunpack.c.l.bf16 %v349_v6  ;;  %v1019_v13 = vld [vmem:[%s1134_s20 + $0x8] ss:$8 sps:$4 sm:$0xff]  }
  0x24   : > { %v348_v20 = vadd.f32 %v332_v50, %v1175_v28  ;;  %v358_v53 = vunpack.c.l.bf16 %v350_v7  ;;  %v359_v54 = vunpack.c.l.bf16 %v351_v14  ;;  %v360_v21 = vunpack.c.l.bf16 %v352_v41  ;;  %v1023_v50 = vld [vmem:[%s1134_s20 + $0x28] ss:$8 sps:$4 sm:$0xff]  }
  0x25   : > { %v361_v25 = vunpack.c.l.bf16 %v353_v42  ;;  %v362_v55 = vunpack.c.l.bf16 %v354_v47  ;;  %v363_v56 = vunpack.c.l.bf16 %v355_v48  ;;  %v364_v57 = vunpack.c.l.bf16 %v356_v49  ;;  %v1021_v42 = vld [vmem:[%s1134_s20 + $0x18] ss:$8 sps:$4 sm:$0xff]  }
  0x26   : > { %v370_v58 = vmul.f32 %v1018_v52, %v357_v51  ;;  %v371_v26 = vmul.f32 %v1018_v52, %v263_v30  ;;  %v372_v59 = vmul.f32 %v1018_v52, %v358_v53  ;;  %v373_v27 = vmul.f32 %v1018_v52, %v264_v31  ;;  %v1025_v51 = vld [vmem:[%s1134_s20 + $0x38] ss:$8 sps:$4 sm:$0xff]  }
  0x27   : > { %v374_v60 = vmul.f32 %v1018_v52, %v359_v54  ;;  %v375_v61 = vmul.f32 %v1018_v52, %v265_v32  ;;  %v376_v28 = vmul.f32 %v1018_v52, %v360_v21  ;;  %v377_v62 = vmul.f32 %v1018_v52, %v266_v33 }
  0x28   : > { %v378_v63 = vmul.f32 %v1018_v52, %v361_v25  ;;  %v379_v0 = vmul.f32 %v1018_v52, %v267_v34  ;;  %v380_v1 = vmul.f32 %v1018_v52, %v362_v55  ;;  %v381_v9 = vmul.f32 %v1018_v52, %v268_v35 }
  0x29   : > { %v382_v30 = vmul.f32 %v1018_v52, %v363_v56  ;;  %v383_v10 = vmul.f32 %v1018_v52, %v269_v36  ;;  %v384_v31 = vmul.f32 %v1018_v52, %v364_v57  ;;  %v385_v15 = vmul.f32 %v1018_v52, %v270_v37 }
  0x2a   : > { %v403_v32 = vrot.slane %v370_v58, 2  ;;  %v404_v2 = vrot.slane %v371_v26, 2  ;;  %v406_v16 = vrot.slane %v372_v59, 2  ;;  %v407_v33 = vrot.slane %v373_v27, 2  ;;  %v1269_v59 = vld [vmem:[%s1134_s20 + $0xc] sm:$0x1] }
  0x2b   : > { %v409_v3 = vrot.slane %v374_v60, 2  ;;  %v410_v17 = vrot.slane %v375_v61, 2  ;;  %v412_v34 = vrot.slane %v376_v28, 2  ;;  %v413_v4 = vrot.slane %v377_v62, 2  ;;  %v1275_v62 = vld [vmem:[%s1134_s20 + $0x1c] sm:$0x1] }
  0x2c   : > { %v405_v22 = vsel %vm402_vm1, %v403_v32, %v404_v2  ;;  %v408_v35 = vsel %vm402_vm1, %v406_v16, %v407_v33  ;;  %v415_v23 = vrot.slane %v378_v63, 2  ;;  %v416_v36 = vrot.slane %v379_v0, 2  ;;  %v1278_v63 = vld [vmem:[%s1134_s20 + $0x24] sm:$0x1]  ;;  %v1281_v0 = vld [vmem:[%s1134_s20 + $0x2c] sm:$0x1] }
  0x2d   : > { %v411_v5 = vsel %vm402_vm1, %v409_v3, %v410_v17  ;;  %v414_v24 = vsel %vm402_vm1, %v412_v34, %v413_v4  ;;  %v418_v37 = vrot.slane %v380_v1, 2  ;;  %v419_v6 = vrot.slane %v381_v9, 2  ;;  %v1294_v32 = vld [vmem:[%s1134_s20 + $0x44] sm:$0x1] }
  0x2e   : > { %v417_v7 = vsel %vm402_vm1, %v415_v23, %v416_v36  ;;  %v421_v8 = vrot.slane %v382_v30, 2  ;;  %v422_v11 = vrot.slane %v383_v10, 2  ;;  %v424_v12 = vrot.slane %v384_v31, 2  ;;  %v1288_v31 = vld [vmem:[%s1134_s20 + $0x34] sm:$0x1] }
  0x2f   : > { %v420_v14 = vsel %vm402_vm1, %v418_v37, %v419_v6  ;;  %v425_v29 = vrot.slane %v385_v15, 2  ;;  %v435_v38 = vadd.f32 %v405_v22, %v1213_v39  ;;  %v436_v41 = vadd.f32 %v408_v35, %v1215_v40  ;;  %v1027_v39 = vld [vmem:[%s1559_s1 + $0x3] ss:$0 sm:$0xff]  ;;  %v1291_v15 = vld [vmem:[%s1134_s20 + $0x3c] sm:$0x1] }
  0x30   : > { %v423_v43 = vsel %vm402_vm1, %v421_v8, %v422_v11  ;;  %v437_v47 = vadd.f32 %v411_v5, %v1221_v44  ;;  %v438_v48 = vadd.f32 %v414_v24, %v344_v45  ;;  %v439_v49 = vadd.f32 %v417_v7, %v345_v46  ;;  %v1036_v17 = vld [vmem:[%s1559_s1 + $0x4] ss:$0 sm:$0xff] }
  0x31   : > { %v426_v52 = vsel %vm402_vm1, %v424_v12, %v425_v29  ;;  %v440_v53 = vadd.f32 %v420_v14, %v346_v18  ;;  %v441_v54 = vadd.f32 %v423_v43, %v347_v19  ;;  %v452_v21 = vunpack.c.l.bf16 %v1019_v13 }
  0x32   : > { %v442_v40 = vadd.f32 %v426_v52, %v348_v20  ;;  %v453_v25 = vunpack.c.h.bf16 %v1019_v13  ;;  %v454_v55 = vunpack.c.l.bf16 %v1021_v42  ;;  %v455_v44 = vunpack.c.h.bf16 %v1021_v42  ;;  %v1272_v20 = vld [vmem:[%s1134_s20 + $0x14] sm:$0x1] }
  0x33   : > { %v456_v45 = vunpack.c.l.bf16 %v1023_v50  ;;  %v457_v46 = vunpack.c.h.bf16 %v1023_v50  ;;  %v458_v56 = vunpack.c.l.bf16 %v1025_v51  ;;  %v459_v57 = vunpack.c.h.bf16 %v1025_v51 }
  0x34   : > { %v465_v18 = vmul.f32 %v1027_v39, %v452_v21  ;;  %v466_v58 = vmul.f32 %v1027_v39, %v453_v25  ;;  %v467_v19 = vmul.f32 %v1027_v39, %v454_v55  ;;  %v468_v26 = vmul.f32 %v1027_v39, %v455_v44 }
  0x35   : > { %v469_v27 = vmul.f32 %v1027_v39, %v456_v45  ;;  %v470_v60 = vmul.f32 %v1027_v39, %v457_v46  ;;  %v471_v61 = vmul.f32 %v1027_v39, %v458_v56  ;;  %v472_v28 = vmul.f32 %v1027_v39, %v459_v57 }
  0x36   : > { %v473_v1 = vadd.f32 %v465_v18, %v435_v38  ;;  %v474_v9 = vadd.f32 %v466_v58, %v436_v41  ;;  %v1283_v30 = vadd.f32 %v467_v19, %v437_v47  ;;  %v1285_v10 = vadd.f32 %v468_v26, %v438_v48  ;;  %v1037_v58 = vld [vmem:[%s1134_s20 + $0x8] sm:$0xe]  ;;  %v1038_v19 = vld [vmem:[%s1134_s20 + $0x10] sm:$0xe] }
  0x37   : > { %v477_v2 = vadd.f32 %v469_v27, %v439_v49  ;;  %v1296_v16 = vadd.f32 %v470_v60, %v440_v53  ;;  %v1298_v33 = vadd.f32 %v471_v61, %v441_v54  ;;  %v1300_v3 = vadd.f32 %v472_v28, %v442_v40  ;;  %v1039_v28 = vld [vmem:[%s1134_s20 + $0x18] sm:$0xe] }
  0x38   : > { %v489_v34 = vunpack.c.l.bf16 %v1269_v59  ;;  %v490_v4 = vunpack.c.l.bf16 %v1272_v20  ;;  %v491_v22 = vunpack.c.l.bf16 %v1275_v62  ;;  %v492_v35 = vunpack.c.l.bf16 %v1278_v63 }
  0x39   : > { %v493_v23 = vunpack.c.l.bf16 %v1281_v0  ;;  %v494_v36 = vunpack.c.l.bf16 %v1288_v31  ;;  %v495_v5 = vunpack.c.l.bf16 %v1291_v15  ;;  %v496_v24 = vunpack.c.l.bf16 %v1294_v32 }
  0x3a   : > { %v502_v37 = vmul.f32 %v1036_v17, %v452_v21  ;;  %v503_v6 = vmul.f32 %v1036_v17, %v489_v34  ;;  %v504_v7 = vmul.f32 %v1036_v17, %v453_v25  ;;  %v505_v8 = vmul.f32 %v1036_v17, %v490_v4 }
  0x3b   : > { %v506_v11 = vmul.f32 %v1036_v17, %v454_v55  ;;  %v507_v12 = vmul.f32 %v1036_v17, %v491_v22  ;;  %v508_v13 = vmul.f32 %v1036_v17, %v455_v44  ;;  %v509_v14 = vmul.f32 %v1036_v17, %v492_v35 }
  0x3c   : > { %v510_v29 = vmul.f32 %v1036_v17, %v456_v45  ;;  %v511_v38 = vmul.f32 %v1036_v17, %v493_v23  ;;  %v512_v41 = vmul.f32 %v1036_v17, %v457_v46  ;;  %v513_v42 = vmul.f32 %v1036_v17, %v494_v36 }
  0x3d   : > { %v514_v43 = vmul.f32 %v1036_v17, %v458_v56  ;;  %v515_v47 = vmul.f32 %v1036_v17, %v495_v5  ;;  %v516_v48 = vmul.f32 %v1036_v17, %v459_v57  ;;  %v517_v49 = vmul.f32 %v1036_v17, %v496_v24 }
  0x3e   : > { %v534_v50 = vrot.slane %v502_v37, 1  ;;  %v535_v51 = vrot.slane %v503_v6, 1  ;;  %v537_v52 = vrot.slane %v504_v7, 1  ;;  %v538_v53 = vrot.slane %v505_v8, 1  ;;  %v1040_v8 = vld [vmem:[%s1134_s20 + $0x20] sm:$0xe] }
  0x3f   : > { %v540_v54 = vrot.slane %v506_v11, 1  ;;  %v541_v21 = vrot.slane %v507_v12, 1  ;;  %v543_v39 = vrot.slane %v508_v13, 1  ;;  %v544_v40 = vrot.slane %v509_v14, 1  ;;  %v1041_v11 = vld [vmem:[%s1134_s20 + $0x28] sm:$0xe] }
  0x40   : > { %v536_v25 = vsel %vm308_vm0, %v534_v50, %v535_v51  ;;  %v539_v55 = vsel %vm308_vm0, %v537_v52, %v538_v53  ;;  %v546_v44 = vrot.slane %v510_v29, 1  ;;  %v547_v45 = vrot.slane %v511_v38, 1  ;;  %v1042_v38 = vld [vmem:[%s1134_s20 + $0x30] sm:$0xe] }
  0x41   : > { %v542_v46 = vsel %vm308_vm0, %v540_v54, %v541_v21  ;;  %v545_v56 = vsel %vm308_vm0, %v543_v39, %v544_v40  ;;  %v549_v57 = vrot.slane %v512_v41, 1  ;;  %v550_v18 = vrot.slane %v513_v42, 1  ;;  %v1043_v41 = vld [vmem:[%s1134_s20 + $0x38] sm:$0xe]  ;;  %v1044_v42 = vld [vmem:[%s1134_s20 + $0x40] sm:$0xe] }
  0x42   : > { %v548_v26 = vsel %vm308_vm0, %v546_v44, %v547_v45  ;;  %v552_v27 = vrot.slane %v514_v43, 1  ;;  %v553_v60 = vrot.slane %v515_v47, 1  ;;  %v555_v61 = vrot.slane %v516_v48, 1  ;;  %v1045_v48 = vld [vmem:[%s1559_s1 + $0x5] ss:$0 sm:$0xff] }
  0x43   : > { %v551_v17 = vsel %vm308_vm0, %v549_v57, %v550_v18  ;;  %v556_v37 = vrot.slane %v517_v49, 1  ;;  %v1338_v6 = vadd.f32 %v536_v25, %v473_v1  ;;  %v1340_v7 = vadd.f32 %v539_v55, %v474_v9 }
  0x44   : > { %v554_v12 = vsel %vm308_vm0, %v552_v27, %v553_v60  ;;  %v1346_v13 = vadd.f32 %v542_v46, %v1283_v30  ;;  %v569_v14 = vadd.f32 %v545_v56, %v1285_v10  ;;  %v570_v29 = vadd.f32 %v548_v26, %v477_v2 }
  0x45   : > { %v557_v43 = vsel %vm308_vm0, %v555_v61, %v556_v37  ;;  %v571_v1 = vadd.f32 %v551_v17, %v1296_v16  ;;  %v572_v9 = vadd.f32 %v554_v12, %v1298_v33  ;;  %v582_v47 = vunpack.c.l.bf16 %v1037_v58  ;;  %v1046_v61 = vld [vmem:[%s1134_s20 + $0x10] ss:$8 sps:$4 sm:$0xff]  }
  0x46   : > { %v573_v30 = vadd.f32 %v557_v43, %v1300_v3  ;;  %v583_v49 = vunpack.c.l.bf16 %v1038_v19  ;;  %v584_v50 = vunpack.c.l.bf16 %v1039_v28  ;;  %v585_v10 = vunpack.c.l.bf16 %v1040_v8  ;;  %v1050_v43 = vld [vmem:[%s1134_s20 + $0x30] ss:$8 sps:$4 sm:$0xff]  }
  0x47   : > { %v586_v2 = vunpack.c.l.bf16 %v1041_v11  ;;  %v587_v51 = vunpack.c.l.bf16 %v1042_v38  ;;  %v588_v52 = vunpack.c.l.bf16 %v1043_v41  ;;  %v589_v53 = vunpack.c.l.bf16 %v1044_v42  ;;  %v1048_v11 = vld [vmem:[%s1134_s20 + $0x20] ss:$8 sps:$4 sm:$0xff]  }
  0x48   : > { %v595_v54 = vmul.f32 %v1045_v48, %v582_v47  ;;  %v596_v16 = vmul.f32 %v1045_v48, %v489_v34  ;;  %v597_v21 = vmul.f32 %v1045_v48, %v583_v49  ;;  %v598_v33 = vmul.f32 %v1045_v48, %v490_v4  ;;  %v1052_v47 = vld [vmem:[%s1134_s20 + $0x40] ss:$8 sps:$4 sm:$0xff]  }
  0x49   : > { %v599_v39 = vmul.f32 %v1045_v48, %v584_v50  ;;  %v600_v40 = vmul.f32 %v1045_v48, %v491_v22  ;;  %v601_v3 = vmul.f32 %v1045_v48, %v585_v10  ;;  %v602_v25 = vmul.f32 %v1045_v48, %v492_v35 }
  0x4a   : > { %v603_v55 = vmul.f32 %v1045_v48, %v586_v2  ;;  %v604_v44 = vmul.f32 %v1045_v48, %v493_v23  ;;  %v605_v45 = vmul.f32 %v1045_v48, %v587_v51  ;;  %v606_v59 = vmul.f32 %v1045_v48, %v494_v36 }
  0x4b   : > { %v607_v34 = vmul.f32 %v1045_v48, %v588_v52  ;;  %v608_v20 = vmul.f32 %v1045_v48, %v495_v5  ;;  %v609_v4 = vmul.f32 %v1045_v48, %v589_v53  ;;  %v610_v62 = vmul.f32 %v1045_v48, %v496_v24 }
  0x4c   : > { %v627_v22 = vrot.slane %v595_v54, 2  ;;  %v628_v46 = vrot.slane %v596_v16, 2  ;;  %v630_v63 = vrot.slane %v597_v21, 2  ;;  %v631_v35 = vrot.slane %v598_v33, 2  ;;  %v1394_v21 = vld [vmem:[%s1134_s20 + $0x14] sm:$0x1] }
  0x4d   : > { %v633_v56 = vrot.slane %v599_v39, 2  ;;  %v634_v0 = vrot.slane %v600_v40, 2  ;;  %v636_v23 = vrot.slane %v601_v3, 2  ;;  %v637_v57 = vrot.slane %v602_v25, 2  ;;  %v1400_v25 = vld [vmem:[%s1134_s20 + $0x24] sm:$0x1] }
  0x4e   : > { %v629_v31 = vsel %vm402_vm1, %v627_v22, %v628_v46  ;;  %v632_v36 = vsel %vm402_vm1, %v630_v63, %v631_v35  ;;  %v639_v15 = vrot.slane %v603_v55, 2  ;;  %v640_v5 = vrot.slane %v604_v44, 2  ;;  %v1403_v55 = vld [vmem:[%s1134_s20 + $0x2c] sm:$0x1]  ;;  %v1406_v44 = vld [vmem:[%s1134_s20 + $0x34] sm:$0x1] }
  0x4f   : > { %v635_v18 = vsel %vm402_vm1, %v633_v56, %v634_v0  ;;  %v638_v32 = vsel %vm402_vm1, %v636_v23, %v637_v57  ;;  %v642_v24 = vrot.slane %v605_v45, 2  ;;  %v643_v58 = vrot.slane %v606_v59, 2  ;;  %v1419_v22 = vld [vmem:[%s1134_s20 + $0x4c] sm:$0x1]  ;;  %v1063_v0 = vld [vmem:[%s1559_s1 + $0x7] ss:$0 sm:$0xff] }
  0x50   : > { %v641_v19 = vsel %vm402_vm1, %v639_v15, %v640_v5  ;;  %v645_v26 = vrot.slane %v607_v34, 2  ;;  %v646_v27 = vrot.slane %v608_v20, 2  ;;  %v648_v60 = vrot.slane %v609_v4, 2  ;;  %v1413_v4 = vld [vmem:[%s1134_s20 + $0x3c] sm:$0x1] }
  0x51   : > { %v644_v28 = vsel %vm402_vm1, %v642_v24, %v643_v58  ;;  %v649_v17 = vrot.slane %v610_v62, 2  ;;  %v659_v37 = vadd.f32 %v629_v31, %v1338_v6  ;;  %v660_v8 = vadd.f32 %v632_v36, %v1340_v7  ;;  %v1054_v6 = vld [vmem:[%s1559_s1 + $0x6] ss:$0 sm:$0xff]  ;;  %v1416_v62 = vld [vmem:[%s1134_s20 + $0x44] sm:$0x1] }
  0x52   : > { %v647_v12 = vsel %vm402_vm1, %v645_v26, %v646_v27  ;;  %v661_v38 = vadd.f32 %v635_v18, %v1346_v13  ;;  %v662_v41 = vadd.f32 %v638_v32, %v569_v14  ;;  %v663_v42 = vadd.f32 %v641_v19, %v570_v29 }
  0x53   : > { %v650_v48 = vsel %vm402_vm1, %v648_v60, %v649_v17  ;;  %v664_v49 = vadd.f32 %v644_v28, %v571_v1  ;;  %v665_v50 = vadd.f32 %v647_v12, %v572_v9  ;;  %v676_v10 = vunpack.c.l.bf16 %v1046_v61 }
  0x54   : > { %v666_v7 = vadd.f32 %v650_v48, %v573_v30  ;;  %v677_v2 = vunpack.c.h.bf16 %v1046_v61  ;;  %v678_v51 = vunpack.c.l.bf16 %v1048_v11  ;;  %v679_v13 = vunpack.c.h.bf16 %v1048_v11  ;;  %v1397_v30 = vld [vmem:[%s1134_s20 + $0x1c] sm:$0x1] }
  0x55   : > { %v680_v14 = vunpack.c.l.bf16 %v1050_v43  ;;  %v681_v29 = vunpack.c.h.bf16 %v1050_v43  ;;  %v682_v52 = vunpack.c.l.bf16 %v1052_v47  ;;  %v683_v53 = vunpack.c.h.bf16 %v1052_v47 }
  0x56   : > { %v689_v1 = vmul.f32 %v1054_v6, %v676_v10  ;;  %v690_v54 = vmul.f32 %v1054_v6, %v677_v2  ;;  %v691_v9 = vmul.f32 %v1054_v6, %v678_v51  ;;  %v692_v16 = vmul.f32 %v1054_v6, %v679_v13 }
  0x57   : > { %v693_v33 = vmul.f32 %v1054_v6, %v680_v14  ;;  %v694_v39 = vmul.f32 %v1054_v6, %v681_v29  ;;  %v695_v40 = vmul.f32 %v1054_v6, %v682_v52  ;;  %v696_v3 = vmul.f32 %v1054_v6, %v683_v53 }
  0x58   : > { %v697_v45 = vadd.f32 %v689_v1, %v659_v37  ;;  %v698_v59 = vadd.f32 %v690_v54, %v660_v8  ;;  %v1408_v34 = vadd.f32 %v691_v9, %v661_v38  ;;  %v1410_v20 = vadd.f32 %v692_v16, %v662_v41  ;;  %v1064_v54 = vld [vmem:[%s1134_s20 + $0x10] sm:$0xe]  ;;  %v1065_v9 = vld [vmem:[%s1134_s20 + $0x18] sm:$0xe] }
  0x59   : > { %v701_v46 = vadd.f32 %v693_v33, %v663_v42  ;;  %v1421_v63 = vadd.f32 %v694_v39, %v664_v49  ;;  %v1423_v35 = vadd.f32 %v695_v40, %v665_v50  ;;  %v1425_v56 = vadd.f32 %v696_v3, %v666_v7  ;;  %v1066_v3 = vld [vmem:[%s1134_s20 + $0x20] sm:$0xe] }
  0x5a   : > { %v713_v23 = vunpack.c.l.bf16 %v1394_v21  ;;  %v714_v57 = vunpack.c.l.bf16 %v1397_v30  ;;  %v715_v31 = vunpack.c.l.bf16 %v1400_v25  ;;  %v716_v36 = vunpack.c.l.bf16 %v1403_v55 }
  0x5b   : > { %v717_v15 = vunpack.c.l.bf16 %v1406_v44  ;;  %v718_v5 = vunpack.c.l.bf16 %v1413_v4  ;;  %v719_v18 = vunpack.c.l.bf16 %v1416_v62  ;;  %v720_v32 = vunpack.c.l.bf16 %v1419_v22 }
  0x5c   : > { %v726_v24 = vmul.f32 %v1063_v0, %v676_v10  ;;  %v727_v58 = vmul.f32 %v1063_v0, %v713_v23  ;;  %v728_v19 = vmul.f32 %v1063_v0, %v677_v2  ;;  %v729_v26 = vmul.f32 %v1063_v0, %v714_v57 }
  0x5d   : > { %v730_v27 = vmul.f32 %v1063_v0, %v678_v51  ;;  %v731_v60 = vmul.f32 %v1063_v0, %v715_v31  ;;  %v732_v61 = vmul.f32 %v1063_v0, %v679_v13  ;;  %v733_v28 = vmul.f32 %v1063_v0, %v716_v36 }
  0x5e   : > { %v734_v17 = vmul.f32 %v1063_v0, %v680_v14  ;;  %v735_v37 = vmul.f32 %v1063_v0, %v717_v15  ;;  %v736_v8 = vmul.f32 %v1063_v0, %v681_v29  ;;  %v737_v11 = vmul.f32 %v1063_v0, %v718_v5 }
  0x5f   : > { %v738_v12 = vmul.f32 %v1063_v0, %v682_v52  ;;  %v739_v38 = vmul.f32 %v1063_v0, %v719_v18  ;;  %v740_v41 = vmul.f32 %v1063_v0, %v683_v53  ;;  %v741_v42 = vmul.f32 %v1063_v0, %v720_v32 }
  0x60   : > { %v758_v43 = vrot.slane %v726_v24, 1  ;;  %v759_v47 = vrot.slane %v727_v58, 1  ;;  %v761_v48 = vrot.slane %v728_v19, 1  ;;  %v762_v49 = vrot.slane %v729_v26, 1  ;;  %v1067_v26 = vld [vmem:[%s1134_s20 + $0x28] sm:$0xe] }
  0x61   : > { %v764_v50 = vrot.slane %v730_v27, 1  ;;  %v765_v10 = vrot.slane %v731_v60, 1  ;;  %v767_v6 = vrot.slane %v732_v61, 1  ;;  %v768_v7 = vrot.slane %v733_v28, 1  ;;  %v1068_v27 = vld [vmem:[%s1134_s20 + $0x30] sm:$0xe] }
  0x62   : > { %v760_v2 = vsel %vm308_vm0, %v758_v43, %v759_v47  ;;  %v763_v51 = vsel %vm308_vm0, %v761_v48, %v762_v49  ;;  %v770_v13 = vrot.slane %v734_v17, 1  ;;  %v771_v14 = vrot.slane %v735_v37, 1  ;;  %v1069_v37 = vld [vmem:[%s1134_s20 + $0x38] sm:$0xe] }
  0x63   : > { %v766_v29 = vsel %vm308_vm0, %v764_v50, %v765_v10  ;;  %v769_v52 = vsel %vm308_vm0, %v767_v6, %v768_v7  ;;  %v773_v53 = vrot.slane %v736_v8, 1  ;;  %v774_v1 = vrot.slane %v737_v11, 1  ;;  %v1070_v8 = vld [vmem:[%s1134_s20 + $0x40] sm:$0xe]  ;;  %v1071_v11 = vld [vmem:[%s1134_s20 + $0x48] sm:$0xe] }
  0x64   : > { %v772_v16 = vsel %vm308_vm0, %v770_v13, %v771_v14  ;;  %v776_v33 = vrot.slane %v738_v12, 1  ;;  %v777_v39 = vrot.slane %v739_v38, 1  ;;  %v779_v40 = vrot.slane %v740_v41, 1 }
  0x65   : > { %v775_v0 = vsel %vm308_vm0, %v773_v53, %v774_v1  ;;  %v780_v24 = vrot.slane %v741_v42, 1  ;;  %v1463_v58 = vadd.f32 %v760_v2, %v697_v45  ;;  %v1465_v19 = vadd.f32 %v763_v51, %v698_v59 }
  0x66   : > { %v778_v60 = vsel %vm308_vm0, %v776_v33, %v777_v39  ;;  %v1471_v61 = vadd.f32 %v766_v29, %v1408_v34  ;;  %v1474_v28 = vadd.f32 %v769_v52, %v1410_v20  ;;  %v1476_v17 = vadd.f32 %v772_v16, %v701_v46  ;;  %v1072_v34 = vld [vmem:[%s1559_s1 + $0x8] ss:$0 sm:$0xff] }
  0x67   : > { %v781_v45 = vsel %vm308_vm0, %v779_v40, %v780_v24  ;;  %v1483_v59 = vadd.f32 %v775_v0, %v1421_v63  ;;  %v1486_v12 = vadd.f32 %v778_v60, %v1423_v35  ;;  %v806_v38 = vunpack.c.l.bf16 %v1064_v54  ;;  %v1073_v40 = vld [vmem:[%s1560_s2] ss:$0 sm:$0xff] }
  0x68   : > { %v1492_v20 = vadd.f32 %v781_v45, %v1425_v56  ;;  %v807_v46 = vunpack.c.l.bf16 %v1065_v9  ;;  %v808_v41 = vunpack.c.l.bf16 %v1066_v3  ;;  %v809_v42 = vunpack.c.l.bf16 %v1067_v26 }
  0x69   : > { %v810_v43 = vunpack.c.l.bf16 %v1068_v27  ;;  %v811_v47 = vunpack.c.l.bf16 %v1069_v37  ;;  %v812_v48 = vunpack.c.l.bf16 %v1070_v8  ;;  %v813_v49 = vunpack.c.l.bf16 %v1071_v11  ;;  %v906_v11 = vld [vmem:[%s1516_s18] sm:$0xff] }
  0x6a   : > { %v819_v63 = vmul.f32 %v1072_v34, %v806_v38  ;;  %v820_v35 = vmul.f32 %v1072_v34, %v713_v23  ;;  %v821_v50 = vmul.f32 %v1072_v34, %v807_v46  ;;  %v822_v10 = vmul.f32 %v1072_v34, %v714_v57  ;;  %v908_v46 = vld [vmem:[%s1516_s18 + $0x10] sm:$0xff] }
  0x6b   : > { %v823_v6 = vmul.f32 %v1072_v34, %v808_v41  ;;  %v824_v56 = vmul.f32 %v1072_v34, %v715_v31  ;;  %v825_v7 = vmul.f32 %v1072_v34, %v809_v42  ;;  %v826_v2 = vmul.f32 %v1072_v34, %v716_v36 }
  0x6c   : > { %v827_v51 = vmul.f32 %v1072_v34, %v810_v43  ;;  %v828_v13 = vmul.f32 %v1072_v34, %v717_v15  ;;  %v829_v14 = vmul.f32 %v1072_v34, %v811_v47  ;;  %v830_v21 = vmul.f32 %v1072_v34, %v718_v5  ;;  %v911_v47 = vld [vmem:[%s1516_s18 + $0x28] sm:$0xff] }
  0x6d   : > { %v831_v23 = vmul.f32 %v1072_v34, %v812_v48  ;;  %v832_v30 = vmul.f32 %v1072_v34, %v719_v18  ;;  %v833_v57 = vmul.f32 %v1072_v34, %v813_v49  ;;  %v834_v25 = vmul.f32 %v1072_v34, %v720_v32  ;;  %v907_v34 = vld [vmem:[%s1516_s18 + $0x8] sm:$0xff]  ;;  %v912_v48 = vld [vmem:[%s1516_s18 + $0x30] sm:$0xff] }
  0x6e   : > { %v851_v31 = vrot.slane %v819_v63, 2  ;;  %v852_v55 = vrot.slane %v820_v35, 2  ;;  %v854_v36 = vrot.slane %v821_v50, 2  ;;  %v855_v29 = vrot.slane %v822_v10, 2  ;;  %v913_v50 = vld [vmem:[%s1516_s18 + $0x38] sm:$0xff] }
  0x6f   : > { %v857_v52 = vrot.slane %v823_v6, 2  ;;  %v858_v44 = vrot.slane %v824_v56, 2  ;;  %v860_v15 = vrot.slane %v825_v7, 2  ;;  %v861_v53 = vrot.slane %v826_v2, 2 }
  0x70   : > { %v853_v4 = vsel %vm402_vm1, %v851_v31, %v852_v55  ;;  %v856_v5 = vsel %vm402_vm1, %v854_v36, %v855_v29  ;;  %v863_v1 = vrot.slane %v827_v51, 2  ;;  %v864_v62 = vrot.slane %v828_v13, 2 }
  0x71   : > { %v859_v22 = vsel %vm402_vm1, %v857_v52, %v858_v44  ;;  %v862_v18 = vsel %vm402_vm1, %v860_v15, %v861_v53  ;;  %v866_v32 = vrot.slane %v829_v14, 2  ;;  %v867_v54 = vrot.slane %v830_v21, 2 }
  0x72   : > { %v865_v9 = vsel %vm402_vm1, %v863_v1, %v864_v62  ;;  %v869_v16 = vrot.slane %v831_v23, 2  ;;  %v870_v33 = vrot.slane %v832_v30, 2  ;;  %v872_v39 = vrot.slane %v833_v57, 2 }
  0x73   : > { %v868_v3 = vsel %vm402_vm1, %v866_v32, %v867_v54  ;;  %v873_v0 = vrot.slane %v834_v25, 2  ;;  %v883_v24 = vadd.f32 %v853_v4, %v1463_v58  ;;  %v884_v26 = vadd.f32 %v856_v5, %v1465_v19 }
  0x74   : > { %v871_v27 = vsel %vm402_vm1, %v869_v16, %v870_v33  ;;  %v885_v60 = vadd.f32 %v859_v22, %v1471_v61  ;;  %v886_v37 = vadd.f32 %v862_v18, %v1474_v28  ;;  %v887_v8 = vadd.f32 %v865_v9, %v1476_v17  ;;  %v909_v61 = vld [vmem:[%s1516_s18 + $0x18] sm:$0xff]  ;;  %v910_v17 = vld [vmem:[%s1516_s18 + $0x20] sm:$0xff] }
  0x75   : > { %v874_v45 = vsel %vm402_vm1, %v872_v39, %v873_v0  ;;  %v888_v38 = vadd.f32 %v868_v3, %v1483_v59  ;;  %v889_v58 = vadd.f32 %v871_v27, %v1486_v12  ;;  %v898_v19 = vadd.f32 %v1073_v40, %v883_v24 }
  0x76   : > { %v890_v41 = vadd.f32 %v874_v45, %v1492_v20  ;;  %v899_v28 = vadd.f32 %v1073_v40, %v884_v26  ;;  %v900_v42 = vadd.f32 %v1073_v40, %v885_v60  ;;  %v901_v43 = vadd.f32 %v1073_v40, %v886_v37 }
  0x77   : > { %v902_v49 = vadd.f32 %v1073_v40, %v887_v8  ;;  %v903_v63 = vadd.f32 %v1073_v40, %v888_v38  ;;  %v904_v35 = vadd.f32 %v1073_v40, %v889_v58  ;;  %v914_v59 = vadd.f32 %v906_v11, %v898_v19 }
  0x78   : > { %v905_v12 = vadd.f32 %v1073_v40, %v890_v41  ;;  %v915_v10 = vadd.f32 %v907_v34, %v899_v28  ;;  %v916_v6 = vadd.f32 %v908_v46, %v900_v42  ;;  %v917_v56 = vadd.f32 %v909_v61, %v901_v43 }
  0x79   : > { %v918_v20 = vadd.f32 %v910_v17, %v902_v49  ;;  %v919_v7 = vadd.f32 %v911_v47, %v903_v63  ;;  %v920_v2 = vadd.f32 %v912_v48, %v904_v35  ;;  %v922_v51 = vpack.c.bf16 %v914_v59, %v914_v59 }
  0x7a   : > { %v921_v13 = vadd.f32 %v913_v50, %v905_v12  ;;  %v923_v14 = vpack.c.bf16 %v915_v10, %v915_v10  ;;  %v924_v21 = vpack.c.bf16 %v916_v6, %v916_v6  ;;  %v925_v23 = vpack.c.bf16 %v917_v56, %v917_v56 }
  0x7b   : > { %v926_v30 = vpack.c.bf16 %v918_v20, %v918_v20  ;;  %v927_v57 = vpack.c.bf16 %v919_v7, %v919_v7  ;;  %v928_v25 = vpack.c.bf16 %v920_v2, %v920_v2  ;;  %931 = vst.msk [vmem:[%s217_s23] sm:$0xf] %vm930_vm2, %v922_v51 }
  0x7c   : > { %v929_v31 = vpack.c.bf16 %v921_v13, %v921_v13  ;;  %932 = vst.msk [vmem:[%s217_s23 + $0x4] sm:$0xf] %vm930_vm2, %v923_v14  ;;  %933 = vst.msk [vmem:[%s217_s23 + $0x8] sm:$0xf] %vm930_vm2, %v924_v21 }
  0x7d   : > { %934 = vst.msk [vmem:[%s217_s23 + $0xc] sm:$0xf] %vm930_vm2, %v925_v23  ;;  %935 = vst.msk [vmem:[%s217_s23 + $0x10] sm:$0xf] %vm930_vm2, %v926_v30 }
  0x7e   : > { %936 = vst.msk [vmem:[%s217_s23 + $0x14] sm:$0xf] %vm930_vm2, %v927_v57  ;;  %937 = vst.msk [vmem:[%s217_s23 + $0x18] sm:$0xf] %vm930_vm2, %v928_v25 }
  0x7f   : > { %938 = vst.msk [vmem:[%s217_s23 + $0x1c] sm:$0xf] %vm930_vm2, %v929_v31 }
  0x80 PF: > { %s14_s15 = sadd.s32 1, %s1093_s15  }
  0x81   : > { %p11_p4 = scmp.ge.s32.totalorder %s14_s15, 4  }
  0x83   :  { %13 = sbr.rel (!%p11_p4) target bundleno = 1 (0x1), region = 71 }

// kernel: basic_layer_up_forward.25
= control target key start
LH: loop header
LB: loop body
LE: loop exit
PB: predicated region body
PF: predicated region fallthrough
CT: control target
= control target key end

     0   :  { %s1133_s12 = smov 0   ;;  %s1547_s0 = inlined_call_operand.vmem [shape: bf16[2,10,10,32], index: 0, kind: input, shape index: {}]   ;;  %s1548_s1 = inlined_call_operand.vmem [shape: f32[9,32], index: 1, kind: input, shape index: {}]   ;;  %s1549_s2 = inlined_call_operand.vmem [shape: f32[1,32], index: 2, kind: input, shape index: {}]   ;;  %s1550_s3 = inlined_call_operand.vmem [shape: bf16[2,8,8,32], index: 3, kind: output, shape index: {}]  }
   0x1 LB: > { %s987_s13 = sadd.s32 4294967295, %s1111_s12   ;;  %p991_p0 = scmp.ge.s32.totalorder %s1111_s12, 1  ;;  %s1111_s12 = sphi %s1133_s12, %s13_s12  }
   0x2   : > { %p137_p1 = scmp.lt.s32.totalorder %s1111_s12, 3 }
   0x4   : > { %p138_p2 = pnand %p991_p0, %p137_p1 }
   0x5   : > { %p161_p3 = scmp.lt.s32.totalorder (!%p138_p2), %s987_s13, 1  ;;  %v995_v0 = vld [vmem:[%s1548_s1] ss:$0 sm:$0xff] (!%p138_p2)  ;;  %vm261_vm0 = vcmask (!%p138_p2), 1046528   ;;  %v996_v29 = vld [vmem:[%s1548_s1 + $0x1] ss:$0 sm:$0xff] (!%p138_p2) }
   0x6   : > { %141 = sbr.rel (%p138_p2) target bundleno = 157 (0x9d), region = 32  ;;  %vm355_vm1 = vcmask (!%p138_p2), 1045504   ;;  %vm923_vm2 = vcmask (!%p138_p2), 257024  }
   0xd   : > { %s1552_s13 = smov (!%p161_p3, %s987_s13), 1 }
   0xe   : > { %s1064_s14 = smul.u32 80, %s1552_s13  ;;  %s1063_s11 = sshll.u32 %s1552_s13, 5 }
   0xf   : > { %s170_s16 = scalar_lea.vmem %s1550_s3, %s1063_s11 }
  0x10   : > { %s1147_s17 = scalar_lea.vmem %s1547_s0, %s1064_s14 }
  0x11   : > { %v171_v1 = vld [vmem:[%s1147_s17] ss:$8 sps:$4 sm:$0xff]   ;;  %v173_v2 = vld [vmem:[%s1147_s17 + $0x10] ss:$8 sps:$4 sm:$0xff]   ;;  %v1157_v9 = vld [vmem:[%s1147_s17 + $0x4] sm:$0x1] }
  0x12   : > { %v175_v3 = vld [vmem:[%s1147_s17 + $0x20] ss:$8 sps:$4 sm:$0xff]   ;;  %v177_v4 = vld [vmem:[%s1147_s17 + $0x30] ss:$8 sps:$4 sm:$0xff]   ;;  %v179_v5 = vunpack.c.l.bf16 %v171_v1  ;;  %v180_v6 = vunpack.c.h.bf16 %v171_v1  ;;  %v181_v7 = vunpack.c.l.bf16 %v173_v2  ;;  %v182_v8 = vunpack.c.h.bf16 %v173_v2  ;;  %v1160_v10 = vld [vmem:[%s1147_s17 + $0xc] sm:$0x1] }
  0x13   : > { %v183_v11 = vunpack.c.l.bf16 %v175_v3  ;;  %v184_v12 = vunpack.c.h.bf16 %v175_v3  ;;  %v185_v13 = vunpack.c.l.bf16 %v177_v4  ;;  %v186_v14 = vunpack.c.h.bf16 %v177_v4  ;;  %v1163_v15 = vld [vmem:[%s1147_s17 + $0x14] sm:$0x1]  ;;  %v1166_v16 = vld [vmem:[%s1147_s17 + $0x1c] sm:$0x1]  ;;  %v1169_v17 = vld [vmem:[%s1147_s17 + $0x24] sm:$0x1] }
  0x14   : > { %v192_v18 = vmul.f32 %v995_v0, %v179_v5  ;;  %v193_v19 = vmul.f32 %v995_v0, %v180_v6  ;;  %v1171_v20 = vmul.f32 %v995_v0, %v181_v7  ;;  %v1173_v21 = vmul.f32 %v995_v0, %v182_v8  ;;  %v1176_v22 = vld [vmem:[%s1147_s17 + $0x2c] sm:$0x1]  ;;  %v1179_v23 = vld [vmem:[%s1147_s17 + $0x34] sm:$0x1]  ;;  %v1182_v24 = vld [vmem:[%s1147_s17 + $0x3c] sm:$0x1] }
  0x15   : > { %v196_v25 = vmul.f32 %v995_v0, %v183_v11  ;;  %v1184_v26 = vmul.f32 %v995_v0, %v184_v12  ;;  %v1186_v27 = vmul.f32 %v995_v0, %v185_v13  ;;  %v1188_v28 = vmul.f32 %v995_v0, %v186_v14 }
  0x16   : > { %v216_v30 = vunpack.c.l.bf16 %v1157_v9  ;;  %v217_v31 = vunpack.c.l.bf16 %v1160_v10  ;;  %v218_v32 = vunpack.c.l.bf16 %v1163_v15  ;;  %v219_v33 = vunpack.c.l.bf16 %v1166_v16 }
  0x17   : > { %v220_v34 = vunpack.c.l.bf16 %v1169_v17  ;;  %v221_v35 = vunpack.c.l.bf16 %v1176_v22  ;;  %v222_v36 = vunpack.c.l.bf16 %v1179_v23  ;;  %v223_v37 = vunpack.c.l.bf16 %v1182_v24 }
  0x18   : > { %v229_v38 = vmul.f32 %v996_v29, %v179_v5  ;;  %v230_v39 = vmul.f32 %v996_v29, %v216_v30  ;;  %v231_v40 = vmul.f32 %v996_v29, %v180_v6  ;;  %v232_v41 = vmul.f32 %v996_v29, %v217_v31  ;;  %v302_v6 = vld [vmem:[%s1147_s17] sm:$0xe] }
  0x19   : > { %v233_v42 = vmul.f32 %v996_v29, %v181_v7  ;;  %v234_v43 = vmul.f32 %v996_v29, %v218_v32  ;;  %v235_v44 = vmul.f32 %v996_v29, %v182_v8  ;;  %v236_v45 = vmul.f32 %v996_v29, %v219_v33  ;;  %v303_v7 = vld [vmem:[%s1147_s17 + $0x8] sm:$0xe] }
  0x1a   : > { %v237_v46 = vmul.f32 %v996_v29, %v183_v11  ;;  %v238_v47 = vmul.f32 %v996_v29, %v220_v34  ;;  %v239_v48 = vmul.f32 %v996_v29, %v184_v12  ;;  %v240_v49 = vmul.f32 %v996_v29, %v221_v35 }
  0x1b   : > { %v241_v50 = vmul.f32 %v996_v29, %v185_v13  ;;  %v242_v51 = vmul.f32 %v996_v29, %v222_v36  ;;  %v243_v52 = vmul.f32 %v996_v29, %v186_v14  ;;  %v244_v53 = vmul.f32 %v996_v29, %v223_v37  ;;  %v304_v14 = vld [vmem:[%s1147_s17 + $0x10] sm:$0xe] }
  0x1c   : > { %v262_v54 = vrot.slane %v229_v38, 1  ;;  %v263_v55 = vrot.slane %v230_v39, 1  ;;  %v265_v56 = vrot.slane %v231_v40, 1  ;;  %v266_v57 = vrot.slane %v232_v41, 1  ;;  %v305_v41 = vld [vmem:[%s1147_s17 + $0x18] sm:$0xe] }
  0x1d   : > { %v268_v58 = vrot.slane %v233_v42, 1  ;;  %v269_v59 = vrot.slane %v234_v43, 1  ;;  %v271_v60 = vrot.slane %v235_v44, 1  ;;  %v272_v61 = vrot.slane %v236_v45, 1  ;;  %v306_v42 = vld [vmem:[%s1147_s17 + $0x20] sm:$0xe] }
  0x1e   : > { %v264_v62 = vsel %vm261_vm0, %v262_v54, %v263_v55  ;;  %v267_v63 = vsel %vm261_vm0, %v265_v56, %v266_v57  ;;  %v274_v0 = vrot.slane %v237_v46, 1  ;;  %v275_v1 = vrot.slane %v238_v47, 1  ;;  %v307_v47 = vld [vmem:[%s1147_s17 + $0x28] sm:$0xe] }
  0x1f   : > { %v270_v2 = vsel %vm261_vm0, %v268_v58, %v269_v59  ;;  %v273_v3 = vsel %vm261_vm0, %v271_v60, %v272_v61  ;;  %v277_v4 = vrot.slane %v239_v48, 1  ;;  %v278_v5 = vrot.slane %v240_v49, 1  ;;  %v308_v48 = vld [vmem:[%s1147_s17 + $0x30] sm:$0xe]  ;;  %v309_v49 = vld [vmem:[%s1147_s17 + $0x38] sm:$0xe] }
  0x20   : > { %v276_v8 = vsel %vm261_vm0, %v274_v0, %v275_v1  ;;  %v280_v11 = vrot.slane %v241_v50, 1  ;;  %v281_v12 = vrot.slane %v242_v51, 1  ;;  %v283_v13 = vrot.slane %v243_v52, 1  ;;  %v997_v52 = vld [vmem:[%s1548_s1 + $0x2] ss:$0 sm:$0xff] }
  0x21   : > { %v279_v29 = vsel %vm261_vm0, %v277_v4, %v278_v5  ;;  %v284_v38 = vrot.slane %v244_v53, 1  ;;  %v1226_v39 = vadd.f32 %v264_v62, %v192_v18  ;;  %v1228_v40 = vadd.f32 %v267_v63, %v193_v19 }
  0x22   : > { %v282_v43 = vsel %vm261_vm0, %v280_v11, %v281_v12  ;;  %v1234_v44 = vadd.f32 %v270_v2, %v1171_v20  ;;  %v297_v45 = vadd.f32 %v273_v3, %v1173_v21  ;;  %v298_v46 = vadd.f32 %v276_v8, %v196_v25 }
  0x23   : > { %v285_v50 = vsel %vm261_vm0, %v283_v13, %v284_v38  ;;  %v299_v18 = vadd.f32 %v279_v29, %v1184_v26  ;;  %v300_v19 = vadd.f32 %v282_v43, %v1186_v27  ;;  %v310_v51 = vunpack.c.l.bf16 %v302_v6  ;;  %v998_v13 = vld [vmem:[%s1147_s17 + $0x8] ss:$8 sps:$4 sm:$0xff]  }
  0x24   : > { %v301_v20 = vadd.f32 %v285_v50, %v1188_v28  ;;  %v311_v53 = vunpack.c.l.bf16 %v303_v7  ;;  %v312_v54 = vunpack.c.l.bf16 %v304_v14  ;;  %v313_v21 = vunpack.c.l.bf16 %v305_v41  ;;  %v1002_v50 = vld [vmem:[%s1147_s17 + $0x28] ss:$8 sps:$4 sm:$0xff]  }
  0x25   : > { %v314_v25 = vunpack.c.l.bf16 %v306_v42  ;;  %v315_v55 = vunpack.c.l.bf16 %v307_v47  ;;  %v316_v56 = vunpack.c.l.bf16 %v308_v48  ;;  %v317_v57 = vunpack.c.l.bf16 %v309_v49  ;;  %v1000_v42 = vld [vmem:[%s1147_s17 + $0x18] ss:$8 sps:$4 sm:$0xff]  }
  0x26   : > { %v323_v58 = vmul.f32 %v997_v52, %v310_v51  ;;  %v324_v26 = vmul.f32 %v997_v52, %v216_v30  ;;  %v325_v59 = vmul.f32 %v997_v52, %v311_v53  ;;  %v326_v27 = vmul.f32 %v997_v52, %v217_v31  ;;  %v1004_v51 = vld [vmem:[%s1147_s17 + $0x38] ss:$8 sps:$4 sm:$0xff]  }
  0x27   : > { %v327_v60 = vmul.f32 %v997_v52, %v312_v54  ;;  %v328_v61 = vmul.f32 %v997_v52, %v218_v32  ;;  %v329_v28 = vmul.f32 %v997_v52, %v313_v21  ;;  %v330_v62 = vmul.f32 %v997_v52, %v219_v33 }
  0x28   : > { %v331_v63 = vmul.f32 %v997_v52, %v314_v25  ;;  %v332_v0 = vmul.f32 %v997_v52, %v220_v34  ;;  %v333_v1 = vmul.f32 %v997_v52, %v315_v55  ;;  %v334_v9 = vmul.f32 %v997_v52, %v221_v35 }
  0x29   : > { %v335_v30 = vmul.f32 %v997_v52, %v316_v56  ;;  %v336_v10 = vmul.f32 %v997_v52, %v222_v36  ;;  %v337_v31 = vmul.f32 %v997_v52, %v317_v57  ;;  %v338_v15 = vmul.f32 %v997_v52, %v223_v37 }
  0x2a   : > { %v356_v32 = vrot.slane %v323_v58, 2  ;;  %v357_v2 = vrot.slane %v324_v26, 2  ;;  %v359_v16 = vrot.slane %v325_v59, 2  ;;  %v360_v33 = vrot.slane %v326_v27, 2  ;;  %v1282_v59 = vld [vmem:[%s1147_s17 + $0xc] sm:$0x1] }
  0x2b   : > { %v362_v3 = vrot.slane %v327_v60, 2  ;;  %v363_v17 = vrot.slane %v328_v61, 2  ;;  %v365_v34 = vrot.slane %v329_v28, 2  ;;  %v366_v4 = vrot.slane %v330_v62, 2  ;;  %v1288_v62 = vld [vmem:[%s1147_s17 + $0x1c] sm:$0x1] }
  0x2c   : > { %v358_v22 = vsel %vm355_vm1, %v356_v32, %v357_v2  ;;  %v361_v35 = vsel %vm355_vm1, %v359_v16, %v360_v33  ;;  %v368_v23 = vrot.slane %v331_v63, 2  ;;  %v369_v36 = vrot.slane %v332_v0, 2  ;;  %v1291_v63 = vld [vmem:[%s1147_s17 + $0x24] sm:$0x1]  ;;  %v1294_v0 = vld [vmem:[%s1147_s17 + $0x2c] sm:$0x1] }
  0x2d   : > { %v364_v5 = vsel %vm355_vm1, %v362_v3, %v363_v17  ;;  %v367_v24 = vsel %vm355_vm1, %v365_v34, %v366_v4  ;;  %v371_v37 = vrot.slane %v333_v1, 2  ;;  %v372_v6 = vrot.slane %v334_v9, 2  ;;  %v1307_v32 = vld [vmem:[%s1147_s17 + $0x44] sm:$0x1] }
  0x2e   : > { %v370_v7 = vsel %vm355_vm1, %v368_v23, %v369_v36  ;;  %v374_v8 = vrot.slane %v335_v30, 2  ;;  %v375_v11 = vrot.slane %v336_v10, 2  ;;  %v377_v12 = vrot.slane %v337_v31, 2  ;;  %v1301_v31 = vld [vmem:[%s1147_s17 + $0x34] sm:$0x1] }
  0x2f   : > { %v373_v14 = vsel %vm355_vm1, %v371_v37, %v372_v6  ;;  %v378_v29 = vrot.slane %v338_v15, 2  ;;  %v388_v38 = vadd.f32 %v358_v22, %v1226_v39  ;;  %v389_v41 = vadd.f32 %v361_v35, %v1228_v40  ;;  %v1006_v39 = vld [vmem:[%s1548_s1 + $0x3] ss:$0 sm:$0xff]  ;;  %v1304_v15 = vld [vmem:[%s1147_s17 + $0x3c] sm:$0x1] }
  0x30   : > { %v376_v43 = vsel %vm355_vm1, %v374_v8, %v375_v11  ;;  %v390_v47 = vadd.f32 %v364_v5, %v1234_v44  ;;  %v391_v48 = vadd.f32 %v367_v24, %v297_v45  ;;  %v392_v49 = vadd.f32 %v370_v7, %v298_v46  ;;  %v1015_v17 = vld [vmem:[%s1548_s1 + $0x4] ss:$0 sm:$0xff] }
  0x31   : > { %v379_v52 = vsel %vm355_vm1, %v377_v12, %v378_v29  ;;  %v393_v53 = vadd.f32 %v373_v14, %v299_v18  ;;  %v394_v54 = vadd.f32 %v376_v43, %v300_v19  ;;  %v405_v21 = vunpack.c.l.bf16 %v998_v13 }
  0x32   : > { %v395_v40 = vadd.f32 %v379_v52, %v301_v20  ;;  %v406_v25 = vunpack.c.h.bf16 %v998_v13  ;;  %v407_v55 = vunpack.c.l.bf16 %v1000_v42  ;;  %v408_v44 = vunpack.c.h.bf16 %v1000_v42  ;;  %v1285_v20 = vld [vmem:[%s1147_s17 + $0x14] sm:$0x1] }
  0x33   : > { %v409_v45 = vunpack.c.l.bf16 %v1002_v50  ;;  %v410_v46 = vunpack.c.h.bf16 %v1002_v50  ;;  %v411_v56 = vunpack.c.l.bf16 %v1004_v51  ;;  %v412_v57 = vunpack.c.h.bf16 %v1004_v51 }
  0x34   : > { %v418_v18 = vmul.f32 %v1006_v39, %v405_v21  ;;  %v419_v58 = vmul.f32 %v1006_v39, %v406_v25  ;;  %v420_v19 = vmul.f32 %v1006_v39, %v407_v55  ;;  %v421_v26 = vmul.f32 %v1006_v39, %v408_v44 }
  0x35   : > { %v422_v27 = vmul.f32 %v1006_v39, %v409_v45  ;;  %v423_v60 = vmul.f32 %v1006_v39, %v410_v46  ;;  %v424_v61 = vmul.f32 %v1006_v39, %v411_v56  ;;  %v425_v28 = vmul.f32 %v1006_v39, %v412_v57 }
  0x36   : > { %v426_v1 = vadd.f32 %v418_v18, %v388_v38  ;;  %v427_v9 = vadd.f32 %v419_v58, %v389_v41  ;;  %v1296_v30 = vadd.f32 %v420_v19, %v390_v47  ;;  %v1298_v10 = vadd.f32 %v421_v26, %v391_v48  ;;  %v1016_v58 = vld [vmem:[%s1147_s17 + $0x8] sm:$0xe]  ;;  %v1017_v19 = vld [vmem:[%s1147_s17 + $0x10] sm:$0xe] }
  0x37   : > { %v430_v2 = vadd.f32 %v422_v27, %v392_v49  ;;  %v1309_v16 = vadd.f32 %v423_v60, %v393_v53  ;;  %v1311_v33 = vadd.f32 %v424_v61, %v394_v54  ;;  %v1313_v3 = vadd.f32 %v425_v28, %v395_v40  ;;  %v1018_v28 = vld [vmem:[%s1147_s17 + $0x18] sm:$0xe] }
  0x38   : > { %v442_v34 = vunpack.c.l.bf16 %v1282_v59  ;;  %v443_v4 = vunpack.c.l.bf16 %v1285_v20  ;;  %v444_v22 = vunpack.c.l.bf16 %v1288_v62  ;;  %v445_v35 = vunpack.c.l.bf16 %v1291_v63 }
  0x39   : > { %v446_v23 = vunpack.c.l.bf16 %v1294_v0  ;;  %v447_v36 = vunpack.c.l.bf16 %v1301_v31  ;;  %v448_v5 = vunpack.c.l.bf16 %v1304_v15  ;;  %v449_v24 = vunpack.c.l.bf16 %v1307_v32 }
  0x3a   : > { %v455_v37 = vmul.f32 %v1015_v17, %v405_v21  ;;  %v456_v6 = vmul.f32 %v1015_v17, %v442_v34  ;;  %v457_v7 = vmul.f32 %v1015_v17, %v406_v25  ;;  %v458_v8 = vmul.f32 %v1015_v17, %v443_v4 }
  0x3b   : > { %v459_v11 = vmul.f32 %v1015_v17, %v407_v55  ;;  %v460_v12 = vmul.f32 %v1015_v17, %v444_v22  ;;  %v461_v13 = vmul.f32 %v1015_v17, %v408_v44  ;;  %v462_v14 = vmul.f32 %v1015_v17, %v445_v35 }
  0x3c   : > { %v463_v29 = vmul.f32 %v1015_v17, %v409_v45  ;;  %v464_v38 = vmul.f32 %v1015_v17, %v446_v23  ;;  %v465_v41 = vmul.f32 %v1015_v17, %v410_v46  ;;  %v466_v42 = vmul.f32 %v1015_v17, %v447_v36 }
  0x3d   : > { %v467_v43 = vmul.f32 %v1015_v17, %v411_v56  ;;  %v468_v47 = vmul.f32 %v1015_v17, %v448_v5  ;;  %v469_v48 = vmul.f32 %v1015_v17, %v412_v57  ;;  %v470_v49 = vmul.f32 %v1015_v17, %v449_v24 }
  0x3e   : > { %v487_v50 = vrot.slane %v455_v37, 1  ;;  %v488_v51 = vrot.slane %v456_v6, 1  ;;  %v490_v52 = vrot.slane %v457_v7, 1  ;;  %v491_v53 = vrot.slane %v458_v8, 1  ;;  %v1019_v8 = vld [vmem:[%s1147_s17 + $0x20] sm:$0xe] }
  0x3f   : > { %v493_v54 = vrot.slane %v459_v11, 1  ;;  %v494_v21 = vrot.slane %v460_v12, 1  ;;  %v496_v39 = vrot.slane %v461_v13, 1  ;;  %v497_v40 = vrot.slane %v462_v14, 1  ;;  %v1020_v11 = vld [vmem:[%s1147_s17 + $0x28] sm:$0xe] }
  0x40   : > { %v489_v25 = vsel %vm261_vm0, %v487_v50, %v488_v51  ;;  %v492_v55 = vsel %vm261_vm0, %v490_v52, %v491_v53  ;;  %v499_v44 = vrot.slane %v463_v29, 1  ;;  %v500_v45 = vrot.slane %v464_v38, 1  ;;  %v1021_v38 = vld [vmem:[%s1147_s17 + $0x30] sm:$0xe] }
  0x41   : > { %v495_v46 = vsel %vm261_vm0, %v493_v54, %v494_v21  ;;  %v498_v56 = vsel %vm261_vm0, %v496_v39, %v497_v40  ;;  %v502_v57 = vrot.slane %v465_v41, 1  ;;  %v503_v18 = vrot.slane %v466_v42, 1  ;;  %v1022_v41 = vld [vmem:[%s1147_s17 + $0x38] sm:$0xe]  ;;  %v1023_v42 = vld [vmem:[%s1147_s17 + $0x40] sm:$0xe] }
  0x42   : > { %v501_v26 = vsel %vm261_vm0, %v499_v44, %v500_v45  ;;  %v505_v27 = vrot.slane %v467_v43, 1  ;;  %v506_v60 = vrot.slane %v468_v47, 1  ;;  %v508_v61 = vrot.slane %v469_v48, 1  ;;  %v1024_v48 = vld [vmem:[%s1548_s1 + $0x5] ss:$0 sm:$0xff] }
  0x43   : > { %v504_v17 = vsel %vm261_vm0, %v502_v57, %v503_v18  ;;  %v509_v37 = vrot.slane %v470_v49, 1  ;;  %v1351_v6 = vadd.f32 %v489_v25, %v426_v1  ;;  %v1353_v7 = vadd.f32 %v492_v55, %v427_v9 }
  0x44   : > { %v507_v12 = vsel %vm261_vm0, %v505_v27, %v506_v60  ;;  %v1359_v13 = vadd.f32 %v495_v46, %v1296_v30  ;;  %v522_v14 = vadd.f32 %v498_v56, %v1298_v10  ;;  %v523_v29 = vadd.f32 %v501_v26, %v430_v2 }
  0x45   : > { %v510_v43 = vsel %vm261_vm0, %v508_v61, %v509_v37  ;;  %v524_v1 = vadd.f32 %v504_v17, %v1309_v16  ;;  %v525_v9 = vadd.f32 %v507_v12, %v1311_v33  ;;  %v535_v47 = vunpack.c.l.bf16 %v1016_v58  ;;  %v1025_v61 = vld [vmem:[%s1147_s17 + $0x10] ss:$8 sps:$4 sm:$0xff]  }
  0x46   : > { %v526_v30 = vadd.f32 %v510_v43, %v1313_v3  ;;  %v536_v49 = vunpack.c.l.bf16 %v1017_v19  ;;  %v537_v50 = vunpack.c.l.bf16 %v1018_v28  ;;  %v538_v10 = vunpack.c.l.bf16 %v1019_v8  ;;  %v1029_v43 = vld [vmem:[%s1147_s17 + $0x30] ss:$8 sps:$4 sm:$0xff]  }
  0x47   : > { %v539_v2 = vunpack.c.l.bf16 %v1020_v11  ;;  %v540_v51 = vunpack.c.l.bf16 %v1021_v38  ;;  %v541_v52 = vunpack.c.l.bf16 %v1022_v41  ;;  %v542_v53 = vunpack.c.l.bf16 %v1023_v42  ;;  %v1027_v11 = vld [vmem:[%s1147_s17 + $0x20] ss:$8 sps:$4 sm:$0xff]  }
  0x48   : > { %v548_v54 = vmul.f32 %v1024_v48, %v535_v47  ;;  %v549_v16 = vmul.f32 %v1024_v48, %v442_v34  ;;  %v550_v21 = vmul.f32 %v1024_v48, %v536_v49  ;;  %v551_v33 = vmul.f32 %v1024_v48, %v443_v4  ;;  %v1031_v47 = vld [vmem:[%s1147_s17 + $0x40] ss:$8 sps:$4 sm:$0xff]  }
  0x49   : > { %v552_v39 = vmul.f32 %v1024_v48, %v537_v50  ;;  %v553_v40 = vmul.f32 %v1024_v48, %v444_v22  ;;  %v554_v3 = vmul.f32 %v1024_v48, %v538_v10  ;;  %v555_v25 = vmul.f32 %v1024_v48, %v445_v35 }
  0x4a   : > { %v556_v55 = vmul.f32 %v1024_v48, %v539_v2  ;;  %v557_v44 = vmul.f32 %v1024_v48, %v446_v23  ;;  %v558_v45 = vmul.f32 %v1024_v48, %v540_v51  ;;  %v559_v59 = vmul.f32 %v1024_v48, %v447_v36 }
  0x4b   : > { %v560_v34 = vmul.f32 %v1024_v48, %v541_v52  ;;  %v561_v20 = vmul.f32 %v1024_v48, %v448_v5  ;;  %v562_v4 = vmul.f32 %v1024_v48, %v542_v53  ;;  %v563_v62 = vmul.f32 %v1024_v48, %v449_v24 }
  0x4c   : > { %v580_v22 = vrot.slane %v548_v54, 2  ;;  %v581_v46 = vrot.slane %v549_v16, 2  ;;  %v583_v63 = vrot.slane %v550_v21, 2  ;;  %v584_v35 = vrot.slane %v551_v33, 2  ;;  %v1407_v21 = vld [vmem:[%s1147_s17 + $0x14] sm:$0x1] }
  0x4d   : > { %v586_v56 = vrot.slane %v552_v39, 2  ;;  %v587_v0 = vrot.slane %v553_v40, 2  ;;  %v589_v23 = vrot.slane %v554_v3, 2  ;;  %v590_v57 = vrot.slane %v555_v25, 2  ;;  %v1413_v25 = vld [vmem:[%s1147_s17 + $0x24] sm:$0x1] }
  0x4e   : > { %v582_v31 = vsel %vm355_vm1, %v580_v22, %v581_v46  ;;  %v585_v36 = vsel %vm355_vm1, %v583_v63, %v584_v35  ;;  %v592_v15 = vrot.slane %v556_v55, 2  ;;  %v593_v5 = vrot.slane %v557_v44, 2  ;;  %v1416_v55 = vld [vmem:[%s1147_s17 + $0x2c] sm:$0x1]  ;;  %v1419_v44 = vld [vmem:[%s1147_s17 + $0x34] sm:$0x1] }
  0x4f   : > { %v588_v18 = vsel %vm355_vm1, %v586_v56, %v587_v0  ;;  %v591_v32 = vsel %vm355_vm1, %v589_v23, %v590_v57  ;;  %v595_v24 = vrot.slane %v558_v45, 2  ;;  %v596_v58 = vrot.slane %v559_v59, 2  ;;  %v1432_v22 = vld [vmem:[%s1147_s17 + $0x4c] sm:$0x1]  ;;  %v1042_v0 = vld [vmem:[%s1548_s1 + $0x7] ss:$0 sm:$0xff] }
  0x50   : > { %v594_v19 = vsel %vm355_vm1, %v592_v15, %v593_v5  ;;  %v598_v26 = vrot.slane %v560_v34, 2  ;;  %v599_v27 = vrot.slane %v561_v20, 2  ;;  %v601_v60 = vrot.slane %v562_v4, 2  ;;  %v1426_v4 = vld [vmem:[%s1147_s17 + $0x3c] sm:$0x1] }
  0x51   : > { %v597_v28 = vsel %vm355_vm1, %v595_v24, %v596_v58  ;;  %v602_v17 = vrot.slane %v563_v62, 2  ;;  %v612_v37 = vadd.f32 %v582_v31, %v1351_v6  ;;  %v613_v8 = vadd.f32 %v585_v36, %v1353_v7  ;;  %v1033_v6 = vld [vmem:[%s1548_s1 + $0x6] ss:$0 sm:$0xff]  ;;  %v1429_v62 = vld [vmem:[%s1147_s17 + $0x44] sm:$0x1] }
  0x52   : > { %v600_v12 = vsel %vm355_vm1, %v598_v26, %v599_v27  ;;  %v614_v38 = vadd.f32 %v588_v18, %v1359_v13  ;;  %v615_v41 = vadd.f32 %v591_v32, %v522_v14  ;;  %v616_v42 = vadd.f32 %v594_v19, %v523_v29 }
  0x53   : > { %v603_v48 = vsel %vm355_vm1, %v601_v60, %v602_v17  ;;  %v617_v49 = vadd.f32 %v597_v28, %v524_v1  ;;  %v618_v50 = vadd.f32 %v600_v12, %v525_v9  ;;  %v629_v10 = vunpack.c.l.bf16 %v1025_v61 }
  0x54   : > { %v619_v7 = vadd.f32 %v603_v48, %v526_v30  ;;  %v630_v2 = vunpack.c.h.bf16 %v1025_v61  ;;  %v631_v51 = vunpack.c.l.bf16 %v1027_v11  ;;  %v632_v13 = vunpack.c.h.bf16 %v1027_v11  ;;  %v1410_v30 = vld [vmem:[%s1147_s17 + $0x1c] sm:$0x1] }
  0x55   : > { %v633_v14 = vunpack.c.l.bf16 %v1029_v43  ;;  %v634_v29 = vunpack.c.h.bf16 %v1029_v43  ;;  %v635_v52 = vunpack.c.l.bf16 %v1031_v47  ;;  %v636_v53 = vunpack.c.h.bf16 %v1031_v47 }
  0x56   : > { %v642_v1 = vmul.f32 %v1033_v6, %v629_v10  ;;  %v643_v54 = vmul.f32 %v1033_v6, %v630_v2  ;;  %v644_v9 = vmul.f32 %v1033_v6, %v631_v51  ;;  %v645_v16 = vmul.f32 %v1033_v6, %v632_v13 }
  0x57   : > { %v646_v33 = vmul.f32 %v1033_v6, %v633_v14  ;;  %v647_v39 = vmul.f32 %v1033_v6, %v634_v29  ;;  %v648_v40 = vmul.f32 %v1033_v6, %v635_v52  ;;  %v649_v3 = vmul.f32 %v1033_v6, %v636_v53 }
  0x58   : > { %v650_v45 = vadd.f32 %v642_v1, %v612_v37  ;;  %v651_v59 = vadd.f32 %v643_v54, %v613_v8  ;;  %v1421_v34 = vadd.f32 %v644_v9, %v614_v38  ;;  %v1423_v20 = vadd.f32 %v645_v16, %v615_v41  ;;  %v1043_v54 = vld [vmem:[%s1147_s17 + $0x10] sm:$0xe]  ;;  %v1044_v9 = vld [vmem:[%s1147_s17 + $0x18] sm:$0xe] }
  0x59   : > { %v654_v46 = vadd.f32 %v646_v33, %v616_v42  ;;  %v1434_v63 = vadd.f32 %v647_v39, %v617_v49  ;;  %v1436_v35 = vadd.f32 %v648_v40, %v618_v50  ;;  %v1438_v56 = vadd.f32 %v649_v3, %v619_v7  ;;  %v1045_v3 = vld [vmem:[%s1147_s17 + $0x20] sm:$0xe] }
  0x5a   : > { %v666_v23 = vunpack.c.l.bf16 %v1407_v21  ;;  %v667_v57 = vunpack.c.l.bf16 %v1410_v30  ;;  %v668_v31 = vunpack.c.l.bf16 %v1413_v25  ;;  %v669_v36 = vunpack.c.l.bf16 %v1416_v55 }
  0x5b   : > { %v670_v15 = vunpack.c.l.bf16 %v1419_v44  ;;  %v671_v5 = vunpack.c.l.bf16 %v1426_v4  ;;  %v672_v18 = vunpack.c.l.bf16 %v1429_v62  ;;  %v673_v32 = vunpack.c.l.bf16 %v1432_v22 }
  0x5c   : > { %v679_v24 = vmul.f32 %v1042_v0, %v629_v10  ;;  %v680_v58 = vmul.f32 %v1042_v0, %v666_v23  ;;  %v681_v19 = vmul.f32 %v1042_v0, %v630_v2  ;;  %v682_v26 = vmul.f32 %v1042_v0, %v667_v57 }
  0x5d   : > { %v683_v27 = vmul.f32 %v1042_v0, %v631_v51  ;;  %v684_v60 = vmul.f32 %v1042_v0, %v668_v31  ;;  %v685_v61 = vmul.f32 %v1042_v0, %v632_v13  ;;  %v686_v28 = vmul.f32 %v1042_v0, %v669_v36 }
  0x5e   : > { %v687_v17 = vmul.f32 %v1042_v0, %v633_v14  ;;  %v688_v37 = vmul.f32 %v1042_v0, %v670_v15  ;;  %v689_v8 = vmul.f32 %v1042_v0, %v634_v29  ;;  %v690_v11 = vmul.f32 %v1042_v0, %v671_v5 }
  0x5f   : > { %v691_v12 = vmul.f32 %v1042_v0, %v635_v52  ;;  %v692_v38 = vmul.f32 %v1042_v0, %v672_v18  ;;  %v693_v41 = vmul.f32 %v1042_v0, %v636_v53  ;;  %v694_v42 = vmul.f32 %v1042_v0, %v673_v32 }
  0x60   : > { %v711_v43 = vrot.slane %v679_v24, 1  ;;  %v712_v47 = vrot.slane %v680_v58, 1  ;;  %v714_v48 = vrot.slane %v681_v19, 1  ;;  %v715_v49 = vrot.slane %v682_v26, 1  ;;  %v1046_v26 = vld [vmem:[%s1147_s17 + $0x28] sm:$0xe] }
  0x61   : > { %v717_v50 = vrot.slane %v683_v27, 1  ;;  %v718_v10 = vrot.slane %v684_v60, 1  ;;  %v720_v6 = vrot.slane %v685_v61, 1  ;;  %v721_v7 = vrot.slane %v686_v28, 1  ;;  %v1047_v27 = vld [vmem:[%s1147_s17 + $0x30] sm:$0xe] }
  0x62   : > { %v713_v2 = vsel %vm261_vm0, %v711_v43, %v712_v47  ;;  %v716_v51 = vsel %vm261_vm0, %v714_v48, %v715_v49  ;;  %v723_v13 = vrot.slane %v687_v17, 1  ;;  %v724_v14 = vrot.slane %v688_v37, 1  ;;  %v1048_v37 = vld [vmem:[%s1147_s17 + $0x38] sm:$0xe] }
  0x63   : > { %v719_v29 = vsel %vm261_vm0, %v717_v50, %v718_v10  ;;  %v722_v52 = vsel %vm261_vm0, %v720_v6, %v721_v7  ;;  %v726_v53 = vrot.slane %v689_v8, 1  ;;  %v727_v1 = vrot.slane %v690_v11, 1  ;;  %v1049_v8 = vld [vmem:[%s1147_s17 + $0x40] sm:$0xe]  ;;  %v1050_v11 = vld [vmem:[%s1147_s17 + $0x48] sm:$0xe] }
  0x64   : > { %v725_v16 = vsel %vm261_vm0, %v723_v13, %v724_v14  ;;  %v729_v33 = vrot.slane %v691_v12, 1  ;;  %v730_v39 = vrot.slane %v692_v38, 1  ;;  %v732_v40 = vrot.slane %v693_v41, 1  ;;  %v1051_v41 = vld [vmem:[%s1548_s1 + $0x8] ss:$0 sm:$0xff] }
  0x65   : > { %v728_v0 = vsel %vm261_vm0, %v726_v53, %v727_v1  ;;  %v733_v24 = vrot.slane %v694_v42, 1  ;;  %v1476_v58 = vadd.f32 %v713_v2, %v650_v45  ;;  %v1478_v19 = vadd.f32 %v716_v51, %v651_v59 }
  0x66   : > { %v731_v60 = vsel %vm261_vm0, %v729_v33, %v730_v39  ;;  %v745_v61 = vadd.f32 %v719_v29, %v1421_v34  ;;  %v746_v28 = vadd.f32 %v722_v52, %v1423_v20  ;;  %v747_v17 = vadd.f32 %v725_v16, %v654_v46 }
  0x67   : > { %v734_v12 = vsel %vm261_vm0, %v732_v40, %v733_v24  ;;  %v748_v38 = vadd.f32 %v728_v0, %v1434_v63  ;;  %v749_v45 = vadd.f32 %v731_v60, %v1436_v35  ;;  %v759_v59 = vunpack.c.l.bf16 %v1043_v54  ;;  %v1052_v40 = vld [vmem:[%s1549_s2] ss:$0 sm:$0xff] }
  0x68   : > { %v750_v42 = vadd.f32 %v734_v12, %v1438_v56  ;;  %v760_v34 = vunpack.c.l.bf16 %v1044_v9  ;;  %v761_v43 = vunpack.c.l.bf16 %v1045_v3  ;;  %v762_v20 = vunpack.c.l.bf16 %v1046_v26 }
  0x69   : > { %v763_v46 = vunpack.c.l.bf16 %v1047_v27  ;;  %v764_v47 = vunpack.c.l.bf16 %v1048_v37  ;;  %v765_v48 = vunpack.c.l.bf16 %v1049_v8  ;;  %v766_v49 = vunpack.c.l.bf16 %v1050_v11 }
  0x6a   : > { %v772_v50 = vmul.f32 %v1051_v41, %v759_v59  ;;  %v773_v63 = vmul.f32 %v1051_v41, %v666_v23  ;;  %v774_v10 = vmul.f32 %v1051_v41, %v760_v34  ;;  %v775_v35 = vmul.f32 %v1051_v41, %v667_v57 }
  0x6b   : > { %v776_v6 = vmul.f32 %v1051_v41, %v761_v43  ;;  %v777_v7 = vmul.f32 %v1051_v41, %v668_v31  ;;  %v778_v56 = vmul.f32 %v1051_v41, %v762_v20  ;;  %v779_v2 = vmul.f32 %v1051_v41, %v669_v36 }
  0x6c   : > { %v780_v51 = vmul.f32 %v1051_v41, %v763_v46  ;;  %v781_v13 = vmul.f32 %v1051_v41, %v670_v15  ;;  %v782_v14 = vmul.f32 %v1051_v41, %v764_v47  ;;  %v783_v21 = vmul.f32 %v1051_v41, %v671_v5 }
  0x6d   : > { %v784_v23 = vmul.f32 %v1051_v41, %v765_v48  ;;  %v785_v30 = vmul.f32 %v1051_v41, %v672_v18  ;;  %v786_v57 = vmul.f32 %v1051_v41, %v766_v49  ;;  %v787_v25 = vmul.f32 %v1051_v41, %v673_v32 }
  0x6e   : > { %v804_v31 = vrot.slane %v772_v50, 2  ;;  %v805_v29 = vrot.slane %v773_v63, 2  ;;  %v807_v55 = vrot.slane %v774_v10, 2  ;;  %v808_v36 = vrot.slane %v775_v35, 2 }
  0x6f   : > { %v810_v52 = vrot.slane %v776_v6, 2  ;;  %v811_v53 = vrot.slane %v777_v7, 2  ;;  %v813_v44 = vrot.slane %v778_v56, 2  ;;  %v814_v15 = vrot.slane %v779_v2, 2 }
  0x70   : > { %v806_v1 = vsel %vm355_vm1, %v804_v31, %v805_v29  ;;  %v809_v4 = vsel %vm355_vm1, %v807_v55, %v808_v36  ;;  %v816_v5 = vrot.slane %v780_v51, 2  ;;  %v817_v54 = vrot.slane %v781_v13, 2 }
  0x71   : > { %v812_v62 = vsel %vm355_vm1, %v810_v52, %v811_v53  ;;  %v815_v18 = vsel %vm355_vm1, %v813_v44, %v814_v15  ;;  %v819_v22 = vrot.slane %v782_v14, 2  ;;  %v820_v32 = vrot.slane %v783_v21, 2 }
  0x72   : > { %v818_v9 = vsel %vm355_vm1, %v816_v5, %v817_v54  ;;  %v822_v16 = vrot.slane %v784_v23, 2  ;;  %v823_v33 = vrot.slane %v785_v30, 2  ;;  %v825_v39 = vrot.slane %v786_v57, 2 }
  0x73   : > { %v821_v3 = vsel %vm355_vm1, %v819_v22, %v820_v32  ;;  %v826_v0 = vrot.slane %v787_v25, 2  ;;  %v836_v24 = vadd.f32 %v806_v1, %v1476_v58  ;;  %v837_v26 = vadd.f32 %v809_v4, %v1478_v19 }
  0x74   : > { %v824_v27 = vsel %vm355_vm1, %v822_v16, %v823_v33  ;;  %v838_v60 = vadd.f32 %v812_v62, %v745_v61  ;;  %v839_v37 = vadd.f32 %v815_v18, %v746_v28  ;;  %v840_v8 = vadd.f32 %v818_v9, %v747_v17 }
  0x75   : > { %v827_v11 = vsel %vm355_vm1, %v825_v39, %v826_v0  ;;  %v841_v12 = vadd.f32 %v821_v3, %v748_v38  ;;  %v842_v59 = vadd.f32 %v824_v27, %v749_v45  ;;  %v851_v41 = vadd.f32 %v1052_v40, %v836_v24 }
  0x76   : > { %v843_v34 = vadd.f32 %v827_v11, %v750_v42  ;;  %v852_v43 = vadd.f32 %v1052_v40, %v837_v26  ;;  %v853_v20 = vadd.f32 %v1052_v40, %v838_v60  ;;  %v854_v46 = vadd.f32 %v1052_v40, %v839_v37 }
  0x77   : > { %v855_v47 = vadd.f32 %v1052_v40, %v840_v8  ;;  %v856_v48 = vadd.f32 %v1052_v40, %v841_v12  ;;  %v1524_v49 = vadd.f32 %v1052_v40, %v842_v59  ;;  %v1053_v58 = vmul.f32 -1.442695, %v851_v41 }
  0x78   : > { %v1526_v19 = vadd.f32 %v1052_v40, %v843_v34  ;;  %v1054_v50 = vmul.f32 -1.442695, %v852_v43  ;;  %v1055_v61 = vmul.f32 -1.442695, %v853_v20  ;;  %v1056_v28 = vmul.f32 -1.442695, %v854_v46 }
  0x79   : > { %1073 = vpow2.f32 %v1053_v58  ;;  %v1057_v17 = vmul.f32 -1.442695, %v855_v47  ;;  %v1058_v38 = vmul.f32 -1.442695, %v856_v48  ;;  %v1059_v45 = vmul.f32 -1.442695, %v1524_v49 }
  0x7a   : > { %1075 = vpow2.f32 %v1054_v50  ;;  %v1060_v42 = vmul.f32 -1.442695, %v1526_v19 }
  0x7b   : > { %1077 = vpow2.f32 %v1055_v61 }
  0x7c   : > { %1079 = vpow2.f32 %v1056_v28 }
  0x7d   : > { %1081 = vpow2.f32 %v1057_v17 }
  0x7e   : > { %1083 = vpow2.f32 %v1058_v38 }
  0x7f   : > { %1085 = vpow2.f32 %v1059_v45 }
  0x80   : > { %1087 = vpow2.f32 %v1060_v42 }
  0x83   : > { %v1074_v63 = vpop.eup %1073 }
  0x84   : > { %v1076_v10 = vpop.eup %1075  ;;  %v883_v35 = vadd.f32 1.0, %v1074_v63 }
  0x85   : > { %v1078_v6 = vpop.eup %1077  ;;  %v884_v7 = vadd.f32 1.0, %v1076_v10 }
  0x86   : > { %v1080_v56 = vpop.eup %1079  ;;  %v885_v2 = vadd.f32 1.0, %v1078_v6  ;;  %1089 = vrcp.f32 %v883_v35 }
  0x87   : > { %v1082_v51 = vpop.eup %1081  ;;  %v886_v13 = vadd.f32 1.0, %v1080_v56  ;;  %1091 = vrcp.f32 %v884_v7 }
  0x88   : > { %v1084_v14 = vpop.eup %1083  ;;  %v887_v21 = vadd.f32 1.0, %v1082_v51  ;;  %1093 = vrcp.f32 %v885_v2 }
  0x89   : > { %v1086_v23 = vpop.eup %1085  ;;  %v888_v30 = vadd.f32 1.0, %v1084_v14  ;;  %1095 = vrcp.f32 %v886_v13 }
  0x8a   : > { %v1088_v57 = vpop.eup %1087  ;;  %v889_v25 = vadd.f32 1.0, %v1086_v23  ;;  %1097 = vrcp.f32 %v887_v21 }
  0x8b   : > { %v890_v31 = vadd.f32 1.0, %v1088_v57  ;;  %1099 = vrcp.f32 %v888_v30 }
  0x8c   : > { %1101 = vrcp.f32 %v889_v25 }
  0x8d   : > { %1103 = vrcp.f32 %v890_v31 }
  0x90   : > { %v1090_v29 = vpop.eup %1089 }
  0x91   : > { %v1092_v55 = vpop.eup %1091  ;;  %v907_v36 = vmul.f32 %v1090_v29, %v851_v41 }
  0x92   : > { %v1094_v52 = vpop.eup %1093  ;;  %v908_v53 = vmul.f32 %v1092_v55, %v852_v43 }
  0x93   : > { %v1096_v44 = vpop.eup %1095  ;;  %v909_v15 = vmul.f32 %v1094_v52, %v853_v20  ;;  %v915_v1 = vpack.c.bf16 %v907_v36, %v907_v36 }
  0x94   : > { %v1098_v4 = vpop.eup %1097  ;;  %v910_v5 = vmul.f32 %v1096_v44, %v854_v46  ;;  %v916_v54 = vpack.c.bf16 %v908_v53, %v908_v53 }
  0x95   : > { %v1100_v62 = vpop.eup %1099  ;;  %v911_v18 = vmul.f32 %v1098_v4, %v855_v47  ;;  %v917_v22 = vpack.c.bf16 %v909_v15, %v909_v15  ;;  %924 = vst.msk [vmem:[%s170_s16] sm:$0xf] %vm923_vm2, %v915_v1 }
  0x96   : > { %v1102_v32 = vpop.eup %1101  ;;  %v912_v9 = vmul.f32 %v1100_v62, %v856_v48  ;;  %v918_v16 = vpack.c.bf16 %v910_v5, %v910_v5  ;;  %925 = vst.msk [vmem:[%s170_s16 + $0x4] sm:$0xf] %vm923_vm2, %v916_v54 }
  0x97   : > { %v1104_v33 = vpop.eup %1103  ;;  %v913_v39 = vmul.f32 %v1102_v32, %v1524_v49  ;;  %v919_v40 = vpack.c.bf16 %v911_v18, %v911_v18  ;;  %926 = vst.msk [vmem:[%s170_s16 + $0x8] sm:$0xf] %vm923_vm2, %v917_v22 }
  0x98   : > { %v914_v3 = vmul.f32 %v1104_v33, %v1526_v19  ;;  %v920_v0 = vpack.c.bf16 %v912_v9, %v912_v9  ;;  %927 = vst.msk [vmem:[%s170_s16 + $0xc] sm:$0xf] %vm923_vm2, %v918_v16 }
  0x99   : > { %v921_v24 = vpack.c.bf16 %v913_v39, %v913_v39  ;;  %928 = vst.msk [vmem:[%s170_s16 + $0x10] sm:$0xf] %vm923_vm2, %v919_v40 }
  0x9a   : > { %v922_v26 = vpack.c.bf16 %v914_v3, %v914_v3  ;;  %929 = vst.msk [vmem:[%s170_s16 + $0x14] sm:$0xf] %vm923_vm2, %v920_v0 }
  0x9b   : > { %930 = vst.msk [vmem:[%s170_s16 + $0x18] sm:$0xf] %vm923_vm2, %v921_v24 }
  0x9c   : > { %931 = vst.msk [vmem:[%s170_s16 + $0x1c] sm:$0xf] %vm923_vm2, %v922_v26 }
  0x9d PF: > { %s13_s12 = sadd.s32 1, %s1111_s12  }
  0x9e   : > { %p10_p4 = scmp.ge.s32.totalorder %s13_s12, 4  }
  0xa0   :  { %12 = sbr.rel (!%p10_p4) target bundleno = 1 (0x1), region = 64 }

// kernel: basic_layer_up_forward.26
= control target key start
LH: loop header
LB: loop body
LE: loop exit
PB: predicated region body
PF: predicated region fallthrough
CT: control target
= control target key end

     0   :  { %vm94_vm0 = vcmask 261120   ;;  %s769_s1 = inlined_call_operand.vmem [shape: bf16[32,128], index: 1, kind: input, shape index: {}]   ;;  %s770_s0 = inlined_call_operand.vmem [shape: bf16[128,32], index: 0, kind: input, shape index: {}]   ;;  %s771_s2 = inlined_call_operand.vmem [shape: f32[1,128], index: 2, kind: input, shape index: {}]   ;;  %s772_s3 = inlined_call_operand.vmem [shape: bf16[128,128], index: 3, kind: output, shape index: {}]  }
   0x1   :  { %v528_v0 = vld [vmem:[%s769_s1] sm:$0xff]   ;;  %v529_v1 = vld [vmem:[%s769_s1 + $0x8] sm:$0xff]   ;;  %v534_v6 = vld [vmem:[%s770_s0 + $0x10] sm:$0xff]  }
   0x2   :  { %504 = vmatprep.subr.bf16.mxu0 %v528_v0  ;;  %524 = vmatprep.subr.bf16.mxu1 %v528_v0  ;;  %v530_v2 = vld [vmem:[%s770_s0] sm:$0xff]   ;;  %v532_v4 = vld [vmem:[%s770_s0 + $0x8] sm:$0xff]   ;;  %v535_v7 = vld [vmem:[%s770_s0 + $0x30] sm:$0xff]  }
   0x3   :  { %505 = vmatpush3.bf16.msra.mxu0 %v528_v0  ;;  %526 = vmatpush3.bf16.msra.mxu1 %v528_v0  ;;  %v531_v3 = vld [vmem:[%s770_s0 + $0x20] sm:$0xff]   ;;  %v533_v5 = vld [vmem:[%s770_s0 + $0x28] sm:$0xff]   ;;  %v536_v8 = vld [vmem:[%s770_s0 + $0x18] sm:$0xff]  }
   0x4   :  { %506 = vmatprep.subr.bf16.mxu0 %v529_v1  ;;  %525 = vmatprep.subr.bf16.mxu1 %v529_v1  ;;  %v537_v9 = vld [vmem:[%s770_s0 + $0x38] sm:$0xff]   ;;  %v631_v10 = vld [vmem:[%s771_s2] ss:$0 sm:$0xff] }
   0x5   :  { %508 = vmatprep.mubr.msk.bf16.mxu0 %vm94_vm0, %v530_v2  ;;  %516 = vmatprep.mubr.msk.bf16.mxu1 %vm94_vm0, %v531_v3 }
   0x7   :  { %507 = vmatpush3.bf16.msra.mxu0 %v529_v1  ;;  %527 = vmatpush3.bf16.msra.mxu1 %v529_v1 }
   0xa   :  { %509 = vmatmul.mubr.msk.bf16.vlgmr.msra.gmra.mrb[0].mxu0 %vm94_vm0, %v532_v4  ;;  %517 = vmatmul.mubr.msk.bf16.vlgmr.msra.gmra.mrb[0].mxu1 %vm94_vm0, %v533_v5 }
   0xb   :  { %512 = vmatprep.mubr.msk.bf16.mxu0 %vm94_vm0, %v534_v6  ;;  %520 = vmatprep.mubr.msk.bf16.mxu1 %vm94_vm0, %v535_v7 }
  0x12   :  { %513 = vmatmul.mubr.msk.bf16.gmra.mrb[4].mxu0 %vm94_vm0, %v536_v8  ;;  %521 = vmatmul.mubr.msk.bf16.gmra.mrb[4].mxu1 %vm94_vm0, %v537_v9 }
  0xdd   :  { %v510_v11 = vpop.f32.mrb[0].mxu0  ;;  %v518_v12 = vpop.f32.mrb[0].mxu1 }
  0xde   :  { %v634_v13 = vadd.f32 %v510_v11, %v631_v10  ;;  %v637_v14 = vadd.f32 %v518_v12, %v631_v10  ;;  %v153_v15 = vpop.f32.mrb[1].mxu0  ;;  %v185_v16 = vpop.f32.mrb[1].mxu1 }
  0xdf   :  { %v640_v17 = vadd.f32 %v631_v10, %v153_v15  ;;  %v643_v18 = vadd.f32 %v631_v10, %v185_v16  ;;  %v511_v19 = vpop.f32.mrb[2].mxu0  ;;  %v519_v20 = vpop.f32.mrb[2].mxu1 }
  0xe0   :  { %v250_v21 = vmin.f32 %v634_v13, 0.0  ;;  %v156_v22 = vpop.f32.mrb[3].mxu0  ;;  %v188_v23 = vpop.f32.mrb[3].mxu1  ;;  %v258_v24 = vmin.f32 %v637_v14, 0.0  ;;  %v650_v29 = vadd.f32 %v511_v19, %v631_v10  ;;  %v653_v30 = vadd.f32 %v519_v20, %v631_v10 }
  0xe1   :  { %v248_v26 = vmin.f32 %v640_v17, 0.0  ;;  %v256_v28 = vmin.f32 %v643_v18, 0.0  ;;  %v656_v32 = vadd.f32 %v631_v10, %v156_v22  ;;  %v659_v34 = vadd.f32 %v631_v10, %v188_v23 }
  0xe2   :  { %v268_v25 = vmul.f32 1.442695, %v250_v21  ;;  %v284_v27 = vmul.f32 1.442695, %v258_v24  ;;  %v251_v37 = vmin.f32 %v650_v29, 0.0  ;;  %v259_v40 = vmin.f32 %v653_v30, 0.0 }
  0xe3   :  { %v264_v31 = vmul.f32 1.442695, %v248_v26  ;;  %v280_v33 = vmul.f32 1.442695, %v256_v28  ;;  %v249_v44 = vmin.f32 %v656_v32, 0.0  ;;  %v257_v47 = vmin.f32 %v659_v34, 0.0 }
  0xe4   :  { %538 = vpow2.f32 %v268_v25  ;;  %v270_v43 = vmul.f32 1.442695, %v251_v37  ;;  %v286_v46 = vmul.f32 1.442695, %v259_v40  ;;  %vm218_vm1 = vcmp.gt.f32.partialorder %v634_v13, 0.0 }
  0xe5   :  { %v514_v35 = vpop.f32.mrb[4].mxu0  ;;  %v522_v36 = vpop.f32.mrb[4].mxu1  ;;  %540 = vpow2.f32 %v284_v27  ;;  %v266_v51 = vmul.f32 1.442695, %v249_v44  ;;  %v282_v52 = vmul.f32 1.442695, %v257_v47 }
  0xe6   :  { %v169_v38 = vpop.f32.mrb[5].mxu0  ;;  %v201_v39 = vpop.f32.mrb[5].mxu1  ;;  %542 = vpow2.f32 %v264_v31  ;;  %v666_v48 = vadd.f32 %v514_v35, %v631_v10  ;;  %v669_v49 = vadd.f32 %v522_v36, %v631_v10  ;;  %v234_v55 = vadd.f32 1.0, %v634_v13 }
  0xe7   :  { %v515_v41 = vpop.f32.mrb[6].mxu0  ;;  %v523_v42 = vpop.f32.mrb[6].mxu1  ;;  %544 = vpow2.f32 %v280_v33  ;;  %v673_v54 = vadd.f32 %v631_v10, %v169_v38  ;;  %vm226_vm2 = vcmp.gt.f32.partialorder %v637_v14, 0.0  ;;  %v242_v57 = vadd.f32 1.0, %v637_v14 }
  0xe8   :  { %v172_v45 = vpop.f32.mrb[7].mxu0  ;;  %v204_v50 = vpop.f32.mrb[7].mxu1  ;;  %546 = vpow2.f32 %v270_v43  ;;  %v254_v53 = vmin.f32 %v666_v48, 0.0  ;;  %v262_v56 = vmin.f32 %v669_v49, 0.0  ;;  %vm216_vm3 = vcmp.gt.f32.partialorder %v640_v17, 0.0 }
  0xe9   :  { %548 = vpow2.f32 %v286_v46  ;;  %v232_v58 = vadd.f32 1.0, %v640_v17  ;;  %vm224_vm4 = vcmp.gt.f32.partialorder %v643_v18, 0.0  ;;  %v240_v60 = vadd.f32 1.0, %v643_v18 }
  0xea   :  { %550 = vpow2.f32 %v266_v51  ;;  %vm219_vm5 = vcmp.gt.f32.partialorder %v650_v29, 0.0  ;;  %v686_v61 = vadd.f32 %v631_v10, %v201_v39  ;;  %v689_v62 = vadd.f32 %v515_v41, %v631_v10 }
  0xeb   :  { %552 = vpow2.f32 %v282_v52  ;;  %v235_v0 = vadd.f32 1.0, %v650_v29  ;;  %v276_v1 = vmul.f32 1.442695, %v254_v53  ;;  %v252_v2 = vmin.f32 %v673_v54, 0.0 }
  0xec   :  { %v694_v3 = vadd.f32 %v523_v42, %v631_v10  ;;  %vm227_vm6 = vcmp.gt.f32.partialorder %v653_v30, 0.0  ;;  %v243_v5 = vadd.f32 1.0, %v653_v30  ;;  %vm217_vm7 = vcmp.gt.f32.partialorder %v656_v32, 0.0 }
  0xed   :  { %v292_v6 = vmul.f32 1.442695, %v262_v56  ;;  %v233_v8 = vadd.f32 1.0, %v656_v32  ;;  %vm225_vm8 = vcmp.gt.f32.partialorder %v659_v34, 0.0  ;;  %v241_v9 = vadd.f32 1.0, %v659_v34 }
  0xee   :  { %v539_v59 = vpop.eup %538  ;;  %v255_v11 = vmin.f32 %v689_v62, 0.0  ;;  %v260_v16 = vmin.f32 %v686_v61, 0.0  ;;  %v263_v19 = vmin.f32 %v694_v3, 0.0  ;;  %554 = vpow2.f32 %v276_v1 }
  0xef   :  { %v541_v63 = vpop.eup %540  ;;  %v298_v12 = vsel %vm218_vm1, %v234_v55, %v539_v59  ;;  %v272_v21 = vmul.f32 1.442695, %v252_v2  ;;  %v710_v23 = vadd.f32 %v631_v10, %v172_v45  ;;  %556 = vpow2.f32 %v292_v6 }
  0xf0   :  { %v543_v4 = vpop.eup %542  ;;  %v306_v15 = vsel %vm226_vm2, %v242_v57, %v541_v63  ;;  %v278_v22 = vmul.f32 1.442695, %v255_v11  ;;  %v294_v13 = vmul.f32 1.442695, %v263_v19  ;;  %v715_v14 = vadd.f32 %v631_v10, %v204_v50 }
  0xf1   :  { %v545_v7 = vpop.eup %544  ;;  %v296_v27 = vsel %vm216_vm3, %v232_v58, %v543_v4  ;;  %v288_v36 = vmul.f32 1.442695, %v260_v16  ;;  %v253_v37 = vmin.f32 %v710_v23, 0.0  ;;  %v238_v41 = vadd.f32 1.0, %v666_v48 }
  0xf2   :  { %v547_v20 = vpop.eup %546  ;;  %558 = vpow2.f32 %v278_v22  ;;  %v304_v10 = vsel %vm224_vm4, %v240_v60, %v545_v7  ;;  %v261_v38 = vmin.f32 %v715_v14, 0.0  ;;  %v239_v42 = vadd.f32 1.0, %v689_v62 }
  0xf3   :  { %v549_v24 = vpop.eup %548  ;;  %v299_v25 = vsel %vm219_vm5, %v235_v0, %v547_v20  ;;  %560 = vpow2.f32 %v294_v13  ;;  %v274_v18 = vmul.f32 1.442695, %v253_v37  ;;  %vm222_vm9 = vcmp.gt.f32.partialorder %v666_v48, 0.0 }
  0xf4   :  { %v551_v26 = vpop.eup %550  ;;  %v455_v28 = vpack.c.bf16 %v299_v25, %v298_v12  ;;  %v307_v31 = vsel %vm227_vm6, %v243_v5, %v549_v24  ;;  %562 = vpow2.f32 %v272_v21  ;;  %v290_v34 = vmul.f32 1.442695, %v261_v38 }
  0xf5   :  { %v553_v33 = vpop.eup %552  ;;  %v475_v35 = vpack.c.bf16 %v307_v31, %v306_v15  ;;  %v297_v29 = vsel %vm217_vm7, %v233_v8, %v551_v26  ;;  %564 = vpow2.f32 %v288_v36  ;;  %v246_v44 = vadd.f32 1.0, %v669_v49 }
  0xf6   :  { %487 = vst [vmem:[%s772_s3 + $0x8] sm:$0xff] %v455_v28   ;;  %v450_v17 = vpack.c.bf16 %v297_v29, %v296_v27  ;;  %v305_v30 = vsel %vm225_vm8, %v241_v9, %v553_v33  ;;  %566 = vpow2.f32 %v274_v18  ;;  %vm223_vm10 = vcmp.gt.f32.partialorder %v689_v62, 0.0 }
  0xf7   :  { %491 = vst [vmem:[%s772_s3 + $0x28] sm:$0xff] %v475_v35   ;;  %v470_v32 = vpack.c.bf16 %v305_v30, %v304_v10  ;;  %568 = vpow2.f32 %v290_v34  ;;  %v247_v45 = vadd.f32 1.0, %v694_v3  ;;  %vm230_vm11 = vcmp.gt.f32.partialorder %v669_v49, 0.0 }
  0xf8   :  { %451 = vst [vmem:[%s772_s3] sm:$0xff] %v450_v17   ;;  %v555_v39 = vpop.eup %554  ;;  %vm231_vm12 = vcmp.gt.f32.partialorder %v694_v3, 0.0  ;;  %v236_v57 = vadd.f32 1.0, %v673_v54  ;;  %v237_v49 = vadd.f32 1.0, %v710_v23  ;;  %vm220_vm13 = vcmp.gt.f32.partialorder %v673_v54, 0.0 }
  0xf9   :  { %490 = vst [vmem:[%s772_s3 + $0x20] sm:$0xff] %v470_v32   ;;  %v557_v40 = vpop.eup %556  ;;  %v302_v47 = vsel %vm222_vm9, %v238_v41, %v555_v39  ;;  %v244_v59 = vadd.f32 1.0, %v686_v61  ;;  %vm221_vm14 = vcmp.gt.f32.partialorder %v710_v23, 0.0  ;;  %v245_v60 = vadd.f32 1.0, %v715_v14 }
  0xfa   :  { %v310_v51 = vsel %vm230_vm11, %v246_v44, %v557_v40  ;;  %vm228_vm15 = vcmp.gt.f32.partialorder %v686_v61, 0.0  ;;  %vm229_vm0 = vcmp.gt.f32.partialorder %v715_v14, 0.0 }
  0xfc   :  { %v559_v43 = vpop.eup %558 }
  0xfd   :  { %v561_v46 = vpop.eup %560  ;;  %v303_v50 = vsel %vm223_vm10, %v239_v42, %v559_v43 }
  0xfe   :  { %v465_v52 = vpack.c.bf16 %v303_v50, %v302_v47  ;;  %v311_v53 = vsel %vm231_vm12, %v247_v45, %v561_v46  ;;  %v563_v56 = vpop.eup %562 }
  0xff   :  { %v485_v55 = vpack.c.bf16 %v311_v53, %v310_v51  ;;  %v565_v48 = vpop.eup %564  ;;  %v300_v63 = vsel %vm220_vm13, %v236_v57, %v563_v56 }
 0x100   :  { %489 = vst [vmem:[%s772_s3 + $0x18] sm:$0xff] %v465_v52   ;;  %v567_v58 = vpop.eup %566  ;;  %v308_v1 = vsel %vm228_vm15, %v244_v59, %v565_v48 }
 0x101   :  { %493 = vst [vmem:[%s772_s3 + $0x38] sm:$0xff] %v485_v55   ;;  %v569_v62 = vpop.eup %568  ;;  %v301_v0 = vsel %vm221_vm14, %v237_v49, %v567_v58 }
 0x102   :  { %v460_v2 = vpack.c.bf16 %v301_v0, %v300_v63  ;;  %v309_v3 = vsel %vm229_vm0, %v245_v60, %v569_v62 }
 0x103   :  { %v480_v4 = vpack.c.bf16 %v309_v3, %v308_v1 }
 0x104   :  { %488 = vst [vmem:[%s772_s3 + $0x10] sm:$0xff] %v460_v2  }
 0x105   :  { %492 = vst [vmem:[%s772_s3 + $0x30] sm:$0xff] %v480_v4  }

// kernel: basic_layer_up_forward.29
= control target key start
LH: loop header
LB: loop body
LE: loop exit
PB: predicated region body
PF: predicated region fallthrough
CT: control target
= control target key end

     0   :  { %vm244_vm0 = vcmask 261120   ;;  %s1078_s2 = inlined_call_operand.vmem [shape: bf16[32,128], index: 2, kind: input, shape index: {}]   ;;  %s1079_s1 = inlined_call_operand.vmem [shape: bf16[128,32], index: 1, kind: input, shape index: {}]   ;;  %s1080_s0 = inlined_call_operand.vmem [shape: bf16[128,32], index: 0, kind: input, shape index: {}]   ;;  %s1081_s3 = inlined_call_operand.vmem [shape: f32[1,128], index: 3, kind: input, shape index: {}]   ;;  %s1082_s4 = inlined_call_operand.vmem [shape: bf16[128,128], index: 4, kind: input, shape index: {}]   ;;  %s1083_s5 = inlined_call_operand.vmem [shape: bf16[128,128], index: 5, kind: output, shape index: {}]  }
   0x1   :  { %v755_v0 = vld [vmem:[%s1078_s2] sm:$0xff]   ;;  %v756_v1 = vld [vmem:[%s1078_s2 + $0x8] sm:$0xff]   ;;  %v895_v17 = vld [vmem:[%s1079_s1 + $0x10] sm:$0xff]  }
   0x2   :  { %731 = vmatprep.subr.bf16.mxu0 %v755_v0  ;;  %751 = vmatprep.subr.bf16.mxu1 %v755_v0  ;;  %v860_v2 = vld [vmem:[%s1079_s1] sm:$0xff]   ;;  %v872_v6 = vld [vmem:[%s1079_s1 + $0x8] sm:$0xff]   ;;  %v905_v21 = vld [vmem:[%s1079_s1 + $0x30] sm:$0xff]   ;;  %v599_v24 = vunpack.c.l.bf16 %v895_v17  ;;  %v600_v25 = vunpack.c.h.bf16 %v895_v17 }
   0x3   :  { %732 = vmatpush3.bf16.msra.mxu0 %v755_v0  ;;  %753 = vmatpush3.bf16.msra.mxu1 %v755_v0  ;;  %v591_v3 = vunpack.c.l.bf16 %v860_v2  ;;  %v592_v4 = vunpack.c.h.bf16 %v860_v2  ;;  %v867_v5 = vld [vmem:[%s1079_s1 + $0x20] sm:$0xff]   ;;  %v879_v9 = vld [vmem:[%s1079_s1 + $0x28] sm:$0xff]   ;;  %v595_v14 = vunpack.c.l.bf16 %v872_v6  ;;  %v596_v15 = vunpack.c.h.bf16 %v872_v6  ;;  %v917_v27 = vld [vmem:[%s1079_s1 + $0x18] sm:$0xff]  }
   0x4   :  { %733 = vmatprep.subr.bf16.mxu0 %v756_v1  ;;  %752 = vmatprep.subr.bf16.mxu1 %v756_v1  ;;  %v607_v7 = vunpack.c.l.bf16 %v867_v5  ;;  %v608_v8 = vunpack.c.h.bf16 %v867_v5  ;;  %v611_v16 = vunpack.c.l.bf16 %v879_v9  ;;  %v612_v20 = vunpack.c.h.bf16 %v879_v9  ;;  %v934_v48 = vld [vmem:[%s1079_s1 + $0x38] sm:$0xff]   ;;  %v558_v55 = vld [vmem:[%s1080_s0] sm:$0xff]   ;;  %v694_v2 = vld [vmem:[%s1080_s0 + $0x10] sm:$0xff]  }
   0x5   :  { %v498_v10 = vmul.f32 -1.442695, %v591_v3  ;;  %v499_v11 = vmul.f32 -1.442695, %v592_v4  ;;  %v500_v18 = vmul.f32 -1.442695, %v595_v14  ;;  %v615_v26 = vunpack.c.l.bf16 %v905_v21 }
   0x6   :  { %v506_v12 = vmul.f32 -1.442695, %v607_v7  ;;  %v507_v13 = vmul.f32 -1.442695, %v608_v8  ;;  %v501_v19 = vmul.f32 -1.442695, %v596_v15  ;;  %v616_v30 = vunpack.c.h.bf16 %v905_v21 }
   0x7   :  { %734 = vmatpush3.bf16.msra.mxu0 %v756_v1  ;;  %754 = vmatpush3.bf16.msra.mxu1 %v756_v1  ;;  %757 = vpow2.f32 %v498_v10  ;;  %v508_v22 = vmul.f32 -1.442695, %v611_v16  ;;  %v509_v23 = vmul.f32 -1.442695, %v612_v20  ;;  %v502_v28 = vmul.f32 -1.442695, %v599_v24 }
   0x8   :  { %759 = vpow2.f32 %v499_v11  ;;  %v503_v29 = vmul.f32 -1.442695, %v600_v25  ;;  %v510_v31 = vmul.f32 -1.442695, %v615_v26  ;;  %v511_v32 = vmul.f32 -1.442695, %v616_v30 }
   0x9   :  { %761 = vpow2.f32 %v506_v12  ;;  %v603_v33 = vunpack.c.l.bf16 %v917_v27  ;;  %v604_v51 = vunpack.c.h.bf16 %v917_v27  ;;  %v619_v57 = vunpack.c.l.bf16 %v934_v48  ;;  %v696_v62 = vld [vmem:[%s1080_s0 + $0x20] sm:$0xff]  }
   0xa   :  { %763 = vpow2.f32 %v507_v13  ;;  %v620_v60 = vunpack.c.h.bf16 %v934_v48  ;;  %v559_v10 = vunpack.c.l.bf16 %v558_v55  ;;  %v560_v13 = vunpack.c.h.bf16 %v558_v55  ;;  %v1012_v27 = vld [vmem:[%s1081_s3] ss:$0 sm:$0xff] }
   0xb   :  { %765 = vpow2.f32 %v500_v18  ;;  %v504_v34 = vmul.f32 -1.442695, %v603_v33  ;;  %v505_v0 = vmul.f32 -1.442695, %v604_v51  ;;  %v693_v18 = vld [vmem:[%s1080_s0 + $0x8] sm:$0xff]   ;;  %v567_v55 = vunpack.c.l.bf16 %v694_v2  ;;  %v622_v48 = vld [vmem:[%s1082_s4] sm:$0xff]  }
   0xc   :  { %767 = vpow2.f32 %v501_v19  ;;  %v512_v19 = vmul.f32 -1.442695, %v619_v57 }
   0xd   :  { %769 = vpow2.f32 %v508_v22 }
   0xe   :  { %771 = vpow2.f32 %v509_v23 }
   0xf   :  { %773 = vpow2.f32 %v502_v28  ;;  %v575_v28 = vunpack.c.l.bf16 %v696_v62 }
  0x10   :  { %775 = vpow2.f32 %v503_v29  ;;  %v697_v29 = vld [vmem:[%s1080_s0 + $0x28] sm:$0xff]  }
  0x11   :  { %v758_v35 = vpop.eup %757  ;;  %777 = vpow2.f32 %v510_v31  ;;  %v513_v31 = vmul.f32 -1.442695, %v620_v60 }
  0x12   :  { %v760_v36 = vpop.eup %759  ;;  %v133_v37 = vadd.f32 1.0, %v758_v35  ;;  %779 = vpow2.f32 %v511_v32  ;;  %v576_v35 = vunpack.c.h.bf16 %v696_v62 }
  0x13   :  { %v762_v38 = vpop.eup %761  ;;  %v134_v39 = vadd.f32 1.0, %v760_v36  ;;  %781 = vpow2.f32 %v504_v34 }
  0x14   :  { %v764_v40 = vpop.eup %763  ;;  %783 = vrcp.f32 %v133_v37  ;;  %v141_v41 = vadd.f32 1.0, %v762_v38  ;;  %v563_v38 = vunpack.c.l.bf16 %v693_v18 }
  0x15   :  { %v766_v42 = vpop.eup %765  ;;  %785 = vrcp.f32 %v134_v39  ;;  %v142_v43 = vadd.f32 1.0, %v764_v40  ;;  %v564_v39 = vunpack.c.h.bf16 %v693_v18 }
  0x16   :  { %v768_v44 = vpop.eup %767  ;;  %787 = vrcp.f32 %v141_v41  ;;  %v135_v45 = vadd.f32 1.0, %v766_v42 }
  0x17   :  { %v770_v46 = vpop.eup %769  ;;  %789 = vrcp.f32 %v142_v43  ;;  %v136_v47 = vadd.f32 1.0, %v768_v44  ;;  %v579_v43 = vunpack.c.l.bf16 %v697_v29 }
  0x18   :  { %v772_v49 = vpop.eup %771  ;;  %791 = vrcp.f32 %v135_v45  ;;  %v143_v50 = vadd.f32 1.0, %v770_v46 }
  0x19   :  { %v774_v52 = vpop.eup %773  ;;  %793 = vrcp.f32 %v136_v47  ;;  %v144_v53 = vadd.f32 1.0, %v772_v49 }
  0x1a   :  { %v776_v54 = vpop.eup %775  ;;  %795 = vrcp.f32 %v143_v50  ;;  %v137_v56 = vadd.f32 1.0, %v774_v52  ;;  %v698_v50 = vld [vmem:[%s1080_s0 + $0x30] sm:$0xff]  }
  0x1b   :  { %v778_v58 = vpop.eup %777  ;;  %797 = vrcp.f32 %v144_v53  ;;  %v138_v59 = vadd.f32 1.0, %v776_v54 }
  0x1c   :  { %v780_v61 = vpop.eup %779  ;;  %799 = vrcp.f32 %v137_v56  ;;  %v145_v63 = vadd.f32 1.0, %v778_v58 }
  0x1d   :  { %v782_v1 = vpop.eup %781  ;;  %801 = vrcp.f32 %v138_v59  ;;  %v146_v11 = vadd.f32 1.0, %v780_v61 }
  0x1e   :  { %v784_v12 = vpop.eup %783  ;;  %803 = vrcp.f32 %v145_v63  ;;  %v139_v46 = vadd.f32 1.0, %v782_v1  ;;  %v583_v63 = vunpack.c.l.bf16 %v698_v50 }
  0x1f   :  { %v786_v22 = vpop.eup %785  ;;  %v181_v23 = vmul.f32 %v784_v12, %v591_v3  ;;  %805 = vrcp.f32 %v146_v11  ;;  %v584_v11 = vunpack.c.h.bf16 %v698_v50 }
  0x20   :  { %v788_v32 = vpop.eup %787  ;;  %v182_v34 = vmul.f32 %v786_v22, %v592_v4  ;;  %807 = vpow2.f32 %v505_v0 }
  0x21   :  { %v790_v36 = vpop.eup %789  ;;  %v197_v37 = vmul.f32 %v559_v10, %v181_v23  ;;  %v189_v3 = vmul.f32 %v788_v32, %v607_v7  ;;  %809 = vpow2.f32 %v512_v19 }
  0x22   :  { %v792_v40 = vpop.eup %791  ;;  %v198_v41 = vmul.f32 %v560_v13, %v182_v34  ;;  %v190_v42 = vmul.f32 %v790_v36, %v608_v8  ;;  %811 = vpow2.f32 %v513_v31  ;;  %v580_v8 = vunpack.c.h.bf16 %v697_v29  ;;  %v699_v36 = vld [vmem:[%s1080_s0 + $0x38] sm:$0xff]  }
  0x23   :  { %v794_v4 = vpop.eup %793  ;;  %v205_v44 = vmul.f32 %v575_v28, %v189_v3  ;;  %v183_v45 = vmul.f32 %v792_v40, %v595_v14  ;;  %813 = vrcp.f32 %v139_v46  ;;  %v587_v40 = vunpack.c.l.bf16 %v699_v36 }
  0x24   :  { %v796_v7 = vpop.eup %795  ;;  %v213_v47 = vpack.c.bf16 %v198_v41, %v197_v37  ;;  %v206_v49 = vmul.f32 %v576_v35, %v190_v42  ;;  %v184_v5 = vmul.f32 %v794_v4, %v596_v15  ;;  %v568_v15 = vunpack.c.h.bf16 %v694_v2 }
  0x25   :  { %v798_v52 = vpop.eup %797  ;;  %v199_v53 = vmul.f32 %v563_v38, %v183_v45  ;;  %v191_v54 = vmul.f32 %v796_v7, %v611_v16  ;;  %v588_v42 = vunpack.c.h.bf16 %v699_v36  ;;  %v712_v36 = vld [vmem:[%s1082_s4 + $0x30] sm:$0xff]  }
  0x26   :  { %v800_v14 = vpop.eup %799  ;;  %735 = vmatprep.mubr.msk.bf16.mxu0 %vm244_vm0, %v213_v47  ;;  %v217_v56 = vpack.c.bf16 %v206_v49, %v205_v44  ;;  %v200_v58 = vmul.f32 %v564_v39, %v184_v5  ;;  %v192_v6 = vmul.f32 %v798_v52, %v612_v20 }
  0x27   :  { %v802_v59 = vpop.eup %801  ;;  %v207_v61 = vmul.f32 %v579_v43, %v191_v54  ;;  %v185_v62 = vmul.f32 %v800_v14, %v599_v24  ;;  %v623_v54 = vunpack.c.l.bf16 %v622_v48  ;;  %v624_v14 = vunpack.c.h.bf16 %v622_v48 }
  0x28   :  { %v804_v0 = vpop.eup %803  ;;  %743 = vmatprep.mubr.msk.bf16.mxu1 %vm244_vm0, %v217_v56  ;;  %v214_v16 = vpack.c.bf16 %v200_v58, %v199_v53  ;;  %v208_v1 = vmul.f32 %v580_v8, %v192_v6  ;;  %v186_v10 = vmul.f32 %v802_v59, %v600_v25  ;;  %v710_v8 = vld [vmem:[%s1082_s4 + $0x20] sm:$0xff]  }
  0x29   :  { %v806_v12 = vpop.eup %805  ;;  %v201_v9 = vmul.f32 %v567_v55, %v185_v62  ;;  %v193_v20 = vmul.f32 %v804_v0, %v615_v26 }
  0x2a   :  { %v808_v13 = vpop.eup %807  ;;  %736 = vmatmul.mubr.msk.bf16.vlgmr.msra.gmra.mrb[0].mxu0 %vm244_vm0, %v214_v16  ;;  %v218_v24 = vpack.c.bf16 %v208_v1, %v207_v61  ;;  %v202_v18 = vmul.f32 %v568_v15, %v186_v10  ;;  %v194_v19 = vmul.f32 %v806_v12, %v616_v30  ;;  %v695_v30 = vld [vmem:[%s1080_s0 + $0x18] sm:$0xff]   ;;  %v640_v1 = vunpack.c.h.bf16 %v710_v8 }
  0x2b   :  { %v209_v22 = vmul.f32 %v583_v63, %v193_v20  ;;  %v140_v23 = vadd.f32 1.0, %v808_v13  ;;  %v810_v28 = vpop.eup %809  ;;  %v571_v34 = vunpack.c.l.bf16 %v695_v30  ;;  %v572_v37 = vunpack.c.h.bf16 %v695_v30 }
  0x2c   :  { %744 = vmatmul.mubr.msk.bf16.vlgmr.msra.gmra.mrb[0].mxu1 %vm244_vm0, %v218_v24  ;;  %v215_v17 = vpack.c.bf16 %v202_v18, %v201_v9  ;;  %v210_v25 = vmul.f32 %v584_v11, %v194_v19  ;;  %v812_v29 = vpop.eup %811  ;;  %v147_v31 = vadd.f32 1.0, %v810_v28  ;;  %v639_v63 = vunpack.c.l.bf16 %v710_v8 }
  0x2d   :  { %815 = vrcp.f32 %v140_v23  ;;  %v148_v32 = vadd.f32 1.0, %v812_v29  ;;  %v814_v21 = vpop.eup %813 }
  0x2e   :  { %739 = vmatprep.mubr.msk.bf16.mxu0 %vm244_vm0, %v215_v17  ;;  %v219_v26 = vpack.c.bf16 %v210_v25, %v209_v22  ;;  %817 = vrcp.f32 %v147_v31  ;;  %v187_v35 = vmul.f32 %v814_v21, %v603_v33  ;;  %v709_v31 = vld [vmem:[%s1082_s4 + $0x18] sm:$0xff]  }
  0x2f   :  { %819 = vrcp.f32 %v148_v32  ;;  %v713_v21 = vld [vmem:[%s1082_s4 + $0x38] sm:$0xff]  }
  0x30   :  { %747 = vmatprep.mubr.msk.bf16.mxu1 %vm244_vm0, %v219_v26  ;;  %v203_v39 = vmul.f32 %v571_v34, %v187_v35  ;;  %v708_v26 = vld [vmem:[%s1082_s4 + $0x10] sm:$0xff]   ;;  %v635_v34 = vunpack.c.l.bf16 %v709_v31 }
  0x37   :  { %v816_v3 = vpop.eup %815 }
  0x38   :  { %v188_v38 = vmul.f32 %v816_v3, %v604_v51  ;;  %v818_v41 = vpop.eup %817  ;;  %v707_v51 = vld [vmem:[%s1082_s4 + $0x8] sm:$0xff]  }
  0x39   :  { %v820_v43 = vpop.eup %819  ;;  %v195_v4 = vmul.f32 %v818_v41, %v619_v57  ;;  %v627_v49 = vunpack.c.l.bf16 %v707_v51  ;;  %v628_v50 = vunpack.c.h.bf16 %v707_v51 }
  0x3a   :  { %v204_v2 = vmul.f32 %v572_v37, %v188_v38  ;;  %v196_v33 = vmul.f32 %v820_v43, %v620_v60  ;;  %v711_v60 = vld [vmem:[%s1082_s4 + $0x28] sm:$0xff]   ;;  %v636_v37 = vunpack.c.h.bf16 %v709_v31  ;;  %v631_v38 = vunpack.c.l.bf16 %v708_v26 }
  0x3b   :  { %v211_v45 = vmul.f32 %v587_v40, %v195_v4  ;;  %v643_v58 = vunpack.c.l.bf16 %v711_v60  ;;  %v644_v59 = vunpack.c.h.bf16 %v711_v60  ;;  %v632_v40 = vunpack.c.h.bf16 %v708_v26 }
  0x3c   :  { %v216_v44 = vpack.c.bf16 %v204_v2, %v203_v39  ;;  %v212_v46 = vmul.f32 %v588_v42, %v196_v33  ;;  %v651_v42 = vunpack.c.l.bf16 %v713_v21  ;;  %v648_v60 = vunpack.c.h.bf16 %v712_v36 }
  0x3e   :  { %740 = vmatmul.mubr.msk.bf16.gmra.mrb[4].mxu0 %vm244_vm0, %v216_v44  ;;  %v220_v7 = vpack.c.bf16 %v212_v46, %v211_v45  ;;  %v647_v44 = vunpack.c.l.bf16 %v712_v36  ;;  %v652_v45 = vunpack.c.h.bf16 %v713_v21 }
  0x40   :  { %748 = vmatmul.mubr.msk.bf16.gmra.mrb[4].mxu1 %vm244_vm0, %v220_v7 }
  0xfd   :  { %v737_v57 = vpop.f32.mrb[0].mxu0 }
  0xfe   :  { %v312_v47 = vadd.f32 %v737_v57, %v1012_v27  ;;  %v303_v5 = vpop.f32.mrb[1].mxu0 }
  0xff   :  { %v745_v52 = vpop.f32.mrb[0].mxu1  ;;  %v304_v53 = vadd.f32 %v1012_v27, %v303_v5  ;;  %v738_v55 = vpop.f32.mrb[2].mxu0 }
 0x100   :  { %v344_v56 = vadd.f32 %v745_v52, %v1012_v27  ;;  %v335_v6 = vpop.f32.mrb[1].mxu1  ;;  %v315_v15 = vadd.f32 %v738_v55, %v1012_v27  ;;  %v306_v61 = vpop.f32.mrb[3].mxu0  ;;  %v400_v10 = vadd.f32 %v627_v49, %v312_v47 }
 0x101   :  { %v336_v62 = vadd.f32 %v1012_v27, %v335_v6  ;;  %v746_v0 = vpop.f32.mrb[2].mxu1  ;;  %v307_v16 = vadd.f32 %v1012_v27, %v306_v61  ;;  %v398_v20 = vadd.f32 %v623_v54, %v304_v53 }
 0x102   :  { %v401_v11 = vadd.f32 %v628_v50, %v315_v15  ;;  %v347_v12 = vadd.f32 %v746_v0, %v1012_v27  ;;  %v338_v9 = vpop.f32.mrb[3].mxu1  ;;  %v408_v18 = vadd.f32 %v643_v58, %v344_v56 }
 0x103   :  { %v399_v13 = vadd.f32 %v624_v14, %v307_v16  ;;  %v339_v24 = vadd.f32 %v1012_v27, %v338_v9  ;;  %v406_v23 = vadd.f32 %v639_v63, %v336_v62 }
 0x104   :  { %v661_v19 = vpack.c.bf16 %v401_v11, %v400_v10  ;;  %v409_v22 = vadd.f32 %v644_v59, %v347_v12 }
 0x105   :  { %v656_v28 = vpack.c.bf16 %v399_v13, %v398_v20  ;;  %v407_v17 = vadd.f32 %v640_v1, %v339_v24 }
 0x106   :  { %714 = vst [vmem:[%s1083_s5 + $0x8] sm:$0xff] %v661_v19   ;;  %v681_v25 = vpack.c.bf16 %v409_v22, %v408_v18 }
 0x107   :  { %657 = vst [vmem:[%s1083_s5] sm:$0xff] %v656_v28   ;;  %v676_v29 = vpack.c.bf16 %v407_v17, %v406_v23 }
 0x108   :  { %718 = vst [vmem:[%s1083_s5 + $0x28] sm:$0xff] %v681_v25  }
 0x109   :  { %717 = vst [vmem:[%s1083_s5 + $0x20] sm:$0xff] %v676_v29  }
 0x111   :  { %v741_v32 = vpop.f32.mrb[4].mxu0 }
 0x112   :  { %v328_v30 = vadd.f32 %v741_v32, %v1012_v27  ;;  %v319_v35 = vpop.f32.mrb[5].mxu0 }
 0x113   :  { %v320_v3 = vadd.f32 %v1012_v27, %v319_v35  ;;  %v742_v39 = vpop.f32.mrb[6].mxu0  ;;  %v749_v41 = vpop.f32.mrb[4].mxu1 }
 0x114   :  { %v331_v43 = vadd.f32 %v742_v39, %v1012_v27  ;;  %v322_v2 = vpop.f32.mrb[7].mxu0  ;;  %v360_v4 = vadd.f32 %v749_v41, %v1012_v27  ;;  %v351_v33 = vpop.f32.mrb[5].mxu1  ;;  %v404_v7 = vadd.f32 %v635_v34, %v328_v30 }
 0x115   :  { %v323_v46 = vadd.f32 %v1012_v27, %v322_v2  ;;  %v352_v51 = vadd.f32 %v1012_v27, %v351_v33  ;;  %v750_v57 = vpop.f32.mrb[6].mxu1  ;;  %v402_v47 = vadd.f32 %v631_v38, %v320_v3 }
 0x116   :  { %v405_v48 = vadd.f32 %v636_v37, %v331_v43  ;;  %v363_v49 = vadd.f32 %v750_v57, %v1012_v27  ;;  %v354_v8 = vpop.f32.mrb[7].mxu1  ;;  %v412_v53 = vadd.f32 %v651_v42, %v360_v4 }
 0x117   :  { %v403_v5 = vadd.f32 %v632_v40, %v323_v46  ;;  %v355_v52 = vadd.f32 %v1012_v27, %v354_v8  ;;  %v410_v14 = vadd.f32 %v647_v44, %v352_v51 }
 0x118   :  { %v671_v50 = vpack.c.bf16 %v405_v48, %v404_v7  ;;  %v413_v54 = vadd.f32 %v652_v45, %v363_v49 }
 0x119   :  { %v666_v55 = vpack.c.bf16 %v403_v5, %v402_v47  ;;  %v411_v56 = vadd.f32 %v648_v60, %v355_v52 }
 0x11a   :  { %716 = vst [vmem:[%s1083_s5 + $0x18] sm:$0xff] %v671_v50   ;;  %v691_v58 = vpack.c.bf16 %v413_v54, %v412_v53 }
 0x11b   :  { %715 = vst [vmem:[%s1083_s5 + $0x10] sm:$0xff] %v666_v55   ;;  %v686_v6 = vpack.c.bf16 %v411_v56, %v410_v14 }
 0x11c   :  { %720 = vst [vmem:[%s1083_s5 + $0x38] sm:$0xff] %v691_v58  }
 0x11d   :  { %719 = vst [vmem:[%s1083_s5 + $0x30] sm:$0xff] %v686_v6  }

// kernel: basic_layer_up_forward.28
= control target key start
LH: loop header
LB: loop body
LE: loop exit
PB: predicated region body
PF: predicated region fallthrough
CT: control target
= control target key end

     0   :  { %s1147_s15 = smov 0   ;;  %s1585_s0 = inlined_call_operand.vmem [shape: bf16[2,10,10,32], index: 0, kind: input, shape index: {}]   ;;  %s1586_s1 = inlined_call_operand.vmem [shape: f32[9,32], index: 1, kind: input, shape index: {}]   ;;  %s1587_s2 = inlined_call_operand.vmem [shape: f32[1,32], index: 2, kind: input, shape index: {}]   ;;  %s1588_s3 = inlined_call_operand.vmem [shape: bf16[2,8,8,32], index: 3, kind: input, shape index: {}]   ;;  %s1589_s4 = inlined_call_operand.vmem [shape: bf16[2,8,8,32], index: 4, kind: output, shape index: {}]  }
   0x1 LB: > { %s1014_s16 = sadd.s32 4294967295, %s1120_s15   ;;  %p1018_p0 = scmp.ge.s32.totalorder %s1120_s15, 1  ;;  %s1120_s15 = sphi %s1147_s15, %s14_s15  }
   0x2   : > { %p172_p1 = scmp.lt.s32.totalorder %s1120_s15, 3 }
   0x4   : > { %p173_p2 = pnand %p1018_p0, %p172_p1 }
   0x5   : > { %p203_p3 = scmp.lt.s32.totalorder (!%p173_p2), %s1014_s16, 1  ;;  %v1024_v0 = vld [vmem:[%s1586_s1] ss:$0 sm:$0xff] (!%p173_p2)  ;;  %vm308_vm0 = vcmask (!%p173_p2), 1046528   ;;  %v1025_v35 = vld [vmem:[%s1586_s1 + $0x1] ss:$0 sm:$0xff] (!%p173_p2) }
   0x6   : > { %176 = sbr.rel (%p173_p2) target bundleno = 129 (0x81), region = 36  ;;  %vm402_vm1 = vcmask (!%p173_p2), 1045504   ;;  %vm938_vm2 = vcmask (!%p173_p2), 257024  }
   0xd   : > { %s1591_s16 = smov (!%p203_p3, %s1014_s16), 1 }
   0xe   : > { %s1105_s17 = smul.u32 80, %s1591_s16  ;;  %s1084_s18 = sshll.u32 %s1591_s16, 5 }
   0xf   : > { %s1164_s21 = scalar_lea.vmem %s1588_s3, %s1084_s18 }
  0x10   : > { %s1169_s24 = scalar_lea.vmem %s1585_s0, %s1105_s17  ;;  %v1175_v1 = vld [vmem:[%s1164_s21] sm:$0xff]   ;;  %v1178_v2 = vld [vmem:[%s1164_s21 + $0x8] sm:$0xff]  }
  0x11   : > { %v218_v3 = vld [vmem:[%s1169_s24] ss:$8 sps:$4 sm:$0xff]   ;;  %v220_v4 = vld [vmem:[%s1169_s24 + $0x10] ss:$8 sps:$4 sm:$0xff]   ;;  %v1088_v6 = vunpack.c.l.bf16 %v1175_v1  ;;  %v1089_v7 = vunpack.c.h.bf16 %v1175_v1  ;;  %v1092_v8 = vunpack.c.l.bf16 %v1178_v2  ;;  %v1093_v9 = vunpack.c.h.bf16 %v1178_v2  ;;  %v1189_v15 = vld [vmem:[%s1169_s24 + $0x4] sm:$0x1] }
  0x12   : > { %v222_v5 = vld [vmem:[%s1169_s24 + $0x20] ss:$8 sps:$4 sm:$0xff]   ;;  %v224_v10 = vld [vmem:[%s1169_s24 + $0x30] ss:$8 sps:$4 sm:$0xff]   ;;  %v226_v11 = vunpack.c.l.bf16 %v218_v3  ;;  %v227_v12 = vunpack.c.h.bf16 %v218_v3  ;;  %v228_v13 = vunpack.c.l.bf16 %v220_v4  ;;  %v229_v14 = vunpack.c.h.bf16 %v220_v4  ;;  %v1192_v16 = vld [vmem:[%s1169_s24 + $0xc] sm:$0x1] }
  0x13   : > { %v230_v17 = vunpack.c.l.bf16 %v222_v5  ;;  %v231_v18 = vunpack.c.h.bf16 %v222_v5  ;;  %v232_v19 = vunpack.c.l.bf16 %v224_v10  ;;  %v233_v20 = vunpack.c.h.bf16 %v224_v10  ;;  %v1195_v21 = vld [vmem:[%s1169_s24 + $0x14] sm:$0x1]  ;;  %v1198_v22 = vld [vmem:[%s1169_s24 + $0x1c] sm:$0x1]  ;;  %v1201_v23 = vld [vmem:[%s1169_s24 + $0x24] sm:$0x1] }
  0x14   : > { %v239_v24 = vmul.f32 %v1024_v0, %v226_v11  ;;  %v240_v25 = vmul.f32 %v1024_v0, %v227_v12  ;;  %v1203_v26 = vmul.f32 %v1024_v0, %v228_v13  ;;  %v1205_v27 = vmul.f32 %v1024_v0, %v229_v14  ;;  %v1208_v28 = vld [vmem:[%s1169_s24 + $0x2c] sm:$0x1]  ;;  %v1211_v29 = vld [vmem:[%s1169_s24 + $0x34] sm:$0x1]  ;;  %v1214_v30 = vld [vmem:[%s1169_s24 + $0x3c] sm:$0x1] }
  0x15   : > { %v243_v31 = vmul.f32 %v1024_v0, %v230_v17  ;;  %v1216_v32 = vmul.f32 %v1024_v0, %v231_v18  ;;  %v1218_v33 = vmul.f32 %v1024_v0, %v232_v19  ;;  %v1220_v34 = vmul.f32 %v1024_v0, %v233_v20 }
  0x16   : > { %v263_v36 = vunpack.c.l.bf16 %v1189_v15  ;;  %v264_v37 = vunpack.c.l.bf16 %v1192_v16  ;;  %v265_v38 = vunpack.c.l.bf16 %v1195_v21  ;;  %v266_v39 = vunpack.c.l.bf16 %v1198_v22 }
  0x17   : > { %v267_v40 = vunpack.c.l.bf16 %v1201_v23  ;;  %v268_v41 = vunpack.c.l.bf16 %v1208_v28  ;;  %v269_v42 = vunpack.c.l.bf16 %v1211_v29  ;;  %v270_v43 = vunpack.c.l.bf16 %v1214_v30 }
  0x18   : > { %v276_v44 = vmul.f32 %v1025_v35, %v226_v11  ;;  %v277_v45 = vmul.f32 %v1025_v35, %v263_v36  ;;  %v278_v46 = vmul.f32 %v1025_v35, %v227_v12  ;;  %v279_v47 = vmul.f32 %v1025_v35, %v264_v37 }
  0x19   : > { %v280_v48 = vmul.f32 %v1025_v35, %v228_v13  ;;  %v281_v49 = vmul.f32 %v1025_v35, %v265_v38  ;;  %v282_v50 = vmul.f32 %v1025_v35, %v229_v14  ;;  %v283_v51 = vmul.f32 %v1025_v35, %v266_v39 }
  0x1a   : > { %v284_v52 = vmul.f32 %v1025_v35, %v230_v17  ;;  %v285_v53 = vmul.f32 %v1025_v35, %v267_v40  ;;  %v286_v54 = vmul.f32 %v1025_v35, %v231_v18  ;;  %v287_v55 = vmul.f32 %v1025_v35, %v268_v41 }
  0x1b   : > { %v288_v56 = vmul.f32 %v1025_v35, %v232_v19  ;;  %v289_v57 = vmul.f32 %v1025_v35, %v269_v42  ;;  %v290_v58 = vmul.f32 %v1025_v35, %v233_v20  ;;  %v291_v59 = vmul.f32 %v1025_v35, %v270_v43  ;;  %v349_v20 = vld [vmem:[%s1169_s24] sm:$0xe]  ;;  %v350_v35 = vld [vmem:[%s1169_s24 + $0x8] sm:$0xe] }
  0x1c   : > { %v309_v60 = vrot.slane %v276_v44, 1  ;;  %v310_v61 = vrot.slane %v277_v45, 1  ;;  %v312_v62 = vrot.slane %v278_v46, 1  ;;  %v313_v63 = vrot.slane %v279_v47, 1 }
  0x1d   : > { %v315_v0 = vrot.slane %v280_v48, 1  ;;  %v316_v3 = vrot.slane %v281_v49, 1  ;;  %v318_v4 = vrot.slane %v282_v50, 1  ;;  %v319_v5 = vrot.slane %v283_v51, 1  ;;  %v351_v48 = vld [vmem:[%s1169_s24 + $0x10] sm:$0xe] }
  0x1e   : > { %v311_v10 = vsel %vm308_vm0, %v309_v60, %v310_v61  ;;  %v314_v11 = vsel %vm308_vm0, %v312_v62, %v313_v63  ;;  %v321_v12 = vrot.slane %v284_v52, 1  ;;  %v322_v13 = vrot.slane %v285_v53, 1  ;;  %v352_v53 = vld [vmem:[%s1169_s24 + $0x18] sm:$0xe]  ;;  %v355_v61 = vld [vmem:[%s1169_s24 + $0x30] sm:$0xe] }
  0x1f   : > { %v317_v14 = vsel %vm308_vm0, %v315_v0, %v316_v3  ;;  %v320_v17 = vsel %vm308_vm0, %v318_v4, %v319_v5  ;;  %v324_v18 = vrot.slane %v286_v54, 1  ;;  %v325_v19 = vrot.slane %v287_v55, 1  ;;  %v353_v54 = vld [vmem:[%s1169_s24 + $0x20] sm:$0xe]  ;;  %v356_v62 = vld [vmem:[%s1169_s24 + $0x38] sm:$0xe] }
  0x20   : > { %v323_v44 = vsel %vm308_vm0, %v321_v12, %v322_v13  ;;  %v327_v45 = vrot.slane %v288_v56, 1  ;;  %v328_v46 = vrot.slane %v289_v57, 1  ;;  %v330_v47 = vrot.slane %v290_v58, 1  ;;  %v354_v58 = vld [vmem:[%s1169_s24 + $0x28] sm:$0xe] }
  0x21   : > { %v326_v49 = vsel %vm308_vm0, %v324_v18, %v325_v19  ;;  %v331_v50 = vrot.slane %v291_v59, 1  ;;  %v1258_v51 = vadd.f32 %v311_v10, %v239_v24  ;;  %v1260_v52 = vadd.f32 %v314_v11, %v240_v25  ;;  %v1026_v0 = vld [vmem:[%s1586_s1 + $0x2] ss:$0 sm:$0xff] }
  0x22   : > { %v329_v55 = vsel %vm308_vm0, %v327_v45, %v328_v46  ;;  %v1266_v60 = vadd.f32 %v317_v14, %v1203_v26  ;;  %v344_v56 = vadd.f32 %v320_v17, %v1205_v27  ;;  %v345_v57 = vadd.f32 %v323_v44, %v243_v31 }
  0x23   : > { %v332_v59 = vsel %vm308_vm0, %v330_v47, %v331_v50  ;;  %v346_v24 = vadd.f32 %v326_v49, %v1216_v32  ;;  %v347_v25 = vadd.f32 %v329_v55, %v1218_v33  ;;  %v357_v63 = vunpack.c.l.bf16 %v349_v20  ;;  %v1027_v55 = vld [vmem:[%s1169_s24 + $0x8] ss:$8 sps:$4 sm:$0xff]  }
  0x24   : > { %v348_v26 = vadd.f32 %v332_v59, %v1220_v34  ;;  %v358_v3 = vunpack.c.l.bf16 %v350_v35  ;;  %v359_v4 = vunpack.c.l.bf16 %v351_v48  ;;  %v360_v27 = vunpack.c.l.bf16 %v352_v53 }
  0x25   : > { %v361_v31 = vunpack.c.l.bf16 %v353_v54  ;;  %v362_v5 = vunpack.c.l.bf16 %v354_v58  ;;  %v363_v10 = vunpack.c.l.bf16 %v355_v61  ;;  %v364_v11 = vunpack.c.l.bf16 %v356_v62 }
  0x26   : > { %v370_v12 = vmul.f32 %v1026_v0, %v357_v63  ;;  %v371_v32 = vmul.f32 %v1026_v0, %v263_v36  ;;  %v372_v13 = vmul.f32 %v1026_v0, %v358_v3  ;;  %v373_v33 = vmul.f32 %v1026_v0, %v264_v37  ;;  %v1029_v63 = vld [vmem:[%s1169_s24 + $0x18] ss:$8 sps:$4 sm:$0xff]  }
  0x27   : > { %v374_v14 = vmul.f32 %v1026_v0, %v359_v4  ;;  %v375_v17 = vmul.f32 %v1026_v0, %v265_v38  ;;  %v376_v34 = vmul.f32 %v1026_v0, %v360_v27  ;;  %v377_v18 = vmul.f32 %v1026_v0, %v266_v39 }
  0x28   : > { %v378_v19 = vmul.f32 %v1026_v0, %v361_v31  ;;  %v379_v20 = vmul.f32 %v1026_v0, %v267_v40  ;;  %v380_v35 = vmul.f32 %v1026_v0, %v362_v5  ;;  %v381_v15 = vmul.f32 %v1026_v0, %v268_v41  ;;  %v1031_v31 = vld [vmem:[%s1169_s24 + $0x28] ss:$8 sps:$4 sm:$0xff]   ;;  %v1033_v5 = vld [vmem:[%s1169_s24 + $0x38] ss:$8 sps:$4 sm:$0xff]  }
  0x29   : > { %v382_v36 = vmul.f32 %v1026_v0, %v363_v10  ;;  %v383_v16 = vmul.f32 %v1026_v0, %v269_v42  ;;  %v384_v37 = vmul.f32 %v1026_v0, %v364_v11  ;;  %v385_v21 = vmul.f32 %v1026_v0, %v270_v43 }
  0x2a   : > { %v403_v38 = vrot.slane %v370_v12, 2  ;;  %v404_v44 = vrot.slane %v371_v32, 2  ;;  %v406_v22 = vrot.slane %v372_v13, 2  ;;  %v407_v39 = vrot.slane %v373_v33, 2 }
  0x2b   : > { %v409_v45 = vrot.slane %v374_v14, 2  ;;  %v410_v23 = vrot.slane %v375_v17, 2  ;;  %v412_v40 = vrot.slane %v376_v34, 2  ;;  %v413_v46 = vrot.slane %v377_v18, 2 }
  0x2c   : > { %v405_v28 = vsel %vm402_vm1, %v403_v38, %v404_v44  ;;  %v408_v41 = vsel %vm402_vm1, %v406_v22, %v407_v39  ;;  %v415_v29 = vrot.slane %v378_v19, 2  ;;  %v416_v42 = vrot.slane %v379_v20, 2  ;;  %v1314_v19 = vld [vmem:[%s1169_s24 + $0xc] sm:$0x1] }
  0x2d   : > { %v411_v47 = vsel %vm402_vm1, %v409_v45, %v410_v23  ;;  %v414_v30 = vsel %vm402_vm1, %v412_v40, %v413_v46  ;;  %v418_v43 = vrot.slane %v380_v35, 2  ;;  %v419_v48 = vrot.slane %v381_v15, 2  ;;  %v1333_v45 = vld [vmem:[%s1169_s24 + $0x34] sm:$0x1]  ;;  %v1336_v23 = vld [vmem:[%s1169_s24 + $0x3c] sm:$0x1] }
  0x2e   : > { %v417_v49 = vsel %vm402_vm1, %v415_v29, %v416_v42  ;;  %v421_v50 = vrot.slane %v382_v36, 2  ;;  %v422_v53 = vrot.slane %v383_v16, 2  ;;  %v424_v54 = vrot.slane %v384_v37, 2  ;;  %v1320_v16 = vld [vmem:[%s1169_s24 + $0x1c] sm:$0x1] }
  0x2f   : > { %v420_v58 = vsel %vm402_vm1, %v418_v43, %v419_v48  ;;  %v425_v61 = vrot.slane %v385_v21, 2  ;;  %v435_v62 = vadd.f32 %v405_v28, %v1258_v51  ;;  %v436_v59 = vadd.f32 %v408_v41, %v1260_v52  ;;  %v1035_v51 = vld [vmem:[%s1586_s1 + $0x3] ss:$0 sm:$0xff]  ;;  %v1323_v37 = vld [vmem:[%s1169_s24 + $0x24] sm:$0x1] }
  0x30   : > { %v423_v0 = vsel %vm402_vm1, %v421_v50, %v422_v53  ;;  %v437_v3 = vadd.f32 %v411_v47, %v1266_v60  ;;  %v438_v4 = vadd.f32 %v414_v30, %v344_v56  ;;  %v439_v27 = vadd.f32 %v417_v49, %v345_v57  ;;  %v1326_v21 = vld [vmem:[%s1169_s24 + $0x2c] sm:$0x1]  ;;  %v1339_v40 = vld [vmem:[%s1169_s24 + $0x44] sm:$0x1] }
  0x31   : > { %v426_v10 = vsel %vm402_vm1, %v424_v54, %v425_v61  ;;  %v440_v11 = vadd.f32 %v420_v58, %v346_v24  ;;  %v441_v12 = vadd.f32 %v423_v0, %v347_v25  ;;  %v452_v32 = vunpack.c.l.bf16 %v1027_v55  ;;  %v1044_v42 = vld [vmem:[%s1586_s1 + $0x4] ss:$0 sm:$0xff] }
  0x32   : > { %v442_v52 = vadd.f32 %v426_v10, %v348_v26  ;;  %v453_v13 = vunpack.c.h.bf16 %v1027_v55  ;;  %v454_v33 = vunpack.c.l.bf16 %v1029_v63  ;;  %v455_v60 = vunpack.c.h.bf16 %v1029_v63  ;;  %v1317_v26 = vld [vmem:[%s1169_s24 + $0x14] sm:$0x1] }
  0x33   : > { %v456_v56 = vunpack.c.l.bf16 %v1031_v31  ;;  %v457_v57 = vunpack.c.h.bf16 %v1031_v31  ;;  %v458_v14 = vunpack.c.l.bf16 %v1033_v5  ;;  %v459_v17 = vunpack.c.h.bf16 %v1033_v5 }
  0x34   : > { %v465_v24 = vmul.f32 %v1035_v51, %v452_v32  ;;  %v466_v34 = vmul.f32 %v1035_v51, %v453_v13  ;;  %v467_v25 = vmul.f32 %v1035_v51, %v454_v33  ;;  %v468_v18 = vmul.f32 %v1035_v51, %v455_v60 }
  0x35   : > { %v469_v20 = vmul.f32 %v1035_v51, %v456_v56  ;;  %v470_v35 = vmul.f32 %v1035_v51, %v457_v57  ;;  %v471_v15 = vmul.f32 %v1035_v51, %v458_v14  ;;  %v472_v36 = vmul.f32 %v1035_v51, %v459_v17 }
  0x36   : > { %v473_v38 = vadd.f32 %v465_v24, %v435_v62  ;;  %v474_v44 = vadd.f32 %v466_v34, %v436_v59  ;;  %v1328_v22 = vadd.f32 %v467_v25, %v437_v3  ;;  %v1330_v39 = vadd.f32 %v468_v18, %v438_v4 }
  0x37   : > { %v477_v46 = vadd.f32 %v469_v20, %v439_v27  ;;  %v1341_v28 = vadd.f32 %v470_v35, %v440_v11  ;;  %v1343_v41 = vadd.f32 %v471_v15, %v441_v12  ;;  %v1345_v29 = vadd.f32 %v472_v36, %v442_v52  ;;  %v1045_v36 = vld [vmem:[%s1169_s24 + $0x8] sm:$0xe] }
  0x38   : > { %v489_v47 = vunpack.c.l.bf16 %v1314_v19  ;;  %v490_v30 = vunpack.c.l.bf16 %v1317_v26  ;;  %v491_v43 = vunpack.c.l.bf16 %v1320_v16  ;;  %v492_v48 = vunpack.c.l.bf16 %v1323_v37 }
  0x39   : > { %v493_v49 = vunpack.c.l.bf16 %v1326_v21  ;;  %v494_v50 = vunpack.c.l.bf16 %v1333_v45  ;;  %v495_v53 = vunpack.c.l.bf16 %v1336_v23  ;;  %v496_v54 = vunpack.c.l.bf16 %v1339_v40 }
  0x3a   : > { %v502_v55 = vmul.f32 %v1044_v42, %v452_v32  ;;  %v503_v58 = vmul.f32 %v1044_v42, %v489_v47  ;;  %v504_v61 = vmul.f32 %v1044_v42, %v453_v13  ;;  %v505_v62 = vmul.f32 %v1044_v42, %v490_v30 }
  0x3b   : > { %v506_v59 = vmul.f32 %v1044_v42, %v454_v33  ;;  %v507_v63 = vmul.f32 %v1044_v42, %v491_v43  ;;  %v508_v0 = vmul.f32 %v1044_v42, %v455_v60  ;;  %v509_v3 = vmul.f32 %v1044_v42, %v492_v48 }
  0x3c   : > { %v510_v4 = vmul.f32 %v1044_v42, %v456_v56  ;;  %v511_v27 = vmul.f32 %v1044_v42, %v493_v49  ;;  %v512_v31 = vmul.f32 %v1044_v42, %v457_v57  ;;  %v513_v5 = vmul.f32 %v1044_v42, %v494_v50 }
  0x3d   : > { %v514_v10 = vmul.f32 %v1044_v42, %v458_v14  ;;  %v515_v11 = vmul.f32 %v1044_v42, %v495_v53  ;;  %v516_v12 = vmul.f32 %v1044_v42, %v459_v17  ;;  %v517_v32 = vmul.f32 %v1044_v42, %v496_v54  ;;  %v1046_v42 = vld [vmem:[%s1169_s24 + $0x10] sm:$0xe] }
  0x3e   : > { %v534_v51 = vrot.slane %v502_v55, 1  ;;  %v535_v52 = vrot.slane %v503_v58, 1  ;;  %v537_v13 = vrot.slane %v504_v61, 1  ;;  %v538_v33 = vrot.slane %v505_v62, 1 }
  0x3f   : > { %v540_v60 = vrot.slane %v506_v59, 1  ;;  %v541_v56 = vrot.slane %v507_v63, 1  ;;  %v543_v57 = vrot.slane %v508_v0, 1  ;;  %v544_v24 = vrot.slane %v509_v3, 1  ;;  %v1047_v59 = vld [vmem:[%s1169_s24 + $0x18] sm:$0xe] }
  0x40   : > { %v536_v14 = vsel %vm308_vm0, %v534_v51, %v535_v52  ;;  %v539_v34 = vsel %vm308_vm0, %v537_v13, %v538_v33  ;;  %v546_v25 = vrot.slane %v510_v4, 1  ;;  %v547_v17 = vrot.slane %v511_v27, 1  ;;  %v1048_v27 = vld [vmem:[%s1169_s24 + $0x20] sm:$0xe] }
  0x41   : > { %v542_v18 = vsel %vm308_vm0, %v540_v60, %v541_v56  ;;  %v545_v20 = vsel %vm308_vm0, %v543_v57, %v544_v24  ;;  %v549_v35 = vrot.slane %v512_v31, 1  ;;  %v550_v15 = vrot.slane %v513_v5, 1  ;;  %v1049_v31 = vld [vmem:[%s1169_s24 + $0x28] sm:$0xe]  ;;  %v1052_v13 = vld [vmem:[%s1169_s24 + $0x40] sm:$0xe] }
  0x42   : > { %v548_v55 = vsel %vm308_vm0, %v546_v25, %v547_v17  ;;  %v552_v58 = vrot.slane %v514_v10, 1  ;;  %v553_v61 = vrot.slane %v515_v11, 1  ;;  %v555_v62 = vrot.slane %v516_v12, 1  ;;  %v1050_v11 = vld [vmem:[%s1169_s24 + $0x30] sm:$0xe] }
  0x43   : > { %v551_v63 = vsel %vm308_vm0, %v549_v35, %v550_v15  ;;  %v556_v0 = vrot.slane %v517_v32, 1  ;;  %v1383_v3 = vadd.f32 %v536_v14, %v473_v38  ;;  %v1385_v4 = vadd.f32 %v539_v34, %v474_v44  ;;  %v1051_v12 = vld [vmem:[%s1169_s24 + $0x38] sm:$0xe]  ;;  %v1053_v60 = vld [vmem:[%s1586_s1 + $0x5] ss:$0 sm:$0xff] }
  0x44   : > { %v554_v5 = vsel %vm308_vm0, %v552_v58, %v553_v61  ;;  %v1391_v51 = vadd.f32 %v542_v18, %v1328_v22  ;;  %v569_v10 = vadd.f32 %v545_v20, %v1330_v39  ;;  %v570_v52 = vadd.f32 %v548_v55, %v477_v46 }
  0x45   : > { %v557_v33 = vsel %vm308_vm0, %v555_v62, %v556_v0  ;;  %v571_v38 = vadd.f32 %v551_v63, %v1341_v28  ;;  %v572_v44 = vadd.f32 %v554_v5, %v1343_v41  ;;  %v582_v32 = vunpack.c.l.bf16 %v1045_v36  ;;  %v1054_v5 = vld [vmem:[%s1169_s24 + $0x10] ss:$8 sps:$4 sm:$0xff]  }
  0x46   : > { %v573_v22 = vadd.f32 %v557_v33, %v1345_v29  ;;  %v583_v56 = vunpack.c.l.bf16 %v1046_v42  ;;  %v584_v57 = vunpack.c.l.bf16 %v1047_v59  ;;  %v585_v39 = vunpack.c.l.bf16 %v1048_v27 }
  0x47   : > { %v586_v46 = vunpack.c.l.bf16 %v1049_v31  ;;  %v587_v24 = vunpack.c.l.bf16 %v1050_v11  ;;  %v588_v14 = vunpack.c.l.bf16 %v1051_v12  ;;  %v589_v34 = vunpack.c.l.bf16 %v1052_v13 }
  0x48   : > { %v595_v25 = vmul.f32 %v1053_v60, %v582_v32  ;;  %v596_v28 = vmul.f32 %v1053_v60, %v489_v47  ;;  %v597_v17 = vmul.f32 %v1053_v60, %v583_v56  ;;  %v598_v41 = vmul.f32 %v1053_v60, %v490_v30  ;;  %v1056_v32 = vld [vmem:[%s1169_s24 + $0x20] ss:$8 sps:$4 sm:$0xff]  }
  0x49   : > { %v599_v18 = vmul.f32 %v1053_v60, %v584_v57  ;;  %v600_v20 = vmul.f32 %v1053_v60, %v491_v43  ;;  %v601_v29 = vmul.f32 %v1053_v60, %v585_v39  ;;  %v602_v35 = vmul.f32 %v1053_v60, %v492_v48 }
  0x4a   : > { %v603_v15 = vmul.f32 %v1053_v60, %v586_v46  ;;  %v604_v36 = vmul.f32 %v1053_v60, %v493_v49  ;;  %v605_v42 = vmul.f32 %v1053_v60, %v587_v24  ;;  %v606_v19 = vmul.f32 %v1053_v60, %v494_v50  ;;  %v1058_v46 = vld [vmem:[%s1169_s24 + $0x30] ss:$8 sps:$4 sm:$0xff]   ;;  %v1060_v24 = vld [vmem:[%s1169_s24 + $0x40] ss:$8 sps:$4 sm:$0xff]  }
  0x4b   : > { %v607_v47 = vmul.f32 %v1053_v60, %v588_v14  ;;  %v608_v26 = vmul.f32 %v1053_v60, %v495_v53  ;;  %v609_v30 = vmul.f32 %v1053_v60, %v589_v34  ;;  %v610_v16 = vmul.f32 %v1053_v60, %v496_v54 }
  0x4c   : > { %v627_v43 = vrot.slane %v595_v25, 2  ;;  %v628_v55 = vrot.slane %v596_v28, 2  ;;  %v630_v37 = vrot.slane %v597_v17, 2  ;;  %v631_v48 = vrot.slane %v598_v41, 2 }
  0x4d   : > { %v633_v58 = vrot.slane %v599_v18, 2  ;;  %v634_v21 = vrot.slane %v600_v20, 2  ;;  %v636_v49 = vrot.slane %v601_v29, 2  ;;  %v637_v61 = vrot.slane %v602_v35, 2 }
  0x4e   : > { %v629_v45 = vsel %vm402_vm1, %v627_v43, %v628_v55  ;;  %v632_v50 = vsel %vm402_vm1, %v630_v37, %v631_v48  ;;  %v639_v23 = vrot.slane %v603_v15, 2  ;;  %v640_v53 = vrot.slane %v604_v36, 2  ;;  %v1439_v15 = vld [vmem:[%s1169_s24 + $0x14] sm:$0x1] }
  0x4f   : > { %v635_v62 = vsel %vm402_vm1, %v633_v58, %v634_v21  ;;  %v638_v40 = vsel %vm402_vm1, %v636_v49, %v637_v61  ;;  %v642_v54 = vrot.slane %v605_v42, 2  ;;  %v643_v59 = vrot.slane %v606_v19, 2  ;;  %v1458_v58 = vld [vmem:[%s1169_s24 + $0x3c] sm:$0x1]  ;;  %v1461_v21 = vld [vmem:[%s1169_s24 + $0x44] sm:$0x1] }
  0x50   : > { %v641_v63 = vsel %vm402_vm1, %v639_v23, %v640_v53  ;;  %v645_v0 = vrot.slane %v607_v47, 2  ;;  %v646_v27 = vrot.slane %v608_v26, 2  ;;  %v648_v31 = vrot.slane %v609_v30, 2  ;;  %v1445_v26 = vld [vmem:[%s1169_s24 + $0x24] sm:$0x1] }
  0x51   : > { %v644_v11 = vsel %vm402_vm1, %v642_v54, %v643_v59  ;;  %v649_v12 = vrot.slane %v610_v16, 2  ;;  %v659_v13 = vadd.f32 %v629_v45, %v1383_v3  ;;  %v660_v33 = vadd.f32 %v632_v50, %v1385_v4  ;;  %v1062_v3 = vld [vmem:[%s1586_s1 + $0x6] ss:$0 sm:$0xff]  ;;  %v1448_v30 = vld [vmem:[%s1169_s24 + $0x2c] sm:$0x1] }
  0x52   : > { %v647_v60 = vsel %vm402_vm1, %v645_v0, %v646_v27  ;;  %v661_v56 = vadd.f32 %v635_v62, %v1391_v51  ;;  %v662_v57 = vadd.f32 %v638_v40, %v569_v10  ;;  %v663_v39 = vadd.f32 %v641_v63, %v570_v52  ;;  %v1451_v16 = vld [vmem:[%s1169_s24 + $0x34] sm:$0x1]  ;;  %v1464_v49 = vld [vmem:[%s1169_s24 + $0x4c] sm:$0x1]  ;;  %v1071_v53 = vld [vmem:[%s1586_s1 + $0x7] ss:$0 sm:$0xff] }
  0x53   : > { %v650_v14 = vsel %vm402_vm1, %v648_v31, %v649_v12  ;;  %v664_v34 = vadd.f32 %v644_v11, %v571_v38  ;;  %v665_v25 = vadd.f32 %v647_v60, %v572_v44  ;;  %v676_v28 = vunpack.c.l.bf16 %v1054_v5 }
  0x54   : > { %v666_v4 = vadd.f32 %v650_v14, %v573_v22  ;;  %v677_v17 = vunpack.c.h.bf16 %v1054_v5  ;;  %v678_v41 = vunpack.c.l.bf16 %v1056_v32  ;;  %v679_v51 = vunpack.c.h.bf16 %v1056_v32  ;;  %v1442_v22 = vld [vmem:[%s1169_s24 + $0x1c] sm:$0x1] }
  0x55   : > { %v680_v10 = vunpack.c.l.bf16 %v1058_v46  ;;  %v681_v52 = vunpack.c.h.bf16 %v1058_v46  ;;  %v682_v18 = vunpack.c.l.bf16 %v1060_v24  ;;  %v683_v20 = vunpack.c.h.bf16 %v1060_v24 }
  0x56   : > { %v689_v38 = vmul.f32 %v1062_v3, %v676_v28  ;;  %v690_v29 = vmul.f32 %v1062_v3, %v677_v17  ;;  %v691_v44 = vmul.f32 %v1062_v3, %v678_v41  ;;  %v692_v35 = vmul.f32 %v1062_v3, %v679_v51 }
  0x57   : > { %v693_v36 = vmul.f32 %v1062_v3, %v680_v10  ;;  %v694_v42 = vmul.f32 %v1062_v3, %v681_v52  ;;  %v695_v19 = vmul.f32 %v1062_v3, %v682_v18  ;;  %v696_v47 = vmul.f32 %v1062_v3, %v683_v20 }
  0x58   : > { %v697_v43 = vadd.f32 %v689_v38, %v659_v13  ;;  %v698_v55 = vadd.f32 %v690_v29, %v660_v33  ;;  %v1453_v37 = vadd.f32 %v691_v44, %v661_v56  ;;  %v1455_v48 = vadd.f32 %v692_v35, %v662_v57 }
  0x59   : > { %v701_v61 = vadd.f32 %v693_v36, %v663_v39  ;;  %v1466_v45 = vadd.f32 %v694_v42, %v664_v34  ;;  %v1468_v50 = vadd.f32 %v695_v19, %v665_v25  ;;  %v1470_v23 = vadd.f32 %v696_v47, %v666_v4  ;;  %v1072_v47 = vld [vmem:[%s1169_s24 + $0x10] sm:$0xe] }
  0x5a   : > { %v713_v62 = vunpack.c.l.bf16 %v1439_v15  ;;  %v714_v40 = vunpack.c.l.bf16 %v1442_v22  ;;  %v715_v54 = vunpack.c.l.bf16 %v1445_v26  ;;  %v716_v59 = vunpack.c.l.bf16 %v1448_v30 }
  0x5b   : > { %v717_v63 = vunpack.c.l.bf16 %v1451_v16  ;;  %v718_v0 = vunpack.c.l.bf16 %v1458_v58  ;;  %v719_v27 = vunpack.c.l.bf16 %v1461_v21  ;;  %v720_v31 = vunpack.c.l.bf16 %v1464_v49 }
  0x5c   : > { %v726_v5 = vmul.f32 %v1071_v53, %v676_v28  ;;  %v727_v11 = vmul.f32 %v1071_v53, %v713_v62  ;;  %v728_v12 = vmul.f32 %v1071_v53, %v677_v17  ;;  %v729_v13 = vmul.f32 %v1071_v53, %v714_v40 }
  0x5d   : > { %v730_v33 = vmul.f32 %v1071_v53, %v678_v41  ;;  %v731_v32 = vmul.f32 %v1071_v53, %v715_v54  ;;  %v732_v60 = vmul.f32 %v1071_v53, %v679_v51  ;;  %v733_v56 = vmul.f32 %v1071_v53, %v716_v59 }
  0x5e   : > { %v734_v57 = vmul.f32 %v1071_v53, %v680_v10  ;;  %v735_v39 = vmul.f32 %v1071_v53, %v717_v63  ;;  %v736_v46 = vmul.f32 %v1071_v53, %v681_v52  ;;  %v737_v24 = vmul.f32 %v1071_v53, %v718_v0 }
  0x5f   : > { %v738_v14 = vmul.f32 %v1071_v53, %v682_v18  ;;  %v739_v34 = vmul.f32 %v1071_v53, %v719_v27  ;;  %v740_v25 = vmul.f32 %v1071_v53, %v683_v20  ;;  %v741_v28 = vmul.f32 %v1071_v53, %v720_v31  ;;  %v1073_v53 = vld [vmem:[%s1169_s24 + $0x18] sm:$0xe] }
  0x60   : > { %v758_v3 = vrot.slane %v726_v5, 1  ;;  %v759_v4 = vrot.slane %v727_v11, 1  ;;  %v761_v17 = vrot.slane %v728_v12, 1  ;;  %v762_v41 = vrot.slane %v729_v13, 1 }
  0x61   : > { %v764_v51 = vrot.slane %v730_v33, 1  ;;  %v765_v10 = vrot.slane %v731_v32, 1  ;;  %v767_v52 = vrot.slane %v732_v60, 1  ;;  %v768_v38 = vrot.slane %v733_v56, 1  ;;  %v1074_v33 = vld [vmem:[%s1169_s24 + $0x20] sm:$0xe] }
  0x62   : > { %v760_v18 = vsel %vm308_vm0, %v758_v3, %v759_v4  ;;  %v763_v29 = vsel %vm308_vm0, %v761_v17, %v762_v41  ;;  %v770_v44 = vrot.slane %v734_v57, 1  ;;  %v771_v20 = vrot.slane %v735_v39, 1  ;;  %v1075_v39 = vld [vmem:[%s1169_s24 + $0x28] sm:$0xe] }
  0x63   : > { %v766_v35 = vsel %vm308_vm0, %v764_v51, %v765_v10  ;;  %v769_v36 = vsel %vm308_vm0, %v767_v52, %v768_v38  ;;  %v773_v42 = vrot.slane %v736_v46, 1  ;;  %v774_v19 = vrot.slane %v737_v24, 1  ;;  %v1076_v46 = vld [vmem:[%s1169_s24 + $0x30] sm:$0xe]  ;;  %v1079_v17 = vld [vmem:[%s1169_s24 + $0x48] sm:$0xe] }
  0x64   : > { %v772_v5 = vsel %vm308_vm0, %v770_v44, %v771_v20  ;;  %v776_v11 = vrot.slane %v738_v14, 1  ;;  %v777_v12 = vrot.slane %v739_v34, 1  ;;  %v779_v13 = vrot.slane %v740_v25, 1  ;;  %v1077_v34 = vld [vmem:[%s1169_s24 + $0x38] sm:$0xe] }
  0x65   : > { %v775_v32 = vsel %vm308_vm0, %v773_v42, %v774_v19  ;;  %v780_v60 = vrot.slane %v741_v28, 1  ;;  %v1508_v56 = vadd.f32 %v760_v18, %v697_v43  ;;  %v1510_v57 = vadd.f32 %v763_v29, %v698_v55  ;;  %v1078_v25 = vld [vmem:[%s1169_s24 + $0x40] sm:$0xe]  ;;  %v1080_v51 = vld [vmem:[%s1586_s1 + $0x8] ss:$0 sm:$0xff]  ;;  %s217_s24 = scalar_lea.vmem %s1589_s4, %s1084_s18 }
  0x66   : > { %v778_v24 = vsel %vm308_vm0, %v776_v11, %v777_v12  ;;  %v1516_v3 = vadd.f32 %v766_v35, %v1453_v37  ;;  %v793_v14 = vadd.f32 %v769_v36, %v1455_v48  ;;  %v794_v4 = vadd.f32 %v772_v5, %v701_v61 }
  0x67   : > { %v781_v41 = vsel %vm308_vm0, %v779_v13, %v780_v60  ;;  %v795_v43 = vadd.f32 %v775_v32, %v1466_v45  ;;  %v796_v55 = vadd.f32 %v778_v24, %v1468_v50  ;;  %v806_v28 = vunpack.c.l.bf16 %v1072_v47  ;;  %v1081_v24 = vld [vmem:[%s1587_s2] ss:$0 sm:$0xff] }
  0x68   : > { %v797_v37 = vadd.f32 %v781_v41, %v1470_v23  ;;  %v807_v10 = vunpack.c.l.bf16 %v1073_v53  ;;  %v808_v52 = vunpack.c.l.bf16 %v1074_v33  ;;  %v809_v48 = vunpack.c.l.bf16 %v1075_v39 }
  0x69   : > { %v810_v61 = vunpack.c.l.bf16 %v1076_v46  ;;  %v811_v38 = vunpack.c.l.bf16 %v1077_v34  ;;  %v812_v18 = vunpack.c.l.bf16 %v1078_v25  ;;  %v813_v29 = vunpack.c.l.bf16 %v1079_v17 }
  0x6a   : > { %v819_v44 = vmul.f32 %v1080_v51, %v806_v28  ;;  %v820_v45 = vmul.f32 %v1080_v51, %v713_v62  ;;  %v821_v20 = vmul.f32 %v1080_v51, %v807_v10  ;;  %v822_v50 = vmul.f32 %v1080_v51, %v714_v40 }
  0x6b   : > { %v823_v35 = vmul.f32 %v1080_v51, %v808_v52  ;;  %v824_v36 = vmul.f32 %v1080_v51, %v715_v54  ;;  %v825_v23 = vmul.f32 %v1080_v51, %v809_v48  ;;  %v826_v42 = vmul.f32 %v1080_v51, %v716_v59  ;;  %v1103_v48 = vld [vmem:[%s1164_s21 + $0x10] sm:$0xff]  }
  0x6c   : > { %v827_v19 = vmul.f32 %v1080_v51, %v810_v61  ;;  %v828_v47 = vmul.f32 %v1080_v51, %v717_v63  ;;  %v829_v53 = vmul.f32 %v1080_v51, %v811_v38  ;;  %v830_v15 = vmul.f32 %v1080_v51, %v718_v0 }
  0x6d   : > { %v831_v62 = vmul.f32 %v1080_v51, %v812_v18  ;;  %v832_v22 = vmul.f32 %v1080_v51, %v719_v27  ;;  %v833_v40 = vmul.f32 %v1080_v51, %v813_v29  ;;  %v834_v26 = vmul.f32 %v1080_v51, %v720_v31 }
  0x6e   : > { %v851_v54 = vrot.slane %v819_v44, 2  ;;  %v852_v5 = vrot.slane %v820_v45, 2  ;;  %v854_v30 = vrot.slane %v821_v20, 2  ;;  %v855_v59 = vrot.slane %v822_v50, 2  ;;  %v1104_v44 = vld [vmem:[%s1164_s21 + $0x18] sm:$0xff]  }
  0x6f   : > { %v857_v11 = vrot.slane %v823_v35, 2  ;;  %v858_v12 = vrot.slane %v824_v36, 2  ;;  %v860_v16 = vrot.slane %v825_v23, 2  ;;  %v861_v63 = vrot.slane %v826_v42, 2 }
  0x70   : > { %v853_v13 = vsel %vm402_vm1, %v851_v54, %v852_v5  ;;  %v856_v58 = vsel %vm402_vm1, %v854_v30, %v855_v59  ;;  %v863_v0 = vrot.slane %v827_v19, 2  ;;  %v864_v33 = vrot.slane %v828_v47, 2 }
  0x71   : > { %v859_v21 = vsel %vm402_vm1, %v857_v11, %v858_v12  ;;  %v862_v27 = vsel %vm402_vm1, %v860_v16, %v861_v63  ;;  %v866_v49 = vrot.slane %v829_v53, 2  ;;  %v867_v31 = vrot.slane %v830_v15, 2 }
  0x72   : > { %v865_v32 = vsel %vm402_vm1, %v863_v0, %v864_v33  ;;  %v869_v60 = vrot.slane %v831_v62, 2  ;;  %v870_v39 = vrot.slane %v832_v22, 2  ;;  %v872_v46 = vrot.slane %v833_v40, 2 }
  0x73   : > { %v868_v34 = vsel %vm402_vm1, %v866_v49, %v867_v31  ;;  %v873_v25 = vrot.slane %v834_v26, 2  ;;  %v883_v17 = vadd.f32 %v853_v13, %v1508_v56  ;;  %v884_v41 = vadd.f32 %v856_v58, %v1510_v57 }
  0x74   : > { %v871_v28 = vsel %vm402_vm1, %v869_v60, %v870_v39  ;;  %v885_v51 = vadd.f32 %v859_v21, %v1516_v3  ;;  %v886_v10 = vadd.f32 %v862_v27, %v793_v14  ;;  %v887_v52 = vadd.f32 %v865_v32, %v794_v4 }
  0x75   : > { %v874_v61 = vsel %vm402_vm1, %v872_v46, %v873_v25  ;;  %v888_v38 = vadd.f32 %v868_v34, %v795_v43  ;;  %v889_v18 = vadd.f32 %v871_v28, %v796_v55  ;;  %v898_v29 = vadd.f32 %v1081_v24, %v883_v17 }
  0x76   : > { %v890_v45 = vadd.f32 %v874_v61, %v797_v37  ;;  %v899_v20 = vadd.f32 %v1081_v24, %v884_v41  ;;  %v900_v50 = vadd.f32 %v1081_v24, %v885_v51  ;;  %v901_v56 = vadd.f32 %v1081_v24, %v886_v10 }
  0x77   : > { %v902_v35 = vadd.f32 %v1081_v24, %v887_v52  ;;  %v903_v57 = vadd.f32 %v1081_v24, %v888_v38  ;;  %v904_v36 = vadd.f32 %v1081_v24, %v889_v18  ;;  %v1096_v23 = vunpack.c.l.bf16 %v1103_v48 }
  0x78   : > { %v905_v42 = vadd.f32 %v1081_v24, %v890_v45  ;;  %v1097_v3 = vunpack.c.h.bf16 %v1103_v48  ;;  %v1100_v14 = vunpack.c.l.bf16 %v1104_v44  ;;  %v1101_v4 = vunpack.c.h.bf16 %v1104_v44 }
  0x79   : > { %v922_v19 = vadd.f32 %v1088_v6, %v898_v29  ;;  %v923_v43 = vadd.f32 %v1089_v7, %v899_v20  ;;  %v924_v55 = vadd.f32 %v1092_v8, %v900_v50  ;;  %v925_v37 = vadd.f32 %v1093_v9, %v901_v56 }
  0x7a   : > { %v926_v47 = vadd.f32 %v1096_v23, %v902_v35  ;;  %v927_v53 = vadd.f32 %v1097_v3, %v903_v57  ;;  %v928_v15 = vadd.f32 %v1100_v14, %v904_v36  ;;  %v929_v62 = vadd.f32 %v1101_v4, %v905_v42 }
  0x7b   : > { %v930_v22 = vpack.c.bf16 %v922_v19, %v922_v19  ;;  %v931_v6 = vpack.c.bf16 %v923_v43, %v923_v43  ;;  %v932_v40 = vpack.c.bf16 %v924_v55, %v924_v55  ;;  %v933_v1 = vpack.c.bf16 %v925_v37, %v925_v37 }
  0x7c   : > { %v934_v7 = vpack.c.bf16 %v926_v47, %v926_v47  ;;  %v935_v26 = vpack.c.bf16 %v927_v53, %v927_v53  ;;  %v936_v54 = vpack.c.bf16 %v928_v15, %v928_v15  ;;  %v937_v8 = vpack.c.bf16 %v929_v62, %v929_v62 }
  0x7d   : > { %939 = vst.msk [vmem:[%s217_s24] sm:$0xf] %vm938_vm2, %v930_v22  ;;  %940 = vst.msk [vmem:[%s217_s24 + $0x4] sm:$0xf] %vm938_vm2, %v931_v6 }
  0x7e   : > { %941 = vst.msk [vmem:[%s217_s24 + $0x8] sm:$0xf] %vm938_vm2, %v932_v40  ;;  %942 = vst.msk [vmem:[%s217_s24 + $0xc] sm:$0xf] %vm938_vm2, %v933_v1 }
  0x7f   : > { %943 = vst.msk [vmem:[%s217_s24 + $0x10] sm:$0xf] %vm938_vm2, %v934_v7  ;;  %944 = vst.msk [vmem:[%s217_s24 + $0x14] sm:$0xf] %vm938_vm2, %v935_v26 }
  0x80   : > { %945 = vst.msk [vmem:[%s217_s24 + $0x18] sm:$0xf] %vm938_vm2, %v936_v54  ;;  %946 = vst.msk [vmem:[%s217_s24 + $0x1c] sm:$0xf] %vm938_vm2, %v937_v8 }
  0x81 PF: > { %s14_s15 = sadd.s32 1, %s1120_s15  }
  0x82   : > { %p11_p4 = scmp.ge.s32.totalorder %s14_s15, 4  }
  0x84   :  { %13 = sbr.rel (!%p11_p4) target bundleno = 1 (0x1), region = 71 }

// kernel: basic_layer_up_forward.27
= control target key start
LH: loop header
LB: loop body
LE: loop exit
PB: predicated region body
PF: predicated region fallthrough
CT: control target
= control target key end

     0   :  { %s2044_s12 = smov 0   ;;  %s2546_s0 = inlined_call_operand.vmem [shape: bf16[2,64,64], index: 0, kind: input, shape index: {}]   ;;  %s2547_s1 = inlined_call_operand.vmem [shape: bf16[2,64,64], index: 1, kind: input, shape index: {}]   ;;  %s2548_s2 = inlined_call_operand.vmem [shape: bf16[2,64,32], index: 2, kind: input, shape index: {}]   ;;  %s2549_s3 = inlined_call_operand.vmem [shape: bf16[2,64,32], index: 3, kind: output, shape index: {}]  }
   0x1 LB: > { %s1634_s13 = sadd.s32 4294967295, %s2010_s12   ;;  %p1638_p0 = scmp.ge.s32.totalorder %s2010_s12, 1  ;;  %s2010_s12 = sphi %s2044_s12, %s13_s12  }
   0x2   : > { %p157_p1 = scmp.lt.s32.totalorder %s2010_s12, 3 }
   0x4   : > { %p158_p2 = pnand %p1638_p0, %p157_p1 }
   0x5   : > { %p191_p3 = scmp.lt.s32.totalorder (!%p158_p2), %s1634_s13, 1  ;;  %s2012_s18 = smov (!%p158_p2), 96   ;;  %v2013_v4 = vmov (!%p158_p2), 0.0   ;;  %vm2015_vm0 = vmmov (!%p158_p2), 0   ;;  %vm393_vm1 = vcmask (!%p158_p2), 523264   ;;  %vm528_vm2 = vcmask (!%p158_p2), 392512  }
   0x6   : > { %161 = sbr.rel (%p158_p2) target bundleno = 1507 (0x5e3), region = 32  ;;  %1756 = vmatprep.subr.bf16.mxu0 (!%p158_p2), %v2013_v4  ;;  %s2014_s22 = smov (!%p158_p2), 88   ;;  %1764 = vmatprep.mubr.msk.bf16.mxu0 (!%p158_p2), %vm2015_vm0, %v2013_v4  ;;  %vm816_vm3 = vcmask (!%p158_p2), 458112   ;;  %vm1104_vm4 = vcmask (!%p158_p2), 523712   ;;  %vm244_vm5 = vcmask (!%p158_p2), 326912   ;;  %vm280_vm6 = vcmask (!%p158_p2), 64512  }
   0x7   : > { %s2016_s23 = smov (!%p158_p2), 120   ;;  %s2017_s24 = smov (!%p158_p2), 80   ;;  %vm451_vm7 = vcmask (!%p158_p2), 1043456   ;;  %vm1496_vm8 = vcmask (!%p158_p2), 130048   ;;  %vm1505_vm9 = vcmask (!%p158_p2), 195584   ;;  %vm1546_vm10 = vcmask (!%p158_p2), 257024  }
   0x8   : > { %s2018_s25 = smov (!%p158_p2), 112   ;;  %s2019_s26 = smov (!%p158_p2), 72  }
   0x9   : > { %s2020_s27 = smov (!%p158_p2), 104   ;;  %s2021_s4 = smov (!%p158_p2), 8  }
   0xa   : > { %s2022_s5 = smov (!%p158_p2), 16   ;;  %s2023_s6 = smov (!%p158_p2), 24  }
   0xd   : > { %s2551_s13 = smov (!%p191_p3, %s1634_s13), 1 }
   0xe   : > { %s2052_s14 = sshll.u32 %s2551_s13, 5 }
   0xf   : > { %s200_s17 = scalar_lea.vmem %s2547_s1, %s2052_s14  ;;  %s205_s21 = scalar_lea.vmem %s2548_s2, %s2052_s14 }
  0x10   : > { %v2058_v0 = vld [vmem:[%s200_s17] sm:$0xff]   ;;  %v2060_v1 = vld [vmem:[%s200_s17 + $0x8] sm:$0xff]   ;;  %v2064_v2 = vld [vmem:[%s200_s17 + $0x10] sm:$0xff]   ;;  %s195_s30 = scalar_lea.vmem %s2546_s0, %s2052_s14  ;;  %s2513_s9 = scalar_lea.vmem %s2549_s3, %s2052_s14 }
  0x11   : > { %341 = vrot.lane.b32.xlu0 %v2058_v0, %s2012_s18  ;;  %345 = vrot.lane.b32.xlu1 %v2064_v2, %s2012_s18  ;;  %v2068_v3 = vld [vmem:[%s200_s17 + $0x18] sm:$0xff]   ;;  %v1936_v5 = vld [vmem:[%s205_s21] sm:$0xff]  }
  0x12   : > { %1757 = vmatpush3.bf16.msra.mxu0 %v1936_v5  ;;  %v1937_v6 = vld [vmem:[%s205_s21 + $0x8] sm:$0xff]   ;;  %v1938_v7 = vld [vmem:[%s205_s21 + $0x10] sm:$0xff]   ;;  %v2084_v8 = vld [vmem:[%s205_s21 + $0x18] sm:$0xff]   ;;  %1770 = vmatprep.mubr.msk.bf16.mxu1 %vm280_vm6, %v2058_v0 }
  0x13   : > { %1758 = vmatprep.subr.bf16.mxu0 %v2013_v4  ;;  %v1698_v18 = vld [vmem:[%s195_s30] sm:$0xff]   ;;  %v1713_v21 = vld [vmem:[%s195_s30 + $0x8] sm:$0xff]   ;;  %v1714_v27 = vld [vmem:[%s195_s30 + $0x10] sm:$0xff]  }
  0x14   : > { %v2133_v19 = vunpack.c.l.bf16 %v1698_v18  ;;  %v2135_v20 = vunpack.c.h.bf16 %v1698_v18  ;;  %v2137_v22 = vunpack.c.l.bf16 %v1713_v21  ;;  %v2143_v26 = vunpack.c.h.bf16 %v1713_v21  ;;  %v1715_v39 = vld [vmem:[%s195_s30 + $0x18] sm:$0xff]  }
  0x15   : > { %343 = vrot.lane.b32.xlu0 %v2060_v1, %s2012_s18  ;;  %347 = vrot.lane.b32.xlu1 %v2068_v3, %s2012_s18  ;;  %v2151_v31 = vunpack.c.l.bf16 %v1714_v27  ;;  %v2161_v38 = vunpack.c.h.bf16 %v1714_v27  ;;  %v2173_v48 = vunpack.c.l.bf16 %v1715_v39  ;;  %v2183_v58 = vunpack.c.h.bf16 %v1715_v39 }
  0x16   : > { %1759 = vmatpush3.bf16.msra.mxu0 %v1937_v6  ;;  %v529_v23 = vsel %vm528_vm2, %v2133_v19, 0.0  ;;  %v530_v24 = vsel %vm528_vm2, %v2135_v20, 0.0  ;;  %v532_v28 = vsel %vm528_vm2, %v2137_v22, 0.0  ;;  %v817_v29 = vsel %vm816_vm3, %v2133_v19, 0.0 }
  0x17   : > { %1760 = vmatprep.subr.bf16.mxu0 %v2013_v4  ;;  %v531_v25 = vadd.f32 %v530_v24, %v529_v23  ;;  %v818_v30 = vsel %vm816_vm3, %v2135_v20, 0.0  ;;  %v534_v34 = vsel %vm528_vm2, %v2143_v26, 0.0  ;;  %v820_v35 = vsel %vm816_vm3, %v2137_v22, 0.0 }
  0x18   : > { %v819_v33 = vadd.f32 %v818_v30, %v817_v29  ;;  %v1105_v36 = vsel %vm1104_vm4, %v2133_v19, 0.0  ;;  %v1106_v37 = vsel %vm1104_vm4, %v2135_v20, 0.0  ;;  %v536_v41 = vsel %vm528_vm2, %v2151_v31, 0.0 }
  0x19   : > { %635 = vrot.lane.b32.xlu1 %v2058_v0, %s2014_s22  ;;  %v533_v32 = vadd.f32 %v532_v28, %v531_v25  ;;  %v1107_v43 = vadd.f32 %v1106_v37, %v1105_v36  ;;  %v822_v44 = vsel %vm816_vm3, %v2143_v26, 0.0  ;;  %v1108_v45 = vsel %vm1104_vm4, %v2137_v22, 0.0 }
  0x1a   : > { %1761 = vmatpush3.bf16.msra.mxu0 %v1938_v7  ;;  %v821_v42 = vadd.f32 %v820_v35, %v819_v33  ;;  %v245_v46 = vsel %vm244_vm5, %v2133_v19, 0.0  ;;  %v246_v47 = vsel %vm244_vm5, %v2135_v20, 0.0  ;;  %v538_v53 = vsel %vm528_vm2, %v2161_v38, 0.0 }
  0x1b   : > { %1762 = vmatprep.subr.bf16.mxu0 %v2013_v4  ;;  %v535_v40 = vadd.f32 %v534_v34, %v533_v32  ;;  %v1109_v51 = vadd.f32 %v1108_v45, %v1107_v43  ;;  %v247_v52 = vadd.f32 %v246_v47, %v245_v46  ;;  %v824_v54 = vsel %vm816_vm3, %v2151_v31, 0.0 }
  0x1c   : > { %v823_v50 = vadd.f32 %v822_v44, %v821_v42  ;;  %v1110_v55 = vsel %vm1104_vm4, %v2143_v26, 0.0  ;;  %v248_v56 = vsel %vm244_vm5, %v2137_v22, 0.0  ;;  %v540_v63 = vsel %vm528_vm2, %v2173_v48, 0.0 }
  0x1d   : > { %637 = vrot.lane.b32.xlu1 %v2060_v1, %s2014_s22  ;;  %v537_v49 = vadd.f32 %v536_v41, %v535_v40  ;;  %v1111_v61 = vadd.f32 %v1110_v55, %v1109_v51  ;;  %v249_v62 = vadd.f32 %v248_v56, %v247_v52  ;;  %v830_v27 = vsel %vm816_vm3, %v2183_v58, 0.0 }
  0x1e   : > { %1763 = vmatpush3.bf16.msra.mxu0 %v2084_v8  ;;  %v825_v60 = vadd.f32 %v824_v54, %v823_v50  ;;  %v1116_v28 = vsel %vm1104_vm4, %v2173_v48, 0.0  ;;  %v254_v29 = vsel %vm244_vm5, %v2161_v38, 0.0  ;;  %v1118_v36 = vsel %vm1104_vm4, %v2183_v58, 0.0 }
  0x1f   : > { %v539_v59 = vadd.f32 %v538_v53, %v537_v49  ;;  %v256_v37 = vsel %vm244_vm5, %v2173_v48, 0.0  ;;  %v258_v43 = vsel %vm244_vm5, %v2183_v58, 0.0 }
  0x21   : > { %639 = vrot.lane.b32.xlu1 %v2064_v2, %s2014_s22 }
  0x25   : > { %641 = vrot.lane.b32.xlu1 %v2068_v3, %s2014_s22 }
  0x29   : > { %663 = vrot.lane.b32.xlu1 %v1936_v5, %s2016_s23 }
  0x2d   : > { %665 = vrot.lane.b32.xlu1 %v1937_v6, %s2016_s23 }
  0x31   : > { %667 = vrot.lane.b32.xlu1 %v1938_v7, %s2016_s23 }
  0x35   : > { %669 = vrot.lane.b32.xlu1 %v2084_v8, %s2016_s23 }
  0x83   : > { %v342_v9 = vpop.permute.xlu0 %341  ;;  %v346_v11 = vpop.permute.xlu1 %345 }
  0x84   : > { %353 = vxpose.xlu0.c.b16.start [1/4] (short) (narrow) %v342_v9, 16 }
  0x87   : > { %v344_v10 = vpop.permute.xlu0 %343  ;;  %v348_v12 = vpop.permute.xlu1 %347 }
  0x88   : > { %354 = vxpose.xlu0.c.b16.cont [2/4] (short) (narrow) %v344_v10, 16  ;;  %v541_v10 = vadd.f32 %v540_v63, %v539_v59 }
  0x8b   : > { %v636_v13 = vpop.permute.xlu1 %635 }
  0x8c   : > { %355 = vxpose.xlu0.c.b16.cont [3/4] (short) (narrow) %v346_v11, 16  ;;  %647 = vxpose.xlu1.c.b16.start [1/4] (short) (narrow) %v636_v13, 16 }
  0x8f   : > { %v638_v14 = vpop.permute.xlu1 %637 }
  0x90   : > { %356 = vxpose.xlu0.c.b16.end [4/4] (short) (narrow) %v348_v12, 16  ;;  %648 = vxpose.xlu1.c.b16.cont [2/4] (short) (narrow) %v638_v14, 16  ;;  %v542_v14 = vsel %vm528_vm2, %v2183_v58, 0.0 }
  0x91   : > { %v543_v21 = vadd.f32 %v542_v14, %v541_v10 }
  0x93   : > { %v640_v15 = vpop.permute.xlu1 %639  ;;  %v544_v32 = vrot.slane %v543_v21, 4 }
  0x94   : > { %649 = vxpose.xlu1.c.b16.cont [3/4] (short) (narrow) %v640_v15, 16  ;;  %v828_v15 = vsel %vm816_vm3, %v2173_v48, 0.0 }
  0x95   : > { %v545_v39 = vadd.f32 %v544_v32, %v543_v21 }
  0x97   : > { %v642_v16 = vpop.permute.xlu1 %641  ;;  %v546_v44 = vrot.slane %v545_v39, 2 }
  0x98   : > { %650 = vxpose.xlu1.c.b16.end [4/4] (short) (narrow) %v642_v16, 16  ;;  %v1114_v16 = vsel %vm1104_vm4, %v2161_v38, 0.0 }
  0x99   : > { %923 = vrot.lane.b32.xlu0 %v2058_v0, %s2017_s24  ;;  %v547_v49 = vadd.f32 %v546_v44, %v545_v39 }
  0x9b   : > { %v548_v53 = vrot.slane %v547_v49, 1 }
  0x9c   : > { %726 = vrot.lane.b32.xlu1 %v2068_v3, %s2016_s23 }
  0x9d   : > { %925 = vrot.lane.b32.xlu0 %v2060_v1, %s2017_s24 }
  0xa0   : > { %957 = vrot.lane.b32.xlu1 %v2084_v8, %s2018_s25 }
  0xa1   : > { %927 = vrot.lane.b32.xlu0 %v2064_v2, %s2017_s24 }
  0xa4   : > { %1211 = vrot.lane.b32.xlu1 %v2058_v0, %s2019_s26 }
  0xa5   : > { %929 = vrot.lane.b32.xlu0 %v2068_v3, %s2017_s24 }
  0xa8   : > { %1213 = vrot.lane.b32.xlu1 %v2060_v1, %s2019_s26 }
  0xa9   : > { %720 = vrot.lane.b32.xlu0 %v2058_v0, %s2016_s23 }
  0xac   : > { %1215 = vrot.lane.b32.xlu1 %v2064_v2, %s2019_s26 }
  0xad   : > { %722 = vrot.lane.b32.xlu0 %v2060_v1, %s2016_s23 }
  0xb0   : > { %1217 = vrot.lane.b32.xlu1 %v2068_v3, %s2019_s26 }
  0xb1   : > { %951 = vrot.lane.b32.xlu0 %v1936_v5, %s2018_s25 }
  0xb4   : > { %1008 = vrot.lane.b32.xlu1 %v2058_v0, %s2018_s25 }
  0xb5   : > { %953 = vrot.lane.b32.xlu0 %v1937_v6, %s2018_s25 }
  0xb8   : > { %1010 = vrot.lane.b32.xlu1 %v2060_v1, %s2018_s25 }
  0xb9   : > { %724 = vrot.lane.b32.xlu0 %v2064_v2, %s2016_s23 }
  0xbc   : > { %1239 = vrot.lane.b32.xlu1 %v1936_v5, %s2020_s27  ;;  %v826_v5 = vsel %vm816_vm3, %v2161_v38, 0.0 }
  0xbd   : > { %955 = vrot.lane.b32.xlu0 %v1938_v7, %s2018_s25  ;;  %v827_v11 = vadd.f32 %v826_v5, %v825_v60 }
  0xbf   : > { %v829_v23 = vadd.f32 %v828_v15, %v827_v11 }
  0xc0   : > { %1241 = vrot.lane.b32.xlu1 %v1937_v6, %s2020_s27  ;;  %v1112_v6 = vsel %vm1104_vm4, %v2151_v31, 0.0 }
  0xc1   : > { %v1113_v12 = vadd.f32 %v1112_v6, %v1111_v61  ;;  %v831_v33 = vadd.f32 %v830_v27, %v829_v23 }
  0xc3   : > { %v1115_v24 = vadd.f32 %v1114_v16, %v1113_v12  ;;  %v832_v40 = vrot.slane %v831_v33, 4  ;;  %v2225_v12 = vpop.permute.xlu1 %663 }
  0xc4   : > { %1012 = vrot.lane.b32.xlu1 %v2064_v2, %s2018_s25 }
  0xc5   : > { %v1117_v34 = vadd.f32 %v1116_v28, %v1115_v24  ;;  %v833_v45 = vadd.f32 %v832_v40, %v831_v33 }
  0xc7   : > { %v1119_v41 = vadd.f32 %v1118_v36, %v1117_v34  ;;  %v834_v50 = vrot.slane %v833_v45, 2  ;;  %v2228_v14 = vpop.permute.xlu1 %665 }
  0xc8   : > { %1014 = vrot.lane.b32.xlu1 %v2068_v3, %s2018_s25 }
  0xc9   : > { %v1120_v46 = vrot.slane %v1119_v41, 4  ;;  %v835_v54 = vadd.f32 %v834_v50, %v833_v45 }
  0xcb   : > { %v1121_v51 = vadd.f32 %v1120_v46, %v1119_v41  ;;  %v2233_v15 = vpop.permute.xlu1 %667 }
  0xcc   : > { %1243 = vrot.lane.b32.xlu1 %v1938_v7, %s2020_s27  ;;  %v250_v7 = vsel %vm244_vm5, %v2143_v26, 0.0 }
  0xcd   : > { %v251_v13 = vadd.f32 %v250_v7, %v249_v62  ;;  %v1122_v55 = vrot.slane %v1121_v51, 2 }
  0xcf   : > { %v1123_v59 = vadd.f32 %v1122_v55, %v1121_v51  ;;  %v2235_v16 = vpop.permute.xlu1 %669 }
  0xd1   : > { %v1124_v63 = vrot.slane %v1123_v59, 1 }
  0xd3   : > { %v1125_v7 = vadd.f32 %v1124_v63, %v1123_v59 }
  0xd5   : > { %v1126_v10 = vmul.f32 0.015625, %v1125_v7 }
  0xea   : > { %v361_v17 = vpop.trf.xlu0 }
  0xeb   : > { %1765 = vmatmul.mubr.msk.bf16.vlgmr.msra.gmra.mrb[0].mxu0 %vm393_vm1, %v361_v17  ;;  %v252_v17 = vsel %vm244_vm5, %v2151_v31, 0.0 }
  0xec   : > { %v253_v25 = vadd.f32 %v252_v17, %v251_v13 }
  0xee   : > { %v255_v35 = vadd.f32 %v254_v29, %v253_v25 }
  0xf0   : > { %v257_v42 = vadd.f32 %v256_v37, %v255_v35 }
  0xf2   : > { %v259_v47 = vadd.f32 %v258_v43, %v257_v42  ;;  %v2237_v17 = vpop.trf.xlu1 }
  0xf4   : > { %v260_v52 = vrot.slane %v259_v47, 4 }
  0xf6   : > { %v261_v56 = vadd.f32 %v260_v52, %v259_v47 }
  0xf8   : > { %v262_v60 = vrot.slane %v261_v56, 2 }
  0xfa   : > { %v263_v5 = vadd.f32 %v262_v60, %v261_v56 }
 0x10b   : > { %v924_v57 = vpop.permute.xlu0 %923 }
 0x10c   : > { %935 = vxpose.xlu0.c.b16.start [1/4] (short) (narrow) %v924_v57, 16  ;;  %v836_v57 = vrot.slane %v835_v54, 1 }
 0x10e   : > { %v837_v62 = vadd.f32 %v836_v57, %v835_v54 }
 0x10f   : > { %v926_v9 = vpop.permute.xlu0 %925 }
 0x110   : > { %936 = vxpose.xlu0.c.b16.cont [2/4] (short) (narrow) %v926_v9, 16  ;;  %v838_v6 = vmul.f32 0.015625, %v837_v62  ;;  %v264_v9 = vrot.slane %v263_v5, 1 }
 0x112   : > { %v265_v11 = vadd.f32 %v264_v9, %v263_v5 }
 0x113   : > { %v928_v18 = vpop.permute.xlu0 %927 }
 0x114   : > { %937 = vxpose.xlu0.c.b16.cont [3/4] (short) (narrow) %v928_v18, 16  ;;  %v267_v13 = vmul.f32 0.015625, %v265_v11  ;;  %v2239_v18 = vpop.permute.xlu1 %726 }
 0x117   : > { %v930_v30 = vpop.permute.xlu0 %929 }
 0x118   : > { %938 = vxpose.xlu0.c.b16.end [4/4] (short) (narrow) %v930_v30, 16  ;;  %v2241_v21 = vpop.permute.xlu1 %957 }
 0x11b   : > { %v2243_v28 = vpop.permute.xlu0 %720 }
 0x11c   : > { %v1212_v23 = vpop.permute.xlu1 %1211 }
 0x11d   : > { %1223 = vxpose.xlu1.c.b16.start [1/4] (short) (narrow) %v1212_v23, 16 }
 0x11f   : > { %v2246_v29 = vpop.permute.xlu0 %722 }
 0x120   : > { %v1214_v24 = vpop.permute.xlu1 %1213 }
 0x121   : > { %1245 = vrot.lane.b32.xlu0 %v2084_v8, %s2020_s27  ;;  %v549_v8 = vadd.f32 %v548_v53, %v547_v49  ;;  %1224 = vxpose.xlu1.c.b16.cont [2/4] (short) (narrow) %v1214_v24, 16 }
 0x123   : > { %v550_v61 = vmul.f32 0.015625, %v549_v8  ;;  %v2248_v30 = vpop.permute.xlu0 %951 }
 0x124   : > { %v1216_v25 = vpop.permute.xlu1 %1215 }
 0x125   : > { %1296 = vrot.lane.b32.xlu0 %v2058_v0, %s2020_s27  ;;  %1225 = vxpose.xlu1.c.b16.cont [3/4] (short) (narrow) %v1216_v25, 16 }
 0x127   : > { %v2250_v32 = vpop.permute.xlu0 %953 }
 0x128   : > { %v1218_v27 = vpop.permute.xlu1 %1217 }
 0x129   : > { %1300 = vrot.lane.b32.xlu0 %v2064_v2, %s2020_s27  ;;  %1226 = vxpose.xlu1.c.b16.end [4/4] (short) (narrow) %v1218_v27, 16 }
 0x12b   : > { %v2252_v33 = vpop.permute.xlu0 %724 }
 0x12c   : > { %v1009_v0 = vpop.permute.xlu1 %1008 }
 0x12d   : > { %1298 = vrot.lane.b32.xlu0 %v2060_v1, %s2020_s27  ;;  %1814 = vmatprep.mubr.msk.bf16.mxu0 %vm280_vm6, %v1009_v0 }
 0x12f   : > { %v2254_v34 = vpop.permute.xlu0 %955 }
 0x131   : > { %1302 = vrot.lane.b32.xlu0 %v2068_v3, %s2020_s27 }
 0x135   : > { %552 = vrot.lane.b32.xlu0 %v550_v61, %s2012_s18 }
 0x139   : > { %840 = vrot.lane.b32.xlu0 %v838_v6, %s2012_s18 }
 0x13d   : > { %1128 = vrot.lane.b32.xlu0 %v1126_v10, %s2012_s18 }
 0x141   : > { %269 = vrot.lane.b32.xlu0 %v267_v13, %s2012_s18 }
 0x172   : > { %v2256_v35 = vpop.trf.xlu0 }
 0x193   : > { %v2258_v36 = vpop.permute.xlu0 %1245 }
 0x197   : > { %v2260_v37 = vpop.permute.xlu0 %1296 }
 0x19b   : > { %v2262_v39 = vpop.permute.xlu0 %1300 }
 0x19f   : > { %v2264_v40 = vpop.permute.xlu0 %1298 }
 0x1a3   : > { %v2266_v41 = vpop.permute.xlu0 %1302 }
 0x1a7   : > { %v2268_v42 = vpop.permute.xlu0 %552 }
 0x1a8   : > { %v561_v13 = vmul.f32 %v2173_v48, %v2268_v42 }
 0x1ab   : > { %v2270_v43 = vpop.permute.xlu0 %840 }
 0x1ac   : > { %v843_v25 = vmul.f32 %v2133_v19, %v2270_v43  ;;  %v844_v27 = vmul.f32 %v2135_v20, %v2270_v43  ;;  %v845_v0 = vmul.f32 %v2137_v22, %v2270_v43 }
 0x1af   : > { %v2272_v44 = vpop.permute.xlu0 %1128 }
 0x1b3   : > { %v270_v45 = vpop.permute.xlu0 %269 }
 0x1b4   : > { %v273_v46 = vmul.f32 %v2135_v20, %v270_v45  ;;  %v274_v47 = vmul.f32 %v2137_v22, %v270_v45  ;;  %v272_v49 = vmul.f32 %v2133_v19, %v270_v45  ;;  %v277_v50 = vmul.f32 %v2161_v38, %v270_v45 }
 0x1b5   : > { %v275_v54 = vmul.f32 %v2143_v26, %v270_v45  ;;  %v279_v56 = vmul.f32 %v2183_v58, %v270_v45  ;;  %v276_v57 = vmul.f32 %v2151_v31, %v270_v45  ;;  %v278_v6 = vmul.f32 %v2173_v48, %v270_v45 }
 0x1b6   : > { %v284_v51 = vsel %vm280_vm6, %v273_v46, 0.0  ;;  %v281_v52 = vsel %vm280_vm6, %v272_v49, 0.0  ;;  %v287_v53 = vsel %vm280_vm6, %v274_v47, 0.0  ;;  %v296_v55 = vsel %vm280_vm6, %v277_v50, 0.0 }
 0x1b7   : > { %285 = vadd.xlane.f32.xlu1 %v284_v51  ;;  %282 = vadd.xlane.f32.xlu0 %v281_v52  ;;  %v290_v8 = vsel %vm280_vm6, %v275_v54, 0.0  ;;  %v302_v59 = vsel %vm280_vm6, %v279_v56, 0.0  ;;  %v293_v5 = vsel %vm280_vm6, %v276_v57, 0.0  ;;  %v299_v11 = vsel %vm280_vm6, %v278_v6, 0.0 }
 0x1b8   : > { %v847_v45 = vmul.f32 %v2151_v31, %v2270_v43  ;;  %v848_v47 = vmul.f32 %v2161_v38, %v2270_v43  ;;  %v849_v49 = vmul.f32 %v2173_v48, %v2270_v43  ;;  %v850_v50 = vmul.f32 %v2183_v58, %v2270_v43 }
 0x1b9   : > { %v1131_v52 = vmul.f32 %v2133_v19, %v2272_v44  ;;  %v1133_v54 = vmul.f32 %v2137_v22, %v2272_v44 }
 0x1bb   : > { %288 = vadd.xlane.f32.xlu1 %v287_v53  ;;  %297 = vadd.xlane.f32.xlu0 %v296_v55  ;;  %v1132_v53 = vmul.f32 %v2135_v20, %v2272_v44  ;;  %v1134_v55 = vmul.f32 %v2143_v26, %v2272_v44 }
 0x1be   : > { %v431_v60 = vpop.f32.mrb[0].mxu0 }
 0x1bf   : > { %v437_v61 = vmul.f32 0.015625, %v431_v60  ;;  %v1766_v62 = vpop.f32.mrb[1].mxu0  ;;  %291 = vadd.xlane.f32.xlu1 %v290_v8  ;;  %303 = vadd.xlane.f32.xlu0 %v302_v59 }
 0x1c0   : > { %v434_v63 = vpop.f32.mrb[2].mxu0 }
 0x1c1   : > { %v438_v7 = vpack.c.bf16 %v437_v61, %v437_v61  ;;  %v1767_v9 = vpop.f32.mrb[3].mxu0 }
 0x1c3   : > { %1846 = vmatprep.subr.msk.bf16.mxu1 %vm451_vm7, %v438_v7  ;;  %v453_v10 = vsel %vm451_vm7, %v438_v7, 0  ;;  %294 = vadd.xlane.f32.xlu1 %v293_v5 }
 0x1c4   : > { %1769 = vmatpush3.bf16.msra.mxu1 %v453_v10 }
 0x1c5   : > { %1778 = vmatprep.subr.bf16.mxu1 %v2013_v4 }
 0x1c7   : > { %1771 = vmatmul.mubr.msk.bf16.vlgmr.msra.gmra.mrb[0].mxu1 %vm280_vm6, %v2060_v1  ;;  %300 = vadd.xlane.f32.xlu1 %v299_v11  ;;  %v556_v1 = vmul.f32 %v2135_v20, %v2268_v42  ;;  %v1136_v20 = vmul.f32 %v2161_v38, %v2272_v44 }
 0x1c8   : > { %1779 = vmatpush3.bf16.msra.mxu1 %v2225_v12  ;;  %1774 = vmatprep.mubr.msk.bf16.mxu1 %vm280_vm6, %v2064_v2  ;;  %v555_v2 = vmul.f32 %v2133_v19, %v2268_v42  ;;  %v557_v12 = vmul.f32 %v2137_v22, %v2268_v42  ;;  %v1135_v19 = vmul.f32 %v2151_v31, %v2272_v44 }
 0x1c9   : > { %1780 = vmatprep.subr.bf16.mxu1 %v2013_v4  ;;  %v1137_v22 = vmul.f32 %v2173_v48, %v2272_v44 }
 0x1cc   : > { %1781 = vmatpush3.bf16.msra.mxu1 %v2228_v14  ;;  %v558_v14 = vmul.f32 %v2143_v26, %v2268_v42 }
 0x1cd   : > { %1782 = vmatprep.subr.bf16.mxu1 %v2013_v4 }
 0x1cf   : > { %1775 = vmatmul.mubr.msk.bf16.gmra.mrb[4].mxu1 %vm280_vm6, %v2068_v3  ;;  %v559_v3 = vmul.f32 %v2151_v31, %v2268_v42 }
 0x1d0   : > { %1783 = vmatpush3.bf16.msra.mxu1 %v2233_v15  ;;  %1786 = vmatprep.mubr.msk.bf16.mxu1 %vm2015_vm0, %v2013_v4  ;;  %v560_v15 = vmul.f32 %v2161_v38, %v2268_v42 }
 0x1d1   : > { %1784 = vmatprep.subr.bf16.mxu1 %v2013_v4 }
 0x1d4   : > { %1785 = vmatpush3.bf16.msra.mxu1 %v2235_v16  ;;  %v562_v16 = vmul.f32 %v2183_v58, %v2268_v42  ;;  %v846_v42 = vmul.f32 %v2143_v26, %v2270_v43  ;;  %v1138_v26 = vmul.f32 %v2183_v58, %v2272_v44 }
 0x1d5   : > { %573 = vrot.lane.b32.xlu0 %v556_v1, %s2016_s23 }
 0x1d7   : > { %1787 = vmatmul.mubr.msk.bf16.vlgmr.msra.gmra.mrb[8].mxu1 %vm393_vm1, %v2237_v17  ;;  %v2336_v17 = vpop.permute.xlu1 %1010 }
 0x1d8   : > { %571 = vrot.lane.b32.xlu1 %v555_v2, %s2016_s23  ;;  %1792 = vmatprep.mubr.msk.bf16.mxu1 %vm280_vm6, %v2243_v28 }
 0x1d9   : > { %579 = vrot.lane.b32.xlu0 %v559_v3, %s2016_s23 }
 0x1db   : > { %v2338_v23 = vpop.permute.xlu1 %1239 }
 0x1dc   : > { %575 = vrot.lane.b32.xlu1 %v557_v12, %s2016_s23 }
 0x1dd   : > { %583 = vrot.lane.b32.xlu0 %v561_v13, %s2016_s23 }
 0x1df   : > { %v2340_v24 = vpop.permute.xlu1 %1241 }
 0x1e0   : > { %577 = vrot.lane.b32.xlu1 %v558_v14, %s2016_s23 }
 0x1e1   : > { %859 = vrot.lane.b32.xlu0 %v843_v25, %s2018_s25 }
 0x1e3   : > { %v2347_v28 = vpop.permute.xlu1 %1012 }
 0x1e4   : > { %581 = vrot.lane.b32.xlu1 %v560_v15, %s2016_s23 }
 0x1e5   : > { %863 = vrot.lane.b32.xlu0 %v845_v0, %s2018_s25 }
 0x1e7   : > { %v2358_v46 = vpop.permute.xlu1 %1014 }
 0x1e8   : > { %585 = vrot.lane.b32.xlu1 %v562_v16, %s2016_s23 }
 0x1e9   : > { %867 = vrot.lane.b32.xlu0 %v847_v45, %s2018_s25 }
 0x1eb   : > { %v2369_v51 = vpop.permute.xlu1 %1243 }
 0x1ec   : > { %861 = vrot.lane.b32.xlu1 %v844_v27, %s2018_s25 }
 0x1ed   : > { %871 = vrot.lane.b32.xlu0 %v849_v49, %s2018_s25 }
 0x1ef   : > { %v2380_v43 = vpop.trf.xlu1 }
 0x1f0   : > { %865 = vrot.lane.b32.xlu1 %v846_v42, %s2018_s25 }
 0x1f1   : > { %1147 = vrot.lane.b32.xlu0 %v1131_v52, %s2020_s27 }
 0x1f4   : > { %869 = vrot.lane.b32.xlu1 %v848_v47, %s2018_s25 }
 0x1f5   : > { %1151 = vrot.lane.b32.xlu0 %v1133_v54, %s2020_s27 }
 0x1f8   : > { %873 = vrot.lane.b32.xlu1 %v850_v50, %s2018_s25 }
 0x1f9   : > { %1155 = vrot.lane.b32.xlu0 %v1135_v19, %s2020_s27 }
 0x1fc   : > { %1149 = vrot.lane.b32.xlu1 %v1132_v53, %s2020_s27 }
 0x1fd   : > { %1159 = vrot.lane.b32.xlu0 %v1137_v22, %s2020_s27 }
 0x200   : > { %1153 = vrot.lane.b32.xlu1 %v1134_v55, %s2020_s27 }
 0x204   : > { %1157 = vrot.lane.b32.xlu1 %v1136_v20, %s2020_s27 }
 0x208   : > { %1161 = vrot.lane.b32.xlu1 %v1138_v26, %s2020_s27 }
 0x244   : > { %v286_v56 = vpop.xlane.xlu1 %285  ;;  %v283_v59 = vpop.xlane.xlu0 %282 }
 0x245   : > { %v305_v15 = vadd.f32 1e-06, %v283_v59  ;;  %v306_v25 = vadd.f32 1e-06, %v286_v56 }
 0x248   : > { %v289_v8 = vpop.xlane.xlu1 %288  ;;  %v298_v60 = vpop.xlane.xlu0 %297 }
 0x249   : > { %v307_v14 = vadd.f32 1e-06, %v289_v8  ;;  %v310_v45 = vadd.f32 1e-06, %v298_v60 }
 0x24b   : > { %1940 = vrcp.f32 %v307_v14 }
 0x24c   : > { %v292_v31 = vpop.xlane.xlu1 %291  ;;  %v304_v62 = vpop.xlane.xlu0 %303  ;;  %1942 = vrcp.f32 %v305_v15 }
 0x24d   : > { %v308_v16 = vadd.f32 1e-06, %v292_v31  ;;  %v312_v42 = vadd.f32 1e-06, %v304_v62 }
 0x24f   : > { %1944 = vrcp.f32 %v308_v16 }
 0x250   : > { %v295_v57 = vpop.xlane.xlu1 %294  ;;  %v574_v48 = vpop.permute.xlu0 %573  ;;  %1946 = vrcp.f32 %v306_v25 }
 0x251   : > { %v598_v7 = vsel %vm280_vm6, %v574_v48, 0.0  ;;  %v309_v0 = vadd.f32 1e-06, %v295_v57 }
 0x252   : > { %599 = vadd.xlane.f32.xlu1 %v598_v7 }
 0x254   : > { %v301_v38 = vpop.xlane.xlu1 %300  ;;  %v580_v44 = vpop.permute.xlu0 %579 }
 0x255   : > { %v607_v11 = vsel %vm280_vm6, %v580_v44, 0.0  ;;  %v311_v27 = vadd.f32 1e-06, %v301_v38  ;;  %v1941_v47 = vpop.eup %1940 }
 0x256   : > { %608 = vadd.xlane.f32.xlu1 %v607_v11  ;;  %v1943_v49 = vpop.eup %1942 }
 0x257   : > { %1948 = vrcp.f32 %v311_v27 }
 0x258   : > { %v572_v61 = vpop.permute.xlu1 %571  ;;  %v584_v1 = vpop.permute.xlu0 %583  ;;  %1950 = vrcp.f32 %v309_v0 }
 0x259   : > { %v595_v5 = vsel %vm280_vm6, %v572_v61, 0.0  ;;  %v613_v12 = vsel %vm280_vm6, %v584_v1, 0.0  ;;  %1952 = vrcp.f32 %v312_v42  ;;  %v1945_v50 = vpop.eup %1944 }
 0x25a   : > { %596 = vadd.xlane.f32.xlu0 %v595_v5  ;;  %614 = vadd.xlane.f32.xlu1 %v613_v12  ;;  %1954 = vrcp.f32 %v310_v45  ;;  %v1947_v53 = vpop.eup %1946 }
 0x25c   : > { %v576_v63 = vpop.permute.xlu1 %575  ;;  %v860_v26 = vpop.permute.xlu0 %859 }
 0x25d   : > { %v601_v58 = vsel %vm280_vm6, %v576_v63, 0.0  ;;  %v883_v57 = vsel %vm280_vm6, %v860_v26, 0.0 }
 0x25e   : > { %602 = vadd.xlane.f32.xlu0 %v601_v58  ;;  %884 = vadd.xlane.f32.xlu1 %v883_v57 }
 0x260   : > { %v578_v6 = vpop.permute.xlu1 %577  ;;  %v864_v61 = vpop.permute.xlu0 %863 }
 0x261   : > { %v604_v10 = vsel %vm280_vm6, %v578_v6, 0.0  ;;  %v1949_v38 = vpop.eup %1948  ;;  %v889_v5 = vsel %vm280_vm6, %v864_v61, 0.0 }
 0x262   : > { %605 = vadd.xlane.f32.xlu0 %v604_v10  ;;  %v1951_v60 = vpop.eup %1950  ;;  %890 = vadd.xlane.f32.xlu1 %v889_v5 }
 0x263   : > { %v1953_v62 = vpop.eup %1952 }
 0x264   : > { %v582_v9 = vpop.permute.xlu1 %581  ;;  %v1955_v6 = vpop.eup %1954 }
 0x265   : > { %v610_v2 = vsel %vm280_vm6, %v582_v9, 0.0 }
 0x266   : > { %611 = vadd.xlane.f32.xlu0 %v610_v2  ;;  %v868_v2 = vpop.permute.xlu0 %867 }
 0x268   : > { %v586_v3 = vpop.permute.xlu1 %585 }
 0x269   : > { %v616_v13 = vsel %vm280_vm6, %v586_v3, 0.0 }
 0x26a   : > { %617 = vadd.xlane.f32.xlu0 %v616_v13  ;;  %v895_v13 = vsel %vm280_vm6, %v868_v2, 0.0  ;;  %v872_v15 = vpop.permute.xlu0 %871 }
 0x26b   : > { %896 = vadd.xlane.f32.xlu1 %v895_v13  ;;  %v901_v27 = vsel %vm280_vm6, %v872_v15, 0.0 }
 0x26c   : > { %v862_v31 = vpop.permute.xlu1 %861 }
 0x26d   : > { %v886_v59 = vsel %vm280_vm6, %v862_v31, 0.0 }
 0x26e   : > { %887 = vadd.xlane.f32.xlu0 %v886_v59 }
 0x26f   : > { %902 = vadd.xlane.f32.xlu1 %v901_v27 }
 0x270   : > { %v866_v48 = vpop.permute.xlu1 %865 }
 0x271   : > { %v892_v7 = vsel %vm280_vm6, %v866_v48, 0.0 }
 0x272   : > { %893 = vadd.xlane.f32.xlu0 %v892_v7 }
 0x274   : > { %v870_v12 = vpop.permute.xlu1 %869 }
 0x275   : > { %v898_v14 = vsel %vm280_vm6, %v870_v12, 0.0 }
 0x276   : > { %899 = vadd.xlane.f32.xlu0 %v898_v14 }
 0x278   : > { %v874_v25 = vpop.permute.xlu1 %873 }
 0x279   : > { %v904_v45 = vsel %vm280_vm6, %v874_v25, 0.0 }
 0x27a   : > { %905 = vadd.xlane.f32.xlu0 %v904_v45 }
 0x29a   : > { %v1772_v52 = vpop.f32.mrb[0].mxu1 }
 0x29b   : > { %v2406_v54 = vmul.f32 %v1941_v47, %v1772_v52  ;;  %v489_v55 = vpop.f32.mrb[1].mxu1  ;;  %v1148_v52 = vpop.permute.xlu0 %1147 }
 0x29c   : > { %v2408_v19 = vmul.f32 %v1943_v49, %v489_v55  ;;  %v1773_v20 = vpop.f32.mrb[2].mxu1  ;;  %v1171_v55 = vsel %vm280_vm6, %v1148_v52, 0.0 }
 0x29d   : > { %v2410_v22 = vmul.f32 %v1945_v50, %v1773_v20  ;;  %v492_v56 = vpop.f32.mrb[3].mxu1  ;;  %1172 = vadd.xlane.f32.xlu1 %v1171_v55 }
 0x29e   : > { %v2412_v8 = vmul.f32 %v1947_v53, %v492_v56  ;;  %v1150_v53 = vpop.permute.xlu1 %1149 }
 0x29f   : > { %v1174_v56 = vsel %vm280_vm6, %v1150_v53, 0.0  ;;  %v1152_v26 = vpop.permute.xlu0 %1151 }
 0x2a0   : > { %1175 = vadd.xlane.f32.xlu0 %v1174_v56  ;;  %v1177_v57 = vsel %vm280_vm6, %v1152_v26, 0.0 }
 0x2a1   : > { %1178 = vadd.xlane.f32.xlu1 %v1177_v57 }
 0x2a2   : > { %v1776_v63 = vpop.f32.mrb[4].mxu1  ;;  %v1154_v31 = vpop.permute.xlu1 %1153 }
 0x2a3   : > { %v2417_v58 = vmul.f32 %v1949_v38, %v1776_v63  ;;  %v505_v44 = vpop.f32.mrb[5].mxu1  ;;  %v1180_v59 = vsel %vm280_vm6, %v1154_v31, 0.0  ;;  %v1156_v38 = vpop.permute.xlu0 %1155 }
 0x2a4   : > { %v2420_v9 = vmul.f32 %v1951_v60, %v505_v44  ;;  %v1777_v10 = vpop.f32.mrb[6].mxu1  ;;  %1181 = vadd.xlane.f32.xlu0 %v1180_v59  ;;  %v1183_v61 = vsel %vm280_vm6, %v1156_v38, 0.0 }
 0x2a5   : > { %v2422_v11 = vmul.f32 %v1953_v62, %v1777_v10  ;;  %v508_v1 = vpop.f32.mrb[7].mxu1  ;;  %1184 = vadd.xlane.f32.xlu1 %v1183_v61 }
 0x2a6   : > { %v2424_v3 = vmul.f32 %v1955_v6, %v508_v1  ;;  %v1158_v60 = vpop.permute.xlu1 %1157 }
 0x2a7   : > { %v1186_v62 = vsel %vm280_vm6, %v1158_v60, 0.0 }
 0x2a8   : > { %1187 = vadd.xlane.f32.xlu0 %v1186_v62 }
 0x2aa   : > { %v712_v16 = vpop.f32.mrb[8].mxu1  ;;  %v1162_v63 = vpop.permute.xlu1 %1161 }
 0x2ab   : > { %v718_v0 = vmul.f32 0.015625, %v712_v16  ;;  %v1788_v42 = vpop.f32.mrb[9].mxu1 }
 0x2ac   : > { %v715_v47 = vpop.f32.mrb[10].mxu1 }
 0x2ad   : > { %v719_v49 = vpack.c.bf16 %v718_v0, %v718_v0  ;;  %v1789_v50 = vpop.f32.mrb[11].mxu1 }
 0x2af   : > { %v741_v20 = vsel %vm451_vm7, %v719_v49, 0  ;;  %1847 = vmatprep.subr.msk.bf16.mxu1 %vm451_vm7, %v719_v49 }
 0x2b0   : > { %1791 = vmatpush3.bf16.msra.mxu1 %v741_v20 }
 0x2b1   : > { %1800 = vmatprep.subr.bf16.mxu1 %v2013_v4 }
 0x2b3   : > { %1793 = vmatmul.mubr.msk.bf16.vlgmr.msra.gmra.mrb[12].mxu1 %vm280_vm6, %v2246_v29  ;;  %v1160_v29 = vpop.permute.xlu0 %1159 }
 0x2b4   : > { %1796 = vmatprep.mubr.msk.bf16.mxu1 %vm280_vm6, %v2252_v33  ;;  %1801 = vmatpush3.bf16.msra.mxu1 %v2248_v30  ;;  %v1189_v33 = vsel %vm280_vm6, %v1160_v29, 0.0  ;;  %v1192_v30 = vsel %vm280_vm6, %v1162_v63, 0.0 }
 0x2b5   : > { %1802 = vmatprep.subr.bf16.mxu1 %v2013_v4  ;;  %1190 = vadd.xlane.f32.xlu1 %v1189_v33 }
 0x2b6   : > { %1193 = vadd.xlane.f32.xlu0 %v1192_v30 }
 0x2b8   : > { %1803 = vmatpush3.bf16.msra.mxu1 %v2250_v32 }
 0x2b9   : > { %1804 = vmatprep.subr.bf16.mxu1 %v2013_v4 }
 0x2bb   : > { %1797 = vmatmul.mubr.msk.bf16.gmra.mrb[16].mxu1 %vm280_vm6, %v2239_v18 }
 0x2bc   : > { %1805 = vmatpush3.bf16.msra.mxu1 %v2254_v34  ;;  %1808 = vmatprep.mubr.msk.bf16.mxu1 %vm2015_vm0, %v2013_v4 }
 0x2bd   : > { %1806 = vmatprep.subr.bf16.mxu1 %v2013_v4 }
 0x2c0   : > { %1807 = vmatpush3.bf16.msra.mxu1 %v2241_v21 }
 0x2c3   : > { %1809 = vmatmul.mubr.msk.bf16.vlgmr.msra.gmra.mrb[20].mxu1 %vm393_vm1, %v2256_v35 }
 0x2c4   : > { %1840 = vmatprep.mubr.msk.bf16.mxu1 %vm280_vm6, %v2262_v39 }
 0x2df   : > { %v600_v48 = vpop.xlane.xlu1 %599 }
 0x2e0   : > { %v620_v1 = vadd.f32 1e-06, %v600_v48 }
 0x2e3   : > { %v609_v34 = vpop.xlane.xlu1 %608 }
 0x2e4   : > { %v623_v35 = vadd.f32 1e-06, %v609_v34 }
 0x2e7   : > { %v597_v18 = vpop.xlane.xlu0 %596  ;;  %v615_v21 = vpop.xlane.xlu1 %614 }
 0x2e8   : > { %v619_v6 = vadd.f32 1e-06, %v597_v18  ;;  %v625_v12 = vadd.f32 1e-06, %v615_v21 }
 0x2ea   : > { %1956 = vrcp.f32 %v619_v6 }
 0x2eb   : > { %v603_v32 = vpop.xlane.xlu0 %602 }
 0x2ec   : > { %v621_v44 = vadd.f32 1e-06, %v603_v32 }
 0x2ee   : > { %1958 = vrcp.f32 %v621_v44 }
 0x2ef   : > { %v606_v5 = vpop.xlane.xlu0 %605 }
 0x2f0   : > { %v622_v10 = vadd.f32 1e-06, %v606_v5 }
 0x2f2   : > { %1960 = vrcp.f32 %v622_v10 }
 0x2f3   : > { %v612_v7 = vpop.xlane.xlu0 %611  ;;  %1962 = vrcp.f32 %v620_v1 }
 0x2f4   : > { %v624_v39 = vadd.f32 1e-06, %v612_v7  ;;  %1964 = vrcp.f32 %v623_v35  ;;  %v1957_v14 = vpop.eup %1956 }
 0x2f5   : > { %1966 = vrcp.f32 %v625_v12 }
 0x2f7   : > { %v618_v2 = vpop.xlane.xlu0 %617 }
 0x2f8   : > { %v626_v13 = vadd.f32 1e-06, %v618_v2  ;;  %v1959_v15 = vpop.eup %1958 }
 0x2fa   : > { %1968 = vrcp.f32 %v626_v13 }
 0x2fb   : > { %1970 = vrcp.f32 %v624_v39 }
 0x2fc   : > { %v1961_v16 = vpop.eup %1960 }
 0x2fd   : > { %v1963_v27 = vpop.eup %1962 }
 0x2fe   : > { %v1965_v55 = vpop.eup %1964 }
 0x2ff   : > { %v1967_v56 = vpop.eup %1966 }
 0x304   : > { %v1969_v26 = vpop.eup %1968 }
 0x305   : > { %v1971_v57 = vpop.eup %1970 }
 0x386   : > { %v1794_v25 = vpop.f32.mrb[12].mxu1 }
 0x387   : > { %v777_v0 = vpop.f32.mrb[13].mxu1  ;;  %v810_v45 = vmul.f32 %v1959_v15, %v1794_v25 }
 0x388   : > { %v1795_v42 = vpop.f32.mrb[14].mxu1  ;;  %v808_v50 = vmul.f32 %v1957_v14, %v777_v0 }
 0x389   : > { %v811_v47 = vmul.f32 %v1961_v16, %v1795_v42  ;;  %v780_v49 = vpop.f32.mrb[15].mxu1 }
 0x38a   : > { %v809_v52 = vmul.f32 %v1963_v27, %v780_v49 }
 0x38b   : > { %v1872_v53 = vpack.i.bf16 %v811_v47, %v810_v45 }
 0x38c   : > { %v1877_v20 = vpack.i.bf16 %v809_v52, %v808_v50 }
 0x38d   : > { %1873 = vrot.lane.b32.xlu0 %v1872_v53, %s2021_s4 }
 0x38e   : > { %v1798_v31 = vpop.f32.mrb[16].mxu1  ;;  %1878 = vrot.lane.b32.xlu1 %v1877_v20, %s2021_s4 }
 0x38f   : > { %v793_v59 = vpop.f32.mrb[17].mxu1  ;;  %v814_v60 = vmul.f32 %v1967_v56, %v1798_v31 }
 0x390   : > { %v1799_v38 = vpop.f32.mrb[18].mxu1  ;;  %v812_v29 = vmul.f32 %v1965_v55, %v793_v59 }
 0x391   : > { %v815_v61 = vmul.f32 %v1969_v26, %v1799_v38  ;;  %v796_v62 = vpop.f32.mrb[19].mxu1 }
 0x392   : > { %v813_v63 = vmul.f32 %v1971_v57, %v796_v62 }
 0x393   : > { %v1882_v33 = vpack.i.bf16 %v815_v61, %v814_v60 }
 0x394   : > { %v1887_v30 = vpack.i.bf16 %v813_v63, %v812_v29 }
 0x395   : > { %1883 = vrot.lane.b32.xlu1 %v1882_v33, %s2021_s4 }
 0x396   : > { %v1000_v18 = vpop.f32.mrb[20].mxu1 }
 0x397   : > { %v1006_v32 = vmul.f32 0.015625, %v1000_v18  ;;  %v1810_v48 = vpop.f32.mrb[21].mxu1 }
 0x398   : > { %v1003_v5 = vpop.f32.mrb[22].mxu1 }
 0x399   : > { %v1007_v6 = vpack.c.bf16 %v1006_v32, %v1006_v32  ;;  %v1811_v34 = vpop.f32.mrb[23].mxu1  ;;  %1888 = vrot.lane.b32.xlu1 %v1887_v30, %s2021_s4 }
 0x39b   : > { %v1029_v44 = vsel %vm451_vm7, %v1007_v6, 0  ;;  %1848 = vmatprep.subr.msk.bf16.mxu0 %vm451_vm7, %v1007_v6 }
 0x39c   : > { %1813 = vmatpush3.bf16.msra.mxu0 %v1029_v44 }
 0x39d   : > { %1822 = vmatprep.subr.bf16.mxu0 %v2013_v4 }
 0x39f   : > { %1815 = vmatmul.mubr.msk.bf16.vlgmr.msra.gmra.mrb[4].mxu0 %vm280_vm6, %v2336_v17  ;;  %v888_v17 = vpop.xlane.xlu0 %887 }
 0x3a0   : > { %1818 = vmatprep.mubr.msk.bf16.mxu0 %vm280_vm6, %v2347_v28  ;;  %1823 = vmatpush3.bf16.msra.mxu0 %v2338_v23  ;;  %v885_v23 = vpop.xlane.xlu1 %884 }
 0x3a1   : > { %1824 = vmatprep.subr.bf16.mxu0 %v2013_v4  ;;  %v907_v1 = vadd.f32 1e-06, %v885_v23 }
 0x3a4   : > { %1825 = vmatpush3.bf16.msra.mxu0 %v2340_v24  ;;  %v894_v24 = vpop.xlane.xlu0 %893  ;;  %v891_v28 = vpop.xlane.xlu1 %890 }
 0x3a5   : > { %1826 = vmatprep.subr.bf16.mxu0 %v2013_v4  ;;  %v910_v7 = vadd.f32 1e-06, %v894_v24 }
 0x3a7   : > { %1819 = vmatmul.mubr.msk.bf16.gmra.mrb[8].mxu0 %vm280_vm6, %v2358_v46  ;;  %v908_v46 = vadd.f32 1e-06, %v888_v17 }
 0x3a8   : > { %1827 = vmatpush3.bf16.msra.mxu0 %v2369_v51  ;;  %1830 = vmatprep.mubr.msk.bf16.mxu0 %vm2015_vm0, %v2013_v4  ;;  %v909_v51 = vadd.f32 1e-06, %v891_v28  ;;  %v900_v10 = vpop.xlane.xlu0 %899  ;;  %v897_v21 = vpop.xlane.xlu1 %896 }
 0x3a9   : > { %1828 = vmatprep.subr.bf16.mxu0 %v2013_v4  ;;  %1972 = vrcp.f32 %v908_v46  ;;  %v912_v4 = vadd.f32 1e-06, %v900_v10 }
 0x3aa   : > { %1974 = vrcp.f32 %v910_v7 }
 0x3ab   : > { %1976 = vrcp.f32 %v909_v51 }
 0x3ac   : > { %1829 = vmatpush3.bf16.msra.mxu0 %v2258_v36  ;;  %1978 = vrcp.f32 %v907_v1  ;;  %v906_v36 = vpop.xlane.xlu0 %905  ;;  %v903_v2 = vpop.xlane.xlu1 %902 }
 0x3ad   : > { %v913_v35 = vadd.f32 1e-06, %v903_v2  ;;  %1980 = vrcp.f32 %v912_v4 }
 0x3af   : > { %1831 = vmatmul.mubr.msk.bf16.vlgmr.msra.gmra.mrb[12].mxu0 %vm393_vm1, %v2380_v43  ;;  %v914_v43 = vadd.f32 1e-06, %v906_v36 }
 0x3b0   : > { %1836 = vmatprep.mubr.msk.bf16.mxu0 %vm280_vm6, %v2260_v37  ;;  %v911_v37 = vadd.f32 1e-06, %v897_v21  ;;  %v1176_v6 = vpop.xlane.xlu0 %1175  ;;  %v1173_v34 = vpop.xlane.xlu1 %1172 }
 0x3b1   : > { %1982 = vrcp.f32 %v914_v43  ;;  %v1196_v28 = vadd.f32 1e-06, %v1176_v6  ;;  %v1195_v46 = vadd.f32 1e-06, %v1173_v34 }
 0x3b2   : > { %1984 = vrcp.f32 %v913_v35 }
 0x3b3   : > { %v1973_v12 = vpop.eup %1972  ;;  %1986 = vrcp.f32 %v911_v37 }
 0x3b4   : > { %v1975_v13 = vpop.eup %1974  ;;  %v1182_v44 = vpop.xlane.xlu0 %1181  ;;  %1988 = vrcp.f32 %v1196_v28 }
 0x3b5   : > { %v1977_v39 = vpop.eup %1976  ;;  %v1179_v17 = vpop.xlane.xlu1 %1178  ;;  %v1198_v7 = vadd.f32 1e-06, %v1182_v44  ;;  %1990 = vrcp.f32 %v1195_v46 }
 0x3b6   : > { %v1979_v15 = vpop.eup %1978  ;;  %v1197_v51 = vadd.f32 1e-06, %v1179_v17 }
 0x3b7   : > { %v1981_v50 = vpop.eup %1980  ;;  %1992 = vrcp.f32 %v1198_v7 }
 0x3b8   : > { %v1188_v23 = vpop.xlane.xlu0 %1187  ;;  %1994 = vrcp.f32 %v1197_v51 }
 0x3b9   : > { %v1185_v24 = vpop.xlane.xlu1 %1184  ;;  %v1200_v10 = vadd.f32 1e-06, %v1188_v23 }
 0x3bb   : > { %v1983_v53 = vpop.eup %1982  ;;  %1996 = vrcp.f32 %v1200_v10 }
 0x3bc   : > { %v1985_v55 = vpop.eup %1984  ;;  %v1194_v1 = vpop.xlane.xlu0 %1193 }
 0x3bd   : > { %v1987_v56 = vpop.eup %1986  ;;  %v1202_v21 = vadd.f32 1e-06, %v1194_v1  ;;  %v1191_v4 = vpop.xlane.xlu1 %1190 }
 0x3be   : > { %v1989_v36 = vpop.eup %1988 }
 0x3bf   : > { %1998 = vrcp.f32 %v1202_v21  ;;  %v1991_v43 = vpop.eup %1990 }
 0x3c1   : > { %v1993_v2 = vpop.eup %1992 }
 0x3c2   : > { %v1995_v35 = vpop.eup %1994 }
 0x3c5   : > { %v1997_v37 = vpop.eup %1996 }
 0x472   : > { %v1816_v14 = vpop.f32.mrb[4].mxu0 }
 0x473   : > { %v1065_v16 = vpop.f32.mrb[5].mxu0  ;;  %v1098_v27 = vmul.f32 %v1977_v39, %v1816_v14  ;;  %v1999_v39 = vpop.eup %1998 }
 0x474   : > { %v1817_v25 = vpop.f32.mrb[6].mxu0  ;;  %v1096_v45 = vmul.f32 %v1979_v15, %v1065_v16 }
 0x475   : > { %v1099_v0 = vmul.f32 %v1975_v13, %v1817_v25  ;;  %v1068_v42 = vpop.f32.mrb[7].mxu0 }
 0x476   : > { %v1097_v47 = vmul.f32 %v1973_v12, %v1068_v42 }
 0x477   : > { %v1892_v49 = vpack.i.bf16 %v1099_v0, %v1098_v27 }
 0x478   : > { %v1897_v52 = vpack.i.bf16 %v1097_v47, %v1096_v45 }
 0x479   : > { %1893 = vrot.lane.b32.xlu1 %v1892_v49, %s2022_s5 }
 0x47a   : > { %v1820_v20 = vpop.f32.mrb[8].mxu0  ;;  %1898 = vrot.lane.b32.xlu0 %v1897_v52, %s2022_s5 }
 0x47b   : > { %v1081_v26 = vpop.f32.mrb[9].mxu0  ;;  %v1102_v57 = vmul.f32 %v1985_v55, %v1820_v20 }
 0x47c   : > { %v1821_v31 = vpop.f32.mrb[10].mxu0  ;;  %v1100_v60 = vmul.f32 %v1987_v56, %v1081_v26 }
 0x47d   : > { %v1103_v59 = vmul.f32 %v1983_v53, %v1821_v31  ;;  %v1084_v38 = vpop.f32.mrb[11].mxu0 }
 0x47e   : > { %v1101_v61 = vmul.f32 %v1981_v50, %v1084_v38  ;;  %v1879_v38 = vpop.permute.xlu1 %1878 }
 0x47f   : > { %v1902_v62 = vpack.i.bf16 %v1103_v59, %v1102_v57 }
 0x480   : > { %v1907_v29 = vpack.i.bf16 %v1101_v61, %v1100_v60 }
 0x481   : > { %1903 = vrot.lane.b32.xlu1 %v1902_v62, %s2022_s5  ;;  %v1874_v62 = vpop.permute.xlu0 %1873 }
 0x482   : > { %v1288_v63 = vpop.f32.mrb[12].mxu0  ;;  %1908 = vrot.lane.b32.xlu0 %v1907_v29, %s2022_s5  ;;  %v1884_v60 = vpop.permute.xlu1 %1883 }
 0x483   : > { %v1294_v33 = vmul.f32 0.015625, %v1288_v63  ;;  %v1832_v30 = vpop.f32.mrb[13].mxu0 }
 0x484   : > { %v1291_v18 = vpop.f32.mrb[14].mxu0  ;;  %v1875_v30 = vunpack.i.l.bf16 %v1874_v62 }
 0x485   : > { %v1295_v32 = vpack.c.bf16 %v1294_v33, %v1294_v33  ;;  %v1833_v48 = vpop.f32.mrb[15].mxu0  ;;  %v1876_v33 = vunpack.i.h.bf16 %v1874_v62  ;;  %v1881_v18 = vunpack.i.h.bf16 %v1879_v38 }
 0x486   : > { %v1889_v61 = vpop.permute.xlu1 %1888  ;;  %v1886_v48 = vunpack.i.h.bf16 %v1884_v60  ;;  %v1490_v51 = vsel %vm280_vm6, %v2406_v54, %v1875_v30 }
 0x487   : > { %1849 = vmatprep.subr.msk.bf16.mxu0 %vm451_vm7, %v1295_v32  ;;  %1850 = vmatprep.subr.msk.bf16.mxu1 %vm451_vm7, %v1295_v32  ;;  %v1317_v5 = vsel %vm451_vm7, %v1295_v32, 0  ;;  %v1880_v32 = vunpack.i.l.bf16 %v1879_v38  ;;  %v1891_v6 = vunpack.i.h.bf16 %v1889_v61  ;;  %v1890_v34 = vunpack.i.l.bf16 %v1889_v61 }
 0x488   : > { %1835 = vmatpush3.bf16.msra.mxu0 %v1317_v5  ;;  %1845 = vmatpush3.bf16.msra.mxu1 %v1317_v5  ;;  %v1885_v5 = vunpack.i.l.bf16 %v1884_v60  ;;  %v1491_v7 = vsel %vm280_vm6, %v2410_v22, %v1876_v33  ;;  %v1489_v10 = vsel %vm280_vm6, %v2412_v8, %v1881_v18  ;;  %v1495_v21 = vsel %vm280_vm6, %v2422_v11, %v1886_v48 }
 0x489   : > { %v1488_v1 = vsel %vm280_vm6, %v2408_v19, %v1880_v32  ;;  %v1492_v22 = vsel %vm280_vm6, %v2420_v9, %v1890_v34 }
 0x48b   : > { %1837 = vmatmul.mubr.msk.bf16.vlgmr.msra.gmra.mrb[16].mxu0 %vm280_vm6, %v2264_v40  ;;  %1841 = vmatmul.mubr.msk.bf16.vlgmr.msra.gmra.mrb[24].mxu1 %vm280_vm6, %v2266_v41  ;;  %v1201_v40 = vadd.f32 1e-06, %v1191_v4  ;;  %v1199_v41 = vadd.f32 1e-06, %v1185_v24  ;;  %v1494_v4 = vsel %vm280_vm6, %v2417_v58, %v1885_v5 }
 0x48d   : > { %2000 = vrcp.f32 %v1201_v40  ;;  %v1493_v40 = vsel %vm280_vm6, %v2424_v3, %v1891_v6 }
 0x48e   : > { %2002 = vrcp.f32 %v1199_v41 }
 0x497   : > { %v2001_v16 = vpop.eup %2000 }
 0x498   : > { %v2003_v0 = vpop.eup %2002 }
 0x4eb   : > { %v1894_v29 = vpop.permute.xlu1 %1893 }
 0x4ec   : > { %v1899_v63 = vpop.permute.xlu0 %1898  ;;  %v1896_v44 = vunpack.i.h.bf16 %v1894_v29  ;;  %v1895_v17 = vunpack.i.l.bf16 %v1894_v29 }
 0x4ed   : > { %v1901_v24 = vunpack.i.h.bf16 %v1899_v63  ;;  %v1900_v28 = vunpack.i.l.bf16 %v1899_v63 }
 0x4ee   : > { %v1499_v54 = vsel %vm1496_vm8, %v1490_v51, %v1895_v17  ;;  %v1500_v8 = vsel %vm1496_vm8, %v1491_v7, %v1896_v44 }
 0x4ef   : > { %v1498_v41 = vsel %vm1496_vm8, %v1489_v10, %v1901_v24  ;;  %v1497_v11 = vsel %vm1496_vm8, %v1488_v1, %v1900_v28 }
 0x4f3   : > { %v1904_v23 = vpop.permute.xlu1 %1903 }
 0x4f4   : > { %v1909_v46 = vpop.permute.xlu0 %1908  ;;  %v1905_v3 = vunpack.i.l.bf16 %v1904_v23 }
 0x4f5   : > { %v1911_v9 = vunpack.i.h.bf16 %v1909_v46 }
 0x55e   : > { %v1838_v12 = vpop.f32.mrb[16].mxu0  ;;  %v1842_v13 = vpop.f32.mrb[24].mxu1 }
 0x55f   : > { %v1353_v14 = vpop.f32.mrb[17].mxu0  ;;  %v1369_v15 = vpop.f32.mrb[25].mxu1  ;;  %v1386_v42 = vmul.f32 %v1995_v35, %v1838_v12  ;;  %v1390_v45 = vmul.f32 %v2001_v16, %v1842_v13  ;;  %v1910_v12 = vunpack.i.l.bf16 %v1909_v46 }
 0x560   : > { %v1839_v25 = vpop.f32.mrb[18].mxu0  ;;  %v1843_v27 = vpop.f32.mrb[26].mxu1  ;;  %v1384_v53 = vmul.f32 %v1991_v43, %v1353_v14  ;;  %v1388_v55 = vmul.f32 %v2003_v0, %v1369_v15 }
 0x561   : > { %v1387_v47 = vmul.f32 %v1993_v2, %v1839_v25  ;;  %v1391_v49 = vmul.f32 %v1999_v39, %v1843_v27  ;;  %v1356_v50 = vpop.f32.mrb[19].mxu0  ;;  %v1372_v52 = vpop.f32.mrb[27].mxu1  ;;  %v1906_v2 = vunpack.i.h.bf16 %v1904_v23 }
 0x562   : > { %v1385_v20 = vmul.f32 %v1989_v36, %v1356_v50  ;;  %v1389_v56 = vmul.f32 %v1997_v37, %v1372_v52  ;;  %v1503_v52 = vsel %vm1496_vm8, %v1494_v4, %v1905_v3 }
 0x563   : > { %v1912_v26 = vpack.i.bf16 %v1387_v47, %v1386_v42  ;;  %v1927_v31 = vpack.i.bf16 %v1391_v49, %v1390_v45  ;;  %v1504_v50 = vsel %vm1496_vm8, %v1495_v21, %v1906_v2 }
 0x564   : > { %v1917_v57 = vpack.i.bf16 %v1385_v20, %v1384_v53  ;;  %v1922_v59 = vpack.i.bf16 %v1389_v56, %v1388_v55  ;;  %v1502_v20 = vsel %vm1496_vm8, %v1493_v40, %v1911_v9  ;;  %v1501_v56 = vsel %vm1496_vm8, %v1492_v22, %v1910_v12 }
 0x565   : > { %1913 = vrot.lane.b32.xlu1 %v1912_v26, %s2023_s6 }
 0x566   : > { %1918 = vrot.lane.b32.xlu0 %v1917_v57, %s2023_s6 }
 0x569   : > { %1928 = vrot.lane.b32.xlu1 %v1927_v31, %s2023_s6 }
 0x56a   : > { %1923 = vrot.lane.b32.xlu0 %v1922_v59, %s2023_s6 }
 0x5d7   : > { %v1914_v19 = vpop.permute.xlu1 %1913 }
 0x5d8   : > { %v1916_v36 = vunpack.i.h.bf16 %v1914_v19  ;;  %v1915_v58 = vunpack.i.l.bf16 %v1914_v19  ;;  %v1919_v43 = vpop.permute.xlu0 %1918 }
 0x5d9   : > { %v1921_v35 = vunpack.i.h.bf16 %v1919_v43  ;;  %v1920_v37 = vunpack.i.l.bf16 %v1919_v43 }
 0x5da   : > { %v1508_v13 = vsel %vm1505_vm9, %v1499_v54, %v1915_v58  ;;  %v1509_v39 = vsel %vm1505_vm9, %v1500_v8, %v1916_v36 }
 0x5db   : > { %v1691_v14 = vpack.c.bf16 %v1508_v13, %v1508_v13  ;;  %v1692_v15 = vpack.c.bf16 %v1509_v39, %v1509_v39  ;;  %v1506_v16 = vsel %vm1505_vm9, %v1497_v11, %v1920_v37  ;;  %v1507_v25 = vsel %vm1505_vm9, %v1498_v41, %v1921_v35  ;;  %v1929_v27 = vpop.permute.xlu1 %1928 }
 0x5dc   : > { %v1689_v0 = vpack.c.bf16 %v1506_v16, %v1506_v16  ;;  %v1690_v42 = vpack.c.bf16 %v1507_v25, %v1507_v25  ;;  %v1931_v45 = vunpack.i.h.bf16 %v1929_v27  ;;  %v1930_v47 = vunpack.i.l.bf16 %v1929_v27  ;;  %v1924_v49 = vpop.permute.xlu0 %1923 }
 0x5dd   : > { %1549 = vst.msk [vmem:[%s2513_s9 + $0x8] sm:$0xf] %vm1546_vm10, %v1691_v14  ;;  %1550 = vst.msk [vmem:[%s2513_s9 + $0xc] sm:$0xf] %vm1546_vm10, %v1692_v15  ;;  %v1926_v53 = vunpack.i.h.bf16 %v1924_v49  ;;  %v1925_v55 = vunpack.i.l.bf16 %v1924_v49 }
 0x5de   : > { %1547 = vst.msk [vmem:[%s2513_s9] sm:$0xf] %vm1546_vm10, %v1689_v0  ;;  %1548 = vst.msk [vmem:[%s2513_s9 + $0x4] sm:$0xf] %vm1546_vm10, %v1690_v42  ;;  %v1513_v26 = vsel %vm1505_vm9, %v1504_v50, %v1931_v45  ;;  %v1512_v31 = vsel %vm1505_vm9, %v1503_v52, %v1930_v47 }
 0x5df   : > { %v1696_v57 = vpack.c.bf16 %v1513_v26, %v1513_v26  ;;  %v1695_v59 = vpack.c.bf16 %v1512_v31, %v1512_v31  ;;  %v1510_v38 = vsel %vm1505_vm9, %v1501_v56, %v1925_v55  ;;  %v1511_v60 = vsel %vm1505_vm9, %v1502_v20, %v1926_v53 }
 0x5e0   : > { %v1693_v61 = vpack.c.bf16 %v1510_v38, %v1510_v38  ;;  %v1694_v62 = vpack.c.bf16 %v1511_v60, %v1511_v60 }
 0x5e1   : > { %1554 = vst.msk [vmem:[%s2513_s9 + $0x1c] sm:$0xf] %vm1546_vm10, %v1696_v57  ;;  %1553 = vst.msk [vmem:[%s2513_s9 + $0x18] sm:$0xf] %vm1546_vm10, %v1695_v59 }
 0x5e2   : > { %1551 = vst.msk [vmem:[%s2513_s9 + $0x10] sm:$0xf] %vm1546_vm10, %v1693_v61  ;;  %1552 = vst.msk [vmem:[%s2513_s9 + $0x14] sm:$0xf] %vm1546_vm10, %v1694_v62 }
 0x5e3 PF: > { %s13_s12 = sadd.s32 1, %s2010_s12  }
 0x5e4   : > { %p10_p4 = scmp.ge.s32.totalorder %s13_s12, 4  }
 0x5e6   :  { %12 = sbr.rel (!%p10_p4) target bundleno = 1 (0x1), region = 68 }

// kernel: basic_layer_up_forward.31
= control target key start
LH: loop header
LB: loop body
LE: loop exit
PB: predicated region body
PF: predicated region fallthrough
CT: control target
= control target key end

     0   :  { %vm53_vm0 = vcmask 261120   ;;  %s1380_s0 = inlined_call_operand.vmem [shape: bf16[128,32], index: 0, kind: input, shape index: {}]   ;;  %s1381_s3 = inlined_call_operand.vmem [shape: bf16[32,128], index: 3, kind: input, shape index: {}]   ;;  %s1382_s1 = inlined_call_operand.vmem [shape: f32[1,32], index: 1, kind: input, shape index: {}]   ;;  %s1383_s2 = inlined_call_operand.vmem [shape: f32[1,32], index: 2, kind: input, shape index: {}]   ;;  %s1384_s4 = inlined_call_operand.vmem [shape: f32[1,128], index: 4, kind: input, shape index: {}]   ;;  %s1385_s5 = inlined_call_operand.vmem [shape: bf16[128,128], index: 5, kind: output, shape index: {}]  }
   0x1   :  { %v953_v0 = vld [vmem:[%s1380_s0] sm:$0xff]   ;;  %v967_v6 = vld [vmem:[%s1380_s0 + $0x8] sm:$0xff]   ;;  %v995_v18 = vld [vmem:[%s1380_s0 + $0x10] sm:$0xff]  }
   0x2   :  { %v958_v1 = vld [vmem:[%s1380_s0 + $0x20] sm:$0xff]   ;;  %v736_v2 = vunpack.c.l.bf16 %v953_v0  ;;  %v737_v4 = vunpack.c.h.bf16 %v953_v0  ;;  %v740_v11 = vunpack.c.l.bf16 %v967_v6  ;;  %v741_v12 = vunpack.c.h.bf16 %v967_v6  ;;  %v982_v13 = vld [vmem:[%s1380_s0 + $0x28] sm:$0xff]   ;;  %v1008_v23 = vld [vmem:[%s1380_s0 + $0x30] sm:$0xff]  }
   0x3   :  { %v752_v3 = vunpack.c.l.bf16 %v958_v1  ;;  %v753_v5 = vunpack.c.h.bf16 %v958_v1  ;;  %v756_v16 = vunpack.c.l.bf16 %v982_v13  ;;  %v757_v17 = vunpack.c.h.bf16 %v982_v13  ;;  %v1021_v28 = vld [vmem:[%s1380_s0 + $0x18] sm:$0xff]  }
   0x4   :  { %v54_v7 = vsel %vm53_vm0, %v736_v2, 0.0  ;;  %v57_v9 = vsel %vm53_vm0, %v737_v4, 0.0  ;;  %v60_v14 = vsel %vm53_vm0, %v740_v11, 0.0  ;;  %v63_v15 = vsel %vm53_vm0, %v741_v12, 0.0  ;;  %v1034_v33 = vld [vmem:[%s1380_s0 + $0x38] sm:$0xff]  }
   0x5   :  { %v78_v8 = vsel %vm53_vm0, %v752_v3, 0.0  ;;  %55 = vadd.xlane.f32.xlu0 %v54_v7  ;;  %v81_v10 = vsel %vm53_vm0, %v753_v5, 0.0  ;;  %v84_v19 = vsel %vm53_vm0, %v756_v16, 0.0  ;;  %v87_v20 = vsel %vm53_vm0, %v757_v17, 0.0 }
   0x6   :  { %79 = vadd.xlane.f32.xlu1 %v78_v8  ;;  %v744_v21 = vunpack.c.l.bf16 %v995_v18  ;;  %v745_v22 = vunpack.c.h.bf16 %v995_v18  ;;  %v760_v26 = vunpack.c.l.bf16 %v1008_v23  ;;  %v761_v27 = vunpack.c.h.bf16 %v1008_v23 }
   0x7   :  { %v748_v31 = vunpack.c.l.bf16 %v1021_v28  ;;  %v749_v32 = vunpack.c.h.bf16 %v1021_v28  ;;  %v764_v36 = vunpack.c.l.bf16 %v1034_v33  ;;  %v765_v37 = vunpack.c.h.bf16 %v1034_v33 }
   0x8   :  { %v66_v24 = vsel %vm53_vm0, %v744_v21, 0.0  ;;  %v69_v25 = vsel %vm53_vm0, %v745_v22, 0.0  ;;  %v90_v29 = vsel %vm53_vm0, %v760_v26, 0.0  ;;  %v93_v30 = vsel %vm53_vm0, %v761_v27, 0.0 }
   0x9   :  { %58 = vadd.xlane.f32.xlu0 %v57_v9  ;;  %v72_v34 = vsel %vm53_vm0, %v748_v31, 0.0  ;;  %v75_v35 = vsel %vm53_vm0, %v749_v32, 0.0  ;;  %v96_v38 = vsel %vm53_vm0, %v764_v36, 0.0  ;;  %v99_v39 = vsel %vm53_vm0, %v765_v37, 0.0 }
   0xa   :  { %82 = vadd.xlane.f32.xlu1 %v81_v10 }
   0xd   :  { %61 = vadd.xlane.f32.xlu0 %v60_v14 }
   0xe   :  { %64 = vadd.xlane.f32.xlu1 %v63_v15 }
  0x11   :  { %85 = vadd.xlane.f32.xlu0 %v84_v19 }
  0x12   :  { %88 = vadd.xlane.f32.xlu1 %v87_v20 }
  0x15   :  { %67 = vadd.xlane.f32.xlu0 %v66_v24 }
  0x16   :  { %70 = vadd.xlane.f32.xlu1 %v69_v25 }
  0x19   :  { %91 = vadd.xlane.f32.xlu0 %v90_v29 }
  0x1a   :  { %94 = vadd.xlane.f32.xlu1 %v93_v30 }
  0x1d   :  { %73 = vadd.xlane.f32.xlu0 %v72_v34 }
  0x1e   :  { %76 = vadd.xlane.f32.xlu1 %v75_v35 }
  0x21   :  { %97 = vadd.xlane.f32.xlu0 %v96_v38 }
  0x22   :  { %100 = vadd.xlane.f32.xlu1 %v99_v39 }
  0x92   :  { %v56_v40 = vpop.xlane.xlu0 %55 }
  0x93   :  { %v80_v41 = vpop.xlane.xlu1 %79  ;;  %v103_v42 = vmul.f32 0.03125, %v56_v40 }
  0x94   :  { %v111_v43 = vmul.f32 0.03125, %v80_v41 }
  0x95   :  { %v1050_v44 = vsub.f32 %v736_v2, %v103_v42 }
  0x96   :  { %v1052_v45 = vsub.f32 %v752_v3, %v111_v43  ;;  %v59_v46 = vpop.xlane.xlu0 %58 }
  0x97   :  { %v83_v47 = vpop.xlane.xlu1 %82  ;;  %v104_v48 = vmul.f32 0.03125, %v59_v46  ;;  %v135_v50 = vmul.f32 %v1050_v44, %v1050_v44 }
  0x98   :  { %v112_v49 = vmul.f32 0.03125, %v83_v47  ;;  %v143_v51 = vmul.f32 %v1052_v45, %v1052_v45 }
  0x99   :  { %v1060_v52 = vsub.f32 %v737_v4, %v104_v48  ;;  %v151_v54 = vsel %vm53_vm0, %v135_v50, 0.0 }
  0x9a   :  { %v1064_v53 = vsub.f32 %v753_v5, %v112_v49  ;;  %152 = vadd.xlane.f32.xlu0 %v151_v54  ;;  %v62_v55 = vpop.xlane.xlu0 %61  ;;  %v175_v57 = vsel %vm53_vm0, %v143_v51, 0.0 }
  0x9b   :  { %v65_v56 = vpop.xlane.xlu1 %64  ;;  %v105_v58 = vmul.f32 0.03125, %v62_v55  ;;  %v136_v60 = vmul.f32 %v1060_v52, %v1060_v52 }
  0x9c   :  { %v106_v59 = vmul.f32 0.03125, %v65_v56  ;;  %v144_v61 = vmul.f32 %v1064_v53, %v1064_v53 }
  0x9d   :  { %v1074_v62 = vsub.f32 %v740_v11, %v105_v58  ;;  %v154_v0 = vsel %vm53_vm0, %v136_v60, 0.0 }
  0x9e   :  { %v1078_v63 = vsub.f32 %v741_v12, %v106_v59  ;;  %176 = vadd.xlane.f32.xlu0 %v175_v57  ;;  %155 = vadd.xlane.f32.xlu1 %v154_v0  ;;  %v86_v1 = vpop.xlane.xlu0 %85  ;;  %v178_v3 = vsel %vm53_vm0, %v144_v61, 0.0 }
  0x9f   :  { %v89_v2 = vpop.xlane.xlu1 %88  ;;  %v113_v4 = vmul.f32 0.03125, %v86_v1  ;;  %v137_v7 = vmul.f32 %v1074_v62, %v1074_v62 }
  0xa0   :  { %v114_v5 = vmul.f32 0.03125, %v89_v2  ;;  %v138_v8 = vmul.f32 %v1078_v63, %v1078_v63 }
  0xa1   :  { %v1088_v6 = vsub.f32 %v756_v16, %v113_v4  ;;  %v157_v10 = vsel %vm53_vm0, %v137_v7, 0.0 }
  0xa2   :  { %v1092_v9 = vsub.f32 %v757_v17, %v114_v5  ;;  %179 = vadd.xlane.f32.xlu1 %v178_v3  ;;  %158 = vadd.xlane.f32.xlu0 %v157_v10  ;;  %v68_v11 = vpop.xlane.xlu0 %67  ;;  %v160_v14 = vsel %vm53_vm0, %v138_v8, 0.0 }
  0xa3   :  { %v71_v12 = vpop.xlane.xlu1 %70  ;;  %v107_v15 = vmul.f32 0.03125, %v68_v11  ;;  %v145_v20 = vmul.f32 %v1088_v6, %v1088_v6 }
  0xa4   :  { %v108_v19 = vmul.f32 0.03125, %v71_v12  ;;  %v146_v16 = vmul.f32 %v1092_v9, %v1092_v9 }
  0xa5   :  { %v1102_v13 = vsub.f32 %v744_v21, %v107_v15  ;;  %v181_v24 = vsel %vm53_vm0, %v145_v20, 0.0 }
  0xa6   :  { %v1106_v17 = vsub.f32 %v745_v22, %v108_v19  ;;  %161 = vadd.xlane.f32.xlu1 %v160_v14  ;;  %182 = vadd.xlane.f32.xlu0 %v181_v24  ;;  %v92_v25 = vpop.xlane.xlu0 %91  ;;  %v184_v30 = vsel %vm53_vm0, %v146_v16, 0.0 }
  0xa7   :  { %v95_v29 = vpop.xlane.xlu1 %94  ;;  %v115_v34 = vmul.f32 0.03125, %v92_v25  ;;  %v139_v38 = vmul.f32 %v1102_v13, %v1102_v13 }
  0xa8   :  { %v116_v35 = vmul.f32 0.03125, %v95_v29  ;;  %v140_v21 = vmul.f32 %v1106_v17, %v1106_v17 }
  0xa9   :  { %v1116_v18 = vsub.f32 %v760_v26, %v115_v34  ;;  %v163_v39 = vsel %vm53_vm0, %v139_v38, 0.0 }
  0xaa   :  { %v1120_v22 = vsub.f32 %v761_v27, %v116_v35  ;;  %185 = vadd.xlane.f32.xlu1 %v184_v30  ;;  %164 = vadd.xlane.f32.xlu0 %v163_v39  ;;  %v74_v40 = vpop.xlane.xlu0 %73  ;;  %v166_v42 = vsel %vm53_vm0, %v140_v21, 0.0 }
  0xab   :  { %v77_v41 = vpop.xlane.xlu1 %76  ;;  %v109_v43 = vmul.f32 0.03125, %v74_v40  ;;  %v147_v47 = vmul.f32 %v1116_v18, %v1116_v18 }
  0xac   :  { %v110_v46 = vmul.f32 0.03125, %v77_v41  ;;  %v148_v26 = vmul.f32 %v1120_v22, %v1120_v22 }
  0xad   :  { %v1130_v23 = vsub.f32 %v748_v31, %v109_v43  ;;  %v187_v48 = vsel %vm53_vm0, %v147_v47, 0.0 }
  0xae   :  { %v1134_v27 = vsub.f32 %v749_v32, %v110_v46  ;;  %167 = vadd.xlane.f32.xlu1 %v166_v42  ;;  %188 = vadd.xlane.f32.xlu0 %v187_v48  ;;  %v98_v49 = vpop.xlane.xlu0 %97  ;;  %v190_v51 = vsel %vm53_vm0, %v148_v26, 0.0  ;;  %v1168_v42 = vld [vmem:[%s1382_s1] ss:$0 sm:$0xff] }
  0xaf   :  { %v101_v50 = vpop.xlane.xlu1 %100  ;;  %v117_v54 = vmul.f32 0.03125, %v98_v49  ;;  %v141_v56 = vmul.f32 %v1130_v23, %v1130_v23 }
  0xb0   :  { %v118_v55 = vmul.f32 0.03125, %v101_v50  ;;  %v142_v31 = vmul.f32 %v1134_v27, %v1134_v27 }
  0xb1   :  { %v1144_v28 = vsub.f32 %v764_v36, %v117_v54  ;;  %v169_v57 = vsel %vm53_vm0, %v141_v56, 0.0  ;;  %v854_v36 = vld [vmem:[%s1381_s3] sm:$0xff]  }
  0xb2   :  { %v1148_v32 = vsub.f32 %v765_v37, %v118_v55  ;;  %191 = vadd.xlane.f32.xlu1 %v190_v51  ;;  %170 = vadd.xlane.f32.xlu0 %v169_v57  ;;  %v172_v58 = vsel %vm53_vm0, %v142_v31, 0.0  ;;  %v855_v37 = vld [vmem:[%s1381_s3 + $0x8] sm:$0xff]   ;;  %v1175_v55 = vld [vmem:[%s1383_s2] ss:$0 sm:$0xff] }
  0xb3   :  { %v149_v59 = vmul.f32 %v1144_v28, %v1144_v28  ;;  %830 = vmatprep.subr.bf16.mxu0 %v854_v36  ;;  %850 = vmatprep.subr.bf16.mxu1 %v854_v36 }
  0xb4   :  { %v150_v60 = vmul.f32 %v1148_v32, %v1148_v32  ;;  %831 = vmatpush3.bf16.msra.mxu0 %v854_v36  ;;  %852 = vmatpush3.bf16.msra.mxu1 %v854_v36 }
  0xb5   :  { %v193_v61 = vsel %vm53_vm0, %v149_v59, 0.0  ;;  %832 = vmatprep.subr.bf16.mxu0 %v855_v37  ;;  %851 = vmatprep.subr.bf16.mxu1 %v855_v37 }
  0xb6   :  { %173 = vadd.xlane.f32.xlu1 %v172_v58  ;;  %194 = vadd.xlane.f32.xlu0 %v193_v61  ;;  %v196_v33 = vsel %vm53_vm0, %v150_v60, 0.0 }
  0xb8   :  { %833 = vmatpush3.bf16.msra.mxu0 %v855_v37  ;;  %853 = vmatpush3.bf16.msra.mxu1 %v855_v37 }
  0xba   :  { %197 = vadd.xlane.f32.xlu1 %v196_v33 }
 0x127   :  { %v153_v0 = vpop.xlane.xlu0 %152 }
 0x128   :  { %v199_v1 = vmul.f32 0.03125, %v153_v0 }
 0x12a   :  { %v215_v2 = vadd.f32 1e-05, %v199_v1 }
 0x12b   :  { %v156_v3 = vpop.xlane.xlu1 %155  ;;  %v177_v4 = vpop.xlane.xlu0 %176 }
 0x12c   :  { %856 = vrsqrt.f32 %v215_v2  ;;  %v200_v5 = vmul.f32 0.03125, %v156_v3  ;;  %v207_v7 = vmul.f32 0.03125, %v177_v4 }
 0x12e   :  { %v216_v8 = vadd.f32 1e-05, %v200_v5  ;;  %v223_v10 = vadd.f32 1e-05, %v207_v7 }
 0x12f   :  { %v180_v11 = vpop.xlane.xlu1 %179  ;;  %v159_v12 = vpop.xlane.xlu0 %158 }
 0x130   :  { %858 = vrsqrt.f32 %v216_v8  ;;  %v208_v14 = vmul.f32 0.03125, %v180_v11  ;;  %v201_v15 = vmul.f32 0.03125, %v159_v12 }
 0x131   :  { %860 = vrsqrt.f32 %v223_v10 }
 0x132   :  { %v224_v19 = vadd.f32 1e-05, %v208_v14  ;;  %v217_v20 = vadd.f32 1e-05, %v201_v15 }
 0x133   :  { %v162_v16 = vpop.xlane.xlu1 %161  ;;  %v183_v24 = vpop.xlane.xlu0 %182 }
 0x134   :  { %862 = vrsqrt.f32 %v224_v19  ;;  %v202_v25 = vmul.f32 0.03125, %v162_v16  ;;  %v209_v29 = vmul.f32 0.03125, %v183_v24 }
 0x135   :  { %864 = vrsqrt.f32 %v217_v20 }
 0x136   :  { %v857_v30 = vpop.eup %856  ;;  %v218_v34 = vadd.f32 1e-05, %v202_v25  ;;  %v225_v35 = vadd.f32 1e-05, %v209_v29 }
 0x137   :  { %v186_v38 = vpop.xlane.xlu1 %185  ;;  %v165_v21 = vpop.xlane.xlu0 %164  ;;  %v247_v39 = vmul.f32 %v857_v30, %v1050_v44 }
 0x138   :  { %866 = vrsqrt.f32 %v218_v34  ;;  %v210_v40 = vmul.f32 0.03125, %v186_v38  ;;  %v203_v41 = vmul.f32 0.03125, %v165_v21 }
 0x139   :  { %868 = vrsqrt.f32 %v225_v35  ;;  %v270_v51 = vmul.f32 %v1168_v42, %v247_v39 }
 0x13a   :  { %v859_v43 = vpop.eup %858  ;;  %v226_v46 = vadd.f32 1e-05, %v210_v40  ;;  %v219_v47 = vadd.f32 1e-05, %v203_v41 }
 0x13b   :  { %v861_v26 = vpop.eup %860  ;;  %v168_v48 = vpop.xlane.xlu1 %167  ;;  %v248_v50 = vmul.f32 %v859_v43, %v1060_v52  ;;  %v293_v33 = vadd.f32 %v1175_v55, %v270_v51 }
 0x13c   :  { %v189_v49 = vpop.xlane.xlu0 %188  ;;  %870 = vrsqrt.f32 %v226_v46  ;;  %v204_v44 = vmul.f32 0.03125, %v168_v48  ;;  %v255_v56 = vmul.f32 %v861_v26, %v1052_v45 }
 0x13d   :  { %v211_v54 = vmul.f32 0.03125, %v189_v49  ;;  %872 = vrsqrt.f32 %v219_v47  ;;  %v271_v31 = vmul.f32 %v1168_v42, %v248_v50 }
 0x13e   :  { %v863_v57 = vpop.eup %862  ;;  %v220_v58 = vadd.f32 1e-05, %v204_v44  ;;  %v278_v0 = vmul.f32 %v1168_v42, %v255_v56 }
 0x13f   :  { %v227_v59 = vadd.f32 1e-05, %v211_v54  ;;  %v865_v60 = vpop.eup %864  ;;  %v192_v52 = vpop.xlane.xlu1 %191  ;;  %v294_v36 = vadd.f32 %v1175_v55, %v271_v31  ;;  %v256_v37 = vmul.f32 %v863_v57, %v1064_v53 }
 0x140   :  { %v171_v61 = vpop.xlane.xlu0 %170  ;;  %v249_v1 = vmul.f32 %v865_v60, %v1074_v62  ;;  %874 = vrsqrt.f32 %v220_v58  ;;  %v212_v45 = vmul.f32 0.03125, %v192_v52  ;;  %v301_v14 = vadd.f32 %v1175_v55, %v278_v0 }
 0x141   :  { %v205_v2 = vmul.f32 0.03125, %v171_v61  ;;  %876 = vrsqrt.f32 %v227_v59  ;;  %v309_v3 = vpack.c.bf16 %v294_v36, %v293_v33  ;;  %v279_v4 = vmul.f32 %v1168_v42, %v256_v37 }
 0x142   :  { %v867_v5 = vpop.eup %866  ;;  %v228_v7 = vadd.f32 1e-05, %v212_v45  ;;  %v272_v15 = vmul.f32 %v1168_v42, %v249_v1 }
 0x143   :  { %v221_v8 = vadd.f32 1e-05, %v205_v2  ;;  %v869_v10 = vpop.eup %868  ;;  %v250_v11 = vmul.f32 %v867_v5, %v1078_v63  ;;  %v174_v12 = vpop.xlane.xlu1 %173  ;;  %834 = vmatprep.mubr.msk.bf16.mxu0 %vm53_vm0, %v309_v3  ;;  %v302_v62 = vadd.f32 %v1175_v55, %v279_v4 }
 0x144   :  { %v195_v53 = vpop.xlane.xlu0 %194  ;;  %v257_v19 = vmul.f32 %v869_v10, %v1088_v6  ;;  %878 = vrsqrt.f32 %v228_v7  ;;  %v206_v20 = vmul.f32 0.03125, %v174_v12  ;;  %v295_v21 = vadd.f32 %v1175_v55, %v272_v15 }
 0x145   :  { %v213_v16 = vmul.f32 0.03125, %v195_v53  ;;  %880 = vrsqrt.f32 %v221_v8  ;;  %v313_v24 = vpack.c.bf16 %v302_v62, %v301_v14  ;;  %v273_v25 = vmul.f32 %v1168_v42, %v250_v11 }
 0x146   :  { %v871_v63 = vpop.eup %870  ;;  %v222_v29 = vadd.f32 1e-05, %v206_v20  ;;  %v280_v39 = vmul.f32 %v1168_v42, %v257_v19 }
 0x147   :  { %v229_v30 = vadd.f32 1e-05, %v213_v16  ;;  %v873_v34 = vpop.eup %872  ;;  %v258_v35 = vmul.f32 %v871_v63, %v1092_v9  ;;  %v198_v38 = vpop.xlane.xlu1 %197  ;;  %842 = vmatprep.mubr.msk.bf16.mxu1 %vm53_vm0, %v313_v24  ;;  %v296_v6 = vadd.f32 %v1175_v55, %v273_v25 }
 0x148   :  { %v251_v40 = vmul.f32 %v873_v34, %v1102_v13  ;;  %882 = vrsqrt.f32 %v222_v29  ;;  %v214_v41 = vmul.f32 0.03125, %v198_v38  ;;  %v303_v49 = vadd.f32 %v1175_v55, %v280_v39 }
 0x149   :  { %884 = vrsqrt.f32 %v229_v30  ;;  %v310_v43 = vpack.c.bf16 %v296_v6, %v295_v21  ;;  %v281_v46 = vmul.f32 %v1168_v42, %v258_v35 }
 0x14a   :  { %v875_v47 = vpop.eup %874  ;;  %v230_v26 = vadd.f32 1e-05, %v214_v41  ;;  %v274_v51 = vmul.f32 %v1168_v42, %v251_v40 }
 0x14b   :  { %v877_v9 = vpop.eup %876  ;;  %v252_v48 = vmul.f32 %v875_v47, %v1106_v17  ;;  %835 = vmatmul.mubr.msk.bf16.vlgmr.msra.gmra.mrb[0].mxu0 %vm53_vm0, %v310_v43  ;;  %v304_v50 = vadd.f32 %v1175_v55, %v281_v46 }
 0x14c   :  { %v259_v13 = vmul.f32 %v877_v9, %v1116_v18  ;;  %886 = vrsqrt.f32 %v230_v26  ;;  %v297_v17 = vadd.f32 %v1175_v55, %v274_v51 }
 0x14d   :  { %v314_v44 = vpack.c.bf16 %v304_v50, %v303_v49  ;;  %v275_v54 = vmul.f32 %v1168_v42, %v252_v48 }
 0x14e   :  { %v879_v56 = vpop.eup %878  ;;  %v282_v59 = vmul.f32 %v1168_v42, %v259_v13 }
 0x14f   :  { %v881_v31 = vpop.eup %880  ;;  %v260_v57 = vmul.f32 %v879_v56, %v1120_v22  ;;  %843 = vmatmul.mubr.msk.bf16.vlgmr.msra.gmra.mrb[0].mxu1 %vm53_vm0, %v314_v44  ;;  %v298_v58 = vadd.f32 %v1175_v55, %v275_v54 }
 0x150   :  { %v253_v60 = vmul.f32 %v881_v31, %v1130_v23  ;;  %v305_v22 = vadd.f32 %v1175_v55, %v282_v59 }
 0x151   :  { %v311_v52 = vpack.c.bf16 %v298_v58, %v297_v17  ;;  %v283_v18 = vmul.f32 %v1168_v42, %v260_v57 }
 0x152   :  { %v883_v61 = vpop.eup %882  ;;  %v276_v0 = vmul.f32 %v1168_v42, %v253_v60 }
 0x153   :  { %v885_v33 = vpop.eup %884  ;;  %v254_v36 = vmul.f32 %v883_v61, %v1134_v27  ;;  %838 = vmatprep.mubr.msk.bf16.mxu0 %vm53_vm0, %v311_v52  ;;  %v306_v37 = vadd.f32 %v1175_v55, %v283_v18 }
 0x154   :  { %v261_v1 = vmul.f32 %v885_v33, %v1144_v28  ;;  %v299_v27 = vadd.f32 %v1175_v55, %v276_v0 }
 0x155   :  { %v315_v45 = vpack.c.bf16 %v306_v37, %v305_v22  ;;  %v277_v23 = vmul.f32 %v1168_v42, %v254_v36 }
 0x156   :  { %v887_v2 = vpop.eup %886  ;;  %v284_v5 = vmul.f32 %v1168_v42, %v261_v1 }
 0x157   :  { %v262_v3 = vmul.f32 %v887_v2, %v1148_v32  ;;  %846 = vmatprep.mubr.msk.bf16.mxu1 %vm53_vm0, %v315_v45  ;;  %v300_v4 = vadd.f32 %v1175_v55, %v277_v23  ;;  %v1233_v32 = vld [vmem:[%s1384_s4] ss:$0 sm:$0xff] }
 0x158   :  { %v307_v28 = vadd.f32 %v1175_v55, %v284_v5 }
 0x159   :  { %v312_v7 = vpack.c.bf16 %v300_v4, %v299_v27  ;;  %v285_v8 = vmul.f32 %v1168_v42, %v262_v3 }
 0x15b   :  { %839 = vmatmul.mubr.msk.bf16.gmra.mrb[4].mxu0 %vm53_vm0, %v312_v7  ;;  %v308_v10 = vadd.f32 %v1175_v55, %v285_v8 }
 0x15d   :  { %v316_v11 = vpack.c.bf16 %v308_v10, %v307_v28 }
 0x15f   :  { %847 = vmatmul.mubr.msk.bf16.gmra.mrb[4].mxu1 %vm53_vm0, %v316_v11 }
 0x21e   :  { %v836_v12 = vpop.f32.mrb[0].mxu0 }
 0x21f   :  { %v1236_v53 = vadd.f32 %v836_v12, %v1233_v32  ;;  %v398_v14 = vpop.f32.mrb[1].mxu0 }
 0x220   :  { %v1239_v42 = vadd.f32 %v1233_v32, %v398_v14  ;;  %v837_v62 = vpop.f32.mrb[2].mxu0 }
 0x221   :  { %v463_v55 = vmul.f32 %v1236_v53, %v1236_v53  ;;  %v1244_v15 = vadd.f32 %v837_v62, %v1233_v32  ;;  %v401_v19 = vpop.f32.mrb[3].mxu0 }
 0x222   :  { %v461_v20 = vmul.f32 %v1239_v42, %v1239_v42  ;;  %v1249_v16 = vadd.f32 %v1233_v32, %v401_v19  ;;  %v844_v24 = vpop.f32.mrb[0].mxu1 }
 0x223   :  { %v479_v25 = vmul.f32 %v463_v55, %v1236_v53  ;;  %v464_v63 = vmul.f32 %v1244_v15, %v1244_v15  ;;  %v1255_v29 = vadd.f32 %v844_v24, %v1233_v32  ;;  %v430_v30 = vpop.f32.mrb[1].mxu1 }
 0x224   :  { %v477_v34 = vmul.f32 %v461_v20, %v1239_v42  ;;  %v462_v35 = vmul.f32 %v1249_v16, %v1249_v16  ;;  %v1261_v38 = vadd.f32 %v1233_v32, %v430_v30  ;;  %v845_v21 = vpop.f32.mrb[2].mxu1 }
 0x225   :  { %v495_v6 = vmul.f32 0.044715, %v479_v25  ;;  %v480_v39 = vmul.f32 %v464_v63, %v1244_v15  ;;  %v471_v40 = vmul.f32 %v1255_v29, %v1255_v29  ;;  %v1267_v41 = vadd.f32 %v845_v21, %v1233_v32  ;;  %v433_v43 = vpop.f32.mrb[3].mxu1 }
 0x226   :  { %v493_v46 = vmul.f32 0.044715, %v477_v34  ;;  %v478_v47 = vmul.f32 %v462_v35, %v1249_v16  ;;  %v469_v26 = vmul.f32 %v1261_v38, %v1261_v38  ;;  %v1273_v9 = vadd.f32 %v1233_v32, %v433_v43 }
 0x227   :  { %v511_v48 = vadd.f32 %v495_v6, %v1236_v53  ;;  %v496_v49 = vmul.f32 0.044715, %v480_v39  ;;  %v487_v50 = vmul.f32 %v471_v40, %v1255_v29  ;;  %v472_v51 = vmul.f32 %v1267_v41, %v1267_v41 }
 0x228   :  { %v509_v13 = vadd.f32 %v493_v46, %v1239_v42  ;;  %v494_v44 = vmul.f32 0.044715, %v478_v47  ;;  %v485_v54 = vmul.f32 %v469_v26, %v1261_v38  ;;  %v470_v56 = vmul.f32 %v1273_v9, %v1273_v9 }
 0x229   :  { %v527_v31 = vmul.f32 0.7978846, %v511_v48  ;;  %v512_v57 = vadd.f32 %v496_v49, %v1244_v15  ;;  %v503_v17 = vmul.f32 0.044715, %v487_v50  ;;  %v488_v58 = vmul.f32 %v472_v51, %v1267_v41 }
 0x22a   :  { %v525_v59 = vmul.f32 0.7978846, %v509_v13  ;;  %v510_v60 = vadd.f32 %v494_v44, %v1249_v16  ;;  %v501_v52 = vmul.f32 0.044715, %v485_v54  ;;  %v486_v18 = vmul.f32 %v470_v56, %v1273_v9 }
 0x22b   :  { %888 = vtanh.f32 %v527_v31  ;;  %v528_v61 = vmul.f32 0.7978846, %v512_v57  ;;  %v519_v33 = vadd.f32 %v503_v17, %v1255_v29  ;;  %v504_v36 = vmul.f32 0.044715, %v488_v58 }
 0x22c   :  { %890 = vtanh.f32 %v525_v59  ;;  %v526_v22 = vmul.f32 0.7978846, %v510_v60  ;;  %v517_v37 = vadd.f32 %v501_v52, %v1261_v38  ;;  %v502_v0 = vmul.f32 0.044715, %v486_v18 }
 0x22d   :  { %892 = vtanh.f32 %v528_v61  ;;  %v535_v1 = vmul.f32 0.7978846, %v519_v33  ;;  %v520_v45 = vadd.f32 %v504_v36, %v1267_v41 }
 0x22e   :  { %894 = vtanh.f32 %v526_v22  ;;  %v533_v23 = vmul.f32 0.7978846, %v517_v37  ;;  %v518_v2 = vadd.f32 %v502_v0, %v1273_v9  ;;  %v840_v3 = vpop.f32.mrb[4].mxu0 }
 0x22f   :  { %896 = vtanh.f32 %v535_v1  ;;  %v536_v27 = vmul.f32 0.7978846, %v520_v45  ;;  %v1292_v4 = vadd.f32 %v840_v3, %v1233_v32  ;;  %v414_v5 = vpop.f32.mrb[5].mxu0 }
 0x230   :  { %898 = vtanh.f32 %v533_v23  ;;  %v534_v7 = vmul.f32 0.7978846, %v518_v2  ;;  %v1295_v8 = vadd.f32 %v1233_v32, %v414_v5  ;;  %v841_v28 = vpop.f32.mrb[6].mxu0 }
 0x231   :  { %900 = vtanh.f32 %v536_v27  ;;  %v467_v10 = vmul.f32 %v1292_v4, %v1292_v4  ;;  %v1300_v11 = vadd.f32 %v841_v28, %v1233_v32  ;;  %v417_v12 = vpop.f32.mrb[7].mxu0 }
 0x232   :  { %902 = vtanh.f32 %v534_v7  ;;  %v465_v14 = vmul.f32 %v1295_v8, %v1295_v8  ;;  %v1305_v62 = vadd.f32 %v1233_v32, %v417_v12  ;;  %v848_v55 = vpop.f32.mrb[4].mxu1 }
 0x233   :  { %v483_v19 = vmul.f32 %v467_v10, %v1292_v4  ;;  %v468_v20 = vmul.f32 %v1300_v11, %v1300_v11  ;;  %v1311_v24 = vadd.f32 %v848_v55, %v1233_v32  ;;  %v446_v25 = vpop.f32.mrb[5].mxu1 }
 0x234   :  { %v481_v63 = vmul.f32 %v465_v14, %v1295_v8  ;;  %v466_v30 = vmul.f32 %v1305_v62, %v1305_v62  ;;  %v1317_v34 = vadd.f32 %v1233_v32, %v446_v25  ;;  %v849_v35 = vpop.f32.mrb[6].mxu1 }
 0x235   :  { %v889_v21 = vpop.eup %888  ;;  %v499_v6 = vmul.f32 0.044715, %v483_v19  ;;  %v484_v39 = vmul.f32 %v468_v20, %v1300_v11  ;;  %v475_v40 = vmul.f32 %v1311_v24, %v1311_v24  ;;  %v1323_v43 = vadd.f32 %v849_v35, %v1233_v32  ;;  %v449_v46 = vpop.f32.mrb[7].mxu1 }
 0x236   :  { %v891_v47 = vpop.eup %890  ;;  %v559_v26 = vadd.f32 1.0, %v889_v21  ;;  %v497_v48 = vmul.f32 0.044715, %v481_v63  ;;  %v482_v49 = vmul.f32 %v466_v30, %v1305_v62  ;;  %v473_v50 = vmul.f32 %v1317_v34, %v1317_v34 }
 0x237   :  { %v893_v51 = vpop.eup %892  ;;  %v557_v13 = vadd.f32 1.0, %v891_v47  ;;  %v515_v44 = vadd.f32 %v499_v6, %v1292_v4  ;;  %v500_v54 = vmul.f32 0.044715, %v484_v39  ;;  %v491_v56 = vmul.f32 %v475_v40, %v1311_v24 }
 0x238   :  { %v895_v31 = vpop.eup %894  ;;  %v575_v57 = vmul.f32 0.5, %v559_v26  ;;  %v560_v17 = vadd.f32 1.0, %v893_v51  ;;  %v513_v58 = vadd.f32 %v497_v48, %v1295_v8  ;;  %v498_v59 = vmul.f32 0.044715, %v482_v49 }
 0x239   :  { %v897_v60 = vpop.eup %896  ;;  %v573_v52 = vmul.f32 0.5, %v557_v13  ;;  %v558_v18 = vadd.f32 1.0, %v895_v31  ;;  %v531_v61 = vmul.f32 0.7978846, %v515_v44  ;;  %v516_v33 = vadd.f32 %v500_v54, %v1300_v11 }
 0x23a   :  { %v899_v36 = vpop.eup %898  ;;  %v591_v22 = vmul.f32 %v575_v57, %v1236_v53  ;;  %v576_v37 = vmul.f32 0.5, %v560_v17  ;;  %v567_v0 = vadd.f32 1.0, %v897_v60  ;;  %v529_v1 = vmul.f32 0.7978846, %v513_v58 }
 0x23b   :  { %v901_v45 = vpop.eup %900  ;;  %v589_v23 = vmul.f32 %v573_v52, %v1239_v42  ;;  %v574_v2 = vmul.f32 0.5, %v558_v18  ;;  %v565_v3 = vadd.f32 1.0, %v899_v36  ;;  %904 = vtanh.f32 %v531_v61 }
 0x23c   :  { %v903_v27 = vpop.eup %902  ;;  %v592_v5 = vmul.f32 %v576_v37, %v1244_v15  ;;  %v583_v7 = vmul.f32 0.5, %v567_v0  ;;  %v568_v28 = vadd.f32 1.0, %v901_v45  ;;  %906 = vtanh.f32 %v529_v1 }
 0x23d   :  { %v590_v10 = vmul.f32 %v574_v2, %v1249_v16  ;;  %v581_v12 = vmul.f32 0.5, %v565_v3  ;;  %v566_v14 = vadd.f32 1.0, %v903_v27  ;;  %v532_v53 = vmul.f32 0.7978846, %v516_v33 }
 0x23e   :  { %v774_v55 = vpack.c.bf16 %v592_v5, %v591_v22  ;;  %v584_v19 = vmul.f32 0.5, %v568_v28  ;;  %v514_v20 = vadd.f32 %v498_v59, %v1305_v62  ;;  %v599_v42 = vmul.f32 %v583_v7, %v1255_v29 }
 0x23f   :  { %v769_v25 = vpack.c.bf16 %v590_v10, %v589_v23  ;;  %v582_v63 = vmul.f32 0.5, %v566_v14  ;;  %908 = vtanh.f32 %v532_v53  ;;  %v507_v16 = vmul.f32 0.044715, %v491_v56 }
 0x240   :  { %813 = vst [vmem:[%s1385_s5 + $0x8] sm:$0xff] %v774_v55   ;;  %v600_v15 = vmul.f32 %v584_v19, %v1267_v41  ;;  %v530_v30 = vmul.f32 0.7978846, %v514_v20  ;;  %v489_v35 = vmul.f32 %v473_v50, %v1317_v34  ;;  %v597_v21 = vmul.f32 %v581_v12, %v1261_v38 }
 0x241   :  { %770 = vst [vmem:[%s1385_s5] sm:$0xff] %v769_v25   ;;  %v598_v29 = vmul.f32 %v582_v63, %v1273_v9  ;;  %v476_v6 = vmul.f32 %v1323_v43, %v1323_v43  ;;  %v450_v39 = vadd.f32 %v1233_v32, %v449_v46  ;;  %v523_v41 = vadd.f32 %v507_v16, %v1311_v24 }
 0x242   :  { %v794_v40 = vpack.c.bf16 %v600_v15, %v599_v42  ;;  %910 = vtanh.f32 %v530_v30  ;;  %v505_v47 = vmul.f32 0.044715, %v489_v35 }
 0x243   :  { %v789_v26 = vpack.c.bf16 %v598_v29, %v597_v21  ;;  %v492_v48 = vmul.f32 %v476_v6, %v1323_v43  ;;  %v474_v49 = vmul.f32 %v450_v39, %v450_v39  ;;  %v539_v38 = vmul.f32 0.7978846, %v523_v41 }
 0x244   :  { %817 = vst [vmem:[%s1385_s5 + $0x28] sm:$0xff] %v794_v40   ;;  %v521_v9 = vadd.f32 %v505_v47, %v1317_v34 }
 0x245   :  { %v905_v50 = vpop.eup %904  ;;  %816 = vst [vmem:[%s1385_s5 + $0x20] sm:$0xff] %v789_v26   ;;  %v508_v32 = vmul.f32 0.044715, %v492_v48  ;;  %v490_v46 = vmul.f32 %v474_v49, %v450_v39  ;;  %912 = vtanh.f32 %v539_v38 }
 0x246   :  { %v907_v51 = vpop.eup %906  ;;  %v563_v13 = vadd.f32 1.0, %v905_v50  ;;  %v537_v44 = vmul.f32 0.7978846, %v521_v9 }
 0x247   :  { %v524_v54 = vadd.f32 %v508_v32, %v1323_v43  ;;  %v506_v56 = vmul.f32 0.044715, %v490_v46  ;;  %v561_v57 = vadd.f32 1.0, %v907_v51 }
 0x248   :  { %914 = vtanh.f32 %v537_v44  ;;  %v579_v59 = vmul.f32 0.5, %v563_v13 }
 0x249   :  { %v909_v31 = vpop.eup %908  ;;  %v540_v17 = vmul.f32 0.7978846, %v524_v54  ;;  %v522_v58 = vadd.f32 %v506_v56, %v450_v39  ;;  %v577_v33 = vmul.f32 0.5, %v561_v57 }
 0x24a   :  { %v564_v60 = vadd.f32 1.0, %v909_v31  ;;  %v595_v22 = vmul.f32 %v579_v59, %v1292_v4 }
 0x24b   :  { %916 = vtanh.f32 %v540_v17  ;;  %v538_v52 = vmul.f32 0.7978846, %v522_v58  ;;  %v593_v23 = vmul.f32 %v577_v33, %v1295_v8 }
 0x24c   :  { %v911_v18 = vpop.eup %910  ;;  %v580_v61 = vmul.f32 0.5, %v564_v60 }
 0x24d   :  { %v562_v36 = vadd.f32 1.0, %v911_v18  ;;  %918 = vtanh.f32 %v538_v52 }
 0x24e   :  { %v596_v37 = vmul.f32 %v580_v61, %v1300_v11 }
 0x24f   :  { %v578_v0 = vmul.f32 0.5, %v562_v36  ;;  %v913_v1 = vpop.eup %912 }
 0x250   :  { %v784_v45 = vpack.c.bf16 %v596_v37, %v595_v22  ;;  %v571_v27 = vadd.f32 1.0, %v913_v1 }
 0x251   :  { %v594_v2 = vmul.f32 %v578_v0, %v1305_v62 }
 0x252   :  { %v915_v3 = vpop.eup %914  ;;  %815 = vst [vmem:[%s1385_s5 + $0x18] sm:$0xff] %v784_v45   ;;  %v587_v4 = vmul.f32 0.5, %v571_v27 }
 0x253   :  { %v779_v5 = vpack.c.bf16 %v594_v2, %v593_v23  ;;  %v569_v7 = vadd.f32 1.0, %v915_v3 }
 0x254   :  { %v603_v62 = vmul.f32 %v587_v4, %v1311_v24 }
 0x255   :  { %v917_v28 = vpop.eup %916  ;;  %814 = vst [vmem:[%s1385_s5 + $0x10] sm:$0xff] %v779_v5   ;;  %v585_v12 = vmul.f32 0.5, %v569_v7 }
 0x256   :  { %v572_v11 = vadd.f32 1.0, %v917_v28 }
 0x257   :  { %v919_v10 = vpop.eup %918  ;;  %v601_v19 = vmul.f32 %v585_v12, %v1317_v34 }
 0x258   :  { %v588_v8 = vmul.f32 0.5, %v572_v11  ;;  %v570_v14 = vadd.f32 1.0, %v919_v10 }
 0x25a   :  { %v604_v53 = vmul.f32 %v588_v8, %v1323_v43  ;;  %v586_v55 = vmul.f32 0.5, %v570_v14 }
 0x25c   :  { %v804_v20 = vpack.c.bf16 %v604_v53, %v603_v62  ;;  %v602_v25 = vmul.f32 %v586_v55, %v450_v39 }
 0x25e   :  { %819 = vst [vmem:[%s1385_s5 + $0x38] sm:$0xff] %v804_v20   ;;  %v799_v42 = vpack.c.bf16 %v602_v25, %v601_v19 }
 0x260   :  { %818 = vst [vmem:[%s1385_s5 + $0x30] sm:$0xff] %v799_v42  }

// kernel: basic_layer_up_forward.43
= control target key start
LH: loop header
LB: loop body
LE: loop exit
PB: predicated region body
PF: predicated region fallthrough
CT: control target
= control target key end

     0   :  { %vm94_vm0 = vcmask 261120   ;;  %s543_s1 = inlined_call_operand.vmem [shape: bf16[32,128], index: 1, kind: input, shape index: {}]   ;;  %s544_s0 = inlined_call_operand.vmem [shape: bf16[128,32], index: 0, kind: input, shape index: {}]   ;;  %s545_s2 = inlined_call_operand.vmem [shape: f32[1,128], index: 2, kind: input, shape index: {}]   ;;  %s546_s3 = inlined_call_operand.vmem [shape: bf16[128,128], index: 3, kind: output, shape index: {}]  }
   0x1   :  { %v448_v0 = vld [vmem:[%s543_s1] sm:$0xff]   ;;  %v449_v1 = vld [vmem:[%s543_s1 + $0x8] sm:$0xff]   ;;  %v454_v6 = vld [vmem:[%s544_s0 + $0x10] sm:$0xff]  }
   0x2   :  { %424 = vmatprep.subr.bf16.mxu0 %v448_v0  ;;  %444 = vmatprep.subr.bf16.mxu1 %v448_v0  ;;  %v450_v2 = vld [vmem:[%s544_s0] sm:$0xff]   ;;  %v452_v4 = vld [vmem:[%s544_s0 + $0x8] sm:$0xff]   ;;  %v455_v7 = vld [vmem:[%s544_s0 + $0x30] sm:$0xff]  }
   0x3   :  { %425 = vmatpush3.bf16.msra.mxu0 %v448_v0  ;;  %446 = vmatpush3.bf16.msra.mxu1 %v448_v0  ;;  %v451_v3 = vld [vmem:[%s544_s0 + $0x20] sm:$0xff]   ;;  %v453_v5 = vld [vmem:[%s544_s0 + $0x28] sm:$0xff]   ;;  %v456_v8 = vld [vmem:[%s544_s0 + $0x18] sm:$0xff]  }
   0x4   :  { %426 = vmatprep.subr.bf16.mxu0 %v449_v1  ;;  %445 = vmatprep.subr.bf16.mxu1 %v449_v1  ;;  %v457_v9 = vld [vmem:[%s544_s0 + $0x38] sm:$0xff]   ;;  %v316_v10 = vld [vmem:[%s545_s2] ss:$0 sm:$0xff] }
   0x5   :  { %428 = vmatprep.mubr.msk.bf16.mxu0 %vm94_vm0, %v450_v2  ;;  %436 = vmatprep.mubr.msk.bf16.mxu1 %vm94_vm0, %v451_v3 }
   0x7   :  { %427 = vmatpush3.bf16.msra.mxu0 %v449_v1  ;;  %447 = vmatpush3.bf16.msra.mxu1 %v449_v1 }
   0xa   :  { %429 = vmatmul.mubr.msk.bf16.vlgmr.msra.gmra.mrb[0].mxu0 %vm94_vm0, %v452_v4  ;;  %437 = vmatmul.mubr.msk.bf16.vlgmr.msra.gmra.mrb[0].mxu1 %vm94_vm0, %v453_v5 }
   0xb   :  { %432 = vmatprep.mubr.msk.bf16.mxu0 %vm94_vm0, %v454_v6  ;;  %440 = vmatprep.mubr.msk.bf16.mxu1 %vm94_vm0, %v455_v7 }
  0x12   :  { %433 = vmatmul.mubr.msk.bf16.gmra.mrb[4].mxu0 %vm94_vm0, %v456_v8  ;;  %441 = vmatmul.mubr.msk.bf16.gmra.mrb[4].mxu1 %vm94_vm0, %v457_v9 }
  0xdd   :  { %v430_v11 = vpop.f32.mrb[0].mxu0  ;;  %v438_v12 = vpop.f32.mrb[0].mxu1 }
  0xde   :  { %v162_v13 = vadd.f32 %v430_v11, %v316_v10  ;;  %v194_v14 = vadd.f32 %v438_v12, %v316_v10  ;;  %v153_v15 = vpop.f32.mrb[1].mxu0  ;;  %v185_v16 = vpop.f32.mrb[1].mxu1 }
  0xdf   :  { %v154_v17 = vadd.f32 %v316_v10, %v153_v15  ;;  %v186_v18 = vadd.f32 %v316_v10, %v185_v16  ;;  %v431_v19 = vpop.f32.mrb[2].mxu0  ;;  %v439_v20 = vpop.f32.mrb[2].mxu1 }
  0xe0   :  { %v165_v21 = vadd.f32 %v431_v19, %v316_v10  ;;  %v197_v22 = vadd.f32 %v439_v20, %v316_v10  ;;  %v156_v23 = vpop.f32.mrb[3].mxu0  ;;  %v188_v24 = vpop.f32.mrb[3].mxu1  ;;  %v218_v27 = vmax.f32 %v162_v13, 0.0  ;;  %v226_v28 = vmax.f32 %v194_v14, 0.0 }
  0xe1   :  { %v157_v25 = vadd.f32 %v316_v10, %v156_v23  ;;  %v189_v26 = vadd.f32 %v316_v10, %v188_v24  ;;  %v216_v31 = vmax.f32 %v154_v17, 0.0  ;;  %v224_v32 = vmax.f32 %v186_v18, 0.0 }
  0xe2   :  { %v219_v29 = vmax.f32 %v165_v21, 0.0  ;;  %v227_v30 = vmax.f32 %v197_v22, 0.0 }
  0xe3   :  { %v217_v33 = vmax.f32 %v157_v25, 0.0  ;;  %v225_v34 = vmax.f32 %v189_v26, 0.0 }
  0xe4   :  { %v375_v35 = vpack.c.bf16 %v219_v29, %v218_v27  ;;  %v395_v36 = vpack.c.bf16 %v227_v30, %v226_v28 }
  0xe5   :  { %v370_v37 = vpack.c.bf16 %v217_v33, %v216_v31  ;;  %v390_v38 = vpack.c.bf16 %v225_v34, %v224_v32  ;;  %v434_v39 = vpop.f32.mrb[4].mxu0  ;;  %v442_v40 = vpop.f32.mrb[4].mxu1 }
  0xe6   :  { %407 = vst [vmem:[%s546_s3 + $0x8] sm:$0xff] %v375_v35   ;;  %411 = vst [vmem:[%s546_s3 + $0x28] sm:$0xff] %v395_v36   ;;  %v178_v41 = vadd.f32 %v434_v39, %v316_v10  ;;  %v210_v42 = vadd.f32 %v442_v40, %v316_v10  ;;  %v169_v43 = vpop.f32.mrb[5].mxu0  ;;  %v201_v44 = vpop.f32.mrb[5].mxu1 }
  0xe7   :  { %371 = vst [vmem:[%s546_s3] sm:$0xff] %v370_v37   ;;  %410 = vst [vmem:[%s546_s3 + $0x20] sm:$0xff] %v390_v38   ;;  %v170_v45 = vadd.f32 %v316_v10, %v169_v43  ;;  %v202_v46 = vadd.f32 %v316_v10, %v201_v44  ;;  %v435_v47 = vpop.f32.mrb[6].mxu0  ;;  %v443_v48 = vpop.f32.mrb[6].mxu1 }
  0xe8   :  { %v181_v49 = vadd.f32 %v435_v47, %v316_v10  ;;  %v213_v50 = vadd.f32 %v443_v48, %v316_v10  ;;  %v172_v51 = vpop.f32.mrb[7].mxu0  ;;  %v204_v52 = vpop.f32.mrb[7].mxu1  ;;  %v222_v55 = vmax.f32 %v178_v41, 0.0  ;;  %v230_v56 = vmax.f32 %v210_v42, 0.0 }
  0xe9   :  { %v173_v53 = vadd.f32 %v316_v10, %v172_v51  ;;  %v205_v54 = vadd.f32 %v316_v10, %v204_v52  ;;  %v220_v59 = vmax.f32 %v170_v45, 0.0  ;;  %v228_v60 = vmax.f32 %v202_v46, 0.0 }
  0xea   :  { %v223_v57 = vmax.f32 %v181_v49, 0.0  ;;  %v231_v58 = vmax.f32 %v213_v50, 0.0 }
  0xeb   :  { %v221_v61 = vmax.f32 %v173_v53, 0.0  ;;  %v229_v62 = vmax.f32 %v205_v54, 0.0 }
  0xec   :  { %v385_v63 = vpack.c.bf16 %v223_v57, %v222_v55  ;;  %v405_v0 = vpack.c.bf16 %v231_v58, %v230_v56 }
  0xed   :  { %v380_v1 = vpack.c.bf16 %v221_v61, %v220_v59  ;;  %v400_v2 = vpack.c.bf16 %v229_v62, %v228_v60 }
  0xee   :  { %409 = vst [vmem:[%s546_s3 + $0x18] sm:$0xff] %v385_v63   ;;  %413 = vst [vmem:[%s546_s3 + $0x38] sm:$0xff] %v405_v0  }
  0xef   :  { %408 = vst [vmem:[%s546_s3 + $0x10] sm:$0xff] %v380_v1   ;;  %412 = vst [vmem:[%s546_s3 + $0x30] sm:$0xff] %v400_v2  }

// kernel: basic_layer_up_forward.32
= control target key start
LH: loop header
LB: loop body
LE: loop exit
PB: predicated region body
PF: predicated region fallthrough
CT: control target
= control target key end

     0   :  { %s739_s1 = inlined_call_operand.vmem [shape: bf16[128,128], index: 1, kind: input, shape index: {}]   ;;  %s740_s0 = inlined_call_operand.vmem [shape: bf16[128,128], index: 0, kind: input, shape index: {}]   ;;  %s741_s3 = inlined_call_operand.vmem [shape: bf16[128,128], index: 3, kind: input, shape index: {}]   ;;  %s742_s2 = inlined_call_operand.vmem [shape: f32[1,128], index: 2, kind: input, shape index: {}]   ;;  %s743_s4 = inlined_call_operand.vmem [shape: bf16[128,128], index: 4, kind: output, shape index: {}]  }
   0x1   :  { %v581_v0 = vld [vmem:[%s739_s1] sm:$0xff]   ;;  %v582_v1 = vld [vmem:[%s739_s1 + $0x8] sm:$0xff]   ;;  %v583_v2 = vld [vmem:[%s739_s1 + $0x10] sm:$0xff]  }
   0x2   :  { %533 = vmatprep.subr.bf16.mxu0 %v581_v0  ;;  %565 = vmatprep.subr.bf16.mxu1 %v581_v0  ;;  %v584_v3 = vld [vmem:[%s739_s1 + $0x18] sm:$0xff]   ;;  %v589_v4 = vld [vmem:[%s740_s0] sm:$0xff]   ;;  %v586_v7 = vld [vmem:[%s739_s1 + $0x28] sm:$0xff]  }
   0x3   :  { %534 = vmatpush3.bf16.msra.mxu0 %v581_v0  ;;  %573 = vmatpush3.bf16.msra.mxu1 %v581_v0  ;;  %v590_v5 = vld [vmem:[%s740_s0 + $0x20] sm:$0xff]   ;;  %v587_v8 = vld [vmem:[%s739_s1 + $0x30] sm:$0xff]   ;;  %v588_v9 = vld [vmem:[%s739_s1 + $0x38] sm:$0xff]  }
   0x4   :  { %535 = vmatprep.subr.bf16.mxu0 %v582_v1  ;;  %566 = vmatprep.subr.bf16.mxu1 %v582_v1  ;;  %v585_v6 = vld [vmem:[%s739_s1 + $0x20] sm:$0xff]   ;;  %v591_v10 = vld [vmem:[%s740_s0 + $0x8] sm:$0xff]   ;;  %v593_v12 = vld [vmem:[%s740_s0 + $0x10] sm:$0xff]  }
   0x5   :  { %549 = vmatprep.mubr.bf16.mxu0 %v589_v4  ;;  %557 = vmatprep.mubr.bf16.mxu1 %v590_v5  ;;  %v592_v11 = vld [vmem:[%s740_s0 + $0x28] sm:$0xff]   ;;  %v594_v13 = vld [vmem:[%s740_s0 + $0x30] sm:$0xff]   ;;  %v595_v14 = vld [vmem:[%s740_s0 + $0x18] sm:$0xff]  }
   0x6   :  { %v596_v15 = vld [vmem:[%s740_s0 + $0x38] sm:$0xff]   ;;  %v503_v16 = vld [vmem:[%s741_s3 + $0x8] sm:$0xff]   ;;  %v432_v18 = vld [vmem:[%s741_s3] sm:$0xff]  }
   0x7   :  { %536 = vmatpush3.bf16.msra.mxu0 %v582_v1  ;;  %574 = vmatpush3.bf16.msra.mxu1 %v582_v1  ;;  %v507_v17 = vld [vmem:[%s741_s3 + $0x28] sm:$0xff]   ;;  %v506_v19 = vld [vmem:[%s741_s3 + $0x20] sm:$0xff]   ;;  %v437_v22 = vunpack.c.l.bf16 %v503_v16  ;;  %v433_v25 = vunpack.c.l.bf16 %v432_v18  ;;  %v438_v31 = vunpack.c.h.bf16 %v503_v16  ;;  %v434_v37 = vunpack.c.h.bf16 %v432_v18  ;;  %v505_v45 = vld [vmem:[%s741_s3 + $0x18] sm:$0xff]  }
   0x8   :  { %537 = vmatprep.subr.bf16.mxu0 %v583_v2  ;;  %567 = vmatprep.subr.bf16.mxu1 %v583_v2  ;;  %v685_v20 = vld [vmem:[%s742_s2] ss:$0 sm:$0xff]  ;;  %v453_v24 = vunpack.c.l.bf16 %v507_v17  ;;  %v449_v26 = vunpack.c.l.bf16 %v506_v19  ;;  %v454_v32 = vunpack.c.h.bf16 %v507_v17  ;;  %v450_v38 = vunpack.c.h.bf16 %v506_v19  ;;  %v509_v46 = vld [vmem:[%s741_s3 + $0x38] sm:$0xff]   ;;  %v504_v51 = vld [vmem:[%s741_s3 + $0x10] sm:$0xff]  }
   0x9   :  { %v508_v52 = vld [vmem:[%s741_s3 + $0x30] sm:$0xff]   ;;  %v445_v59 = vunpack.c.l.bf16 %v505_v45  ;;  %v461_v60 = vunpack.c.l.bf16 %v509_v46  ;;  %v441_v1 = vunpack.c.l.bf16 %v504_v51 }
   0xb   :  { %538 = vmatpush3.bf16.msra.mxu0 %v583_v2  ;;  %575 = vmatpush3.bf16.msra.mxu1 %v583_v2  ;;  %v457_v2 = vunpack.c.l.bf16 %v508_v52 }
   0xc   :  { %539 = vmatprep.subr.bf16.mxu0 %v584_v3  ;;  %568 = vmatprep.subr.bf16.mxu1 %v584_v3 }
   0xf   :  { %540 = vmatpush3.bf16.msra.mxu0 %v584_v3  ;;  %576 = vmatpush3.bf16.msra.mxu1 %v584_v3 }
  0x10   :  { %541 = vmatprep.subr.bf16.mxu0 %v585_v6  ;;  %569 = vmatprep.subr.bf16.mxu1 %v585_v6 }
  0x13   :  { %542 = vmatpush3.bf16.msra.mxu0 %v585_v6  ;;  %577 = vmatpush3.bf16.msra.mxu1 %v585_v6 }
  0x14   :  { %543 = vmatprep.subr.bf16.mxu0 %v586_v7  ;;  %570 = vmatprep.subr.bf16.mxu1 %v586_v7 }
  0x17   :  { %544 = vmatpush3.bf16.msra.mxu0 %v586_v7  ;;  %578 = vmatpush3.bf16.msra.mxu1 %v586_v7  ;;  %v446_v7 = vunpack.c.h.bf16 %v505_v45 }
  0x18   :  { %545 = vmatprep.subr.bf16.mxu0 %v587_v8  ;;  %571 = vmatprep.subr.bf16.mxu1 %v587_v8 }
  0x1b   :  { %546 = vmatpush3.bf16.msra.mxu0 %v587_v8  ;;  %579 = vmatpush3.bf16.msra.mxu1 %v587_v8  ;;  %v462_v8 = vunpack.c.h.bf16 %v509_v46 }
  0x1c   :  { %547 = vmatprep.subr.bf16.mxu0 %v588_v9  ;;  %572 = vmatprep.subr.bf16.mxu1 %v588_v9 }
  0x1f   :  { %548 = vmatpush3.bf16.msra.mxu0 %v588_v9  ;;  %580 = vmatpush3.bf16.msra.mxu1 %v588_v9 }
  0x22   :  { %550 = vmatmul.mubr.bf16.vlgmr.msra.gmra.mrb[0].mxu0 %v591_v10  ;;  %558 = vmatmul.mubr.bf16.vlgmr.msra.gmra.mrb[0].mxu1 %v592_v11 }
  0x23   :  { %553 = vmatprep.mubr.bf16.mxu0 %v593_v12  ;;  %561 = vmatprep.mubr.bf16.mxu1 %v594_v13  ;;  %v442_v13 = vunpack.c.h.bf16 %v504_v51 }
  0x2a   :  { %554 = vmatmul.mubr.bf16.gmra.mrb[4].mxu0 %v595_v14  ;;  %562 = vmatmul.mubr.bf16.gmra.mrb[4].mxu1 %v596_v15  ;;  %v458_v14 = vunpack.c.h.bf16 %v508_v52 }
  0xf5   :  { %v551_v21 = vpop.f32.mrb[0].mxu0  ;;  %v559_v23 = vpop.f32.mrb[0].mxu1 }
  0xf6   :  { %v196_v27 = vadd.f32 %v551_v21, %v685_v20  ;;  %v228_v28 = vadd.f32 %v559_v23, %v685_v20  ;;  %v187_v29 = vpop.f32.mrb[1].mxu0  ;;  %v219_v30 = vpop.f32.mrb[1].mxu1 }
  0xf7   :  { %v188_v33 = vadd.f32 %v685_v20, %v187_v29  ;;  %v220_v34 = vadd.f32 %v685_v20, %v219_v30  ;;  %v552_v35 = vpop.f32.mrb[2].mxu0  ;;  %v560_v36 = vpop.f32.mrb[2].mxu1 }
  0xf8   :  { %v199_v39 = vadd.f32 %v552_v35, %v685_v20  ;;  %v231_v40 = vadd.f32 %v560_v36, %v685_v20  ;;  %v190_v41 = vpop.f32.mrb[3].mxu0  ;;  %v222_v42 = vpop.f32.mrb[3].mxu1  ;;  %v284_v47 = vadd.f32 %v437_v22, %v196_v27  ;;  %v292_v48 = vadd.f32 %v453_v24, %v228_v28 }
  0xf9   :  { %v191_v43 = vadd.f32 %v685_v20, %v190_v41  ;;  %v223_v44 = vadd.f32 %v685_v20, %v222_v42  ;;  %v282_v53 = vadd.f32 %v433_v25, %v188_v33  ;;  %v290_v54 = vadd.f32 %v449_v26, %v220_v34 }
  0xfa   :  { %v285_v49 = vadd.f32 %v438_v31, %v199_v39  ;;  %v293_v50 = vadd.f32 %v454_v32, %v231_v40 }
  0xfb   :  { %v283_v55 = vadd.f32 %v434_v37, %v191_v43  ;;  %v291_v56 = vadd.f32 %v450_v38, %v223_v44 }
  0xfc   :  { %v471_v57 = vpack.c.bf16 %v285_v49, %v284_v47  ;;  %v491_v58 = vpack.c.bf16 %v293_v50, %v292_v48 }
  0xfd   :  { %v466_v61 = vpack.c.bf16 %v283_v55, %v282_v53  ;;  %v486_v62 = vpack.c.bf16 %v291_v56, %v290_v54  ;;  %v555_v63 = vpop.f32.mrb[4].mxu0  ;;  %v563_v0 = vpop.f32.mrb[4].mxu1 }
  0xfe   :  { %510 = vst [vmem:[%s743_s4 + $0x8] sm:$0xff] %v471_v57   ;;  %514 = vst [vmem:[%s743_s4 + $0x28] sm:$0xff] %v491_v58   ;;  %v212_v3 = vadd.f32 %v555_v63, %v685_v20  ;;  %v244_v4 = vadd.f32 %v563_v0, %v685_v20  ;;  %v203_v5 = vpop.f32.mrb[5].mxu0  ;;  %v235_v6 = vpop.f32.mrb[5].mxu1 }
  0xff   :  { %467 = vst [vmem:[%s743_s4] sm:$0xff] %v466_v61   ;;  %513 = vst [vmem:[%s743_s4 + $0x20] sm:$0xff] %v486_v62   ;;  %v204_v9 = vadd.f32 %v685_v20, %v203_v5  ;;  %v236_v10 = vadd.f32 %v685_v20, %v235_v6  ;;  %v556_v11 = vpop.f32.mrb[6].mxu0  ;;  %v564_v12 = vpop.f32.mrb[6].mxu1 }
 0x100   :  { %v215_v15 = vadd.f32 %v556_v11, %v685_v20  ;;  %v247_v16 = vadd.f32 %v564_v12, %v685_v20  ;;  %v206_v17 = vpop.f32.mrb[7].mxu0  ;;  %v238_v18 = vpop.f32.mrb[7].mxu1  ;;  %v288_v22 = vadd.f32 %v445_v59, %v212_v3  ;;  %v296_v23 = vadd.f32 %v461_v60, %v244_v4 }
 0x101   :  { %v207_v19 = vadd.f32 %v685_v20, %v206_v17  ;;  %v239_v21 = vadd.f32 %v685_v20, %v238_v18  ;;  %v286_v26 = vadd.f32 %v441_v1, %v204_v9  ;;  %v294_v27 = vadd.f32 %v457_v2, %v236_v10 }
 0x102   :  { %v289_v24 = vadd.f32 %v446_v7, %v215_v15  ;;  %v297_v25 = vadd.f32 %v462_v8, %v247_v16 }
 0x103   :  { %v287_v28 = vadd.f32 %v442_v13, %v207_v19  ;;  %v295_v29 = vadd.f32 %v458_v14, %v239_v21 }
 0x104   :  { %v481_v30 = vpack.c.bf16 %v289_v24, %v288_v22  ;;  %v501_v31 = vpack.c.bf16 %v297_v25, %v296_v23 }
 0x105   :  { %v476_v32 = vpack.c.bf16 %v287_v28, %v286_v26  ;;  %v496_v33 = vpack.c.bf16 %v295_v29, %v294_v27 }
 0x106   :  { %512 = vst [vmem:[%s743_s4 + $0x18] sm:$0xff] %v481_v30   ;;  %516 = vst [vmem:[%s743_s4 + $0x38] sm:$0xff] %v501_v31  }
 0x107   :  { %511 = vst [vmem:[%s743_s4 + $0x10] sm:$0xff] %v476_v32   ;;  %515 = vst [vmem:[%s743_s4 + $0x30] sm:$0xff] %v496_v33  }

// kernel: basic_layer_up_forward.44
= control target key start
LH: loop header
LB: loop body
LE: loop exit
PB: predicated region body
PF: predicated region fallthrough
CT: control target
= control target key end

     0   :  { %s1340_s18 = smov 0   ;;  %s1772_s0 = inlined_call_operand.vmem [shape: bf16[2,9,9,128], index: 0, kind: input, shape index: {}]   ;;  %s1773_s1 = inlined_call_operand.vmem [shape: f32[9,128], index: 1, kind: input, shape index: {}]   ;;  %s1774_s2 = inlined_call_operand.vmem [shape: bf16[2,8,8,128], index: 2, kind: output, shape index: {0}]   ;;  %s1775_s3 = inlined_call_operand.vmem [shape: bf16[2,8,8,128], index: 3, kind: output, shape index: {1}]   ;;  %s1776_s4 = inlined_call_operand.vmem [shape: bf16[2,8,8,128], index: 4, kind: output, shape index: {2}]   ;;  %s1777_s5 = inlined_call_operand.vmem [shape: bf16[2,8,8,128], index: 5, kind: output, shape index: {3}]  }
   0x1 LB: > { %s1146_s19 = sadd.s32 4294967295, %s1308_s18   ;;  %p1150_p0 = scmp.ge.s32.totalorder %s1308_s18, 1  ;;  %s1308_s18 = sphi %s1340_s18, %s16_s18  }
   0x2   : > { %p194_p1 = scmp.lt.s32.totalorder %s1308_s18, 3 }
   0x4   : > { %p195_p2 = pnand %p1150_p0, %p194_p1 }
   0x5   : > { %p237_p3 = scmp.lt.s32.totalorder (!%p195_p2), %s1146_s19, 1  ;;  %v329_v0 = vlaneseq (!%p195_p2)  ;;  %v1357_v6 = vld [vmem:[%s1773_s1] sm:$0xff] (!%p195_p2)  ;;  %vm669_vm0 = vsmask.f32 (!%p195_p2), 3328  ;;  %vm670_vm1 = vsmask.f32 (!%p195_p2), 7440 }
   0x6   : > { %198 = sbr.rel (%p195_p2) target bundleno = 131 (0x83), region = 28  ;;  %vm1476_vm2 = vmor (!%p195_p2), %vm669_vm0, %vm670_vm1 }
   0x7   : > { %v1348_v1 = vshrl.u32 (!%p195_p2), %v329_v0, 7 }
   0x9   : > { %v331_v2 = vsub.s32 (!%p195_p2), 4, %v1348_v1  ;;  %v343_v3 = vsub.s32 (!%p195_p2), 3, %v1348_v1  ;;  %v447_v4 = vsub.s32 (!%p195_p2), 0, %v1348_v1  ;;  %v519_v5 = vsub.s32 (!%p195_p2), 6, %v1348_v1 }
   0xa   : > { %v363_v7 = vsub.s32 (!%p195_p2), 5, %v1348_v1  ;;  %v415_v8 = vsub.s32 (!%p195_p2), 1, %v1348_v1  ;;  %v427_v9 = vsub.s32 (!%p195_p2), 7, %v1348_v1  ;;  %v467_v13 = vsub.s32 (!%p195_p2), 2, %v1348_v1 }
   0xb   : > { %v332_v10 = vrot.slane (!%p195_p2), %v1357_v6, %v331_v2  ;;  %v1369_v11 = vrot.slane (!%p195_p2), %v1357_v6, %v343_v3  ;;  %v1372_v12 = vrot.slane (!%p195_p2), %v1357_v6, %v447_v4  ;;  %v1377_v15 = vrot.slane (!%p195_p2), %v1357_v6, %v519_v5 }
   0xc   : > { %v1382_v18 = vrot.slane (!%p195_p2), %v1357_v6, %v363_v7  ;;  %v1385_v19 = vrot.slane (!%p195_p2), %v1357_v6, %v415_v8  ;;  %v1388_v20 = vrot.slane (!%p195_p2), %v1357_v6, %v427_v9 }
   0xd   : > { %s1781_s19 = smov (!%p237_p3, %s1146_s19), 1 }
   0xe   : > { %s1293_s20 = smul.u32 72, %s1781_s19  ;;  %s1390_s26 = sshll.u32 %s1781_s19, 5 }
   0xf   : > { %s246_s29 = scalar_lea.vmem %s1774_s2, %s1390_s26  ;;  %s1487_s7 = scalar_lea.vmem %s1775_s3, %s1390_s26 }
  0x10   : > { %s1365_s25 = scalar_lea.vmem %s1772_s0, %s1293_s20  ;;  %s1562_s10 = scalar_lea.vmem %s1776_s4, %s1390_s26 }
  0x11   : > { %v264_v14 = vld [vmem:[%s1365_s25] ss:$8 sps:$4 sm:$0xff]   ;;  %v266_v16 = vld [vmem:[%s1365_s25 + $0x10] ss:$8 sps:$4 sm:$0xff]   ;;  %v1410_v30 = vld [vmem:[%s1365_s25 + $0x4] sm:$0x1]  ;;  %s1688_s15 = scalar_lea.vmem %s1777_s5, %s1390_s26 }
  0x12   : > { %v268_v17 = vld [vmem:[%s1365_s25 + $0x20] ss:$8 sps:$4 sm:$0xff]   ;;  %v1392_v21 = vunpack.c.l.bf16 %v264_v14  ;;  %v1394_v22 = vunpack.c.h.bf16 %v264_v14  ;;  %v1396_v23 = vunpack.c.l.bf16 %v266_v16  ;;  %v1398_v24 = vunpack.c.h.bf16 %v266_v16  ;;  %v270_v25 = vld [vmem:[%s1365_s25 + $0x30] ss:$8 sps:$4 sm:$0xff]   ;;  %v1417_v35 = vld [vmem:[%s1365_s25 + $0xc] sm:$0x1] }
  0x13   : > { %v1401_v26 = vunpack.c.l.bf16 %v268_v17  ;;  %v1403_v27 = vunpack.c.h.bf16 %v268_v17  ;;  %v1405_v28 = vunpack.c.l.bf16 %v270_v25  ;;  %v1407_v29 = vunpack.c.h.bf16 %v270_v25  ;;  %v1428_v40 = vld [vmem:[%s1365_s25 + $0x14] sm:$0x1]  ;;  %v1437_v49 = vld [vmem:[%s1365_s25 + $0x1c] sm:$0x1]  ;;  %v1455_v58 = vld [vmem:[%s1365_s25 + $0x24] sm:$0x1] }
  0x14   : > { %v333_v31 = vmul.f32 %v332_v10, %v1392_v21  ;;  %v334_v32 = vmul.f32 %v332_v10, %v1394_v22  ;;  %v335_v33 = vmul.f32 %v332_v10, %v1396_v23  ;;  %v336_v34 = vmul.f32 %v332_v10, %v1398_v24 }
  0x15   : > { %v337_v36 = vmul.f32 %v332_v10, %v1401_v26  ;;  %v338_v37 = vmul.f32 %v332_v10, %v1403_v27  ;;  %v339_v38 = vmul.f32 %v332_v10, %v1405_v28  ;;  %v340_v39 = vmul.f32 %v332_v10, %v1407_v29 }
  0x16   : > { %v1250_v41 = vpack.c.bf16 %v334_v32, %v333_v31  ;;  %v1255_v42 = vpack.c.bf16 %v336_v34, %v335_v33  ;;  %v288_v43 = vunpack.c.l.bf16 %v1410_v30  ;;  %v345_v44 = vmul.f32 %v1369_v11, %v1392_v21 }
  0x17   : > { %v1260_v45 = vpack.c.bf16 %v338_v37, %v337_v36  ;;  %v1265_v46 = vpack.c.bf16 %v340_v39, %v339_v38  ;;  %v365_v47 = vmul.f32 %v1382_v18, %v1392_v21  ;;  %v289_v48 = vunpack.c.l.bf16 %v1417_v35 }
  0x18   : > { %1251 = vst [vmem:[%s246_s29] sm:$0xff] %v1250_v41   ;;  %1287 = vst [vmem:[%s246_s29 + $0x8] sm:$0xff] %v1255_v42   ;;  %v346_v50 = vmul.f32 %v1369_v11, %v288_v43  ;;  %v347_v51 = vmul.f32 %v1369_v11, %v1394_v22  ;;  %v366_v52 = vmul.f32 %v1382_v18, %v1394_v22  ;;  %v290_v53 = vunpack.c.l.bf16 %v1428_v40 }
  0x19   : > { %1288 = vst [vmem:[%s246_s29 + $0x10] sm:$0xff] %v1260_v45   ;;  %1289 = vst [vmem:[%s246_s29 + $0x18] sm:$0xff] %v1265_v46   ;;  %v381_v54 = vrot.slane %v365_v47, 7  ;;  %v348_v55 = vmul.f32 %v1369_v11, %v289_v48  ;;  %v349_v56 = vmul.f32 %v1369_v11, %v1396_v23  ;;  %v367_v57 = vmul.f32 %v1382_v18, %v1396_v23 }
  0x1a   : > { %v382_v59 = vrot.slane %v366_v52, 7  ;;  %v350_v60 = vmul.f32 %v1369_v11, %v290_v53  ;;  %v291_v61 = vunpack.c.l.bf16 %v1437_v49  ;;  %v351_v62 = vmul.f32 %v1369_v11, %v1398_v24 }
  0x1b   : > { %v397_v63 = vadd.f32 %v381_v54, %v345_v44  ;;  %v398_v0 = vadd.f32 %v381_v54, %v346_v50  ;;  %v383_v2 = vrot.slane %v367_v57, 7  ;;  %v368_v3 = vmul.f32 %v1382_v18, %v1398_v24 }
  0x1c   : > { %v399_v4 = vadd.f32 %v382_v59, %v347_v51  ;;  %v400_v5 = vadd.f32 %v382_v59, %v348_v55  ;;  %v352_v7 = vmul.f32 %v1369_v11, %v291_v61  ;;  %v292_v8 = vunpack.c.l.bf16 %v1455_v58 }
  0x1d   : > { %v1215_v9 = vpack.c.bf16 %v397_v63, %v397_v63  ;;  %v1216_v10 = vpack.c.bf16 %v398_v0, %v398_v0  ;;  %v401_v14 = vadd.f32 %v383_v2, %v349_v56  ;;  %v402_v16 = vadd.f32 %v383_v2, %v350_v60  ;;  %v1472_v60 = vld [vmem:[%s1365_s25 + $0x2c] sm:$0x1] }
  0x1e   : > { %v1217_v17 = vpack.c.bf16 %v399_v4, %v399_v4  ;;  %v1218_v25 = vpack.c.bf16 %v400_v5, %v400_v5  ;;  %v384_v31 = vrot.slane %v368_v3, 7  ;;  %v353_v32 = vmul.f32 %v1369_v11, %v1401_v26 }
  0x1f   : > { %v673_v33 = vshrl.u32 %v1215_v9, 16  ;;  %v676_v34 = vshll.u32 %v1215_v9, 16  ;;  %v682_v36 = vshll.u32 %v1216_v10, 16  ;;  %v1219_v37 = vpack.c.bf16 %v401_v14, %v401_v14 }
  0x20   : > { %v687_v38 = vshrl.u32 %v1217_v17, 16  ;;  %v690_v39 = vshll.u32 %v1217_v17, 16  ;;  %v696_v41 = vshll.u32 %v1218_v25, 16  ;;  %v1220_v42 = vpack.c.bf16 %v402_v16, %v402_v16 }
  0x21   : > { %v675_v44 = vrot.slane %v673_v33, 4  ;;  %v678_v45 = vrot.slane %v676_v34, 5  ;;  %v684_v46 = vrot.slane %v682_v36, 5  ;;  %v701_v47 = vshrl.u32 %v1219_v37, 16 }
  0x22   : > { %v689_v50 = vrot.slane %v687_v38, 4  ;;  %v692_v51 = vrot.slane %v690_v39, 5  ;;  %v698_v52 = vrot.slane %v696_v41, 5  ;;  %v704_v54 = vshll.u32 %v1219_v37, 16  ;;  %v1500_v41 = vld [vmem:[%s1365_s25 + $0x34] sm:$0x1] }
  0x23   : > { %v679_v55 = vor.u32 %v678_v45, %v675_v44  ;;  %v703_v56 = vrot.slane %v701_v47, 4  ;;  %v710_v57 = vshll.u32 %v1220_v42, 16  ;;  %v403_v59 = vadd.f32 %v384_v31, %v351_v62  ;;  %v1504_v47 = vld [vmem:[%s1365_s25 + $0x3c] sm:$0x1] }
  0x24   : > { %v693_v0 = vor.u32 %v692_v51, %v689_v50  ;;  %v706_v2 = vrot.slane %v704_v54, 5  ;;  %v404_v3 = vadd.f32 %v384_v31, %v352_v7  ;;  %v354_v4 = vmul.f32 %v1369_v11, %v292_v8 }
  0x25   : > { %v680_v62 = vrot.slane %v679_v55, 4  ;;  %v712_v5 = vrot.slane %v710_v57, 5  ;;  %v1221_v9 = vpack.c.bf16 %v403_v59, %v403_v59  ;;  %v369_v10 = vmul.f32 %v1382_v18, %v1401_v26 }
  0x26   : > { %v694_v14 = vrot.slane %v693_v0, 4  ;;  %v707_v7 = vor.u32 %v706_v2, %v703_v56  ;;  %v1222_v16 = vpack.c.bf16 %v404_v3, %v404_v3  ;;  %v293_v17 = vunpack.c.l.bf16 %v1472_v60 }
  0x27   : > { %v685_v25 = vsel %vm1476_vm2, %v680_v62, %v684_v46  ;;  %v715_v31 = vshrl.u32 %v1221_v9, 16  ;;  %v718_v33 = vshll.u32 %v1221_v9, 16  ;;  %v385_v34 = vrot.slane %v369_v10, 7 }
  0x28   : > { %792 = vst [vmem:[%s1487_s7] sm:$0xf] %v685_v25  ;;  %v699_v36 = vsel %vm1476_vm2, %v694_v14, %v698_v52  ;;  %v708_v37 = vrot.slane %v707_v7, 4  ;;  %v724_v38 = vshll.u32 %v1222_v16, 16  ;;  %v355_v39 = vmul.f32 %v1369_v11, %v1403_v27 }
  0x29   : > { %793 = vst [vmem:[%s1487_s7 + $0x4] sm:$0xf] %v699_v36  ;;  %v717_v42 = vrot.slane %v715_v31, 4  ;;  %v720_v44 = vrot.slane %v718_v33, 5  ;;  %v405_v45 = vadd.f32 %v385_v34, %v353_v32  ;;  %v406_v46 = vadd.f32 %v385_v34, %v354_v4 }
  0x2a   : > { %v713_v50 = vsel %vm1476_vm2, %v708_v37, %v712_v5  ;;  %v726_v51 = vrot.slane %v724_v38, 5  ;;  %v356_v52 = vmul.f32 %v1369_v11, %v293_v17  ;;  %v370_v54 = vmul.f32 %v1382_v18, %v1403_v27 }
  0x2b   : > { %794 = vst [vmem:[%s1487_s7 + $0x8] sm:$0xf] %v713_v50  ;;  %v721_v55 = vor.u32 %v720_v44, %v717_v42  ;;  %v1223_v56 = vpack.c.bf16 %v405_v45, %v405_v45  ;;  %v1224_v57 = vpack.c.bf16 %v406_v46, %v406_v46  ;;  %v294_v32 = vunpack.c.l.bf16 %v1500_v41  ;;  %v1160_v44 = vld [vmem:[%s1365_s25 + $0x8] ss:$8 sps:$4 sm:$0xff]  }
  0x2c   : > { %v386_v59 = vrot.slane %v370_v54, 7  ;;  %v357_v0 = vmul.f32 %v1369_v11, %v1405_v28  ;;  %v371_v2 = vmul.f32 %v1382_v18, %v1405_v28  ;;  %v295_v3 = vunpack.c.l.bf16 %v1504_v47 }
  0x2d   : > { %v722_v4 = vrot.slane %v721_v55, 4  ;;  %v729_v62 = vshrl.u32 %v1223_v56, 16  ;;  %v732_v5 = vshll.u32 %v1223_v56, 16  ;;  %v738_v9 = vshll.u32 %v1224_v57, 16 }
  0x2e   : > { %v407_v10 = vadd.f32 %v386_v59, %v355_v39  ;;  %v408_v14 = vadd.f32 %v386_v59, %v356_v52  ;;  %v358_v7 = vmul.f32 %v1369_v11, %v294_v32  ;;  %v387_v16 = vrot.slane %v371_v2, 7 }
  0x2f   : > { %v727_v25 = vsel %vm1476_vm2, %v722_v4, %v726_v51  ;;  %v731_v31 = vrot.slane %v729_v62, 4  ;;  %v734_v33 = vrot.slane %v732_v5, 5  ;;  %v740_v34 = vrot.slane %v738_v9, 5 }
  0x30   : > { %795 = vst [vmem:[%s1487_s7 + $0xc] sm:$0xf] %v727_v25  ;;  %v1225_v36 = vpack.c.bf16 %v407_v10, %v407_v10  ;;  %v1226_v37 = vpack.c.bf16 %v408_v14, %v408_v14  ;;  %v409_v38 = vadd.f32 %v387_v16, %v357_v0  ;;  %v410_v42 = vadd.f32 %v387_v16, %v358_v7 }
  0x31   : > { %v735_v45 = vor.u32 %v734_v33, %v731_v31  ;;  %v359_v39 = vmul.f32 %v1369_v11, %v1407_v29  ;;  %v360_v46 = vmul.f32 %v1369_v11, %v295_v3  ;;  %v372_v50 = vmul.f32 %v1382_v18, %v1407_v29 }
  0x32   : > { %v743_v51 = vshrl.u32 %v1225_v36, 16  ;;  %v746_v52 = vshll.u32 %v1225_v36, 16  ;;  %v752_v54 = vshll.u32 %v1226_v37, 16  ;;  %v1227_v55 = vpack.c.bf16 %v409_v38, %v409_v38 }
  0x33   : > { %v736_v56 = vrot.slane %v735_v45, 4  ;;  %v1228_v57 = vpack.c.bf16 %v410_v42, %v410_v42  ;;  %v388_v59 = vrot.slane %v372_v50, 7  ;;  %v1534_v0 = vunpack.c.l.bf16 %v1160_v44 }
  0x34   : > { %v745_v2 = vrot.slane %v743_v51, 4  ;;  %v748_v4 = vrot.slane %v746_v52, 5  ;;  %v754_v62 = vrot.slane %v752_v54, 5  ;;  %v757_v5 = vshrl.u32 %v1227_v55, 16  ;;  %v1162_v51 = vld [vmem:[%s1365_s25 + $0x18] ss:$8 sps:$4 sm:$0xff]  }
  0x35   : > { %v741_v11 = vsel %vm1476_vm2, %v736_v56, %v740_v34  ;;  %v760_v9 = vshll.u32 %v1227_v55, 16  ;;  %v766_v10 = vshll.u32 %v1228_v57, 16  ;;  %v411_v18 = vadd.f32 %v388_v59, %v359_v39 }
  0x36   : > { %796 = vst [vmem:[%s1487_s7 + $0x10] sm:$0xf] %v741_v11  ;;  %v749_v14 = vor.u32 %v748_v4, %v745_v2  ;;  %v759_v7 = vrot.slane %v757_v5, 4  ;;  %v412_v16 = vadd.f32 %v388_v59, %v360_v46  ;;  %v1539_v25 = vunpack.c.h.bf16 %v1160_v44 }
  0x37   : > { %v762_v31 = vrot.slane %v760_v9, 5  ;;  %v768_v33 = vrot.slane %v766_v10, 5  ;;  %v1229_v36 = vpack.c.bf16 %v411_v18, %v411_v18  ;;  %v417_v37 = vmul.f32 %v1385_v19, %v1534_v0 }
  0x38   : > { %v750_v38 = vrot.slane %v749_v14, 4  ;;  %v1230_v42 = vpack.c.bf16 %v412_v16, %v412_v16  ;;  %v418_v34 = vmul.f32 %v1385_v19, %v1539_v25  ;;  %v429_v45 = vmul.f32 %v1388_v20, %v1392_v21 }
  0x39   : > { %v763_v39 = vor.u32 %v762_v31, %v759_v7  ;;  %v771_v46 = vshrl.u32 %v1229_v36, 16  ;;  %v774_v44 = vshll.u32 %v1229_v36, 16  ;;  %v430_v50 = vmul.f32 %v1388_v20, %v1394_v22 }
  0x3a   : > { %v755_v52 = vsel %vm1476_vm2, %v750_v38, %v754_v62  ;;  %v780_v54 = vshll.u32 %v1230_v42, 16  ;;  %v437_v55 = vadd.f32 %v429_v45, %v417_v37  ;;  %v1555_v56 = vrot.slane %v1357_v6, %v467_v13  ;;  %v1164_v13 = vld [vmem:[%s1365_s25 + $0x28] ss:$8 sps:$4 sm:$0xff]   ;;  %v1166_v42 = vld [vmem:[%s1365_s25 + $0x38] ss:$8 sps:$4 sm:$0xff]  }
  0x3b   : > { %797 = vst [vmem:[%s1487_s7 + $0x14] sm:$0xf] %v755_v52  ;;  %v764_v57 = vrot.slane %v763_v39, 4  ;;  %v773_v59 = vrot.slane %v771_v46, 4  ;;  %v776_v2 = vrot.slane %v774_v44, 5  ;;  %v438_v4 = vadd.f32 %v430_v50, %v418_v34 }
  0x3c   : > { %v782_v5 = vrot.slane %v780_v54, 5  ;;  %v449_v62 = vmul.f32 %v1372_v12, %v1534_v0  ;;  %v1566_v1 = vunpack.c.l.bf16 %v1162_v51  ;;  %v1568_v6 = vunpack.c.h.bf16 %v1162_v51 }
  0x3d   : > { %v769_v11 = vsel %vm1476_vm2, %v764_v57, %v768_v33  ;;  %v777_v9 = vor.u32 %v776_v2, %v773_v59  ;;  %v1270_v10 = vpack.c.bf16 %v438_v4, %v437_v55  ;;  %v431_v18 = vmul.f32 %v1388_v20, %v1396_v23  ;;  %v1168_v2 = vld [vmem:[%s1365_s25 + $0xc] sm:$0x1] }
  0x3e   : > { %798 = vst [vmem:[%s1487_s7 + $0x18] sm:$0xf] %v769_v11  ;;  %v1578_v14 = vmul.f32 %v1372_v12, %v1539_v25  ;;  %v419_v7 = vmul.f32 %v1385_v19, %v1566_v1  ;;  %v420_v16 = vmul.f32 %v1385_v19, %v1568_v6  ;;  %v432_v31 = vmul.f32 %v1388_v20, %v1398_v24 }
  0x3f   : > { %v778_v33 = vrot.slane %v777_v9, 4  ;;  %1271 = vst [vmem:[%s1562_s10] sm:$0xff] %v1270_v10   ;;  %v1589_v36 = vmul.f32 %v1372_v12, %v1566_v1  ;;  %v1591_v37 = vunpack.c.l.bf16 %v1164_v13  ;;  %v1593_v38 = vunpack.c.h.bf16 %v1164_v13  ;;  %v1627_v9 = vld [vmem:[%s1773_s1 + $0x8] ss:$0 sm:$0xff] }
  0x40   : > { %v439_v34 = vadd.f32 %v431_v18, %v419_v7  ;;  %v440_v45 = vadd.f32 %v432_v31, %v420_v16  ;;  %v433_v39 = vmul.f32 %v1388_v20, %v1401_v26  ;;  %v434_v46 = vmul.f32 %v1388_v20, %v1403_v27  ;;  %v1169_v16 = vld [vmem:[%s1365_s25 + $0x14] sm:$0x1] }
  0x41   : > { %v783_v44 = vsel %vm1476_vm2, %v778_v33, %v782_v5  ;;  %v1604_v50 = vmul.f32 %v1372_v12, %v1568_v6  ;;  %v421_v51 = vmul.f32 %v1385_v19, %v1591_v37  ;;  %v422_v52 = vmul.f32 %v1385_v19, %v1593_v38 }
  0x42   : > { %799 = vst [vmem:[%s1487_s7 + $0x1c] sm:$0xf] %v783_v44  ;;  %v1275_v54 = vpack.c.bf16 %v440_v45, %v439_v34  ;;  %v1613_v55 = vmul.f32 %v1372_v12, %v1591_v37  ;;  %v1615_v57 = vunpack.c.l.bf16 %v1166_v42  ;;  %v1617_v59 = vunpack.c.h.bf16 %v1166_v42 }
  0x43   : > { %v441_v4 = vadd.f32 %v433_v39, %v421_v51  ;;  %v442_v5 = vadd.f32 %v434_v46, %v422_v52  ;;  %v435_v13 = vmul.f32 %v1388_v20, %v1405_v28  ;;  %v436_v11 = vmul.f32 %v1388_v20, %v1407_v29 }
  0x44   : > { %1290 = vst [vmem:[%s1562_s10 + $0x8] sm:$0xff] %v1275_v54   ;;  %v1632_v10 = vmul.f32 %v1372_v12, %v1593_v38  ;;  %v423_v18 = vmul.f32 %v1385_v19, %v1615_v57  ;;  %v424_v7 = vmul.f32 %v1385_v19, %v1617_v59  ;;  %v1640_v20 = vmul.f32 %v1372_v12, %v1615_v57  ;;  %v1170_v54 = vld [vmem:[%s1365_s25 + $0x1c] sm:$0x1] }
  0x45   : > { %v1280_v31 = vpack.c.bf16 %v442_v5, %v441_v4  ;;  %v321_v33 = vunpack.c.l.bf16 %v1168_v2  ;;  %v469_v42 = vmul.f32 %v1555_v56, %v1534_v0  ;;  %v521_v34 = vmul.f32 %v1377_v15, %v1392_v21 }
  0x46   : > { %v443_v45 = vadd.f32 %v435_v13, %v423_v18  ;;  %v444_v39 = vadd.f32 %v436_v11, %v424_v7  ;;  %v522_v19 = vmul.f32 %v1377_v15, %v288_v43  ;;  %v557_v46 = vmul.f32 %v1627_v9, %v1392_v21 }
  0x47   : > { %1291 = vst [vmem:[%s1562_s10 + $0x10] sm:$0xff] %v1280_v31   ;;  %v450_v44 = vmul.f32 %v1372_v12, %v321_v33  ;;  %v485_v51 = vrot.slane %v469_v42, 7  ;;  %v322_v52 = vunpack.c.l.bf16 %v1169_v16  ;;  %v470_v0 = vmul.f32 %v1555_v56, %v1539_v25  ;;  %v1171_v33 = vld [vmem:[%s1365_s25 + $0x24] sm:$0x1] }
  0x48   : > { %v1285_v2 = vpack.c.bf16 %v444_v39, %v443_v45  ;;  %v573_v4 = vrot.slane %v557_v46, 7  ;;  %v523_v30 = vmul.f32 %v1377_v15, %v1394_v22  ;;  %v524_v43 = vmul.f32 %v1377_v15, %v289_v48 }
  0x49   : > { %v501_v21 = vadd.f32 %v485_v51, %v449_v62  ;;  %v502_v5 = vadd.f32 %v485_v51, %v450_v44  ;;  %v452_v13 = vmul.f32 %v1372_v12, %v322_v52  ;;  %v486_v11 = vrot.slane %v470_v0, 7 }
  0x4a   : > { %1292 = vst [vmem:[%s1562_s10 + $0x18] sm:$0xff] %v1285_v2   ;;  %v558_v25 = vmul.f32 %v1627_v9, %v1394_v22  ;;  %v323_v18 = vunpack.c.l.bf16 %v1170_v54  ;;  %v471_v7 = vmul.f32 %v1555_v56, %v1566_v1  ;;  %v525_v16 = vmul.f32 %v1377_v15, %v1396_v23 }
  0x4b   : > { %v537_v31 = vadd.f32 %v521_v34, %v501_v21  ;;  %v538_v35 = vadd.f32 %v522_v19, %v502_v5  ;;  %v503_v48 = vadd.f32 %v486_v11, %v1578_v14  ;;  %v504_v62 = vadd.f32 %v486_v11, %v452_v13 }
  0x4c   : > { %v574_v42 = vrot.slane %v558_v25, 7  ;;  %v454_v45 = vmul.f32 %v1372_v12, %v323_v18  ;;  %v487_v39 = vrot.slane %v471_v7, 7  ;;  %v526_v22 = vmul.f32 %v1377_v15, %v290_v53 }
  0x4d   : > { %v589_v46 = vadd.f32 %v573_v4, %v537_v31  ;;  %v590_v44 = vadd.f32 %v573_v4, %v538_v35  ;;  %v539_v1 = vadd.f32 %v523_v30, %v503_v48  ;;  %v540_v51 = vadd.f32 %v524_v43, %v504_v62 }
  0x4e   : > { %v505_v52 = vadd.f32 %v487_v39, %v1589_v36  ;;  %v506_v34 = vadd.f32 %v487_v39, %v454_v45  ;;  %v559_v14 = vmul.f32 %v1627_v9, %v1396_v23  ;;  %v324_v19 = vunpack.c.l.bf16 %v1171_v33 }
  0x4f   : > { %v1231_v0 = vpack.c.bf16 %v589_v46, %v589_v46  ;;  %v1232_v54 = vpack.c.bf16 %v590_v44, %v590_v44  ;;  %v591_v2 = vadd.f32 %v574_v42, %v539_v1  ;;  %v592_v21 = vadd.f32 %v574_v42, %v540_v51 }
  0x50   : > { %v541_v5 = vadd.f32 %v525_v16, %v505_v52  ;;  %v542_v13 = vadd.f32 %v526_v22, %v506_v34  ;;  %v575_v40 = vrot.slane %v559_v14, 7  ;;  %v456_v53 = vmul.f32 %v1372_v12, %v324_v19 }
  0x51   : > { %v865_v11 = vshrl.u32 %v1231_v0, 16  ;;  %v868_v4 = vshll.u32 %v1231_v0, 16  ;;  %v874_v30 = vshll.u32 %v1232_v54, 16  ;;  %v1233_v43 = vpack.c.bf16 %v591_v2, %v591_v2  ;;  %v1172_v0 = vld [vmem:[%s1365_s25 + $0x2c] sm:$0x1] }
  0x52   : > { %v1234_v25 = vpack.c.bf16 %v592_v21, %v592_v21  ;;  %v593_v36 = vadd.f32 %v575_v40, %v541_v5  ;;  %v594_v18 = vadd.f32 %v575_v40, %v542_v13  ;;  %v472_v23 = vmul.f32 %v1555_v56, %v1568_v6 }
  0x53   : > { %v867_v7 = vrot.slane %v865_v11, 4  ;;  %v870_v31 = vrot.slane %v868_v4, 5  ;;  %v876_v35 = vrot.slane %v874_v30, 5  ;;  %v879_v48 = vshrl.u32 %v1233_v43, 16 }
  0x54   : > { %v882_v16 = vshll.u32 %v1233_v43, 16  ;;  %v888_v62 = vshll.u32 %v1234_v25, 16  ;;  %v1235_v33 = vpack.c.bf16 %v593_v36, %v593_v36  ;;  %v1236_v42 = vpack.c.bf16 %v594_v18, %v594_v18  ;;  %v1173_v25 = vld [vmem:[%s1365_s25 + $0x34] sm:$0x1] }
  0x55   : > { %v871_v45 = vor.u32 %v870_v31, %v867_v7  ;;  %v881_v39 = vrot.slane %v879_v48, 4  ;;  %v488_v22 = vrot.slane %v472_v23, 7  ;;  %v527_v46 = vmul.f32 %v1377_v15, %v1398_v24 }
  0x56   : > { %v884_v44 = vrot.slane %v882_v16, 5  ;;  %v890_v1 = vrot.slane %v888_v62, 5  ;;  %v893_v51 = vshrl.u32 %v1235_v33, 16  ;;  %v896_v6 = vshll.u32 %v1235_v33, 16 }
  0x57   : > { %v872_v52 = vrot.slane %v871_v45, 4  ;;  %v902_v34 = vshll.u32 %v1236_v42, 16  ;;  %v507_v14 = vadd.f32 %v488_v22, %v1604_v50  ;;  %v508_v19 = vadd.f32 %v488_v22, %v456_v53 }
  0x58   : > { %v885_v54 = vor.u32 %v884_v44, %v881_v39  ;;  %v895_v2 = vrot.slane %v893_v51, 4  ;;  %v898_v21 = vrot.slane %v896_v6, 5  ;;  %v528_v5 = vmul.f32 %v1377_v15, %v291_v61 }
  0x59   : > { %v877_v13 = vsel %vm1476_vm2, %v872_v52, %v876_v35  ;;  %v904_v40 = vrot.slane %v902_v34, 5  ;;  %v543_v11 = vadd.f32 %v527_v46, %v507_v14  ;;  %v560_v4 = vmul.f32 %v1627_v9, %v1398_v24  ;;  %v1174_v34 = vld [vmem:[%s1365_s25 + $0x3c] sm:$0x1] }
  0x5a   : > { %984 = vst [vmem:[%s1688_s15] sm:$0xf] %v877_v13  ;;  %v886_v50 = vrot.slane %v885_v54, 4  ;;  %v899_v53 = vor.u32 %v898_v21, %v895_v2  ;;  %v544_v30 = vadd.f32 %v528_v5, %v508_v19  ;;  %v325_v43 = vunpack.c.l.bf16 %v1172_v0 }
  0x5b   : > { %v576_v36 = vrot.slane %v560_v4, 7  ;;  %v473_v49 = vmul.f32 %v1555_v56, %v1591_v37  ;;  %v529_v61 = vmul.f32 %v1377_v15, %v1401_v26  ;;  %v530_v18 = vmul.f32 %v1377_v15, %v292_v8 }
  0x5c   : > { %v891_v24 = vsel %vm1476_vm2, %v886_v50, %v890_v1  ;;  %v900_v23 = vrot.slane %v899_v53, 4  ;;  %v458_v7 = vmul.f32 %v1372_v12, %v325_v43  ;;  %v561_v31 = vmul.f32 %v1627_v9, %v1401_v26 }
  0x5d   : > { %985 = vst [vmem:[%s1688_s15 + $0x4] sm:$0xf] %v891_v24  ;;  %v595_v35 = vadd.f32 %v576_v36, %v543_v11  ;;  %v596_v37 = vadd.f32 %v576_v36, %v544_v30  ;;  %v489_v48 = vrot.slane %v473_v49, 7  ;;  %v326_v16 = vunpack.c.l.bf16 %v1173_v25 }
  0x5e   : > { %v905_v62 = vsel %vm1476_vm2, %v900_v23, %v904_v40  ;;  %v577_v58 = vrot.slane %v561_v31, 7  ;;  %v474_v8 = vmul.f32 %v1555_v56, %v1593_v38  ;;  %v531_v33 = vmul.f32 %v1377_v15, %v1403_v27 }
  0x5f   : > { %986 = vst [vmem:[%s1688_s15 + $0x8] sm:$0xf] %v905_v62  ;;  %v1237_v42 = vpack.c.bf16 %v595_v35, %v595_v35  ;;  %v1238_v45 = vpack.c.bf16 %v596_v37, %v596_v37  ;;  %v509_v26 = vadd.f32 %v489_v48, %v1613_v55  ;;  %v510_v39 = vadd.f32 %v489_v48, %v458_v7  ;;  %v1175_v48 = vld [vmem:[%s1365_s25 + $0x44] sm:$0x1] }
  0x60   : > { %v460_v22 = vmul.f32 %v1372_v12, %v326_v16  ;;  %v490_v46 = vrot.slane %v474_v8, 7  ;;  %v532_v44 = vmul.f32 %v1377_v15, %v293_v17  ;;  %v562_v1 = vmul.f32 %v1627_v9, %v1403_v27 }
  0x61   : > { %v907_v38 = vshrl.u32 %v1237_v42, 16  ;;  %v910_v51 = vshll.u32 %v1237_v42, 16  ;;  %v916_v6 = vshll.u32 %v1238_v45, 16  ;;  %v545_v52 = vadd.f32 %v529_v61, %v509_v26 }
  0x62   : > { %v546_v14 = vadd.f32 %v530_v18, %v510_v39  ;;  %v511_v19 = vadd.f32 %v490_v46, %v1632_v10  ;;  %v512_v55 = vadd.f32 %v490_v46, %v460_v22  ;;  %v578_v0 = vrot.slane %v562_v1, 7 }
  0x63   : > { %v909_v54 = vrot.slane %v907_v38, 4  ;;  %v912_v2 = vrot.slane %v910_v51, 5  ;;  %v918_v21 = vrot.slane %v916_v6, 5  ;;  %v597_v5 = vadd.f32 %v577_v58, %v545_v52 }
  0x64   : > { %v598_v60 = vadd.f32 %v577_v58, %v546_v14  ;;  %v547_v13 = vadd.f32 %v531_v33, %v511_v19  ;;  %v548_v17 = vadd.f32 %v532_v44, %v512_v55  ;;  %v327_v40 = vunpack.c.l.bf16 %v1174_v34 }
  0x65   : > { %v913_v11 = vor.u32 %v912_v2, %v909_v54  ;;  %v1239_v27 = vpack.c.bf16 %v597_v5, %v597_v5  ;;  %v475_v4 = vmul.f32 %v1555_v56, %v1615_v57  ;;  %v533_v50 = vmul.f32 %v1377_v15, %v1405_v28 }
  0x66   : > { %v1240_v53 = vpack.c.bf16 %v598_v60, %v598_v60  ;;  %v599_v10 = vadd.f32 %v578_v0, %v547_v13  ;;  %v600_v30 = vadd.f32 %v578_v0, %v548_v17  ;;  %v462_v43 = vmul.f32 %v1372_v12, %v327_v40 }
  0x67   : > { %v914_v25 = vrot.slane %v913_v11, 4  ;;  %v921_v36 = vshrl.u32 %v1239_v27, 16  ;;  %v924_v49 = vshll.u32 %v1239_v27, 16  ;;  %v491_v61 = vrot.slane %v475_v4, 7 }
  0x68   : > { %v930_v18 = vshll.u32 %v1240_v53, 16  ;;  %v1241_v24 = vpack.c.bf16 %v599_v10, %v599_v10  ;;  %v1242_v23 = vpack.c.bf16 %v600_v30, %v600_v30  ;;  %v534_v57 = vmul.f32 %v1377_v15, %v294_v32 }
  0x69   : > { %v919_v7 = vsel %vm1476_vm2, %v914_v25, %v918_v21  ;;  %v923_v31 = vrot.slane %v921_v36, 4  ;;  %v926_v35 = vrot.slane %v924_v49, 5  ;;  %v513_v37 = vadd.f32 %v491_v61, %v1640_v20 }
  0x6a   : > { %987 = vst [vmem:[%s1688_s15 + $0xc] sm:$0xf] %v919_v7  ;;  %v932_v16 = vrot.slane %v930_v18, 5  ;;  %v935_v62 = vshrl.u32 %v1241_v24, 16  ;;  %v938_v58 = vshll.u32 %v1241_v24, 16  ;;  %v944_v8 = vshll.u32 %v1242_v23, 16 }
  0x6b   : > { %v927_v33 = vor.u32 %v926_v35, %v923_v31  ;;  %v514_v42 = vadd.f32 %v491_v61, %v462_v43  ;;  %v549_v45 = vadd.f32 %v533_v50, %v513_v37  ;;  %v563_v41 = vmul.f32 %v1627_v9, %v1405_v28 }
  0x6c   : > { %v463_v32 = vmul.f32 %v1372_v12, %v1617_v59  ;;  %v937_v26 = vrot.slane %v935_v62, 4  ;;  %v940_v39 = vrot.slane %v938_v58, 5  ;;  %v328_v22 = vunpack.c.l.bf16 %v1175_v48 }
  0x6d   : > { %v928_v20 = vrot.slane %v927_v33, 4  ;;  %v550_v46 = vadd.f32 %v534_v57, %v514_v42  ;;  %v579_v44 = vrot.slane %v563_v41, 7  ;;  %v476_v1 = vmul.f32 %v1555_v56, %v1617_v59 }
  0x6e   : > { %v941_v38 = vor.u32 %v940_v39, %v937_v26  ;;  %v946_v51 = vrot.slane %v944_v8, 5  ;;  %v464_v6 = vmul.f32 %v1372_v12, %v328_v22  ;;  %v535_v28 = vmul.f32 %v1377_v15, %v1407_v29 }
  0x6f   : > { %v933_v52 = vsel %vm1476_vm2, %v928_v20, %v932_v16  ;;  %v601_v34 = vadd.f32 %v579_v44, %v549_v45  ;;  %v602_v14 = vadd.f32 %v579_v44, %v550_v46  ;;  %v492_v19 = vrot.slane %v476_v1, 7 }
  0x70   : > { %988 = vst [vmem:[%s1688_s15 + $0x10] sm:$0xf] %v933_v52  ;;  %v942_v55 = vrot.slane %v941_v38, 4  ;;  %v536_v56 = vmul.f32 %v1377_v15, %v295_v3  ;;  %v564_v59 = vmul.f32 %v1627_v9, %v1407_v29 }
  0x71   : > { %v1243_v12 = vpack.c.bf16 %v601_v34, %v601_v34  ;;  %v1244_v0 = vpack.c.bf16 %v602_v14, %v602_v14  ;;  %v515_v54 = vadd.f32 %v492_v19, %v463_v32  ;;  %v516_v2 = vadd.f32 %v492_v19, %v464_v6 }
  0x72   : > { %v947_v21 = vsel %vm1476_vm2, %v942_v55, %v946_v51  ;;  %v580_v5 = vrot.slane %v564_v59, 7 }
  0x73   : > { %989 = vst [vmem:[%s1688_s15 + $0x14] sm:$0xf] %v947_v21  ;;  %v949_v60 = vshrl.u32 %v1243_v12, 16  ;;  %v952_v13 = vshll.u32 %v1243_v12, 16  ;;  %v958_v17 = vshll.u32 %v1244_v0, 16  ;;  %v551_v40 = vadd.f32 %v535_v28, %v515_v54 }
  0x74   : > { %v552_v11 = vadd.f32 %v536_v56, %v516_v2 }
  0x75   : > { %v951_v47 = vrot.slane %v949_v60, 4  ;;  %v954_v15 = vrot.slane %v952_v13, 5  ;;  %v603_v3 = vadd.f32 %v580_v5, %v551_v40  ;;  %v960_v9 = vrot.slane %v958_v17, 5 }
  0x76   : > { %v604_v27 = vadd.f32 %v580_v5, %v552_v11 }
  0x77   : > { %v955_v29 = vor.u32 %v954_v15, %v951_v47  ;;  %v1245_v4 = vpack.c.bf16 %v603_v3, %v603_v3 }
  0x78   : > { %v1246_v50 = vpack.c.bf16 %v604_v27, %v604_v27 }
  0x79   : > { %v956_v53 = vrot.slane %v955_v29, 4  ;;  %v963_v10 = vshrl.u32 %v1245_v4, 16  ;;  %v966_v30 = vshll.u32 %v1245_v4, 16 }
  0x7a   : > { %v972_v43 = vshll.u32 %v1246_v50, 16 }
  0x7b   : > { %v961_v25 = vsel %vm1476_vm2, %v956_v53, %v960_v9  ;;  %v965_v36 = vrot.slane %v963_v10, 4  ;;  %v968_v49 = vrot.slane %v966_v30, 5 }
  0x7c   : > { %990 = vst [vmem:[%s1688_s15 + $0x18] sm:$0xf] %v961_v25  ;;  %v974_v18 = vrot.slane %v972_v43, 5 }
  0x7d   : > { %v969_v61 = vor.u32 %v968_v49, %v965_v36 }
  0x7f   : > { %v970_v24 = vrot.slane %v969_v61, 4 }
  0x81   : > { %v975_v23 = vsel %vm1476_vm2, %v970_v24, %v974_v18 }
  0x82   : > { %991 = vst [vmem:[%s1688_s15 + $0x1c] sm:$0xf] %v975_v23 }
  0x83 PF: > { %s16_s18 = sadd.s32 1, %s1308_s18  }
  0x84   : > { %p13_p4 = scmp.ge.s32.totalorder %s16_s18, 4  }
  0x86   :  { %15 = sbr.rel (!%p13_p4) target bundleno = 1 (0x1), region = 95 }

// kernel: basic_layer_up_forward.45
= control target key start
LH: loop header
LB: loop body
LE: loop exit
PB: predicated region body
PF: predicated region fallthrough
CT: control target
= control target key end

     0   :  { %s1565_s18 = smov 0   ;;  %s1567_s19 = smov 0   ;;  %s2176_s0 = inlined_call_operand.vmem [shape: bf16[512,128], index: 0, kind: input, shape index: {}]   ;;  %s2177_s1 = inlined_call_operand.vmem [shape: bf16[128,128], index: 1, kind: input, shape index: {}]   ;;  %s2178_s2 = inlined_call_operand.vmem [shape: f32[1,128], index: 2, kind: input, shape index: {}]   ;;  %s2179_s3 = inlined_call_operand.vmem [shape: f32[1,128], index: 3, kind: input, shape index: {}]   ;;  %s2180_s4 = inlined_call_operand.vmem [shape: f32[1,128], index: 4, kind: input, shape index: {}]   ;;  %s2181_s5 = inlined_call_operand.vmem [shape: f32[512,128], index: 5, kind: output, shape index: {}]  }
   0x1   :  { %s1569_s20 = smov 0  }
   0x2 LB: > { %s24_s21 = sadd.s32 1, %s1529_s19  ;;  %p1277_p0 = scmp.ge.s32.totalorder %s1533_s20, 1  ;;  %s1533_s20 = sphi %s1569_s20, %s15_s20   ;;  %s1529_s19 = sphi %s1567_s19, %s2183_s19   ;;  %s1525_s18 = sphi %s1565_s18, %s2182_s18  }
   0x3   : > { %p25_p1 = scmp.ge.s32.totalorder %s24_s21, 2  ;;  %p219_p2 = scmp.lt.s32.totalorder %s1533_s20, 3 }
   0x5   : > { %s2185_s21 = smov (%p25_p1, %s24_s21), 0  ;;  %p220_p3 = pnand %p1277_p0, %p219_p2 }
   0x6   : > { %v1423_v0 = vld [vmem:[%s2177_s1] sm:$0xff] (!%p220_p3)   ;;  %s1278_s24 = sshll.u32 (!%p220_p3), %s1525_s18, 5  ;;  %v1424_v1 = vld [vmem:[%s2177_s1 + $0x8] sm:$0xff] (!%p220_p3)   ;;  %v1425_v2 = vld [vmem:[%s2177_s1 + $0x10] sm:$0xff] (!%p220_p3)   ;;  %v640_v24 = vlaneseq (!%p220_p3) }
   0x7   : > { %223 = sbr.rel (%p220_p3) target bundleno = 631 (0x277), region = 40  ;;  %p258_p4 = scmp.lt.s32.totalorder (!%p220_p3), %s1278_s24, 63  ;;  %1335 = vmatprep.subr.bf16.mxu0 (!%p220_p3), %v1423_v0  ;;  %1383 = vmatprep.subr.bf16.mxu1 (!%p220_p3), %v1423_v0  ;;  %v1426_v3 = vld [vmem:[%s2177_s1 + $0x18] sm:$0xff] (!%p220_p3)   ;;  %v1427_v6 = vld [vmem:[%s2177_s1 + $0x20] sm:$0xff] (!%p220_p3)   ;;  %v1428_v7 = vld [vmem:[%s2177_s1 + $0x28] sm:$0xff] (!%p220_p3)  }
   0x8   : > { %1336 = vmatpush3.bf16.msra.mxu0 (!%p220_p3), %v1423_v0  ;;  %1391 = vmatpush3.bf16.msra.mxu1 (!%p220_p3), %v1423_v0  ;;  %v1429_v8 = vld [vmem:[%s2177_s1 + $0x30] sm:$0xff] (!%p220_p3)   ;;  %v1430_v9 = vld [vmem:[%s2177_s1 + $0x38] sm:$0xff] (!%p220_p3)   ;;  %v1631_v25 = vand.u32 (!%p220_p3), 127, %v640_v24  ;;  %v1636_v26 = vld [vmem:[%s2178_s2] ss:$0 sm:$0xff] (!%p220_p3) }
   0x9   : > { %1337 = vmatprep.subr.bf16.mxu0 (!%p220_p3), %v1424_v1  ;;  %1384 = vmatprep.subr.bf16.mxu1 (!%p220_p3), %v1424_v1 }
   0xa   : > { %vm642_vm0 = vcmp.lt.s32.totalorder (!%p220_p3), %v1631_v25, 16 }
   0xc   : > { %1338 = vmatpush3.bf16.msra.mxu0 (!%p220_p3), %v1424_v1  ;;  %1392 = vmatpush3.bf16.msra.mxu1 (!%p220_p3), %v1424_v1 }
   0xd   : > { %1339 = vmatprep.subr.bf16.mxu0 (!%p220_p3), %v1425_v2  ;;  %1385 = vmatprep.subr.bf16.mxu1 (!%p220_p3), %v1425_v2 }
   0xe   : > { %s2187_s24 = smov (!%p258_p4, %s1278_s24), 63 }
   0xf   : > { %s1279_s29 = sshll.u32 %s2187_s24, 2  ;;  %s1281_s26 = sshll.u32 %s2187_s24, 3 }
  0x10   : > { %s1598_s7 = scalar_lea.vmem %s2176_s0, %s1279_s29  ;;  %1340 = vmatpush3.bf16.msra.mxu0 %v1425_v2  ;;  %1393 = vmatpush3.bf16.msra.mxu1 %v1425_v2  ;;  %s2039_s24 = scalar_lea.vmem %s2181_s5, %s1281_s26 }
  0x11   : > { %v1431_v4 = vld [vmem:[%s1598_s7] sm:$0xff]   ;;  %1341 = vmatprep.subr.bf16.mxu0 %v1426_v3  ;;  %1386 = vmatprep.subr.bf16.mxu1 %v1426_v3  ;;  %v1433_v10 = vld [vmem:[%s1598_s7 + $0x8] sm:$0xff]   ;;  %v1435_v12 = vld [vmem:[%s1598_s7 + $0x10] sm:$0xff]  }
  0x12   : > { %v1432_v5 = vld [vmem:[%s1598_s7 + $0x40] sm:$0xff]   ;;  %1351 = vmatprep.mubr.bf16.mxu0 %v1431_v4  ;;  %v1434_v11 = vld [vmem:[%s1598_s7 + $0x48] sm:$0xff]   ;;  %v1437_v13 = vld [vmem:[%s1598_s7 + $0x50] sm:$0xff]  }
  0x13   : > { %1367 = vmatprep.mubr.bf16.mxu1 %v1432_v5  ;;  %v1436_v14 = vld [vmem:[%s1598_s7 + $0x18] sm:$0xff]   ;;  %v1439_v16 = vld [vmem:[%s1598_s7 + $0x20] sm:$0xff]   ;;  %v1440_v18 = vld [vmem:[%s1598_s7 + $0x28] sm:$0xff]  }
  0x14   : > { %1342 = vmatpush3.bf16.msra.mxu0 %v1426_v3  ;;  %1394 = vmatpush3.bf16.msra.mxu1 %v1426_v3  ;;  %v1438_v15 = vld [vmem:[%s1598_s7 + $0x58] sm:$0xff]   ;;  %v1441_v17 = vld [vmem:[%s1598_s7 + $0x60] sm:$0xff]   ;;  %v1442_v19 = vld [vmem:[%s1598_s7 + $0x68] sm:$0xff]  }
  0x15   : > { %1343 = vmatprep.subr.bf16.mxu0 %v1427_v6  ;;  %1387 = vmatprep.subr.bf16.mxu1 %v1427_v6  ;;  %v1443_v20 = vld [vmem:[%s1598_s7 + $0x30] sm:$0xff]   ;;  %v1444_v22 = vld [vmem:[%s1598_s7 + $0x38] sm:$0xff]  }
  0x16   : > { %v1445_v21 = vld [vmem:[%s1598_s7 + $0x70] sm:$0xff]   ;;  %v1446_v23 = vld [vmem:[%s1598_s7 + $0x78] sm:$0xff]  }
  0x18   : > { %1344 = vmatpush3.bf16.msra.mxu0 %v1427_v6  ;;  %1395 = vmatpush3.bf16.msra.mxu1 %v1427_v6 }
  0x19   : > { %1345 = vmatprep.subr.bf16.mxu0 %v1428_v7  ;;  %1388 = vmatprep.subr.bf16.mxu1 %v1428_v7 }
  0x1c   : > { %1346 = vmatpush3.bf16.msra.mxu0 %v1428_v7  ;;  %1396 = vmatpush3.bf16.msra.mxu1 %v1428_v7 }
  0x1d   : > { %1347 = vmatprep.subr.bf16.mxu0 %v1429_v8  ;;  %1389 = vmatprep.subr.bf16.mxu1 %v1429_v8 }
  0x20   : > { %1348 = vmatpush3.bf16.msra.mxu0 %v1429_v8  ;;  %1397 = vmatpush3.bf16.msra.mxu1 %v1429_v8 }
  0x21   : > { %1349 = vmatprep.subr.bf16.mxu0 %v1430_v9  ;;  %1390 = vmatprep.subr.bf16.mxu1 %v1430_v9 }
  0x24   : > { %1350 = vmatpush3.bf16.msra.mxu0 %v1430_v9  ;;  %1398 = vmatpush3.bf16.msra.mxu1 %v1430_v9 }
  0x27   : > { %1352 = vmatmul.mubr.bf16.vlgmr.msra.gmra.mrb[0].mxu0 %v1433_v10  ;;  %1368 = vmatmul.mubr.bf16.vlgmr.msra.gmra.mrb[0].mxu1 %v1434_v11 }
  0x28   : > { %1355 = vmatprep.mubr.bf16.mxu0 %v1435_v12  ;;  %1371 = vmatprep.mubr.bf16.mxu1 %v1437_v13 }
  0x2f   : > { %1356 = vmatmul.mubr.bf16.gmra.mrb[4].mxu0 %v1436_v14  ;;  %1372 = vmatmul.mubr.bf16.gmra.mrb[4].mxu1 %v1438_v15 }
  0x30   : > { %1359 = vmatprep.mubr.bf16.mxu0 %v1439_v16  ;;  %1375 = vmatprep.mubr.bf16.mxu1 %v1441_v17 }
  0x37   : > { %1360 = vmatmul.mubr.bf16.gmra.mrb[8].mxu0 %v1440_v18  ;;  %1376 = vmatmul.mubr.bf16.gmra.mrb[8].mxu1 %v1442_v19 }
  0x38   : > { %1363 = vmatprep.mubr.bf16.mxu0 %v1443_v20  ;;  %1379 = vmatprep.mubr.bf16.mxu1 %v1445_v21 }
  0x3f   : > { %1364 = vmatmul.mubr.bf16.gmra.mrb[12].mxu0 %v1444_v22  ;;  %1380 = vmatmul.mubr.bf16.gmra.mrb[12].mxu1 %v1446_v23 }
  0xfa   : > { %v1353_v27 = vpop.f32.mrb[0].mxu0  ;;  %v1369_v28 = vpop.f32.mrb[0].mxu1 }
  0xfb   : > { %v1640_v29 = vadd.f32 %v1353_v27, %v1636_v26  ;;  %v1643_v30 = vadd.f32 %v1369_v28, %v1636_v26  ;;  %v513_v31 = vpop.f32.mrb[1].mxu0  ;;  %v577_v32 = vpop.f32.mrb[1].mxu1 }
  0xfc   : > { %v1354_v33 = vpop.f32.mrb[2].mxu0  ;;  %v1370_v34 = vpop.f32.mrb[2].mxu1  ;;  %v1646_v35 = vadd.f32 %v1636_v26, %v513_v31  ;;  %v1658_v41 = vadd.f32 %v1636_v26, %v577_v32 }
  0xfd   : > { %v1649_v36 = vadd.f32 %v1354_v33, %v1636_v26  ;;  %v516_v37 = vpop.f32.mrb[3].mxu0  ;;  %v580_v38 = vpop.f32.mrb[3].mxu1  ;;  %v661_v39 = vsel %vm642_vm0, %v1643_v30, 0.0  ;;  %v645_v40 = vsel %vm642_vm0, %v1640_v29, 0.0  ;;  %v1661_v42 = vadd.f32 %v1370_v34, %v1636_v26 }
  0xfe   : > { %711 = vadd.xlane.f32.xlu0 %v661_v39  ;;  %679 = vadd.xlane.f32.xlu1 %v645_v40  ;;  %v643_v44 = vsel %vm642_vm0, %v1646_v35, 0.0  ;;  %v1670_v51 = vadd.f32 %v1636_v26, %v516_v37  ;;  %v1673_v52 = vadd.f32 %v1636_v26, %v580_v38  ;;  %v659_v54 = vsel %vm642_vm0, %v1658_v41, 0.0 }
  0xff   : > { %v646_v43 = vsel %vm642_vm0, %v1649_v36, 0.0  ;;  %v662_v53 = vsel %vm642_vm0, %v1661_v42, 0.0 }
 0x100   : > { %v660_v59 = vsel %vm642_vm0, %v1673_v52, 0.0  ;;  %v644_v60 = vsel %vm642_vm0, %v1670_v51, 0.0 }
 0x102   : > { %681 = vadd.xlane.f32.xlu1 %v646_v43  ;;  %675 = vadd.xlane.f32.xlu0 %v643_v44  ;;  %v1357_v45 = vpop.f32.mrb[4].mxu0  ;;  %v1373_v46 = vpop.f32.mrb[4].mxu1 }
 0x103   : > { %v529_v47 = vpop.f32.mrb[5].mxu0  ;;  %v593_v48 = vpop.f32.mrb[5].mxu1  ;;  %v1682_v57 = vadd.f32 %v1357_v45, %v1636_v26  ;;  %v1694_v63 = vadd.f32 %v1373_v46, %v1636_v26 }
 0x104   : > { %v1358_v49 = vpop.f32.mrb[6].mxu0  ;;  %v1374_v50 = vpop.f32.mrb[6].mxu1  ;;  %v1712_v11 = vadd.f32 %v1636_v26, %v529_v47  ;;  %v1718_v19 = vadd.f32 %v1636_v26, %v593_v48 }
 0x105   : > { %v532_v55 = vpop.f32.mrb[7].mxu0  ;;  %v596_v56 = vpop.f32.mrb[7].mxu1  ;;  %v1685_v58 = vadd.f32 %v1358_v49, %v1636_v26  ;;  %v1697_v0 = vadd.f32 %v1374_v50, %v1636_v26  ;;  %v649_v2 = vsel %vm642_vm0, %v1682_v57, 0.0  ;;  %v665_v10 = vsel %vm642_vm0, %v1694_v63, 0.0 }
 0x106   : > { %713 = vadd.xlane.f32.xlu1 %v662_v53  ;;  %707 = vadd.xlane.f32.xlu0 %v659_v54  ;;  %v1715_v12 = vadd.f32 %v1636_v26, %v532_v55  ;;  %v1721_v20 = vadd.f32 %v1636_v26, %v596_v56  ;;  %v647_v22 = vsel %vm642_vm0, %v1712_v11, 0.0  ;;  %v663_v32 = vsel %vm642_vm0, %v1718_v19, 0.0 }
 0x107   : > { %v650_v1 = vsel %vm642_vm0, %v1685_v58, 0.0  ;;  %v666_v9 = vsel %vm642_vm0, %v1697_v0, 0.0 }
 0x108   : > { %v648_v21 = vsel %vm642_vm0, %v1715_v12, 0.0  ;;  %v664_v31 = vsel %vm642_vm0, %v1721_v20, 0.0 }
 0x10a   : > { %709 = vadd.xlane.f32.xlu1 %v660_v59  ;;  %677 = vadd.xlane.f32.xlu0 %v644_v60  ;;  %v1361_v61 = vpop.f32.mrb[8].mxu0  ;;  %v1377_v62 = vpop.f32.mrb[8].mxu1 }
 0x10b   : > { %v545_v3 = vpop.f32.mrb[9].mxu0  ;;  %v609_v4 = vpop.f32.mrb[9].mxu1  ;;  %v1730_v27 = vadd.f32 %v1361_v61, %v1636_v26  ;;  %v1742_v33 = vadd.f32 %v1377_v62, %v1636_v26 }
 0x10c   : > { %v1362_v5 = vpop.f32.mrb[10].mxu0  ;;  %v1378_v6 = vpop.f32.mrb[10].mxu1  ;;  %v1760_v43 = vadd.f32 %v1636_v26, %v545_v3  ;;  %v1766_v45 = vadd.f32 %v1636_v26, %v609_v4 }
 0x10d   : > { %v548_v7 = vpop.f32.mrb[11].mxu0  ;;  %v612_v8 = vpop.f32.mrb[11].mxu1  ;;  %v1733_v28 = vadd.f32 %v1362_v5, %v1636_v26  ;;  %v1745_v34 = vadd.f32 %v1378_v6, %v1636_v26  ;;  %v653_v38 = vsel %vm642_vm0, %v1730_v27, 0.0  ;;  %v669_v40 = vsel %vm642_vm0, %v1742_v33, 0.0 }
 0x10e   : > { %689 = vadd.xlane.f32.xlu1 %v650_v1  ;;  %687 = vadd.xlane.f32.xlu0 %v649_v2  ;;  %v1763_v44 = vadd.f32 %v1636_v26, %v548_v7  ;;  %v1769_v46 = vadd.f32 %v1636_v26, %v612_v8  ;;  %v651_v48 = vsel %vm642_vm0, %v1760_v43, 0.0  ;;  %v667_v54 = vsel %vm642_vm0, %v1766_v45, 0.0 }
 0x10f   : > { %v654_v37 = vsel %vm642_vm0, %v1733_v28, 0.0  ;;  %v670_v39 = vsel %vm642_vm0, %v1745_v34, 0.0 }
 0x110   : > { %v652_v47 = vsel %vm642_vm0, %v1763_v44, 0.0  ;;  %v668_v53 = vsel %vm642_vm0, %v1769_v46, 0.0 }
 0x112   : > { %721 = vadd.xlane.f32.xlu1 %v666_v9  ;;  %719 = vadd.xlane.f32.xlu0 %v665_v10  ;;  %v1365_v13 = vpop.f32.mrb[12].mxu0  ;;  %v1381_v14 = vpop.f32.mrb[12].mxu1 }
 0x113   : > { %v561_v15 = vpop.f32.mrb[13].mxu0  ;;  %v625_v16 = vpop.f32.mrb[13].mxu1  ;;  %v1778_v49 = vadd.f32 %v1365_v13, %v1636_v26  ;;  %v1820_v5 = vadd.f32 %v1381_v14, %v1636_v26 }
 0x114   : > { %v1366_v17 = vpop.f32.mrb[14].mxu0  ;;  %v1382_v18 = vpop.f32.mrb[14].mxu1  ;;  %v1796_v59 = vadd.f32 %v1636_v26, %v561_v15  ;;  %v1802_v61 = vadd.f32 %v1636_v26, %v625_v16 }
 0x115   : > { %v564_v23 = vpop.f32.mrb[15].mxu0  ;;  %v628_v24 = vpop.f32.mrb[15].mxu1  ;;  %v1781_v50 = vadd.f32 %v1366_v17, %v1636_v26  ;;  %v657_v56 = vsel %vm642_vm0, %v1778_v49, 0.0  ;;  %v1823_v6 = vadd.f32 %v1382_v18, %v1636_v26  ;;  %v673_v8 = vsel %vm642_vm0, %v1820_v5, 0.0 }
 0x116   : > { %685 = vadd.xlane.f32.xlu1 %v648_v21  ;;  %683 = vadd.xlane.f32.xlu0 %v647_v22  ;;  %v1799_v60 = vadd.f32 %v1636_v26, %v564_v23  ;;  %v1805_v62 = vadd.f32 %v1636_v26, %v628_v24  ;;  %v655_v2 = vsel %vm642_vm0, %v1796_v59, 0.0  ;;  %v671_v4 = vsel %vm642_vm0, %v1802_v61, 0.0 }
 0x117   : > { %v658_v55 = vsel %vm642_vm0, %v1781_v50, 0.0  ;;  %v674_v7 = vsel %vm642_vm0, %v1823_v6, 0.0 }
 0x118   : > { %v656_v1 = vsel %vm642_vm0, %v1799_v60, 0.0  ;;  %v672_v3 = vsel %vm642_vm0, %v1805_v62, 0.0 }
 0x11a   : > { %717 = vadd.xlane.f32.xlu1 %v664_v31  ;;  %715 = vadd.xlane.f32.xlu0 %v663_v32 }
 0x11e   : > { %697 = vadd.xlane.f32.xlu1 %v654_v37  ;;  %695 = vadd.xlane.f32.xlu0 %v653_v38 }
 0x122   : > { %729 = vadd.xlane.f32.xlu1 %v670_v39  ;;  %727 = vadd.xlane.f32.xlu0 %v669_v40 }
 0x126   : > { %693 = vadd.xlane.f32.xlu1 %v652_v47  ;;  %691 = vadd.xlane.f32.xlu0 %v651_v48 }
 0x12a   : > { %725 = vadd.xlane.f32.xlu1 %v668_v53  ;;  %723 = vadd.xlane.f32.xlu0 %v667_v54 }
 0x12e   : > { %705 = vadd.xlane.f32.xlu1 %v658_v55  ;;  %703 = vadd.xlane.f32.xlu0 %v657_v56 }
 0x132   : > { %701 = vadd.xlane.f32.xlu1 %v656_v1  ;;  %699 = vadd.xlane.f32.xlu0 %v655_v2 }
 0x136   : > { %733 = vadd.xlane.f32.xlu1 %v672_v3  ;;  %731 = vadd.xlane.f32.xlu0 %v671_v4 }
 0x13a   : > { %737 = vadd.xlane.f32.xlu1 %v674_v7  ;;  %735 = vadd.xlane.f32.xlu0 %v673_v8 }
 0x18b   : > { %v712_v9 = vpop.xlane.xlu0 %711  ;;  %v680_v10 = vpop.xlane.xlu1 %679 }
 0x18c   : > { %v757_v13 = vmul.f32 0.0625, %v712_v9  ;;  %v741_v14 = vmul.f32 0.0625, %v680_v10 }
 0x18e   : > { %v1832_v15 = vsub.f32 %v1643_v30, %v757_v13  ;;  %v1835_v26 = vsub.f32 %v1640_v29, %v741_v14 }
 0x18f   : > { %v682_v16 = vpop.xlane.xlu1 %681  ;;  %v676_v17 = vpop.xlane.xlu0 %675 }
 0x190   : > { %v742_v18 = vmul.f32 0.0625, %v682_v16  ;;  %v739_v21 = vmul.f32 0.0625, %v676_v17  ;;  %v805_v22 = vsel %vm642_vm0, %v1835_v26, 0.0  ;;  %v821_v29 = vsel %vm642_vm0, %v1832_v15, 0.0 }
 0x191   : > { %v837_v23 = vmul.f32 %v805_v22, %v805_v22  ;;  %v853_v47 = vmul.f32 %v821_v29, %v821_v29 }
 0x192   : > { %v1841_v24 = vsub.f32 %v1649_v36, %v742_v18  ;;  %v1844_v31 = vsub.f32 %v1646_v35, %v739_v21 }
 0x193   : > { %v714_v30 = vpop.xlane.xlu1 %713  ;;  %871 = vadd.xlane.f32.xlu0 %v837_v23  ;;  %v708_v32 = vpop.xlane.xlu0 %707 }
 0x194   : > { %v758_v37 = vmul.f32 0.0625, %v714_v30  ;;  %v755_v38 = vmul.f32 0.0625, %v708_v32  ;;  %v806_v39 = vsel %vm642_vm0, %v1841_v24, 0.0  ;;  %v803_v48 = vsel %vm642_vm0, %v1844_v31, 0.0 }
 0x195   : > { %v838_v40 = vmul.f32 %v806_v39, %v806_v39 }
 0x196   : > { %v1853_v36 = vsub.f32 %v1661_v42, %v758_v37  ;;  %v1856_v35 = vsub.f32 %v1658_v41, %v755_v38  ;;  %v835_v42 = vmul.f32 %v803_v48, %v803_v48 }
 0x197   : > { %v710_v53 = vpop.xlane.xlu1 %709  ;;  %873 = vadd.xlane.f32.xlu1 %v838_v40  ;;  %903 = vadd.xlane.f32.xlu0 %v853_v47  ;;  %v678_v54 = vpop.xlane.xlu0 %677 }
 0x198   : > { %v756_v55 = vmul.f32 0.0625, %v710_v53  ;;  %v740_v56 = vmul.f32 0.0625, %v678_v54  ;;  %v822_v1 = vsel %vm642_vm0, %v1853_v36, 0.0  ;;  %v819_v4 = vsel %vm642_vm0, %v1856_v35, 0.0 }
 0x199   : > { %v854_v2 = vmul.f32 %v822_v1, %v822_v1  ;;  %v851_v14 = vmul.f32 %v819_v4, %v819_v4 }
 0x19a   : > { %v1865_v3 = vsub.f32 %v1673_v52, %v756_v55  ;;  %v1868_v41 = vsub.f32 %v1670_v51, %v740_v56 }
 0x19b   : > { %v690_v7 = vpop.xlane.xlu1 %689  ;;  %905 = vadd.xlane.f32.xlu1 %v854_v2  ;;  %867 = vadd.xlane.f32.xlu0 %v835_v42  ;;  %v688_v8 = vpop.xlane.xlu0 %687 }
 0x19c   : > { %v746_v9 = vmul.f32 0.0625, %v690_v7  ;;  %v745_v10 = vmul.f32 0.0625, %v688_v8  ;;  %v804_v13 = vsel %vm642_vm0, %v1868_v41, 0.0  ;;  %v820_v17 = vsel %vm642_vm0, %v1865_v3, 0.0 }
 0x19d   : > { %v836_v52 = vmul.f32 %v804_v13, %v804_v13  ;;  %v852_v30 = vmul.f32 %v820_v17, %v820_v17 }
 0x19e   : > { %v1877_v16 = vsub.f32 %v1685_v58, %v746_v9  ;;  %v1880_v51 = vsub.f32 %v1682_v57, %v745_v10 }
 0x19f   : > { %v722_v18 = vpop.xlane.xlu1 %721  ;;  %899 = vadd.xlane.f32.xlu0 %v851_v14  ;;  %869 = vadd.xlane.f32.xlu1 %v836_v52  ;;  %v720_v21 = vpop.xlane.xlu0 %719 }
 0x1a0   : > { %v762_v22 = vmul.f32 0.0625, %v722_v18  ;;  %v761_v23 = vmul.f32 0.0625, %v720_v21  ;;  %v809_v29 = vsel %vm642_vm0, %v1880_v51, 0.0  ;;  %v810_v37 = vsel %vm642_vm0, %v1877_v16, 0.0 }
 0x1a1   : > { %v841_v58 = vmul.f32 %v809_v29, %v809_v29  ;;  %v842_v53 = vmul.f32 %v810_v37, %v810_v37 }
 0x1a2   : > { %v1889_v32 = vsub.f32 %v1697_v0, %v762_v22  ;;  %v1892_v57 = vsub.f32 %v1694_v63, %v761_v23 }
 0x1a3   : > { %v686_v38 = vpop.xlane.xlu1 %685  ;;  %901 = vadd.xlane.f32.xlu1 %v852_v30  ;;  %879 = vadd.xlane.f32.xlu0 %v841_v58  ;;  %v684_v39 = vpop.xlane.xlu0 %683 }
 0x1a4   : > { %v744_v40 = vmul.f32 0.0625, %v686_v38  ;;  %v743_v47 = vmul.f32 0.0625, %v684_v39  ;;  %v825_v48 = vsel %vm642_vm0, %v1892_v57, 0.0  ;;  %v826_v55 = vsel %vm642_vm0, %v1889_v32, 0.0 }
 0x1a5   : > { %v857_v0 = vmul.f32 %v825_v48, %v825_v48  ;;  %v858_v7 = vmul.f32 %v826_v55, %v826_v55 }
 0x1a6   : > { %v1901_v54 = vsub.f32 %v1715_v12, %v744_v40  ;;  %v1904_v63 = vsub.f32 %v1712_v11, %v743_v47 }
 0x1a7   : > { %v718_v56 = vpop.xlane.xlu1 %717  ;;  %881 = vadd.xlane.f32.xlu1 %v842_v53  ;;  %911 = vadd.xlane.f32.xlu0 %v857_v0  ;;  %v716_v1 = vpop.xlane.xlu0 %715 }
 0x1a8   : > { %v760_v2 = vmul.f32 0.0625, %v718_v56  ;;  %v759_v42 = vmul.f32 0.0625, %v716_v1  ;;  %v807_v4 = vsel %vm642_vm0, %v1904_v63, 0.0  ;;  %v808_v9 = vsel %vm642_vm0, %v1901_v54, 0.0 }
 0x1a9   : > { %v839_v12 = vmul.f32 %v807_v4, %v807_v4  ;;  %v840_v18 = vmul.f32 %v808_v9, %v808_v9 }
 0x1aa   : > { %v1913_v8 = vsub.f32 %v1721_v20, %v760_v2  ;;  %v1916_v11 = vsub.f32 %v1718_v19, %v759_v42 }
 0x1ab   : > { %v698_v10 = vpop.xlane.xlu1 %697  ;;  %913 = vadd.xlane.f32.xlu1 %v858_v7  ;;  %875 = vadd.xlane.f32.xlu0 %v839_v12  ;;  %v696_v13 = vpop.xlane.xlu0 %695 }
 0x1ac   : > { %v750_v14 = vmul.f32 0.0625, %v698_v10  ;;  %v749_v52 = vmul.f32 0.0625, %v696_v13  ;;  %v823_v17 = vsel %vm642_vm0, %v1916_v11, 0.0  ;;  %v824_v22 = vsel %vm642_vm0, %v1913_v8, 0.0 }
 0x1ad   : > { %v855_v20 = vmul.f32 %v823_v17, %v823_v17  ;;  %v856_v38 = vmul.f32 %v824_v22, %v824_v22 }
 0x1ae   : > { %v1925_v21 = vsub.f32 %v1733_v28, %v750_v14  ;;  %v1928_v19 = vsub.f32 %v1730_v27, %v749_v52 }
 0x1af   : > { %v730_v23 = vpop.xlane.xlu1 %729  ;;  %877 = vadd.xlane.f32.xlu1 %v840_v18  ;;  %907 = vadd.xlane.f32.xlu0 %v855_v20  ;;  %v728_v29 = vpop.xlane.xlu0 %727 }
 0x1b0   : > { %v766_v30 = vmul.f32 0.0625, %v730_v23  ;;  %v765_v58 = vmul.f32 0.0625, %v728_v29  ;;  %v813_v37 = vsel %vm642_vm0, %v1928_v19, 0.0  ;;  %v814_v40 = vsel %vm642_vm0, %v1925_v21, 0.0 }
 0x1b1   : > { %v845_v28 = vmul.f32 %v813_v37, %v813_v37  ;;  %v846_v56 = vmul.f32 %v814_v40, %v814_v40 }
 0x1b2   : > { %v1937_v39 = vsub.f32 %v1745_v34, %v766_v30  ;;  %v1940_v27 = vsub.f32 %v1742_v33, %v765_v58 }
 0x1b3   : > { %v694_v47 = vpop.xlane.xlu1 %693  ;;  %909 = vadd.xlane.f32.xlu1 %v856_v38  ;;  %887 = vadd.xlane.f32.xlu0 %v845_v28  ;;  %v692_v48 = vpop.xlane.xlu0 %691 }
 0x1b4   : > { %v748_v53 = vmul.f32 0.0625, %v694_v47  ;;  %v747_v0 = vmul.f32 0.0625, %v692_v48  ;;  %v829_v55 = vsel %vm642_vm0, %v1940_v27, 0.0  ;;  %v830_v2 = vsel %vm642_vm0, %v1937_v39, 0.0 }
 0x1b5   : > { %v861_v34 = vmul.f32 %v829_v55, %v829_v55  ;;  %v862_v10 = vmul.f32 %v830_v2, %v830_v2 }
 0x1b6   : > { %v1949_v1 = vsub.f32 %v1763_v44, %v748_v53  ;;  %v1952_v33 = vsub.f32 %v1760_v43, %v747_v0 }
 0x1b7   : > { %v726_v42 = vpop.xlane.xlu1 %725  ;;  %889 = vadd.xlane.f32.xlu1 %v846_v56  ;;  %919 = vadd.xlane.f32.xlu0 %v861_v34  ;;  %v724_v4 = vpop.xlane.xlu0 %723 }
 0x1b8   : > { %v764_v7 = vmul.f32 0.0625, %v726_v42  ;;  %v763_v12 = vmul.f32 0.0625, %v724_v4  ;;  %v811_v9 = vsel %vm642_vm0, %v1952_v33, 0.0  ;;  %v812_v14 = vsel %vm642_vm0, %v1949_v1, 0.0 }
 0x1b9   : > { %v843_v44 = vmul.f32 %v811_v9, %v811_v9  ;;  %v844_v23 = vmul.f32 %v812_v14, %v812_v14 }
 0x1ba   : > { %v1961_v13 = vsub.f32 %v1769_v46, %v764_v7  ;;  %v1964_v43 = vsub.f32 %v1766_v45, %v763_v12 }
 0x1bb   : > { %v706_v52 = vpop.xlane.xlu1 %705  ;;  %921 = vadd.xlane.f32.xlu1 %v862_v10  ;;  %883 = vadd.xlane.f32.xlu0 %v843_v44  ;;  %v704_v17 = vpop.xlane.xlu0 %703 }
 0x1bc   : > { %v754_v18 = vmul.f32 0.0625, %v706_v52  ;;  %v753_v20 = vmul.f32 0.0625, %v704_v17  ;;  %v827_v22 = vsel %vm642_vm0, %v1964_v43, 0.0  ;;  %v828_v30 = vsel %vm642_vm0, %v1961_v13, 0.0 }
 0x1bd   : > { %v859_v46 = vmul.f32 %v827_v22, %v827_v22  ;;  %v860_v47 = vmul.f32 %v828_v30, %v828_v30 }
 0x1be   : > { %v1973_v29 = vsub.f32 %v1781_v50, %v754_v18  ;;  %v1976_v45 = vsub.f32 %v1778_v49, %v753_v20 }
 0x1bf   : > { %v702_v58 = vpop.xlane.xlu1 %701  ;;  %885 = vadd.xlane.f32.xlu1 %v844_v23  ;;  %915 = vadd.xlane.f32.xlu0 %v859_v46  ;;  %v700_v37 = vpop.xlane.xlu0 %699 }
 0x1c0   : > { %v752_v38 = vmul.f32 0.0625, %v702_v58  ;;  %v751_v28 = vmul.f32 0.0625, %v700_v37  ;;  %v817_v40 = vsel %vm642_vm0, %v1976_v45, 0.0  ;;  %v818_v53 = vsel %vm642_vm0, %v1973_v29, 0.0 }
 0x1c1   : > { %v849_v50 = vmul.f32 %v817_v40, %v817_v40  ;;  %v850_v42 = vmul.f32 %v818_v53, %v818_v53 }
 0x1c2   : > { %v1985_v48 = vsub.f32 %v1799_v60, %v752_v38  ;;  %v1988_v49 = vsub.f32 %v1796_v59, %v751_v28 }
 0x1c3   : > { %v734_v0 = vpop.xlane.xlu1 %733  ;;  %917 = vadd.xlane.f32.xlu1 %v860_v47  ;;  %895 = vadd.xlane.f32.xlu0 %v849_v50  ;;  %v732_v55 = vpop.xlane.xlu0 %731 }
 0x1c4   : > { %v768_v56 = vmul.f32 0.0625, %v734_v0  ;;  %v767_v34 = vmul.f32 0.0625, %v732_v55  ;;  %v815_v2 = vsel %vm642_vm0, %v1988_v49, 0.0  ;;  %v816_v7 = vsel %vm642_vm0, %v1985_v48, 0.0 }
 0x1c5   : > { %v847_v60 = vmul.f32 %v815_v2, %v815_v2  ;;  %v848_v52 = vmul.f32 %v816_v7, %v816_v7 }
 0x1c6   : > { %v1997_v4 = vsub.f32 %v1805_v62, %v768_v56  ;;  %v2000_v59 = vsub.f32 %v1802_v61, %v767_v34 }
 0x1c7   : > { %v738_v12 = vpop.xlane.xlu1 %737  ;;  %897 = vadd.xlane.f32.xlu1 %v850_v42  ;;  %891 = vadd.xlane.f32.xlu0 %v847_v60  ;;  %v736_v9 = vpop.xlane.xlu0 %735 }
 0x1c8   : > { %v770_v10 = vmul.f32 0.0625, %v738_v12  ;;  %v769_v44 = vmul.f32 0.0625, %v736_v9  ;;  %v831_v14 = vsel %vm642_vm0, %v2000_v59, 0.0  ;;  %v832_v18 = vsel %vm642_vm0, %v1997_v4, 0.0  ;;  %v2026_v9 = vld [vmem:[%s2179_s3] ss:$0 sm:$0xff] }
 0x1c9   : > { %v863_v62 = vmul.f32 %v831_v14, %v831_v14  ;;  %v864_v22 = vmul.f32 %v832_v18, %v832_v18  ;;  %v2033_v18 = vld [vmem:[%s2180_s4] ss:$0 sm:$0xff] }
 0x1ca   : > { %v2009_v17 = vsub.f32 %v1823_v6, %v770_v10  ;;  %v2012_v61 = vsub.f32 %v1820_v5, %v769_v44 }
 0x1cb   : > { %893 = vadd.xlane.f32.xlu1 %v848_v52  ;;  %923 = vadd.xlane.f32.xlu0 %v863_v62 }
 0x1cc   : > { %v833_v20 = vsel %vm642_vm0, %v2012_v61, 0.0  ;;  %v834_v6 = vsel %vm642_vm0, %v2009_v17, 0.0 }
 0x1cd   : > { %v865_v23 = vmul.f32 %v833_v20, %v833_v20  ;;  %v866_v5 = vmul.f32 %v834_v6, %v834_v6 }
 0x1cf   : > { %925 = vadd.xlane.f32.xlu1 %v864_v22  ;;  %927 = vadd.xlane.f32.xlu0 %v865_v23 }
 0x1d3   : > { %929 = vadd.xlane.f32.xlu1 %v866_v5 }
 0x220   : > { %v872_v46 = vpop.xlane.xlu0 %871 }
 0x221   : > { %v933_v30 = vmul.f32 0.0625, %v872_v46 }
 0x223   : > { %v965_v58 = vadd.f32 1e-05, %v933_v30 }
 0x224   : > { %v874_v37 = vpop.xlane.xlu1 %873  ;;  %v904_v38 = vpop.xlane.xlu0 %903 }
 0x225   : > { %1447 = vrsqrt.f32 %v965_v58  ;;  %v934_v28 = vmul.f32 0.0625, %v874_v37  ;;  %v949_v40 = vmul.f32 0.0625, %v904_v38 }
 0x227   : > { %v966_v47 = vadd.f32 1e-05, %v934_v28  ;;  %v981_v50 = vadd.f32 1e-05, %v949_v40 }
 0x228   : > { %v906_v53 = vpop.xlane.xlu1 %905  ;;  %v868_v0 = vpop.xlane.xlu0 %867 }
 0x229   : > { %1449 = vrsqrt.f32 %v966_v47  ;;  %v950_v25 = vmul.f32 0.0625, %v906_v53  ;;  %v931_v55 = vmul.f32 0.0625, %v868_v0 }
 0x22a   : > { %1451 = vrsqrt.f32 %v981_v50 }
 0x22b   : > { %v982_v56 = vadd.f32 1e-05, %v950_v25  ;;  %v963_v34 = vadd.f32 1e-05, %v931_v55 }
 0x22c   : > { %v870_v2 = vpop.xlane.xlu1 %869  ;;  %v900_v42 = vpop.xlane.xlu0 %899 }
 0x22d   : > { %1453 = vrsqrt.f32 %v982_v56  ;;  %v932_v60 = vmul.f32 0.0625, %v870_v2  ;;  %v947_v7 = vmul.f32 0.0625, %v900_v42 }
 0x22e   : > { %1455 = vrsqrt.f32 %v963_v34 }
 0x22f   : > { %v1448_v12 = vpop.eup %1447  ;;  %v964_v10 = vadd.f32 1e-05, %v932_v60  ;;  %v979_v44 = vadd.f32 1e-05, %v947_v7 }
 0x230   : > { %v1029_v14 = vmul.f32 %v1448_v12, %v1835_v26  ;;  %v902_v52 = vpop.xlane.xlu1 %901  ;;  %v880_v62 = vpop.xlane.xlu0 %879 }
 0x231   : > { %1457 = vrsqrt.f32 %v964_v10  ;;  %v948_v20 = vmul.f32 0.0625, %v902_v52  ;;  %v937_v22 = vmul.f32 0.0625, %v880_v62 }
 0x232   : > { %v1068_v23 = vmul.f32 %v2026_v9, %v1029_v14  ;;  %1459 = vrsqrt.f32 %v979_v44 }
 0x233   : > { %v1450_v6 = vpop.eup %1449  ;;  %v980_v26 = vadd.f32 1e-05, %v948_v20  ;;  %v969_v5 = vadd.f32 1e-05, %v937_v22 }
 0x234   : > { %v1452_v46 = vpop.eup %1451  ;;  %v1107_v30 = vadd.f32 %v2033_v18, %v1068_v23  ;;  %v1030_v58 = vmul.f32 %v1450_v6, %v1841_v24  ;;  %v882_v37 = vpop.xlane.xlu1 %881 }
 0x235   : > { %v912_v38 = vpop.xlane.xlu0 %911  ;;  %v1045_v28 = vmul.f32 %v1452_v46, %v1832_v15  ;;  %1461 = vrsqrt.f32 %v980_v26  ;;  %v938_v40 = vmul.f32 0.0625, %v882_v37 }
 0x236   : > { %v953_v47 = vmul.f32 0.0625, %v912_v38  ;;  %1139 = vst [vmem:[%s2039_s24 + $0x10] sm:$0xff] %v1107_v30  ;;  %v1069_v50 = vmul.f32 %v2026_v9, %v1030_v58  ;;  %1463 = vrsqrt.f32 %v969_v5 }
 0x237   : > { %v1454_v53 = vpop.eup %1453  ;;  %v1084_v0 = vmul.f32 %v2026_v9, %v1045_v28  ;;  %v970_v25 = vadd.f32 1e-05, %v938_v40 }
 0x238   : > { %v985_v55 = vadd.f32 1e-05, %v953_v47  ;;  %v1456_v56 = vpop.eup %1455  ;;  %v1108_v24 = vadd.f32 %v2033_v18, %v1069_v50  ;;  %v1046_v34 = vmul.f32 %v1454_v53, %v1853_v36  ;;  %v914_v15 = vpop.xlane.xlu1 %913 }
 0x239   : > { %v876_v2 = vpop.xlane.xlu0 %875  ;;  %v1123_v42 = vadd.f32 %v2033_v18, %v1084_v0  ;;  %v1027_v60 = vmul.f32 %v1456_v56, %v1844_v31  ;;  %1465 = vrsqrt.f32 %v970_v25  ;;  %v954_v7 = vmul.f32 0.0625, %v914_v15 }
 0x23a   : > { %1140 = vst [vmem:[%s2039_s24 + $0x18] sm:$0xff] %v1108_v24  ;;  %v1085_v12 = vmul.f32 %v2026_v9, %v1046_v34  ;;  %1467 = vrsqrt.f32 %v985_v55  ;;  %v935_v10 = vmul.f32 0.0625, %v876_v2 }
 0x23b   : > { %v1458_v44 = vpop.eup %1457  ;;  %1155 = vst [vmem:[%s2039_s24 + $0x90] sm:$0xff] %v1123_v42  ;;  %v1066_v14 = vmul.f32 %v2026_v9, %v1027_v60  ;;  %v986_v52 = vadd.f32 1e-05, %v954_v7 }
 0x23c   : > { %v1460_v36 = vpop.eup %1459  ;;  %v1124_v62 = vadd.f32 %v2033_v18, %v1085_v12  ;;  %v1028_v20 = vmul.f32 %v1458_v44, %v1868_v41  ;;  %v967_v31 = vadd.f32 1e-05, %v935_v10  ;;  %v878_v22 = vpop.xlane.xlu1 %877 }
 0x23d   : > { %v908_v23 = vpop.xlane.xlu0 %907  ;;  %v1105_v6 = vadd.f32 %v2033_v18, %v1066_v14  ;;  %v1043_v26 = vmul.f32 %v1460_v36, %v1856_v35  ;;  %1469 = vrsqrt.f32 %v986_v52  ;;  %v936_v5 = vmul.f32 0.0625, %v878_v22 }
 0x23e   : > { %1156 = vst [vmem:[%s2039_s24 + $0x98] sm:$0xff] %v1124_v62  ;;  %v1067_v46 = vmul.f32 %v2026_v9, %v1028_v20  ;;  %1471 = vrsqrt.f32 %v967_v31  ;;  %v951_v30 = vmul.f32 0.0625, %v908_v23 }
 0x23f   : > { %v1462_v58 = vpop.eup %1461  ;;  %1137 = vst [vmem:[%s2039_s24] sm:$0xff] %v1105_v6  ;;  %v1082_v37 = vmul.f32 %v2026_v9, %v1043_v26  ;;  %v968_v41 = vadd.f32 1e-05, %v936_v5 }
 0x240   : > { %v1464_v38 = vpop.eup %1463  ;;  %v1106_v28 = vadd.f32 %v2033_v18, %v1067_v46  ;;  %v1044_v40 = vmul.f32 %v1462_v58, %v1865_v3  ;;  %v983_v35 = vadd.f32 1e-05, %v951_v30  ;;  %v910_v47 = vpop.xlane.xlu1 %909 }
 0x241   : > { %v888_v50 = vpop.xlane.xlu0 %887  ;;  %v1121_v53 = vadd.f32 %v2033_v18, %v1082_v37  ;;  %v1033_v0 = vmul.f32 %v1464_v38, %v1880_v51  ;;  %1473 = vrsqrt.f32 %v968_v41  ;;  %v952_v25 = vmul.f32 0.0625, %v910_v47 }
 0x242   : > { %1138 = vst [vmem:[%s2039_s24 + $0x8] sm:$0xff] %v1106_v28  ;;  %v1083_v55 = vmul.f32 %v2026_v9, %v1044_v40  ;;  %1475 = vrsqrt.f32 %v983_v35  ;;  %v941_v56 = vmul.f32 0.0625, %v888_v50 }
 0x243   : > { %v1466_v24 = vpop.eup %1465  ;;  %1153 = vst [vmem:[%s2039_s24 + $0x80] sm:$0xff] %v1121_v53  ;;  %v1072_v34 = vmul.f32 %v2026_v9, %v1033_v0  ;;  %v984_v3 = vadd.f32 1e-05, %v952_v25 }
 0x244   : > { %v1468_v15 = vpop.eup %1467  ;;  %v1122_v2 = vadd.f32 %v2033_v18, %v1083_v55  ;;  %v1034_v42 = vmul.f32 %v1466_v24, %v1877_v16  ;;  %v973_v51 = vadd.f32 1e-05, %v941_v56  ;;  %v890_v60 = vpop.xlane.xlu1 %889 }
 0x245   : > { %v920_v7 = vpop.xlane.xlu0 %919  ;;  %v1111_v12 = vadd.f32 %v2033_v18, %v1072_v34  ;;  %v1049_v10 = vmul.f32 %v1468_v15, %v1892_v57  ;;  %1477 = vrsqrt.f32 %v984_v3  ;;  %v942_v44 = vmul.f32 0.0625, %v890_v60 }
 0x246   : > { %1154 = vst [vmem:[%s2039_s24 + $0x88] sm:$0xff] %v1122_v2  ;;  %v1073_v14 = vmul.f32 %v2026_v9, %v1034_v42  ;;  %1479 = vrsqrt.f32 %v973_v51  ;;  %v957_v52 = vmul.f32 0.0625, %v920_v7 }
 0x247   : > { %v1470_v36 = vpop.eup %1469  ;;  %1143 = vst [vmem:[%s2039_s24 + $0x30] sm:$0xff] %v1111_v12  ;;  %v1088_v62 = vmul.f32 %v2026_v9, %v1049_v10  ;;  %v974_v16 = vadd.f32 1e-05, %v942_v44 }
 0x248   : > { %v1472_v20 = vpop.eup %1471  ;;  %v1112_v31 = vadd.f32 %v2033_v18, %v1073_v14  ;;  %v1050_v22 = vmul.f32 %v1470_v36, %v1889_v32  ;;  %v989_v57 = vadd.f32 1e-05, %v957_v52  ;;  %v922_v23 = vpop.xlane.xlu1 %921 }
 0x249   : > { %v884_v6 = vpop.xlane.xlu0 %883  ;;  %v1127_v26 = vadd.f32 %v2033_v18, %v1088_v62  ;;  %v1031_v5 = vmul.f32 %v1472_v20, %v1904_v63  ;;  %1481 = vrsqrt.f32 %v974_v16  ;;  %v958_v46 = vmul.f32 0.0625, %v922_v23 }
 0x24a   : > { %1144 = vst [vmem:[%s2039_s24 + $0x38] sm:$0xff] %v1112_v31  ;;  %v1089_v30 = vmul.f32 %v2026_v9, %v1050_v22  ;;  %1483 = vrsqrt.f32 %v989_v57  ;;  %v939_v58 = vmul.f32 0.0625, %v884_v6 }
 0x24b   : > { %v1474_v37 = vpop.eup %1473  ;;  %1159 = vst [vmem:[%s2039_s24 + $0xb0] sm:$0xff] %v1127_v26  ;;  %v1070_v41 = vmul.f32 %v2026_v9, %v1031_v5  ;;  %v990_v32 = vadd.f32 1e-05, %v958_v46 }
 0x24c   : > { %v1476_v38 = vpop.eup %1475  ;;  %v1128_v28 = vadd.f32 %v2033_v18, %v1089_v30  ;;  %v1032_v40 = vmul.f32 %v1474_v37, %v1901_v54  ;;  %v971_v63 = vadd.f32 1e-05, %v939_v58  ;;  %v886_v35 = vpop.xlane.xlu1 %885 }
 0x24d   : > { %v916_v47 = vpop.xlane.xlu0 %915  ;;  %v1109_v50 = vadd.f32 %v2033_v18, %v1070_v41  ;;  %v1047_v53 = vmul.f32 %v1476_v38, %v1916_v11  ;;  %1485 = vrsqrt.f32 %v990_v32  ;;  %v940_v0 = vmul.f32 0.0625, %v886_v35 }
 0x24e   : > { %1160 = vst [vmem:[%s2039_s24 + $0xb8] sm:$0xff] %v1128_v28  ;;  %v1071_v25 = vmul.f32 %v2026_v9, %v1032_v40  ;;  %1487 = vrsqrt.f32 %v971_v63  ;;  %v955_v55 = vmul.f32 0.0625, %v916_v47 }
 0x24f   : > { %v1478_v56 = vpop.eup %1477  ;;  %1141 = vst [vmem:[%s2039_s24 + $0x20] sm:$0xff] %v1109_v50  ;;  %v1086_v24 = vmul.f32 %v2026_v9, %v1047_v53  ;;  %v972_v54 = vadd.f32 1e-05, %v940_v0 }
 0x250   : > { %v1480_v34 = vpop.eup %1479  ;;  %v1110_v3 = vadd.f32 %v2033_v18, %v1071_v25  ;;  %v1048_v15 = vmul.f32 %v1478_v56, %v1913_v8  ;;  %v987_v11 = vadd.f32 1e-05, %v955_v55  ;;  %v918_v2 = vpop.xlane.xlu1 %917 }
 0x251   : > { %v896_v42 = vpop.xlane.xlu0 %895  ;;  %v1125_v51 = vadd.f32 %v2033_v18, %v1086_v24  ;;  %v1037_v60 = vmul.f32 %v1480_v34, %v1928_v19  ;;  %1489 = vrsqrt.f32 %v972_v54  ;;  %v956_v7 = vmul.f32 0.0625, %v918_v2 }
 0x252   : > { %1142 = vst [vmem:[%s2039_s24 + $0x28] sm:$0xff] %v1110_v3  ;;  %v1087_v12 = vmul.f32 %v2026_v9, %v1048_v15  ;;  %1491 = vrsqrt.f32 %v987_v11  ;;  %v945_v10 = vmul.f32 0.0625, %v896_v42 }
 0x253   : > { %v1482_v44 = vpop.eup %1481  ;;  %1157 = vst [vmem:[%s2039_s24 + $0xa0] sm:$0xff] %v1125_v51  ;;  %v1076_v14 = vmul.f32 %v2026_v9, %v1037_v60  ;;  %v988_v8 = vadd.f32 1e-05, %v956_v7 }
 0x254   : > { %v1484_v52 = vpop.eup %1483  ;;  %v1126_v36 = vadd.f32 %v2033_v18, %v1087_v12  ;;  %v1038_v62 = vmul.f32 %v1482_v44, %v1925_v21  ;;  %v977_v19 = vadd.f32 1e-05, %v945_v10  ;;  %v898_v16 = vpop.xlane.xlu1 %897 }
 0x255   : > { %v892_v20 = vpop.xlane.xlu0 %891  ;;  %v1115_v31 = vadd.f32 %v2033_v18, %v1076_v14  ;;  %v1053_v22 = vmul.f32 %v1484_v52, %v1940_v27  ;;  %1493 = vrsqrt.f32 %v988_v8  ;;  %v946_v57 = vmul.f32 0.0625, %v898_v16 }
 0x256   : > { %1158 = vst [vmem:[%s2039_s24 + $0xa8] sm:$0xff] %v1126_v36  ;;  %v1077_v23 = vmul.f32 %v2026_v9, %v1038_v62  ;;  %1495 = vrsqrt.f32 %v977_v19  ;;  %v943_v6 = vmul.f32 0.0625, %v892_v20 }
 0x257   : > { %v1486_v26 = vpop.eup %1485  ;;  %1147 = vst [vmem:[%s2039_s24 + $0x50] sm:$0xff] %v1115_v31  ;;  %v1092_v5 = vmul.f32 %v2026_v9, %v1053_v22  ;;  %v978_v21 = vadd.f32 1e-05, %v946_v57 }
 0x258   : > { %v1488_v46 = vpop.eup %1487  ;;  %v1116_v30 = vadd.f32 %v2033_v18, %v1077_v23  ;;  %v1054_v58 = vmul.f32 %v1486_v26, %v1937_v39  ;;  %v975_v27 = vadd.f32 1e-05, %v943_v6  ;;  %v894_v37 = vpop.xlane.xlu1 %893 }
 0x259   : > { %v924_v41 = vpop.xlane.xlu0 %923  ;;  %v1131_v32 = vadd.f32 %v2033_v18, %v1092_v5  ;;  %v1035_v38 = vmul.f32 %v1488_v46, %v1952_v33  ;;  %1497 = vrsqrt.f32 %v978_v21  ;;  %v944_v28 = vmul.f32 0.0625, %v894_v37 }
 0x25a   : > { %1148 = vst [vmem:[%s2039_s24 + $0x58] sm:$0xff] %v1116_v30  ;;  %v1093_v40 = vmul.f32 %v2026_v9, %v1054_v58  ;;  %1499 = vrsqrt.f32 %v975_v27  ;;  %v959_v63 = vmul.f32 0.0625, %v924_v41 }
 0x25b   : > { %v1490_v35 = vpop.eup %1489  ;;  %1163 = vst [vmem:[%s2039_s24 + $0xd0] sm:$0xff] %v1131_v32  ;;  %v1074_v47 = vmul.f32 %v2026_v9, %v1035_v38  ;;  %v976_v39 = vadd.f32 1e-05, %v944_v28 }
 0x25c   : > { %v1492_v50 = vpop.eup %1491  ;;  %v1132_v53 = vadd.f32 %v2033_v18, %v1093_v40  ;;  %v1036_v0 = vmul.f32 %v1490_v35, %v1949_v1  ;;  %v991_v33 = vadd.f32 1e-05, %v959_v63  ;;  %v926_v25 = vpop.xlane.xlu1 %925 }
 0x25d   : > { %v928_v55 = vpop.xlane.xlu0 %927  ;;  %v1113_v56 = vadd.f32 %v2033_v18, %v1074_v47  ;;  %v1051_v24 = vmul.f32 %v1492_v50, %v1964_v43  ;;  %1501 = vrsqrt.f32 %v976_v39  ;;  %v960_v54 = vmul.f32 0.0625, %v926_v25 }
 0x25e   : > { %1164 = vst [vmem:[%s2039_s24 + $0xd8] sm:$0xff] %v1132_v53  ;;  %v1075_v34 = vmul.f32 %v2026_v9, %v1036_v0  ;;  %1503 = vrsqrt.f32 %v991_v33  ;;  %v961_v3 = vmul.f32 0.0625, %v928_v55 }
 0x25f   : > { %v1494_v15 = vpop.eup %1493  ;;  %1145 = vst [vmem:[%s2039_s24 + $0x40] sm:$0xff] %v1113_v56  ;;  %v1090_v1 = vmul.f32 %v2026_v9, %v1051_v24  ;;  %v992_v11 = vadd.f32 1e-05, %v960_v54 }
 0x260   : > { %v1496_v2 = vpop.eup %1495  ;;  %v1114_v42 = vadd.f32 %v2033_v18, %v1075_v34  ;;  %v1052_v51 = vmul.f32 %v1494_v15, %v1961_v13  ;;  %v993_v43 = vadd.f32 1e-05, %v961_v3  ;;  %v930_v60 = vpop.xlane.xlu1 %929 }
 0x261   : > { %v1129_v7 = vadd.f32 %v2033_v18, %v1090_v1  ;;  %v1041_v12 = vmul.f32 %v1496_v2, %v1976_v45  ;;  %1505 = vrsqrt.f32 %v992_v11  ;;  %v962_v10 = vmul.f32 0.0625, %v930_v60 }
 0x262   : > { %1146 = vst [vmem:[%s2039_s24 + $0x48] sm:$0xff] %v1114_v42  ;;  %v1091_v44 = vmul.f32 %v2026_v9, %v1052_v51  ;;  %1507 = vrsqrt.f32 %v993_v43 }
 0x263   : > { %v1498_v14 = vpop.eup %1497  ;;  %1161 = vst [vmem:[%s2039_s24 + $0xc0] sm:$0xff] %v1129_v7  ;;  %v1080_v8 = vmul.f32 %v2026_v9, %v1041_v12  ;;  %v994_v52 = vadd.f32 1e-05, %v962_v10 }
 0x264   : > { %v1500_v13 = vpop.eup %1499  ;;  %v1130_v36 = vadd.f32 %v2033_v18, %v1091_v44  ;;  %v1042_v62 = vmul.f32 %v1498_v14, %v1973_v29 }
 0x265   : > { %v1119_v45 = vadd.f32 %v2033_v18, %v1080_v8  ;;  %v1039_v19 = vmul.f32 %v1500_v13, %v1988_v49  ;;  %1509 = vrsqrt.f32 %v994_v52 }
 0x266   : > { %1162 = vst [vmem:[%s2039_s24 + $0xc8] sm:$0xff] %v1130_v36  ;;  %v1081_v16 = vmul.f32 %v2026_v9, %v1042_v62 }
 0x267   : > { %v1502_v20 = vpop.eup %1501  ;;  %1151 = vst [vmem:[%s2039_s24 + $0x70] sm:$0xff] %v1119_v45  ;;  %v1078_v31 = vmul.f32 %v2026_v9, %v1039_v19 }
 0x268   : > { %v1504_v22 = vpop.eup %1503  ;;  %v1120_v57 = vadd.f32 %v2033_v18, %v1081_v16  ;;  %v1040_v23 = vmul.f32 %v1502_v20, %v1985_v48 }
 0x269   : > { %v1117_v29 = vadd.f32 %v2033_v18, %v1078_v31  ;;  %v1055_v6 = vmul.f32 %v1504_v22, %v2000_v59 }
 0x26a   : > { %1152 = vst [vmem:[%s2039_s24 + $0x78] sm:$0xff] %v1120_v57  ;;  %v1079_v49 = vmul.f32 %v2026_v9, %v1040_v23 }
 0x26b   : > { %v1506_v26 = vpop.eup %1505  ;;  %1149 = vst [vmem:[%s2039_s24 + $0x60] sm:$0xff] %v1117_v29  ;;  %v1094_v5 = vmul.f32 %v2026_v9, %v1055_v6 }
 0x26c   : > { %v1508_v21 = vpop.eup %1507  ;;  %v1118_v46 = vadd.f32 %v2033_v18, %v1079_v49  ;;  %v1056_v48 = vmul.f32 %v1506_v26, %v1997_v4 }
 0x26d   : > { %v1133_v30 = vadd.f32 %v2033_v18, %v1094_v5  ;;  %v1057_v58 = vmul.f32 %v1508_v21, %v2012_v61 }
 0x26e   : > { %1150 = vst [vmem:[%s2039_s24 + $0x68] sm:$0xff] %v1118_v46  ;;  %v1095_v59 = vmul.f32 %v2026_v9, %v1056_v48 }
 0x26f   : > { %v1510_v27 = vpop.eup %1509  ;;  %1165 = vst [vmem:[%s2039_s24 + $0xe0] sm:$0xff] %v1133_v30  ;;  %v1096_v37 = vmul.f32 %v2026_v9, %v1057_v58 }
 0x270   : > { %v1134_v41 = vadd.f32 %v2033_v18, %v1095_v59  ;;  %v1058_v32 = vmul.f32 %v1510_v27, %v2009_v17 }
 0x271   : > { %v1135_v38 = vadd.f32 %v2033_v18, %v1096_v37 }
 0x272   : > { %1166 = vst [vmem:[%s2039_s24 + $0xe8] sm:$0xff] %v1134_v41  ;;  %v1097_v4 = vmul.f32 %v2026_v9, %v1058_v32 }
 0x273   : > { %1167 = vst [vmem:[%s2039_s24 + $0xf0] sm:$0xff] %v1135_v38 }
 0x274   : > { %v1136_v28 = vadd.f32 %v2033_v18, %v1097_v4 }
 0x276   : > { %1168 = vst [vmem:[%s2039_s24 + $0xf8] sm:$0xff] %v1136_v28 }
 0x277 PF: > { %s15_s20 = sadd.s32 1, %s1533_s20   ;;  %s2182_s18 = smov %s1529_s19 }
 0x278   : > { %p12_p5 = scmp.ge.s32.totalorder %s15_s20, 4   ;;  %s2183_s19 = smov %s2185_s21 }
 0x27a   :  { %14 = sbr.rel (!%p12_p5) target bundleno = 2 (0x2), region = 76 }

</bundles_post_ra>
